<compile_context>
chip_gen: v7x
topology: tpu7x:2x2x1
jax: 0.10.0
libtpu: 0.0.40
codegen_flags: <defaults>
</compile_context>

<pallas_src>
import functools

import jax
import jax.numpy as jnp
from jax.experimental import pallas as pl
from jax.experimental.pallas import tpu as pltpu


def _round_up(x, m):
    return (x + m - 1) // m * m


# ----------------------------------------------------------------------------
# Fused head kernel.
#   grid = (patch_out_chan // pchunk,)   -- streams w1 over the fc1 K axis
#   k == 0    : stand-in patch model (1x1 conv + ReLU) -> feats scratch (bf16),
#               zero the fc1 accumulator, start the deferred w2/w3 DMAs.
#   every k   : acc1 += feats[k] @ dequant(w1_chunk)     (one deep-K MXU dot)
#   k == last : wait w2/w3; h1 = relu(acc1*scale + b1);
#               h2 = relu(h1 @ w2 + b2); out = h2 @ w3 + b3
# ----------------------------------------------------------------------------
def _fused_head_kernel(x_ref, cw_ref, cb_ref, w1_ref, s1_ref, bias_ref,
                       w2_hbm, w3_hbm, o_ref,
                       feats_ref, acc1_ref, w2_vmem, w3_vmem, dma_sem,
                       *, num_chan, patch_out_chan, pchunk, hw, f2p, ncp):
    k = pl.program_id(0)

    @pl.when(k == 0)
    def _prologue():
        # Deferred w2/w3 loads: overlap the fc1 k-loop instead of serializing
        # ahead of iteration 0.
        pltpu.make_async_copy(w2_hbm, w2_vmem, dma_sem.at[0]).start()
        pltpu.make_async_copy(w3_hbm, w3_vmem, dma_sem.at[1]).start()

        # TODO(synk): the real patch_model is torch.load()'ed from
        # args.patch_snapshot and cannot be reproduced from source; this
        # 1x1-conv + ReLU is a deterministic stand-in.  Pixel axis (HW) stays
        # on lanes; channel-plane loads are hoisted out of the p-loop.
        planes = [x_ref[ci] for ci in range(num_chan)]           # (M, HW) f32
        for p in range(patch_out_chan):
            acc = cb_ref[p] + cw_ref[0, p] * planes[0]
            for ci in range(1, num_chan):
                acc = acc + cw_ref[ci, p] * planes[ci]
            step_i, j = p // pchunk, p % pchunk
            feats_ref[step_i, :, j * hw:(j + 1) * hw] = (
                jnp.maximum(acc, 0.0).astype(jnp.bfloat16))
        acc1_ref[...] = jnp.zeros_like(acc1_ref)

    # fc1 partial sums: one deep-K dot per grid step.  LHS is a contiguous
    # (M, pchunk*HW) bf16 slab; RHS is the streamed int8 chunk dequantized to
    # bf16 (per-column scale is applied once, in the epilogue).
    acc1_ref[...] += jnp.dot(
        feats_ref[k],
        w1_ref[...].astype(jnp.bfloat16),
        preferred_element_type=jnp.float32,
    )

    @pl.when(k == pl.num_programs(0) - 1)
    def _epilogue():
        pltpu.make_async_copy(w2_hbm, w2_vmem, dma_sem.at[0]).wait()
        pltpu.make_async_copy(w3_hbm, w3_vmem, dma_sem.at[1]).wait()

        h1 = jnp.maximum(acc1_ref[...] * s1_ref[...] + bias_ref[0:1, :], 0.0)
        h2 = jnp.dot(h1.astype(jnp.bfloat16), w2_vmem[...],
                     preferred_element_type=jnp.float32) + bias_ref[1:2, :f2p]
        h2 = jnp.maximum(h2, 0.0)
        logits = jnp.dot(h2.astype(jnp.bfloat16), w3_vmem[...],
                         preferred_element_type=jnp.float32) + bias_ref[2:3, :ncp]
        o_ref[...] = logits.astype(o_ref.dtype)          # (M, ncp), lane-dense


# ----------------------------------------------------------------------------
# Aggregator
# ----------------------------------------------------------------------------
class AggregatorPallas:
    def __init__(self, key, *, num_chan, img_size, patch_out_chan, num_classes):
        H, W = img_size
        self.num_chan = num_chan
        self.patch_out_chan = patch_out_chan
        self.num_classes = num_classes
        self.hw = H * W
        assert self.hw % 128 == 0, "H*W must be lane-aligned for this kernel"

        hidden_dim = patch_out_chan * H * W       # stand-in patch-model output size
        fc1_dim = max(2056, hidden_dim // 8)      # 2056 as in the original module
        fc2_dim = max(1024, hidden_dim // 16)
        self.hidden_dim, self.fc1_dim, self.fc2_dim = hidden_dim, fc1_dim, fc2_dim

        ks = jax.random.split(key, 7)

        def _w(k, fan_in, shape):
            return jax.random.normal(k, shape, jnp.float32) / jnp.sqrt(fan_in)

        # Raw (unpadded, f32) parameters -- also used by the pure-JAX reference.
        self.conv_w = _w(ks[0], num_chan, (num_chan, patch_out_chan))
        self.conv_b = jnp.zeros((patch_out_chan,), jnp.float32)
        self.w1 = _w(ks[1], hidden_dim, (hidden_dim, fc1_dim))
        self.b1 = _w(ks[2], hidden_dim, (fc1_dim,)) * 0.01
        self.w2 = _w(ks[3], fc1_dim, (fc1_dim, fc2_dim))
        self.b2 = _w(ks[4], fc1_dim, (fc2_dim,)) * 0.01
        self.w3 = _w(ks[5], fc2_dim, (fc2_dim, num_classes))
        self.b3 = _w(ks[6], fc2_dim, (num_classes,)) * 0.01

        # ---- kernel-side layout: zero-pad to lane multiples --------------------
        f1p = _round_up(fc1_dim, 128)       # 2056 -> 2176
        f2p = _round_up(fc2_dim, 128)       # 1024 -> 1024
        ncp = _round_up(num_classes, 128)   # 4    -> 128
        self.f1p, self.f2p, self.ncp = f1p, f2p, ncp

        # w1: int8 storage with per-output-column f32 scales (halves the
        # dominant HBM stream; dequant happens on the VPU inside the k-loop).
        w1p = jnp.zeros((hidden_dim, f1p), jnp.float32).at[:, :fc1_dim].set(self.w1)
        col_max = jnp.max(jnp.abs(w1p), axis=0)
        scale = jnp.where(col_max > 0, col_max / 127.0, 1.0)
        self.w1_q = jnp.clip(jnp.round(w1p / scale), -127, 127).astype(jnp.int8)
        self.w1_scale = scale.reshape(1, f1p).astype(jnp.float32)

        # w2 / w3 stay bf16; they are fetched with a manual DMA that overlaps
        # the fc1 k-loop (an int8 w2 would put a dequant on the serial epilogue).
        w2p = jnp.zeros((f1p, f2p), jnp.float32).at[:fc1_dim, :fc2_dim].set(self.w2)
        self.w2_k = w2p.astype(jnp.bfloat16)
        w3p = jnp.zeros((f2p, ncp), jnp.float32).at[:fc2_dim, :num_classes].set(self.w3)
        self.w3_k = w3p.astype(jnp.bfloat16)

        # All biases packed into a single (3, f1p) f32 block (one DMA).
        bias = jnp.zeros((3, f1p), jnp.float32)
        bias = bias.at[0, :fc1_dim].set(self.b1)
        bias = bias.at[1, :fc2_dim].set(self.b2)
        bias = bias.at[2, :num_classes].set(self.b3)
        self.bias_k = bias

        # ---- w1 streaming chunk size -------------------------------------------
        # Largest channel-count divisor of patch_out_chan that leaves >=2 grid
        # steps (DMA/compute overlap) and whose double-buffered int8 chunk fits
        # the VMEM left after the resident scratch.
        self.vmem_limit = 32 * 1024 * 1024
        resident = (f1p * f2p * 2 + f2p * ncp * 2     # w2 / w3 scratch (bf16)
                    + hidden_dim * 8 * 2              # feats scratch (bf16)
                    + 8 * f1p * 4                     # fc1 accumulator (f32)
                    + (1 << 20))                      # slack for temporaries
        chunk_budget = max(self.hw * f1p, (self.vmem_limit - resident) // 2)
        pchunk = 1
        prefer = max(1, patch_out_chan // 2)          # keep >= 2 steps if possible
        for cand in range(prefer, 0, -1):
            if patch_out_chan % cand == 0 and cand * self.hw * f1p <= chunk_budget:
                pchunk = cand
                break
        self.pchunk = pchunk
        self.nsteps = patch_out_chan // pchunk

    def __call__(self, x):
        # x: NHWC float32 (the PyTorch module would receive the NCHW transpose)
        n, h, w, c = x.shape
        assert c == self.num_chan and h * w == self.hw
        m_pad = _round_up(max(n, 8), 8)

        # (N,H,W,C) -> (C, N, HW); pad batch to a full sublane tile with zeros.
        xk = x.transpose(3, 0, 1, 2).reshape(c, n, self.hw)
        xk = jnp.pad(xk, ((0, 0), (0, m_pad - n), (0, 0)))

        chunk_k = self.pchunk * self.hw
        kernel = functools.partial(
            _fused_head_kernel,
            num_chan=c, patch_out_chan=self.patch_out_chan,
            pchunk=self.pchunk, hw=self.hw, f2p=self.f2p, ncp=self.ncp)

        out = pl.pallas_call(
            kernel,
            out_shape=jax.ShapeDtypeStruct((m_pad, self.ncp), jnp.float32),
            grid_spec=pltpu.PrefetchScalarGridSpec(
                num_scalar_prefetch=0,
                grid=(self.nsteps,),
                in_specs=[
                    # full image tensor, resident across the grid (32 KB)
                    pl.BlockSpec((c, m_pad, self.hw), lambda k: (0, 0, 0)),
                    # tiny conv params -> SMEM scalars
                    pl.BlockSpec(memory_space=pltpu.MemorySpace.SMEM),
                    pl.BlockSpec(memory_space=pltpu.MemorySpace.SMEM),
                    # int8 w1 streamed over the reduction axis
                    pl.BlockSpec((chunk_k, self.f1p), lambda k: (k, 0)),
                    # per-column dequant scales + packed biases (resident)
                    pl.BlockSpec((1, self.f1p), lambda k: (0, 0)),
                    pl.BlockSpec((3, self.f1p), lambda k: (0, 0)),
                    # w2 / w3: raw HBM refs, fetched by manual DMA in-kernel
                    pl.BlockSpec(memory_space=pl.ANY),
                    pl.BlockSpec(memory_space=pl.ANY),
                ],
                out_specs=pl.BlockSpec((m_pad, self.ncp), lambda k: (0, 0)),
                scratch_shapes=[
                    pltpu.VMEM((self.nsteps, m_pad, chunk_k), jnp.bfloat16),
                    pltpu.VMEM((m_pad, self.f1p), jnp.float32),
                    pltpu.VMEM((self.f1p, self.f2p), jnp.bfloat16),
                    pltpu.VMEM((self.f2p, self.ncp), jnp.bfloat16),
                    pltpu.SemaphoreType.DMA((2,)),
                ],
            ),
            compiler_params=pltpu.CompilerParams(
                # single axis carries the fc1 accumulator + feats scratch
                dimension_semantics=("arbitrary",),
                vmem_limit_bytes=self.vmem_limit,
            ),
        )(xk, self.conv_w, self.conv_b, self.w1_q, self.w1_scale, self.bias_k,
          self.w2_k, self.w3_k)

        return out[:n, :self.num_classes]

    # Pure-JAX f32 reference (same stand-in patch model, unpadded weights).
    def reference(self, x):
        n, h, w, c = x.shape
        xc = x.transpose(0, 3, 1, 2).reshape(n, c, h * w)
        feats = jax.nn.relu(
            jnp.einsum("nch,cp->nph", xc, self.conv_w)
            + self.conv_b[None, :, None])
        ph = feats.reshape(n, -1)                      # channel-major (p, hw) flatten
        h1 = jax.nn.relu(ph @ self.w1 + self.b1)
        h2 = jax.nn.relu(h1 @ self.w2 + self.b2)
        return h2 @ self.w3 + self.b3


if __name__ == "__main__":
    key = jax.random.PRNGKey(0)
    k_x, k_params = jax.random.split(key)

    batch, num_chan, Himg, Wimg = 2, 4, 16, 16
    num_classes = 4
    patch_out_chan = 8   # stand-in patch-model output channels -> hidden_dim = 2048

    # NHWC input (the PyTorch module would receive the NCHW transpose)
    x = jax.random.normal(k_x, (batch, Himg, Wimg, num_chan), jnp.float32)

    model = AggregatorPallas(
        k_params,
        num_chan=num_chan,
        img_size=(Himg, Wimg),
        patch_out_chan=patch_out_chan,
        num_classes=num_classes,
    )

    logit = model(x)
    jax.block_until_ready(logit)
    assert logit.shape == (batch, num_classes)

    # Correctness vs. pure-JAX f32 reference.  Relative check (per review):
    # kernel uses int8 w1 + bf16 w2/w3/activations over a K=2048 reduction.
    ref = model.reference(x)
    denom = jnp.maximum(jnp.max(jnp.abs(ref)), 0.1)
    rel_err = jnp.max(jnp.abs(logit - ref)) / denom
    assert rel_err < 0.08, f"relative error {rel_err}"

    print("KERNEL_OK")
</pallas_src>

<mosaic_0001>
module attributes {stable_mosaic.version = 11 : i64} {
  func.func @_fused_head_kernel(%arg0: i32, %arg1: memref<4x8x256xf32, #tpu.memory_space<vmem>>, %arg2: memref<4x8xf32, #tpu.memory_space<smem>>, %arg3: memref<8xf32, #tpu.memory_space<smem>>, %arg4: memref<1024x2176xi8, #tpu.memory_space<vmem>>, %arg5: memref<1x2176xf32, #tpu.memory_space<vmem>>, %arg6: memref<3x2176xf32, #tpu.memory_space<vmem>>, %arg7: memref<2176x1024xbf16, #tpu.memory_space<any>>, %arg8: memref<1024x128xbf16, #tpu.memory_space<any>>, %arg9: memref<8x128xf32, #tpu.memory_space<vmem>>, %arg10: memref<2x8x1024xbf16, #tpu.memory_space<vmem>>, %arg11: memref<8x2176xf32, #tpu.memory_space<vmem>>, %arg12: memref<2176x1024xbf16, #tpu.memory_space<vmem>>, %arg13: memref<1024x128xbf16, #tpu.memory_space<vmem>>, %arg14: memref<2x!tpu.dma_semaphore, #tpu.memory_space<semaphore_mem>>) attributes {dimension_semantics = [#tpu.dimension_semantics<arbitrary>], iteration_bounds = array<i64: 2>, scalar_prefetch = 0 : i64, scratch_operands = 5 : i64, tpu.core_type = #tpu.core_type<tc>, window_params = [{pipeline_mode = #tpu.pipeline_mode<synchronous>, transform_indices = @transform_0, window_bounds = array<i64: 4, 8, 256>}, {transform_indices = @transform_1, window_bounds = array<i64: 4, 8>}, {transform_indices = @transform_2, window_bounds = array<i64: 8>}, {transform_indices = @transform_3, window_bounds = array<i64: 1024, 2176>}, {pipeline_mode = #tpu.pipeline_mode<synchronous>, transform_indices = @transform_4, window_bounds = array<i64: 1, 2176>}, {pipeline_mode = #tpu.pipeline_mode<synchronous>, transform_indices = @transform_5, window_bounds = array<i64: 3, 2176>}, {}, {}, {pipeline_mode = #tpu.pipeline_mode<synchronous>, transform_indices = @transform_8, window_bounds = array<i64: 8, 128>}]} {
    %c0_i32 = arith.constant 0 : i32
    %0 = arith.cmpi eq, %arg0, %c0_i32 : i32
    %1 = arith.extui %0 : i1 to i32
    %c0_i32_0 = arith.constant 0 : i32
    %2 = arith.cmpi ne, %1, %c0_i32_0 : i32
    scf.if %2 {
      %c0_i32_9 = arith.constant 0 : i32
      %15 = tpu.memref_slice %arg14[%c0_i32_9] : memref<2x!tpu.dma_semaphore, #tpu.memory_space<semaphore_mem>> -> memref<1x!tpu.dma_semaphore, #tpu.memory_space<semaphore_mem>>
      %16 = tpu.memref_squeeze %15 : memref<1x!tpu.dma_semaphore, #tpu.memory_space<semaphore_mem>> -> memref<!tpu.dma_semaphore, #tpu.memory_space<semaphore_mem>>
      tpu.enqueue_dma source(%arg7 : memref<2176x1024xbf16, #tpu.memory_space<any>>) target(%arg12 : memref<2176x1024xbf16, #tpu.memory_space<vmem>>) target_semaphore(%16 : memref<!tpu.dma_semaphore, #tpu.memory_space<semaphore_mem>>)
      %c1_i32_10 = arith.constant 1 : i32
      %17 = tpu.memref_slice %arg14[%c1_i32_10] : memref<2x!tpu.dma_semaphore, #tpu.memory_space<semaphore_mem>> -> memref<1x!tpu.dma_semaphore, #tpu.memory_space<semaphore_mem>>
      %18 = tpu.memref_squeeze %17 : memref<1x!tpu.dma_semaphore, #tpu.memory_space<semaphore_mem>> -> memref<!tpu.dma_semaphore, #tpu.memory_space<semaphore_mem>>
      tpu.enqueue_dma source(%arg8 : memref<1024x128xbf16, #tpu.memory_space<any>>) target(%arg13 : memref<1024x128xbf16, #tpu.memory_space<vmem>>) target_semaphore(%18 : memref<!tpu.dma_semaphore, #tpu.memory_space<semaphore_mem>>)
      %c0_11 = arith.constant 0 : index
      %c0_12 = arith.constant 0 : index
      %c0_13 = arith.constant 0 : index
      %19 = vector.load %arg1[%c0_11, %c0_12, %c0_13] : memref<4x8x256xf32, #tpu.memory_space<vmem>>, vector<1x8x256xf32>
      %20 = vector.shape_cast %19 : vector<1x8x256xf32> to vector<8x256xf32>
      %c1 = arith.constant 1 : index
      %c0_14 = arith.constant 0 : index
      %c0_15 = arith.constant 0 : index
      %21 = vector.load %arg1[%c1, %c0_14, %c0_15] : memref<4x8x256xf32, #tpu.memory_space<vmem>>, vector<1x8x256xf32>
      %22 = vector.shape_cast %21 : vector<1x8x256xf32> to vector<8x256xf32>
      %c2 = arith.constant 2 : index
      %c0_16 = arith.constant 0 : index
      %c0_17 = arith.constant 0 : index
      %23 = vector.load %arg1[%c2, %c0_16, %c0_17] : memref<4x8x256xf32, #tpu.memory_space<vmem>>, vector<1x8x256xf32>
      %24 = vector.shape_cast %23 : vector<1x8x256xf32> to vector<8x256xf32>
      %c3 = arith.constant 3 : index
      %c0_18 = arith.constant 0 : index
      %c0_19 = arith.constant 0 : index
      %25 = vector.load %arg1[%c3, %c0_18, %c0_19] : memref<4x8x256xf32, #tpu.memory_space<vmem>>, vector<1x8x256xf32>
      %26 = vector.shape_cast %25 : vector<1x8x256xf32> to vector<8x256xf32>
      %c0_20 = arith.constant 0 : index
      %27 = memref.load %arg3[%c0_20] : memref<8xf32, #tpu.memory_space<smem>>
      %c0_21 = arith.constant 0 : index
      %c0_22 = arith.constant 0 : index
      %28 = memref.load %arg2[%c0_21, %c0_22] : memref<4x8xf32, #tpu.memory_space<smem>>
      %29 = vector.broadcast %28 : f32 to vector<8x256xf32>
      %30 = arith.mulf %29, %20 : vector<8x256xf32>
      %31 = vector.broadcast %27 : f32 to vector<8x256xf32>
      %32 = arith.addf %31, %30 : vector<8x256xf32>
      %c1_23 = arith.constant 1 : index
      %c0_24 = arith.constant 0 : index
      %33 = memref.load %arg2[%c1_23, %c0_24] : memref<4x8xf32, #tpu.memory_space<smem>>
      %34 = vector.broadcast %33 : f32 to vector<8x256xf32>
      %35 = arith.mulf %34, %22 : vector<8x256xf32>
      %36 = arith.addf %32, %35 : vector<8x256xf32>
      %c2_25 = arith.constant 2 : index
      %c0_26 = arith.constant 0 : index
      %37 = memref.load %arg2[%c2_25, %c0_26] : memref<4x8xf32, #tpu.memory_space<smem>>
      %38 = vector.broadcast %37 : f32 to vector<8x256xf32>
      %39 = arith.mulf %38, %24 : vector<8x256xf32>
      %40 = arith.addf %36, %39 : vector<8x256xf32>
      %c3_27 = arith.constant 3 : index
      %c0_28 = arith.constant 0 : index
      %41 = memref.load %arg2[%c3_27, %c0_28] : memref<4x8xf32, #tpu.memory_space<smem>>
      %42 = vector.broadcast %41 : f32 to vector<8x256xf32>
      %43 = arith.mulf %42, %26 : vector<8x256xf32>
      %44 = arith.addf %40, %43 : vector<8x256xf32>
      %cst_29 = arith.constant 0.000000e+00 : f32
      %45 = vector.broadcast %cst_29 : f32 to vector<8x256xf32>
      %46 = arith.maximumf %44, %45 : vector<8x256xf32>
      %47 = arith.truncf %46 : vector<8x256xf32> to vector<8x256xbf16>
      %c0_30 = arith.constant 0 : index
      %c0_31 = arith.constant 0 : index
      %c0_32 = arith.constant 0 : index
      %48 = vector.load %arg10[%c0_30, %c0_31, %c0_32] : memref<2x8x1024xbf16, #tpu.memory_space<vmem>>, vector<1x8x256xbf16>
      %49 = vector.shape_cast %48 : vector<1x8x256xbf16> to vector<8x256xbf16>
      %50 = vector.shape_cast %47 : vector<8x256xbf16> to vector<1x8x256xbf16>
      tpu.vector_store %arg10[%c0_30, %c0_31, %c0_32], %50 {strides = array<i32>} : memref<2x8x1024xbf16, #tpu.memory_space<vmem>>, vector<1x8x256xbf16>,
      %c1_33 = arith.constant 1 : index
      %51 = memref.load %arg3[%c1_33] : memref<8xf32, #tpu.memory_space<smem>>
      %c0_34 = arith.constant 0 : index
      %c1_35 = arith.constant 1 : index
      %52 = memref.load %arg2[%c0_34, %c1_35] : memref<4x8xf32, #tpu.memory_space<smem>>
      %53 = vector.broadcast %52 : f32 to vector<8x256xf32>
      %54 = arith.mulf %53, %20 : vector<8x256xf32>
      %55 = vector.broadcast %51 : f32 to vector<8x256xf32>
      %56 = arith.addf %55, %54 : vector<8x256xf32>
      %c1_36 = arith.constant 1 : index
      %c1_37 = arith.constant 1 : index
      %57 = memref.load %arg2[%c1_36, %c1_37] : memref<4x8xf32, #tpu.memory_space<smem>>
      %58 = vector.broadcast %57 : f32 to vector<8x256xf32>
      %59 = arith.mulf %58, %22 : vector<8x256xf32>
      %60 = arith.addf %56, %59 : vector<8x256xf32>
      %c2_38 = arith.constant 2 : index
      %c1_39 = arith.constant 1 : index
      %61 = memref.load %arg2[%c2_38, %c1_39] : memref<4x8xf32, #tpu.memory_space<smem>>
      %62 = vector.broadcast %61 : f32 to vector<8x256xf32>
      %63 = arith.mulf %62, %24 : vector<8x256xf32>
      %64 = arith.addf %60, %63 : vector<8x256xf32>
      %c3_40 = arith.constant 3 : index
      %c1_41 = arith.constant 1 : index
      %65 = memref.load %arg2[%c3_40, %c1_41] : memref<4x8xf32, #tpu.memory_space<smem>>
      %66 = vector.broadcast %65 : f32 to vector<8x256xf32>
      %67 = arith.mulf %66, %26 : vector<8x256xf32>
      %68 = arith.addf %64, %67 : vector<8x256xf32>
      %cst_42 = arith.constant 0.000000e+00 : f32
      %69 = vector.broadcast %cst_42 : f32 to vector<8x256xf32>
      %70 = arith.maximumf %68, %69 : vector<8x256xf32>
      %71 = arith.truncf %70 : vector<8x256xf32> to vector<8x256xbf16>
      %c0_43 = arith.constant 0 : index
      %c0_44 = arith.constant 0 : index
      %c256 = arith.constant 256 : index
      %72 = vector.load %arg10[%c0_43, %c0_44, %c256] : memref<2x8x1024xbf16, #tpu.memory_space<vmem>>, vector<1x8x256xbf16>
      %73 = vector.shape_cast %72 : vector<1x8x256xbf16> to vector<8x256xbf16>
      %74 = vector.shape_cast %71 : vector<8x256xbf16> to vector<1x8x256xbf16>
      tpu.vector_store %arg10[%c0_43, %c0_44, %c256], %74 {strides = array<i32>} : memref<2x8x1024xbf16, #tpu.memory_space<vmem>>, vector<1x8x256xbf16>,
      %c2_45 = arith.constant 2 : index
      %75 = memref.load %arg3[%c2_45] : memref<8xf32, #tpu.memory_space<smem>>
      %c0_46 = arith.constant 0 : index
      %c2_47 = arith.constant 2 : index
      %76 = memref.load %arg2[%c0_46, %c2_47] : memref<4x8xf32, #tpu.memory_space<smem>>
      %77 = vector.broadcast %76 : f32 to vector<8x256xf32>
      %78 = arith.mulf %77, %20 : vector<8x256xf32>
      %79 = vector.broadcast %75 : f32 to vector<8x256xf32>
      %80 = arith.addf %79, %78 : vector<8x256xf32>
      %c1_48 = arith.constant 1 : index
      %c2_49 = arith.constant 2 : index
      %81 = memref.load %arg2[%c1_48, %c2_49] : memref<4x8xf32, #tpu.memory_space<smem>>
      %82 = vector.broadcast %81 : f32 to vector<8x256xf32>
      %83 = arith.mulf %82, %22 : vector<8x256xf32>
      %84 = arith.addf %80, %83 : vector<8x256xf32>
      %c2_50 = arith.constant 2 : index
      %c2_51 = arith.constant 2 : index
      %85 = memref.load %arg2[%c2_50, %c2_51] : memref<4x8xf32, #tpu.memory_space<smem>>
      %86 = vector.broadcast %85 : f32 to vector<8x256xf32>
      %87 = arith.mulf %86, %24 : vector<8x256xf32>
      %88 = arith.addf %84, %87 : vector<8x256xf32>
      %c3_52 = arith.constant 3 : index
      %c2_53 = arith.constant 2 : index
      %89 = memref.load %arg2[%c3_52, %c2_53] : memref<4x8xf32, #tpu.memory_space<smem>>
      %90 = vector.broadcast %89 : f32 to vector<8x256xf32>
      %91 = arith.mulf %90, %26 : vector<8x256xf32>
      %92 = arith.addf %88, %91 : vector<8x256xf32>
      %cst_54 = arith.constant 0.000000e+00 : f32
      %93 = vector.broadcast %cst_54 : f32 to vector<8x256xf32>
      %94 = arith.maximumf %92, %93 : vector<8x256xf32>
      %95 = arith.truncf %94 : vector<8x256xf32> to vector<8x256xbf16>
      %c0_55 = arith.constant 0 : index
      %c0_56 = arith.constant 0 : index
      %c512 = arith.constant 512 : index
      %96 = vector.load %arg10[%c0_55, %c0_56, %c512] : memref<2x8x1024xbf16, #tpu.memory_space<vmem>>, vector<1x8x256xbf16>
      %97 = vector.shape_cast %96 : vector<1x8x256xbf16> to vector<8x256xbf16>
      %98 = vector.shape_cast %95 : vector<8x256xbf16> to vector<1x8x256xbf16>
      tpu.vector_store %arg10[%c0_55, %c0_56, %c512], %98 {strides = array<i32>} : memref<2x8x1024xbf16, #tpu.memory_space<vmem>>, vector<1x8x256xbf16>,
      %c3_57 = arith.constant 3 : index
      %99 = memref.load %arg3[%c3_57] : memref<8xf32, #tpu.memory_space<smem>>
      %c0_58 = arith.constant 0 : index
      %c3_59 = arith.constant 3 : index
      %100 = memref.load %arg2[%c0_58, %c3_59] : memref<4x8xf32, #tpu.memory_space<smem>>
      %101 = vector.broadcast %100 : f32 to vector<8x256xf32>
      %102 = arith.mulf %101, %20 : vector<8x256xf32>
      %103 = vector.broadcast %99 : f32 to vector<8x256xf32>
      %104 = arith.addf %103, %102 : vector<8x256xf32>
      %c1_60 = arith.constant 1 : index
      %c3_61 = arith.constant 3 : index
      %105 = memref.load %arg2[%c1_60, %c3_61] : memref<4x8xf32, #tpu.memory_space<smem>>
      %106 = vector.broadcast %105 : f32 to vector<8x256xf32>
      %107 = arith.mulf %106, %22 : vector<8x256xf32>
      %108 = arith.addf %104, %107 : vector<8x256xf32>
      %c2_62 = arith.constant 2 : index
      %c3_63 = arith.constant 3 : index
      %109 = memref.load %arg2[%c2_62, %c3_63] : memref<4x8xf32, #tpu.memory_space<smem>>
      %110 = vector.broadcast %109 : f32 to vector<8x256xf32>
      %111 = arith.mulf %110, %24 : vector<8x256xf32>
      %112 = arith.addf %108, %111 : vector<8x256xf32>
      %c3_64 = arith.constant 3 : index
      %c3_65 = arith.constant 3 : index
      %113 = memref.load %arg2[%c3_64, %c3_65] : memref<4x8xf32, #tpu.memory_space<smem>>
      %114 = vector.broadcast %113 : f32 to vector<8x256xf32>
      %115 = arith.mulf %114, %26 : vector<8x256xf32>
      %116 = arith.addf %112, %115 : vector<8x256xf32>
      %cst_66 = arith.constant 0.000000e+00 : f32
      %117 = vector.broadcast %cst_66 : f32 to vector<8x256xf32>
      %118 = arith.maximumf %116, %117 : vector<8x256xf32>
      %119 = arith.truncf %118 : vector<8x256xf32> to vector<8x256xbf16>
      %c0_67 = arith.constant 0 : index
      %c0_68 = arith.constant 0 : index
      %c768 = arith.constant 768 : index
      %120 = vector.load %arg10[%c0_67, %c0_68, %c768] : memref<2x8x1024xbf16, #tpu.memory_space<vmem>>, vector<1x8x256xbf16>
      %121 = vector.shape_cast %120 : vector<1x8x256xbf16> to vector<8x256xbf16>
      %122 = vector.shape_cast %119 : vector<8x256xbf16> to vector<1x8x256xbf16>
      tpu.vector_store %arg10[%c0_67, %c0_68, %c768], %122 {strides = array<i32>} : memref<2x8x1024xbf16, #tpu.memory_space<vmem>>, vector<1x8x256xbf16>,
      %c4 = arith.constant 4 : index
      %123 = memref.load %arg3[%c4] : memref<8xf32, #tpu.memory_space<smem>>
      %c0_69 = arith.constant 0 : index
      %c4_70 = arith.constant 4 : index
      %124 = memref.load %arg2[%c0_69, %c4_70] : memref<4x8xf32, #tpu.memory_space<smem>>
      %125 = vector.broadcast %124 : f32 to vector<8x256xf32>
      %126 = arith.mulf %125, %20 : vector<8x256xf32>
      %127 = vector.broadcast %123 : f32 to vector<8x256xf32>
      %128 = arith.addf %127, %126 : vector<8x256xf32>
      %c1_71 = arith.constant 1 : index
      %c4_72 = arith.constant 4 : index
      %129 = memref.load %arg2[%c1_71, %c4_72] : memref<4x8xf32, #tpu.memory_space<smem>>
      %130 = vector.broadcast %129 : f32 to vector<8x256xf32>
      %131 = arith.mulf %130, %22 : vector<8x256xf32>
      %132 = arith.addf %128, %131 : vector<8x256xf32>
      %c2_73 = arith.constant 2 : index
      %c4_74 = arith.constant 4 : index
      %133 = memref.load %arg2[%c2_73, %c4_74] : memref<4x8xf32, #tpu.memory_space<smem>>
      %134 = vector.broadcast %133 : f32 to vector<8x256xf32>
      %135 = arith.mulf %134, %24 : vector<8x256xf32>
      %136 = arith.addf %132, %135 : vector<8x256xf32>
      %c3_75 = arith.constant 3 : index
      %c4_76 = arith.constant 4 : index
      %137 = memref.load %arg2[%c3_75, %c4_76] : memref<4x8xf32, #tpu.memory_space<smem>>
      %138 = vector.broadcast %137 : f32 to vector<8x256xf32>
      %139 = arith.mulf %138, %26 : vector<8x256xf32>
      %140 = arith.addf %136, %139 : vector<8x256xf32>
      %cst_77 = arith.constant 0.000000e+00 : f32
      %141 = vector.broadcast %cst_77 : f32 to vector<8x256xf32>
      %142 = arith.maximumf %140, %141 : vector<8x256xf32>
      %143 = arith.truncf %142 : vector<8x256xf32> to vector<8x256xbf16>
      %c1_78 = arith.constant 1 : index
      %c0_79 = arith.constant 0 : index
      %c0_80 = arith.constant 0 : index
      %144 = vector.load %arg10[%c1_78, %c0_79, %c0_80] : memref<2x8x1024xbf16, #tpu.memory_space<vmem>>, vector<1x8x256xbf16>
      %145 = vector.shape_cast %144 : vector<1x8x256xbf16> to vector<8x256xbf16>
      %146 = vector.shape_cast %143 : vector<8x256xbf16> to vector<1x8x256xbf16>
      tpu.vector_store %arg10[%c1_78, %c0_79, %c0_80], %146 {strides = array<i32>} : memref<2x8x1024xbf16, #tpu.memory_space<vmem>>, vector<1x8x256xbf16>,
      %c5 = arith.constant 5 : index
      %147 = memref.load %arg3[%c5] : memref<8xf32, #tpu.memory_space<smem>>
      %c0_81 = arith.constant 0 : index
      %c5_82 = arith.constant 5 : index
      %148 = memref.load %arg2[%c0_81, %c5_82] : memref<4x8xf32, #tpu.memory_space<smem>>
      %149 = vector.broadcast %148 : f32 to vector<8x256xf32>
      %150 = arith.mulf %149, %20 : vector<8x256xf32>
      %151 = vector.broadcast %147 : f32 to vector<8x256xf32>
      %152 = arith.addf %151, %150 : vector<8x256xf32>
      %c1_83 = arith.constant 1 : index
      %c5_84 = arith.constant 5 : index
      %153 = memref.load %arg2[%c1_83, %c5_84] : memref<4x8xf32, #tpu.memory_space<smem>>
      %154 = vector.broadcast %153 : f32 to vector<8x256xf32>
      %155 = arith.mulf %154, %22 : vector<8x256xf32>
      %156 = arith.addf %152, %155 : vector<8x256xf32>
      %c2_85 = arith.constant 2 : index
      %c5_86 = arith.constant 5 : index
      %157 = memref.load %arg2[%c2_85, %c5_86] : memref<4x8xf32, #tpu.memory_space<smem>>
      %158 = vector.broadcast %157 : f32 to vector<8x256xf32>
      %159 = arith.mulf %158, %24 : vector<8x256xf32>
      %160 = arith.addf %156, %159 : vector<8x256xf32>
      %c3_87 = arith.constant 3 : index
      %c5_88 = arith.constant 5 : index
      %161 = memref.load %arg2[%c3_87, %c5_88] : memref<4x8xf32, #tpu.memory_space<smem>>
      %162 = vector.broadcast %161 : f32 to vector<8x256xf32>
      %163 = arith.mulf %162, %26 : vector<8x256xf32>
      %164 = arith.addf %160, %163 : vector<8x256xf32>
      %cst_89 = arith.constant 0.000000e+00 : f32
      %165 = vector.broadcast %cst_89 : f32 to vector<8x256xf32>
      %166 = arith.maximumf %164, %165 : vector<8x256xf32>
      %167 = arith.truncf %166 : vector<8x256xf32> to vector<8x256xbf16>
      %c1_90 = arith.constant 1 : index
      %c0_91 = arith.constant 0 : index
      %c256_92 = arith.constant 256 : index
      %168 = vector.load %arg10[%c1_90, %c0_91, %c256_92] : memref<2x8x1024xbf16, #tpu.memory_space<vmem>>, vector<1x8x256xbf16>
      %169 = vector.shape_cast %168 : vector<1x8x256xbf16> to vector<8x256xbf16>
      %170 = vector.shape_cast %167 : vector<8x256xbf16> to vector<1x8x256xbf16>
      tpu.vector_store %arg10[%c1_90, %c0_91, %c256_92], %170 {strides = array<i32>} : memref<2x8x1024xbf16, #tpu.memory_space<vmem>>, vector<1x8x256xbf16>,
      %c6 = arith.constant 6 : index
      %171 = memref.load %arg3[%c6] : memref<8xf32, #tpu.memory_space<smem>>
      %c0_93 = arith.constant 0 : index
      %c6_94 = arith.constant 6 : index
      %172 = memref.load %arg2[%c0_93, %c6_94] : memref<4x8xf32, #tpu.memory_space<smem>>
      %173 = vector.broadcast %172 : f32 to vector<8x256xf32>
      %174 = arith.mulf %173, %20 : vector<8x256xf32>
      %175 = vector.broadcast %171 : f32 to vector<8x256xf32>
      %176 = arith.addf %175, %174 : vector<8x256xf32>
      %c1_95 = arith.constant 1 : index
      %c6_96 = arith.constant 6 : index
      %177 = memref.load %arg2[%c1_95, %c6_96] : memref<4x8xf32, #tpu.memory_space<smem>>
      %178 = vector.broadcast %177 : f32 to vector<8x256xf32>
      %179 = arith.mulf %178, %22 : vector<8x256xf32>
      %180 = arith.addf %176, %179 : vector<8x256xf32>
      %c2_97 = arith.constant 2 : index
      %c6_98 = arith.constant 6 : index
      %181 = memref.load %arg2[%c2_97, %c6_98] : memref<4x8xf32, #tpu.memory_space<smem>>
      %182 = vector.broadcast %181 : f32 to vector<8x256xf32>
      %183 = arith.mulf %182, %24 : vector<8x256xf32>
      %184 = arith.addf %180, %183 : vector<8x256xf32>
      %c3_99 = arith.constant 3 : index
      %c6_100 = arith.constant 6 : index
      %185 = memref.load %arg2[%c3_99, %c6_100] : memref<4x8xf32, #tpu.memory_space<smem>>
      %186 = vector.broadcast %185 : f32 to vector<8x256xf32>
      %187 = arith.mulf %186, %26 : vector<8x256xf32>
      %188 = arith.addf %184, %187 : vector<8x256xf32>
      %cst_101 = arith.constant 0.000000e+00 : f32
      %189 = vector.broadcast %cst_101 : f32 to vector<8x256xf32>
      %190 = arith.maximumf %188, %189 : vector<8x256xf32>
      %191 = arith.truncf %190 : vector<8x256xf32> to vector<8x256xbf16>
      %c1_102 = arith.constant 1 : index
      %c0_103 = arith.constant 0 : index
      %c512_104 = arith.constant 512 : index
      %192 = vector.load %arg10[%c1_102, %c0_103, %c512_104] : memref<2x8x1024xbf16, #tpu.memory_space<vmem>>, vector<1x8x256xbf16>
      %193 = vector.shape_cast %192 : vector<1x8x256xbf16> to vector<8x256xbf16>
      %194 = vector.shape_cast %191 : vector<8x256xbf16> to vector<1x8x256xbf16>
      tpu.vector_store %arg10[%c1_102, %c0_103, %c512_104], %194 {strides = array<i32>} : memref<2x8x1024xbf16, #tpu.memory_space<vmem>>, vector<1x8x256xbf16>,
      %c7 = arith.constant 7 : index
      %195 = memref.load %arg3[%c7] : memref<8xf32, #tpu.memory_space<smem>>
      %c0_105 = arith.constant 0 : index
      %c7_106 = arith.constant 7 : index
      %196 = memref.load %arg2[%c0_105, %c7_106] : memref<4x8xf32, #tpu.memory_space<smem>>
      %197 = vector.broadcast %196 : f32 to vector<8x256xf32>
      %198 = arith.mulf %197, %20 : vector<8x256xf32>
      %199 = vector.broadcast %195 : f32 to vector<8x256xf32>
      %200 = arith.addf %199, %198 : vector<8x256xf32>
      %c1_107 = arith.constant 1 : index
      %c7_108 = arith.constant 7 : index
      %201 = memref.load %arg2[%c1_107, %c7_108] : memref<4x8xf32, #tpu.memory_space<smem>>
      %202 = vector.broadcast %201 : f32 to vector<8x256xf32>
      %203 = arith.mulf %202, %22 : vector<8x256xf32>
      %204 = arith.addf %200, %203 : vector<8x256xf32>
      %c2_109 = arith.constant 2 : index
      %c7_110 = arith.constant 7 : index
      %205 = memref.load %arg2[%c2_109, %c7_110] : memref<4x8xf32, #tpu.memory_space<smem>>
      %206 = vector.broadcast %205 : f32 to vector<8x256xf32>
      %207 = arith.mulf %206, %24 : vector<8x256xf32>
      %208 = arith.addf %204, %207 : vector<8x256xf32>
      %c3_111 = arith.constant 3 : index
      %c7_112 = arith.constant 7 : index
      %209 = memref.load %arg2[%c3_111, %c7_112] : memref<4x8xf32, #tpu.memory_space<smem>>
      %210 = vector.broadcast %209 : f32 to vector<8x256xf32>
      %211 = arith.mulf %210, %26 : vector<8x256xf32>
      %212 = arith.addf %208, %211 : vector<8x256xf32>
      %cst_113 = arith.constant 0.000000e+00 : f32
      %213 = vector.broadcast %cst_113 : f32 to vector<8x256xf32>
      %214 = arith.maximumf %212, %213 : vector<8x256xf32>
      %215 = arith.truncf %214 : vector<8x256xf32> to vector<8x256xbf16>
      %c1_114 = arith.constant 1 : index
      %c0_115 = arith.constant 0 : index
      %c768_116 = arith.constant 768 : index
      %216 = vector.load %arg10[%c1_114, %c0_115, %c768_116] : memref<2x8x1024xbf16, #tpu.memory_space<vmem>>, vector<1x8x256xbf16>
      %217 = vector.shape_cast %216 : vector<1x8x256xbf16> to vector<8x256xbf16>
      %218 = vector.shape_cast %215 : vector<8x256xbf16> to vector<1x8x256xbf16>
      tpu.vector_store %arg10[%c1_114, %c0_115, %c768_116], %218 {strides = array<i32>} : memref<2x8x1024xbf16, #tpu.memory_space<vmem>>, vector<1x8x256xbf16>,
      %cst_117 = arith.constant 0.000000e+00 : f32
      %219 = vector.broadcast %cst_117 : f32 to vector<8x2176xf32>
      %c0_118 = arith.constant 0 : index
      %c0_119 = arith.constant 0 : index
      %220 = vector.load %arg11[%c0_118, %c0_119] : memref<8x2176xf32, #tpu.memory_space<vmem>>, vector<8x2176xf32>
      tpu.vector_store %arg11[%c0_118, %c0_119], %219 {strides = array<i32>} : memref<8x2176xf32, #tpu.memory_space<vmem>>, vector<8x2176xf32>,
    } else {
    }
    %c0 = arith.constant 0 : index
    %c0_1 = arith.constant 0 : index
    %3 = vector.load %arg11[%c0, %c0_1] : memref<8x2176xf32, #tpu.memory_space<vmem>>, vector<8x2176xf32>
    %4 = arith.index_cast %arg0 : i32 to index
    %c0_2 = arith.constant 0 : index
    %c0_3 = arith.constant 0 : index
    %5 = vector.load %arg10[%4, %c0_2, %c0_3] : memref<2x8x1024xbf16, #tpu.memory_space<vmem>>, vector<1x8x1024xbf16>
    %6 = vector.shape_cast %5 : vector<1x8x1024xbf16> to vector<8x1024xbf16>
    %c0_4 = arith.constant 0 : index
    %c0_5 = arith.constant 0 : index
    %7 = vector.load %arg4[%c0_4, %c0_5] : memref<1024x2176xi8, #tpu.memory_space<vmem>>, vector<1024x2176xi8>
    %8 = arith.sitofp %7 : vector<1024x2176xi8> to vector<1024x2176xbf16>
    %cst = arith.constant dense<0.000000e+00> : vector<8x2176xf32>
    %9 = tpu.matmul %6, %8, %cst {dimension_numbers = #tpu.dot_dimension_numbers<[1], [0], [0], [1], [0, 0, 1, 1], [], []>} : vector<8x1024xbf16>, vector<1024x2176xbf16>, vector<8x2176xf32> -> vector<8x2176xf32>
    %10 = arith.addf %3, %9 : vector<8x2176xf32>
    %c0_6 = arith.constant 0 : index
    %c0_7 = arith.constant 0 : index
    %11 = vector.load %arg11[%c0_6, %c0_7] : memref<8x2176xf32, #tpu.memory_space<vmem>>, vector<8x2176xf32>
    tpu.vector_store %arg11[%c0_6, %c0_7], %10 {strides = array<i32>} : memref<8x2176xf32, #tpu.memory_space<vmem>>, vector<8x2176xf32>,
    %c1_i32 = arith.constant 1 : i32
    %12 = arith.cmpi eq, %arg0, %c1_i32 : i32
    %13 = arith.extui %12 : i1 to i32
    %c0_i32_8 = arith.constant 0 : i32
    %14 = arith.cmpi ne, %13, %c0_i32_8 : i32
    scf.if %14 {
      %c0_i32_9 = arith.constant 0 : i32
      %15 = tpu.memref_slice %arg14[%c0_i32_9] : memref<2x!tpu.dma_semaphore, #tpu.memory_space<semaphore_mem>> -> memref<1x!tpu.dma_semaphore, #tpu.memory_space<semaphore_mem>>
      %16 = tpu.memref_squeeze %15 : memref<1x!tpu.dma_semaphore, #tpu.memory_space<semaphore_mem>> -> memref<!tpu.dma_semaphore, #tpu.memory_space<semaphore_mem>>
      tpu.wait_dma2 semaphore(%16 : memref<!tpu.dma_semaphore, #tpu.memory_space<semaphore_mem>>) src(%arg7 : memref<2176x1024xbf16, #tpu.memory_space<any>>) dst(%arg12 : memref<2176x1024xbf16, #tpu.memory_space<vmem>>)
      %c1_i32_10 = arith.constant 1 : i32
      %17 = tpu.memref_slice %arg14[%c1_i32_10] : memref<2x!tpu.dma_semaphore, #tpu.memory_space<semaphore_mem>> -> memref<1x!tpu.dma_semaphore, #tpu.memory_space<semaphore_mem>>
      %18 = tpu.memref_squeeze %17 : memref<1x!tpu.dma_semaphore, #tpu.memory_space<semaphore_mem>> -> memref<!tpu.dma_semaphore, #tpu.memory_space<semaphore_mem>>
      tpu.wait_dma2 semaphore(%18 : memref<!tpu.dma_semaphore, #tpu.memory_space<semaphore_mem>>) src(%arg8 : memref<1024x128xbf16, #tpu.memory_space<any>>) dst(%arg13 : memref<1024x128xbf16, #tpu.memory_space<vmem>>)
      %c0_11 = arith.constant 0 : index
      %c0_12 = arith.constant 0 : index
      %19 = vector.load %arg11[%c0_11, %c0_12] : memref<8x2176xf32, #tpu.memory_space<vmem>>, vector<8x2176xf32>
      %c0_13 = arith.constant 0 : index
      %c0_14 = arith.constant 0 : index
      %20 = vector.load %arg5[%c0_13, %c0_14] : memref<1x2176xf32, #tpu.memory_space<vmem>>, vector<1x2176xf32>
      %21 = vector.broadcast %20 : vector<1x2176xf32> to vector<8x2176xf32>
      %22 = arith.mulf %19, %21 : vector<8x2176xf32>
      %c0_15 = arith.constant 0 : index
      %c0_16 = arith.constant 0 : index
      %23 = vector.load %arg6[%c0_15, %c0_16] : memref<3x2176xf32, #tpu.memory_space<vmem>>, vector<1x2176xf32>
      %24 = vector.broadcast %23 : vector<1x2176xf32> to vector<8x2176xf32>
      %25 = arith.addf %22, %24 : vector<8x2176xf32>
      %cst_17 = arith.constant 0.000000e+00 : f32
      %26 = vector.broadcast %cst_17 : f32 to vector<8x2176xf32>
      %27 = arith.maximumf %25, %26 : vector<8x2176xf32>
      %28 = arith.truncf %27 : vector<8x2176xf32> to vector<8x2176xbf16>
      %c0_18 = arith.constant 0 : index
      %c0_19 = arith.constant 0 : index
      %29 = vector.load %arg12[%c0_18, %c0_19] : memref<2176x1024xbf16, #tpu.memory_space<vmem>>, vector<2176x1024xbf16>
      %cst_20 = arith.constant dense<0.000000e+00> : vector<8x1024xf32>
      %30 = tpu.matmul %28, %29, %cst_20 {dimension_numbers = #tpu.dot_dimension_numbers<[1], [0], [0], [1], [0, 0, 1, 1], [], []>} : vector<8x2176xbf16>, vector<2176x1024xbf16>, vector<8x1024xf32> -> vector<8x1024xf32>
      %c1 = arith.constant 1 : index
      %c0_21 = arith.constant 0 : index
      %31 = vector.load %arg6[%c1, %c0_21] : memref<3x2176xf32, #tpu.memory_space<vmem>>, vector<1x1024xf32>
      %32 = vector.broadcast %31 : vector<1x1024xf32> to vector<8x1024xf32>
      %33 = arith.addf %30, %32 : vector<8x1024xf32>
      %cst_22 = arith.constant 0.000000e+00 : f32
      %34 = vector.broadcast %cst_22 : f32 to vector<8x1024xf32>
      %35 = arith.maximumf %33, %34 : vector<8x1024xf32>
      %36 = arith.truncf %35 : vector<8x1024xf32> to vector<8x1024xbf16>
      %c0_23 = arith.constant 0 : index
      %c0_24 = arith.constant 0 : index
      %37 = vector.load %arg13[%c0_23, %c0_24] : memref<1024x128xbf16, #tpu.memory_space<vmem>>, vector<1024x128xbf16>
      %cst_25 = arith.constant dense<0.000000e+00> : vector<8x128xf32>
      %38 = tpu.matmul %36, %37, %cst_25 {dimension_numbers = #tpu.dot_dimension_numbers<[1], [0], [0], [1], [0, 0, 1, 1], [], []>} : vector<8x1024xbf16>, vector<1024x128xbf16>, vector<8x128xf32> -> vector<8x128xf32>
      %c2 = arith.constant 2 : index
      %c0_26 = arith.constant 0 : index
      %39 = vector.load %arg6[%c2, %c0_26] : memref<3x2176xf32, #tpu.memory_space<vmem>>, vector<1x128xf32>
      %40 = vector.broadcast %39 : vector<1x128xf32> to vector<8x128xf32>
      %41 = arith.addf %38, %40 : vector<8x128xf32>
      %c0_27 = arith.constant 0 : index
      %c0_28 = arith.constant 0 : index
      %42 = vector.load %arg9[%c0_27, %c0_28] : memref<8x128xf32, #tpu.memory_space<vmem>>, vector<8x128xf32>
      tpu.vector_store %arg9[%c0_27, %c0_28], %41 {strides = array<i32>} : memref<8x128xf32, #tpu.memory_space<vmem>>, vector<8x128xf32>,
    } else {
    }
    return
  }
  func.func @transform_0(%arg0: i32) -> (i32, i32, i32) {
    %c0_i32 = arith.constant 0 : i32
    %c0_i32_0 = arith.constant 0 : i32
    %c0_i32_1 = arith.constant 0 : i32
    %c0_i32_2 = arith.constant 0 : i32
    return %c0_i32, %c0_i32_0, %c0_i32_1 : i32, i32, i32
  }
  func.func @transform_1(%arg0: i32) -> (i32, i32) {
    %c0_i32 = arith.constant 0 : i32
    %c0_i32_0 = arith.constant 0 : i32
    %c0_i32_1 = arith.constant 0 : i32
    return %c0_i32, %c0_i32_0 : i32, i32
  }
  func.func @transform_2(%arg0: i32) -> i32 {
    %c0_i32 = arith.constant 0 : i32
    %c0_i32_0 = arith.constant 0 : i32
    return %c0_i32 : i32
  }
  func.func @transform_3(%arg0: i32) -> (i32, i32) {
    %c0_i32 = arith.constant 0 : i32
    %c0_i32_0 = arith.constant 0 : i32
    return %arg0, %c0_i32 : i32, i32
  }
  func.func @transform_4(%arg0: i32) -> (i32, i32) {
    %c0_i32 = arith.constant 0 : i32
    %c0_i32_0 = arith.constant 0 : i32
    %c0_i32_1 = arith.constant 0 : i32
    return %c0_i32, %c0_i32_0 : i32, i32
  }
  func.func @transform_5(%arg0: i32) -> (i32, i32) {
    %c0_i32 = arith.constant 0 : i32
    %c0_i32_0 = arith.constant 0 : i32
    %c0_i32_1 = arith.constant 0 : i32
    return %c0_i32, %c0_i32_0 : i32, i32
  }
  func.func @transform_8(%arg0: i32) -> (i32, i32) {
    %c0_i32 = arith.constant 0 : i32
    %c0_i32_0 = arith.constant 0 : i32
    %c0_i32_1 = arith.constant 0 : i32
    return %c0_i32, %c0_i32_0 : i32, i32
  }
}

</mosaic_0001>

<bundles_post_ra>
// kernel: tpu_custom_call.1
= control target key start
LH: loop header
LB: loop body
LE: loop exit
PB: predicated region body
PF: predicated region fallthrough
CT: control target
= control target key end

     0   :  { %13 = vsyncpa [#allocation8], 0  ;;  %s9420_s0 = inlined_call_operand.hbm [shape: f32[4,8,256], index: 0, kind: input, shape index: {}]   ;;  %s9421_s1 = inlined_call_operand.hbm [shape: f32[4,8], index: 1, kind: input, shape index: {}]   ;;  %s9422_s2 = inlined_call_operand.hbm [shape: f32[8], index: 2, kind: input, shape index: {}]   ;;  %s9423_s3 = inlined_call_operand.hbm [shape: s8[2048,2176], index: 3, kind: input, shape index: {}]   ;;  %s9424_s4 = inlined_call_operand.hbm [shape: f32[1,2176], index: 4, kind: input, shape index: {}]   ;;  %s9425_s5 = inlined_call_operand.hbm [shape: f32[3,2176], index: 5, kind: input, shape index: {}]   ;;  %s9426_s6 = inlined_call_operand.hbm [shape: bf16[2176,1024], index: 6, kind: input, shape index: {}]   ;;  %s9427_s7 = inlined_call_operand.hbm [shape: bf16[1024,128], index: 7, kind: input, shape index: {}]   ;;  %s9428_s8 = inlined_call_operand.hbm [shape: f32[8,128], index: 8, kind: output, shape index: {}]  }
   0x1   :  { %14 = vsyncpa [#allocation10], 0 }
   0x2   :  { %15 = vsyncpa [#allocation13], 0 }
   0x3   :  { %16 = vsyncpa [#allocation15], 0 }
   0x4   :  { %18 = vsyncpa [#allocation15 + $0x1], 0 }
   0x5   :  { %19 = vsyncpa [#allocation18], 0 }
   0x6   :  { %20 = vsyncpa [#allocation9], 0  ;;  %s8007_s27 = smov 0   ;;  %s8009_s28 = smov 0  }
   0x7   :  { %s8011_s29 = smov 0   ;;  %s8013_s30 = smov 0  }
   0x8 LB: > { %s8026_s9 = sadd.s32 4294967295, %s7936_s30   ;;  %p109_p0 = scmp.ne.s32.totalorder %s7928_s28, %s7924_s27  ;;  %s7936_s30 = sphi %s8013_s30, %s9453_s30   ;;  %s7932_s29 = sphi %s8011_s29, %s9452_s29   ;;  %s7928_s28 = sphi %s8009_s28, %s9451_s28   ;;  %s7924_s27 = sphi %s8007_s27, %s9450_s27  }
   0x9   : > { %p9429_p1 = scmp.eq.s32.totalorder %s8026_s9, 0  ;;  %p7153_p2 = scmp.ge.s32.totalorder %s7936_s30, 1 }
   0xa   : > { %p183_p3 = scmp.lt.s32.totalorder %s7936_s30, 3  ;;  %s7938_s12 = smov [#allocation16]  }
   0xb   : > { %p8035_p5 = por %p9429_p1, %p109_p0  ;;  %s227_s13 = sshll.u32 %s7938_s12, 4  ;;  %s228_s13 = int_to_ptr.vmem [resolvable:$true] %s227_s13 }
   0xc   : > { %p8039_p6 = pnand %p7153_p2, %p183_p3  ;;  %s7939_s14 = smov [#allocation7]  }
   0xd   : > { %s9432_s10 = scalar_select %p8035_p5, 1, 0 }
   0xe   : > { %s9433_s11 = scalar_select %p8039_p6, 1, 0 }
   0xf   : > { %p7587_p7 = pneg %p8039_p6  ;;  %s195_s15 = sshll.u32 %s7939_s14, 4  ;;  %s8051_s15 = int_to_ptr.vmem [resolvable:$true] %s195_s15 }
  0x10   : > { %s7686_s19 = scalar_lea.hbm %s9424_s4, 272 }
  0x11   : > { %p8047_p8 = pnand %p7587_p7, %p9429_p1  ;;  %p7687_p9 = scmp.ne.s32.totalorder %s9424_s4, %s7686_s19 }
  0x12   : > { %p7693_p13 = scmp.lt.u32.totalorder %s7686_s19, %s9424_s4 }
  0x13   : > { %p8061_p10 = pneg %p8047_p8 }
  0x15   : > { %p7689_p11 = pnand %p8061_p10, %p7687_p9 }
  0x17   : > { %p7690_p12 = pneg %p7689_p11 }
  0x19   : > { %p7695_p0 = pnand %p7693_p13, %p7690_p12 }
  0x1b   : > { %7698 = shalt.err (!%p7695_p0)
}
  0x1c   : > { %s7699_s25 = scalar_lea.vmem %s228_s13, 272  ;;  %s7706_s26 = scalar_lea.vmem %s228_s13, 288 }
  0x1d   : > { %p7700_p2 = scmp.ne.s32.totalorder %s228_s13, %s7699_s25  ;;  %p7707_p4 = scmp.lt.s32.totalorder %s228_s13, %s228_s13 }
  0x1e   : > { %p7708_p1 = scmp.lt.s32.totalorder %s7706_s26, %s7699_s25 }
  0x1f   : > { %p7702_p3 = pnand %p7700_p2, %p8061_p10 }
  0x20   : > { %p7709_p5 = por %p7708_p1, %p7707_p4 }
  0x21   : > { %p7703_p7 = pneg %p7702_p3 }
  0x23   : > { %p7710_p6 = pnand %p7709_p5, %p7703_p7 }
  0x25   : > { %7713 = shalt.err (!%p7710_p6)
}
  0x26   : > { %7599 = dma.hbm_to_vmem [thread:$0]  (!%p8047_p8), %s9424_s4, 272, %s228_s13, [#allocation15]  }
  0x27   : > { %s7714_s18 = scalar_lea.hbm %s9420_s0, 1024 }
  0x28   : > { %p7715_p9 = scmp.ne.s32.totalorder %s9420_s0, %s7714_s18  ;;  %p7721_p4 = scmp.lt.u32.totalorder %s7714_s18, %s9420_s0 }
  0x2a   : > { %p7717_p11 = pnand %p7715_p9, %p8061_p10 }
  0x2c   : > { %p7718_p1 = pneg %p7717_p11 }
  0x2e   : > { %p7723_p5 = pnand %p7721_p4, %p7718_p1 }
  0x30   : > { %7726 = shalt.err (!%p7723_p5)
}
  0x31   : > { %s7727_s13 = scalar_lea.vmem %s8051_s15, 1024  ;;  %p7735_p0 = scmp.lt.s32.totalorder %s8051_s15, %s8051_s15 }
  0x32   : > { %p7728_p6 = scmp.ne.s32.totalorder %s8051_s15, %s7727_s13  ;;  %p7736_p2 = scmp.lt.s32.totalorder %s7727_s13, %s7727_s13 }
  0x34   : > { %p7730_p12 = pnand %p7728_p6, %p8061_p10  ;;  %p7737_p3 = por %p7736_p2, %p7735_p0 }
  0x36   : > { %p7731_p13 = pneg %p7730_p12 }
  0x38   : > { %p7738_p7 = pnand %p7737_p3, %p7731_p13 }
  0x3a   : > { %7741 = shalt.err (!%p7738_p7)
}
  0x3b   : > { %s7940_s24 = smov 256   ;;  %s7941_s25 = smov 16  }
  0x3c   : > { %7590 = dma.hbm_to_vmem [thread:$0]  (!%p8047_p8), %s9420_s0, 1024, %s8051_s15, [#allocation8], %s7940_s24, %s7940_s24, %s7941_s25  }
  0x3d   : > { %s7742_s17 = scalar_lea.hbm %s9421_s1, 64 }
  0x3e   : > { %p7743_p9 = scmp.ne.s32.totalorder %s9421_s1, %s7742_s17  ;;  %p7749_p4 = scmp.lt.u32.totalorder %s7742_s17, %s9421_s1 }
  0x40   : > { %p7745_p11 = pnand %p7743_p9, %p8061_p10 }
  0x42   : > { %p7746_p1 = pneg %p7745_p11 }
  0x44   : > { %p7751_p5 = pnand %p7749_p4, %p7746_p1 }
  0x46   : > { %7754 = shalt.err (!%p7751_p5)
}
  0x47   : > { %s7942_s23 = smov [#allocation11]   ;;  %s7755_s26 = scalar_lea.hbm %s9422_s2, 16 }
  0x48   : > { %7593 = dma.hbm_to_smem (!%p8047_p8), %s9421_s1, 64, %s7942_s23, [#allocation10]  }
  0x49   : > { %p7756_p6 = scmp.ne.s32.totalorder %s9422_s2, %s7755_s26  ;;  %p7762_p0 = scmp.lt.u32.totalorder %s7755_s26, %s9422_s2 }
  0x4b   : > { %p7758_p12 = pnand %p7756_p6, %p8061_p10 }
  0x4d   : > { %p7759_p13 = pneg %p7758_p12 }
  0x4f   : > { %p7764_p2 = pnand %p7762_p0, %p7759_p13 }
  0x51   : > { %7767 = shalt.err (!%p7764_p2)
}
  0x52   : > { %s7943_s18 = smov [#allocation12]   ;;  %s7944_s21 = smov [#allocation17]  }
  0x53   : > { %7596 = dma.hbm_to_smem (!%p8047_p8), %s9422_s2, 16, %s7943_s18, [#allocation13]  }
  0x54   : > { %s238_s23 = sshll.u32 %s7944_s21, 4  ;;  %s8133_s15 = sadd.s32 1, %s7936_s30   ;;  %s239_s23 = int_to_ptr.vmem [resolvable:$true] %s238_s23 }
  0x55   : > { %s7768_s25 = scalar_lea.hbm %s9425_s5, 1088 }
  0x56   : > { %p7769_p3 = scmp.ne.s32.totalorder %s9425_s5, %s7768_s25  ;;  %p7775_p11 = scmp.lt.u32.totalorder %s7768_s25, %s9425_s5 }
  0x58   : > { %p7771_p7 = pnand %p7769_p3, %p8061_p10 }
  0x5a   : > { %p7772_p9 = pneg %p7771_p7 }
  0x5c   : > { %p7777_p1 = pnand %p7775_p11, %p7772_p9 }
  0x5e   : > { %7780 = shalt.err (!%p7777_p1)
}
  0x5f   : > { %s7781_s17 = scalar_lea.vmem %s239_s23, 1088  ;;  %p7789_p12 = scmp.lt.s32.totalorder %s239_s23, %s239_s23 }
  0x60   : > { %p7782_p4 = scmp.ne.s32.totalorder %s239_s23, %s7781_s17  ;;  %p7790_p13 = scmp.lt.s32.totalorder %s7781_s17, %s7781_s17 }
  0x62   : > { %p7784_p5 = pnand %p7782_p4, %p8061_p10  ;;  %p7791_p0 = por %p7790_p13, %p7789_p12 }
  0x64   : > { %p7785_p6 = pneg %p7784_p5 }
  0x66   : > { %p7792_p2 = pnand %p7791_p0, %p7785_p6 }
  0x68   : > { %7795 = shalt.err (!%p7792_p2)
}
  0x69   : > { %7602 = dma.hbm_to_vmem [thread:$0]  (!%p8047_p8), %s9425_s5, 1088, %s239_s23, [#allocation18]  }
  0x6a   : > { %s93_s22 = ssub.s32 %s7936_s30, %s8133_s15  ;;  %s96_s20 = sadd.s32 1, %s7932_s29 }
  0x6b   : > { %p94_p10 = scmp.eq.s32.totalorder %s93_s22, 0  ;;  %p103_p3 = scmp.ne.s32.totalorder %s7932_s29, %s7928_s28 }
  0x6c   : > { %p104_p7 = scmp.eq.s32.totalorder %s7936_s30, 0  ;;  %p7612_p9 = scmp.lt.s32.totalorder %s7936_s30, 2 }
  0x6d   : > { %s8161_s16 = scalar_select %p94_p10, %s7932_s29, %s96_s20  }
  0x6e   : > { %p105_p11 = por %p104_p7, %p103_p3  ;;  %s249_s21 = sand.u32 1, %s7936_s30  }
  0x6f   : > { %s251_s13 = sand.u32 1, %s7932_s29   ;;  %s7559_s26 = smul.u32 69632, %s7936_s30 }
  0x70   : > { %s7558_s24 = smul.u32 4352, %s251_s13  ;;  %p8165_p1 = pnand %p7612_p9, %p105_p11 }
  0x71   : > { %s8173_s12 = scalar_lea.hbm %s9423_s3, %s7559_s26  ;;  %s8177_s18 = scalar_lea.sflag [#allocation15], %s249_s21 }
  0x72   : > { %s253_s14 = scalar_lea.vmem [#allocation14], %s7558_s24  ;;  %s7796_s19 = scalar_lea.hbm %s8173_s12, 69632 }
  0x73   : > { %s261_s17 = sshll.u32 %s253_s14, 4  ;;  %p7797_p8 = scmp.ne.s32.totalorder %s8173_s12, %s7796_s19  ;;  %s8175_s17 = int_to_ptr.vmem [resolvable:$true] %s261_s17 }
  0x74   : > { %p7798_p4 = pneg %p8165_p1  ;;  %s7801_s20 = scalar_lea.hbm %s9423_s3, 139264 }
  0x75   : > { %p7802_p12 = scmp.lt.u32.totalorder %s8173_s12, %s9423_s3  ;;  %p7803_p13 = scmp.lt.u32.totalorder %s7801_s20, %s7796_s19 }
  0x76   : > { %p7799_p5 = pnand %p7798_p4, %p7797_p8  ;;  %p7805_p2 = scmp.lt.u32.totalorder %s7796_s19, %s8173_s12 }
  0x77   : > { %p7804_p0 = por %p7803_p13, %p7802_p12 }
  0x78   : > { %p7800_p6 = pneg %p7799_p5 }
  0x79   : > { %p7806_p10 = por %p7805_p2, %p7804_p0 }
  0x7b   : > { %p7807_p3 = pnand %p7806_p10, %p7800_p6 }
  0x7d   : > { %7810 = shalt.err (!%p7807_p3)
}
  0x7e   : > { %s7811_s21 = scalar_lea.vmem %s8175_s17, 69632  ;;  %s7945_s24 = smov [#allocation14]  }
  0x7f   : > { %p7812_p7 = scmp.ne.s32.totalorder %s8175_s17, %s7811_s21  ;;  %s7816_s23 = sshll.u32 %s7945_s24, 4  ;;  %s7817_s23 = int_to_ptr.vmem [resolvable:$false] %s7816_s23 }
  0x80   : > { %s7818_s27 = scalar_lea.vmem %s7817_s23, 139264  ;;  %p7819_p8 = scmp.lt.s32.totalorder %s8175_s17, %s7817_s23 }
  0x81   : > { %p7814_p9 = pnand %p7812_p7, %p7798_p4  ;;  %p7820_p5 = scmp.lt.s32.totalorder %s7818_s27, %s7811_s21 }
  0x83   : > { %p7815_p11 = pneg %p7814_p9  ;;  %p7821_p12 = por %p7820_p5, %p7819_p8 }
  0x85   : > { %p7822_p13 = pnand %p7821_p12, %p7815_p11 }
  0x87   : > { %7825 = shalt.err (!%p7822_p13)
}
  0x88   : > { %s7946_s14 = smov 2176   ;;  %s7947_s19 = smov 136  }
  0x89   : > { %7606 = dma.hbm_to_vmem [thread:$0]  (!%p8165_p1), %s8173_s12, 69632, %s8175_s17, %s8177_s18, %s7946_s14, %s7946_s14, %s7947_s19  }
  0x8a   : > { %p9437_p4 = scmp.ne.s32.totalorder %s9433_s11, 0 }
  0x8b   : > { %p9438_p6 = scmp.eq.s32.totalorder (!%p9437_p4), %s8026_s9, 0 }
  0x8c   : > { %273 = sbr.rel (%p9437_p4) target bundleno = 3138 (0xc42), region = 44 }
  0x93   : > { %7891 = dma.done.wait (%p9438_p6), [#allocation8], 1024   ;;  %p9439_p0 = pmov %p9438_p6 }
  0x95   : > { %7893 = vsyncadd (%p9439_p0), [#allocation8], 4294966272  ;;  %p9440_p2 = pmov %p9439_p0 }
  0x96   : > { %p9441_p10 = pmov %p9439_p0 }
  0x97   : > { %7895 = dma.done.wait (%p9440_p2), [#allocation10], 64  }
  0x98   : > { %7897 = vsyncadd (%p9441_p10), [#allocation10], 4294967232  ;;  %p9442_p3 = pmov %p9439_p0 }
  0x99   : > { %p9443_p1 = pmov %p9439_p0 }
  0x9a   : > { %7899 = dma.done.wait (%p9442_p3), [#allocation13], 16  }
  0x9b   : > { %7901 = vsyncadd (%p9443_p1), [#allocation13], 4294967280  ;;  %s287_s11 = sand.u32 1, %s8026_s9   ;;  %s289_s25 = sand.u32 1, %s7928_s28  }
  0x9c   : > { %s7560_s12 = smul.u32 4352, %s289_s25  ;;  %s288_s17 = scalar_lea.sflag [#allocation15], %s287_s11 }
  0x9d   : > { %p9444_p7 = scmp.ne.s32.totalorder %s9432_s10, 0 }
  0x9e   : > { %s8221_s18 = scalar_lea.vmem [#allocation14], %s7560_s12 }
  0x9f   : > { %7903 = dma.done.wait (%p9444_p7), %s288_s17, 69632  }
  0xa0   : > { %7905 = vsyncadd (%p9444_p7), %s288_s17, 4294897664  ;;  %p9445_p9 = pmov %p9439_p0 }
  0xa1   : > { %p9446_p11 = pmov %p9439_p0 }
  0xa2   : > { %7907 = dma.done.wait (%p9445_p9), [#allocation15], 272  }
  0xa3   : > { %7909 = vsyncadd (%p9446_p11), [#allocation15], 4294967024  ;;  %p9447_p8 = pmov %p9439_p0 }
  0xa4   : > { %p9448_p5 = pmov %p9439_p0 }
  0xa5   : > { %7911 = dma.done.wait (%p9447_p8), [#allocation18], 1088  }
  0xa6   : > { %7913 = vsyncadd (%p9448_p5), [#allocation18], 4294966208 }
  0xa7   : > { %304 = sfence }
  0xa8   : > { %p9449_p12 = scmp.ne.s32.totalorder %s8026_s9, 0 }
  0xaa   : > { %329 = sbr.rel (%p9449_p12) target bundleno = 268 (0x10c), region = 72 }
  0xb1   : > { %s334_s30 = sld [smem:[#allocation0]]   ;;  %s7948_s22 = smov [#allocation4]   ;;  %v7958_v0 = vmov 0.0  }
  0xb2   : > { %s342_s10 = sshll.u32 %s7948_s22, 4  ;;  %s7949_s20 = smov 1024   ;;  %s343_s10 = int_to_ptr.vmem [resolvable:$true] %s342_s10 }
  0xb3   : > { %346 = sst [smem:[#allocation21]] %s7949_s20  ;;  %s7950_s13 = smov 8  }
  0xb4   : > { %348 = sst [smem:[#allocation21 + $0x1]] %s7949_s20  ;;  %s7951_s26 = smov 64  }
  0xb5   : > { %350 = sst [smem:[#allocation21 + $0x2]] %s7950_s13  ;;  %s7952_s24 = smov 128  }
  0xb6   : > { %352 = sst [smem:[#allocation21 + $0x3]] %s7951_s26  ;;  %s7953_s27 = smov 2  }
  0xb7   : > { %s7170_s21 = sshll.u32 %s334_s30, 26  ;;  %354 = sst [smem:[#allocation21 + $0x4]] %s7952_s24 }
  0xb8   : > { %s7171_s23 = sadd.s32 134217728, %s7170_s21  ;;  %356 = sst [smem:[#allocation21 + $0x5]] %s7953_s27 }
  0xb9   : > { %s7954_s14 = smov 512   ;;  %360 = sst [smem:[#allocation21 + $0x7]] %s7951_s26 }
  0xba   : > { %358 = sst [smem:[#allocation21 + $0x6]] %s7954_s14  ;;  %s7955_s19 = smov 4  }
  0xbb   : > { %362 = sst [smem:[#allocation21 + $0x8]] %s7955_s19  ;;  %s7956_s11 = smov [#allocation6]  }
  0xbc   : > { %s7957_s25 = smov [#allocation20]   ;;  %s7959_s30 = smov [#allocation5]  }
  0xbd   : > { %364 = dma.general %s9426_s6, 139264, %s343_s10, %s7956_s11, %s7957_s25, [#allocation21], %s7171_s23, 0  }
  0xbe   : > { %s8240_s22 = sld [smem:[#allocation12]]  ;;  %685 = vst [vmem:[#allocation3] sm:$0xff] %v7958_v0  ;;  %686 = vst [vmem:[#allocation3 + $0x8] sm:$0xff] %v7958_v0  ;;  %s373_s10 = sshll.u32 %s7959_s30, 4  ;;  %s374_s10 = int_to_ptr.vmem [resolvable:$true] %s373_s10 }
  0xbf   : > { %687 = vst [vmem:[#allocation3 + $0x10] sm:$0xff] %v7958_v0  ;;  %688 = vst [vmem:[#allocation3 + $0x18] sm:$0xff] %v7958_v0  ;;  %s8242_s20 = sld [smem:[#allocation11]]  ;;  %s7826_s24 = scalar_lea.hbm %s9427_s7, 8192 }
  0xc0   : > { %689 = vst [vmem:[#allocation3 + $0x20] sm:$0xff] %v7958_v0  ;;  %690 = vst [vmem:[#allocation3 + $0x28] sm:$0xff] %v7958_v0  ;;  %s8244_s13 = sld [smem:[#allocation11 + $0x80]]  ;;  %p7827_p13 = scmp.ne.s32.totalorder %s9427_s7, %s7826_s24 }
  0xc1   : > { %691 = vst [vmem:[#allocation3 + $0x30] sm:$0xff] %v7958_v0  ;;  %692 = vst [vmem:[#allocation3 + $0x38] sm:$0xff] %v7958_v0  ;;  %p7830_p4 = scmp.lt.u32.totalorder %s7826_s24, %s9427_s7 }
  0xc2   : > { %693 = vst [vmem:[#allocation3 + $0x40] sm:$0xff] %v7958_v0  ;;  %694 = vst [vmem:[#allocation3 + $0x48] sm:$0xff] %v7958_v0 }
  0xc3   : > { %695 = vst [vmem:[#allocation3 + $0x50] sm:$0xff] %v7958_v0  ;;  %696 = vst [vmem:[#allocation3 + $0x58] sm:$0xff] %v7958_v0  ;;  %p7832_p6 = pnand %p7830_p4, %p7827_p13 }
  0xc4   : > { %697 = vst [vmem:[#allocation3 + $0x60] sm:$0xff] %v7958_v0  ;;  %698 = vst [vmem:[#allocation3 + $0x68] sm:$0xff] %v7958_v0 }
  0xc5   : > { %699 = vst [vmem:[#allocation3 + $0x70] sm:$0xff] %v7958_v0  ;;  %700 = vst [vmem:[#allocation3 + $0x78] sm:$0xff] %v7958_v0 }
  0xc6   : > { %701 = vst [vmem:[#allocation3 + $0x80] sm:$0xff] %v7958_v0 }
  0xc7   : > { %7835 = shalt.err (!%p7832_p6)  }
  0xc8   : > { %s7836_s11 = scalar_lea.vmem %s374_s10, 8192  ;;  %p7841_p2 = scmp.lt.s32.totalorder %s374_s10, %s374_s10 }
  0xc9   : > { %p7837_p0 = scmp.ne.s32.totalorder %s374_s10, %s7836_s11  ;;  %p7842_p10 = scmp.lt.s32.totalorder %s7836_s11, %s7836_s11 }
  0xcb   : > { %p7843_p3 = por %p7842_p10, %p7841_p2 }
  0xcd   : > { %p7844_p1 = pnand %p7843_p3, %p7837_p0 }
  0xcf   : > { %7847 = shalt.err (!%p7844_p1)  }
  0xd0   : > { %376 = dma.hbm_to_vmem [thread:$0]  %s9427_s7, 8192, %s374_s10, [#allocation6 + $0x1]  ;;  %v8262_v1 = vld [vmem:[#allocation7] sm:$0xff]  ;;  %v8264_v2 = vld [vmem:[#allocation7 + $0x8] sm:$0xff]  ;;  %v8266_v3 = vld [vmem:[#allocation7 + $0x10] sm:$0xff]  ;;  %v390_v6 = vstv %s8242_s20  ;;  %v393_v7 = vstv %s8240_s22  ;;  %v397_v13 = vstv %s8244_s13 }
  0xd1   : > { %s7173_s17 = sld [smem:[#allocation11 + $0x100]]  ;;  %s8258_s26 = sld [smem:[#allocation12 + $0x1]]  ;;  %v8270_v4 = vld [vmem:[#allocation7 + $0x18] sm:$0xff]  ;;  %v8272_v5 = vld [vmem:[#allocation7 + $0x20] sm:$0xff]  ;;  %v8278_v8 = vld [vmem:[#allocation7 + $0x28] sm:$0xff]  ;;  %v391_v11 = vmul.f32 %v390_v6, %v8262_v1  ;;  %v392_v12 = vmul.f32 %v390_v6, %v8264_v2  ;;  %v398_v14 = vmul.f32 %v397_v13, %v8266_v3 }
  0xd2   : > { %s7174_s30 = sld [smem:[#allocation11 + $0x180]]  ;;  %s8260_s21 = sld [smem:[#allocation11 + $0x1]]  ;;  %v8280_v9 = vld [vmem:[#allocation7 + $0x30] sm:$0xff]  ;;  %v8282_v10 = vld [vmem:[#allocation7 + $0x38] sm:$0xff]  ;;  %v399_v15 = vmul.f32 %v397_v13, %v8270_v4 }
  0xd3   : > { %s8268_s24 = sld [smem:[#allocation11 + $0x81]]  ;;  %s8291_s22 = sld [smem:[#allocation11 + $0x2]]  ;;  %v394_v16 = vadd.f32 %v393_v7, %v391_v11  ;;  %v395_v17 = vadd.f32 %v393_v7, %v392_v12 }
  0xd4   : > { %s8276_s10 = sld [smem:[#allocation11 + $0x101]]  ;;  %s8297_s20 = sld [smem:[#allocation12 + $0x2]] }
  0xd5   : > { %s8287_s23 = sld [smem:[#allocation11 + $0x181]]  ;;  %s8299_s13 = sld [smem:[#allocation11 + $0x82]]  ;;  %v400_v24 = vadd.f32 %v398_v14, %v394_v16  ;;  %v401_v25 = vadd.f32 %v399_v15, %v395_v17 }
  0xd6   : > { %s8307_s27 = sld [smem:[#allocation11 + $0x102]]  ;;  %s8317_s19 = sld [smem:[#allocation12 + $0x3]] }
  0xd7   : > { %v403_v18 = vstv %s7173_s17  ;;  %v430_v27 = vstv %s8258_s26  ;;  %s8311_s14 = sld [smem:[#allocation11 + $0x182]]  ;;  %s8319_s11 = sld [smem:[#allocation11 + $0x3]] }
  0xd8   : > { %v409_v19 = vstv %s7174_s30  ;;  %v404_v20 = vmul.f32 %v403_v18, %v8272_v5  ;;  %v405_v21 = vmul.f32 %v403_v18, %v8278_v8  ;;  %v427_v26 = vstv %s8260_s21  ;;  %s8323_s25 = sld [smem:[#allocation11 + $0x83]]  ;;  %s8336_s30 = sld [smem:[#allocation12 + $0x4]] }
  0xd9   : > { %v410_v22 = vmul.f32 %v409_v19, %v8280_v9  ;;  %v411_v23 = vmul.f32 %v409_v19, %v8282_v10  ;;  %v428_v28 = vmul.f32 %v427_v26, %v8262_v1  ;;  %v429_v29 = vmul.f32 %v427_v26, %v8264_v2  ;;  %s8327_s12 = sld [smem:[#allocation11 + $0x103]]  ;;  %s8341_s26 = sld [smem:[#allocation11 + $0x4]] }
  0xda   : > { %v434_v30 = vstv %s8268_s24  ;;  %v440_v31 = vstv %s8276_s10  ;;  %v406_v32 = vadd.f32 %v404_v20, %v400_v24  ;;  %v407_v33 = vadd.f32 %v405_v21, %v401_v25  ;;  %s8329_s17 = sld [smem:[#allocation11 + $0x183]]  ;;  %s8343_s21 = sld [smem:[#allocation11 + $0x84]] }
  0xdb   : > { %v435_v34 = vmul.f32 %v434_v30, %v8266_v3  ;;  %v436_v35 = vmul.f32 %v434_v30, %v8270_v4  ;;  %v431_v36 = vadd.f32 %v430_v27, %v428_v28  ;;  %v432_v37 = vadd.f32 %v430_v27, %v429_v29  ;;  %s8349_s24 = sld [smem:[#allocation11 + $0x104]] }
  0xdc   : > { %v441_v38 = vmul.f32 %v440_v31, %v8272_v5  ;;  %v442_v39 = vmul.f32 %v440_v31, %v8278_v8  ;;  %v412_v40 = vadd.f32 %v410_v22, %v406_v32  ;;  %v413_v41 = vadd.f32 %v411_v23, %v407_v33  ;;  %s8356_s10 = sld [smem:[#allocation11 + $0x184]] }
  0xdd   : > { %v446_v42 = vstv %s8287_s23  ;;  %v464_v43 = vstv %s8291_s22  ;;  %v437_v44 = vadd.f32 %v435_v34, %v431_v36  ;;  %v438_v45 = vadd.f32 %v436_v35, %v432_v37  ;;  %s8358_s23 = sld [smem:[#allocation11 + $0x5]] }
  0xde   : > { %v447_v46 = vmul.f32 %v446_v42, %v8280_v9  ;;  %v448_v47 = vmul.f32 %v446_v42, %v8282_v10  ;;  %v414_v48 = vmax.f32 %v412_v40, 0.0  ;;  %v415_v49 = vmax.f32 %v413_v41, 0.0  ;;  %s8366_s22 = sld [smem:[#allocation12 + $0x5]] }
  0xdf   : > { %v465_v50 = vmul.f32 %v464_v43, %v8262_v1  ;;  %v466_v51 = vmul.f32 %v464_v43, %v8264_v2  ;;  %v443_v52 = vadd.f32 %v441_v38, %v437_v44  ;;  %v444_v53 = vadd.f32 %v442_v39, %v438_v45 }
  0xe0   : > { %v467_v54 = vstv %s8297_s20  ;;  %v471_v55 = vstv %s8299_s13  ;;  %v7237_v56 = vpack.c.bf16 %v415_v49, %v414_v48  ;;  %v477_v63 = vstv %s8307_s27  ;;  %s8368_s20 = sld [smem:[#allocation11 + $0x85]] }
  0xe1   : > { %v468_v57 = vadd.f32 %v467_v54, %v465_v50  ;;  %v469_v58 = vadd.f32 %v467_v54, %v466_v51  ;;  %v472_v59 = vmul.f32 %v471_v55, %v8266_v3  ;;  %v449_v60 = vadd.f32 %v447_v46, %v443_v52  ;;  %s8375_s13 = sld [smem:[#allocation11 + $0x105]] }
  0xe2   : > { %v450_v61 = vadd.f32 %v448_v47, %v444_v53  ;;  %v473_v62 = vmul.f32 %v471_v55, %v8270_v4  ;;  %424 = vst [vmem:[#allocation2] sm:$0xff] %v7237_v56  ;;  %v478_v6 = vmul.f32 %v477_v63, %v8272_v5  ;;  %v479_v7 = vmul.f32 %v477_v63, %v8278_v8  ;;  %s8380_s27 = sld [smem:[#allocation11 + $0x185]] }
  0xe3   : > { %v474_v0 = vadd.f32 %v472_v59, %v468_v57  ;;  %v483_v11 = vstv %s8311_s14  ;;  %v451_v12 = vmax.f32 %v449_v60, 0.0  ;;  %v501_v18 = vstv %s8319_s11  ;;  %s8386_s14 = sld [smem:[#allocation12 + $0x6]] }
  0xe4   : > { %v452_v13 = vmax.f32 %v450_v61, 0.0  ;;  %v475_v14 = vadd.f32 %v473_v62, %v469_v58  ;;  %v484_v15 = vmul.f32 %v483_v11, %v8280_v9  ;;  %v485_v17 = vmul.f32 %v483_v11, %v8282_v10  ;;  %s8391_s11 = sld [smem:[#allocation11 + $0x86]] }
  0xe5   : > { %v480_v16 = vadd.f32 %v478_v6, %v474_v0  ;;  %v504_v19 = vstv %s8317_s19  ;;  %v502_v22 = vmul.f32 %v501_v18, %v8262_v1  ;;  %v503_v23 = vmul.f32 %v501_v18, %v8264_v2  ;;  %s8388_s19 = sld [smem:[#allocation11 + $0x6]] }
  0xe6   : > { %v7238_v20 = vpack.c.bf16 %v452_v13, %v451_v12  ;;  %v481_v21 = vadd.f32 %v479_v7, %v475_v14  ;;  %v508_v25 = vstv %s8323_s25  ;;  %v514_v26 = vstv %s8327_s12  ;;  %s8396_s25 = sld [smem:[#allocation11 + $0x106]] }
  0xe7   : > { %v486_v24 = vadd.f32 %v484_v15, %v480_v16  ;;  %v520_v27 = vstv %s8329_s17  ;;  %v505_v29 = vadd.f32 %v504_v19, %v502_v22  ;;  %v506_v30 = vadd.f32 %v504_v19, %v503_v23  ;;  %s8398_s12 = sld [smem:[#allocation11 + $0x186]]  ;;  %s8405_s17 = sld [smem:[#allocation12 + $0x7]] }
  0xe8   : > { %461 = vst [vmem:[#allocation2 + $0x8] sm:$0xff] %v7238_v20  ;;  %v487_v28 = vadd.f32 %v485_v17, %v481_v21  ;;  %v509_v31 = vmul.f32 %v508_v25, %v8266_v3  ;;  %v510_v33 = vmul.f32 %v508_v25, %v8270_v4  ;;  %v515_v34 = vmul.f32 %v514_v26, %v8272_v5 }
  0xe9   : > { %v488_v32 = vmax.f32 %v486_v24, 0.0  ;;  %v516_v35 = vmul.f32 %v514_v26, %v8278_v8  ;;  %v521_v38 = vmul.f32 %v520_v27, %v8280_v9  ;;  %v522_v39 = vmul.f32 %v520_v27, %v8282_v10 }
  0xea   : > { %v489_v36 = vmax.f32 %v487_v28, 0.0  ;;  %v511_v37 = vadd.f32 %v509_v31, %v505_v29  ;;  %v512_v40 = vadd.f32 %v510_v33, %v506_v30  ;;  %v538_v41 = vstv %s8341_s26  ;;  %s8412_s26 = sld [smem:[#allocation11 + $0x87]] }
  0xeb   : > { %v541_v42 = vstv %s8336_s30  ;;  %v545_v43 = vstv %s8343_s21  ;;  %v539_v46 = vmul.f32 %v538_v41, %v8262_v1  ;;  %v540_v47 = vmul.f32 %v538_v41, %v8264_v2  ;;  %s8410_s30 = sld [smem:[#allocation11 + $0x7]] }
  0xec   : > { %v7239_v44 = vpack.c.bf16 %v489_v36, %v488_v32  ;;  %v517_v45 = vadd.f32 %v515_v34, %v511_v37  ;;  %v518_v48 = vadd.f32 %v516_v35, %v512_v40  ;;  %v546_v49 = vmul.f32 %v545_v43, %v8266_v3  ;;  %s8418_s21 = sld [smem:[#allocation11 + $0x107]] }
  0xed   : > { %v547_v50 = vmul.f32 %v545_v43, %v8270_v4  ;;  %v551_v51 = vstv %s8349_s24  ;;  %v542_v53 = vadd.f32 %v541_v42, %v539_v46  ;;  %v543_v54 = vadd.f32 %v541_v42, %v540_v47  ;;  %s8425_s24 = sld [smem:[#allocation11 + $0x187]] }
  0xee   : > { %498 = vst [vmem:[#allocation2 + $0x10] sm:$0xff] %v7239_v44  ;;  %v523_v52 = vadd.f32 %v521_v38, %v517_v45  ;;  %v552_v55 = vmul.f32 %v551_v51, %v8272_v5  ;;  %v524_v56 = vadd.f32 %v522_v39, %v518_v48  ;;  %v553_v57 = vmul.f32 %v551_v51, %v8278_v8 }
  0xef   : > { %v557_v58 = vstv %s8356_s10  ;;  %v576_v59 = vstv %s8358_s23  ;;  %v548_v61 = vadd.f32 %v546_v49, %v542_v53  ;;  %v549_v62 = vadd.f32 %v547_v50, %v543_v54 }
  0xf0   : > { %v525_v60 = vmax.f32 %v523_v52, 0.0  ;;  %v558_v63 = vmul.f32 %v557_v58, %v8280_v9  ;;  %v526_v0 = vmax.f32 %v524_v56, 0.0  ;;  %v559_v6 = vmul.f32 %v557_v58, %v8282_v10 }
  0xf1   : > { %v577_v7 = vmul.f32 %v576_v59, %v8262_v1  ;;  %v578_v11 = vmul.f32 %v576_v59, %v8264_v2  ;;  %v554_v12 = vadd.f32 %v552_v55, %v548_v61  ;;  %v555_v13 = vadd.f32 %v553_v57, %v549_v62 }
  0xf2   : > { %v579_v14 = vstv %s8366_s22  ;;  %v583_v15 = vstv %s8368_s20  ;;  %v7240_v16 = vpack.c.bf16 %v526_v0, %v525_v60  ;;  %v589_v23 = vstv %s8375_s13 }
  0xf3   : > { %v580_v17 = vadd.f32 %v579_v14, %v577_v7  ;;  %v581_v18 = vadd.f32 %v579_v14, %v578_v11  ;;  %v584_v19 = vmul.f32 %v583_v15, %v8266_v3  ;;  %v560_v20 = vadd.f32 %v558_v63, %v554_v12 }
  0xf4   : > { %v561_v21 = vadd.f32 %v559_v6, %v555_v13  ;;  %v585_v22 = vmul.f32 %v583_v15, %v8270_v4  ;;  %535 = vst [vmem:[#allocation2 + $0x18] sm:$0xff] %v7240_v16  ;;  %v590_v25 = vmul.f32 %v589_v23, %v8272_v5  ;;  %v591_v26 = vmul.f32 %v589_v23, %v8278_v8 }
  0xf5   : > { %v586_v24 = vadd.f32 %v584_v19, %v580_v17  ;;  %v595_v27 = vstv %s8380_s27  ;;  %v562_v28 = vmax.f32 %v560_v20, 0.0  ;;  %v613_v34 = vstv %s8388_s19 }
  0xf6   : > { %v563_v29 = vmax.f32 %v561_v21, 0.0  ;;  %v587_v30 = vadd.f32 %v585_v22, %v581_v18  ;;  %v596_v31 = vmul.f32 %v595_v27, %v8280_v9  ;;  %v597_v33 = vmul.f32 %v595_v27, %v8282_v10 }
  0xf7   : > { %v592_v32 = vadd.f32 %v590_v25, %v586_v24  ;;  %v616_v35 = vstv %s8386_s14  ;;  %v614_v38 = vmul.f32 %v613_v34, %v8262_v1  ;;  %v615_v39 = vmul.f32 %v613_v34, %v8264_v2 }
  0xf8   : > { %v7241_v36 = vpack.c.bf16 %v563_v29, %v562_v28  ;;  %v593_v37 = vadd.f32 %v591_v26, %v587_v30  ;;  %v620_v41 = vstv %s8391_s11  ;;  %v626_v42 = vstv %s8396_s25 }
  0xf9   : > { %v598_v40 = vadd.f32 %v596_v31, %v592_v32  ;;  %v632_v43 = vstv %s8398_s12  ;;  %v617_v45 = vadd.f32 %v616_v35, %v614_v38  ;;  %v618_v46 = vadd.f32 %v616_v35, %v615_v39 }
  0xfa   : > { %573 = vst [vmem:[#allocation2 + $0x20] sm:$0xff] %v7241_v36  ;;  %v599_v44 = vadd.f32 %v597_v33, %v593_v37  ;;  %v621_v47 = vmul.f32 %v620_v41, %v8266_v3  ;;  %v622_v49 = vmul.f32 %v620_v41, %v8270_v4  ;;  %v627_v50 = vmul.f32 %v626_v42, %v8272_v5 }
  0xfb   : > { %v600_v48 = vmax.f32 %v598_v40, 0.0  ;;  %v628_v51 = vmul.f32 %v626_v42, %v8278_v8  ;;  %v633_v54 = vmul.f32 %v632_v43, %v8280_v9  ;;  %v634_v55 = vmul.f32 %v632_v43, %v8282_v10 }
  0xfc   : > { %v601_v52 = vmax.f32 %v599_v44, 0.0  ;;  %v623_v53 = vadd.f32 %v621_v47, %v617_v45  ;;  %v624_v56 = vadd.f32 %v622_v49, %v618_v46  ;;  %v650_v57 = vstv %s8410_s30 }
  0xfd   : > { %v653_v58 = vstv %s8405_s17  ;;  %v657_v59 = vstv %s8412_s26  ;;  %v651_v62 = vmul.f32 %v650_v57, %v8262_v1  ;;  %v652_v63 = vmul.f32 %v650_v57, %v8264_v2 }
  0xfe   : > { %v7242_v60 = vpack.c.bf16 %v601_v52, %v600_v48  ;;  %v629_v61 = vadd.f32 %v627_v50, %v623_v53  ;;  %v630_v0 = vadd.f32 %v628_v51, %v624_v56  ;;  %v658_v6 = vmul.f32 %v657_v59, %v8266_v3 }
  0xff   : > { %v659_v7 = vmul.f32 %v657_v59, %v8270_v4  ;;  %v663_v11 = vstv %s8418_s21  ;;  %v654_v13 = vadd.f32 %v653_v58, %v651_v62  ;;  %v655_v14 = vadd.f32 %v653_v58, %v652_v63 }
 0x100   : > { %610 = vst [vmem:[#allocation2 + $0x28] sm:$0xff] %v7242_v60  ;;  %v635_v12 = vadd.f32 %v633_v54, %v629_v61  ;;  %v664_v15 = vmul.f32 %v663_v11, %v8272_v5  ;;  %v636_v16 = vadd.f32 %v634_v55, %v630_v0  ;;  %v665_v17 = vmul.f32 %v663_v11, %v8278_v8 }
 0x101   : > { %v669_v18 = vstv %s8425_s24  ;;  %v660_v1 = vadd.f32 %v658_v6, %v654_v13  ;;  %v661_v20 = vadd.f32 %v659_v7, %v655_v14 }
 0x102   : > { %v637_v19 = vmax.f32 %v635_v12, 0.0  ;;  %v670_v2 = vmul.f32 %v669_v18, %v8280_v9  ;;  %v638_v21 = vmax.f32 %v636_v16, 0.0  ;;  %v671_v3 = vmul.f32 %v669_v18, %v8282_v10 }
 0x103   : > { %v666_v4 = vadd.f32 %v664_v15, %v660_v1  ;;  %v667_v22 = vadd.f32 %v665_v17, %v661_v20 }
 0x104   : > { %v7243_v23 = vpack.c.bf16 %v638_v21, %v637_v19 }
 0x105   : > { %v672_v24 = vadd.f32 %v670_v2, %v666_v4  ;;  %v673_v25 = vadd.f32 %v671_v3, %v667_v22 }
 0x106   : > { %647 = vst [vmem:[#allocation2 + $0x30] sm:$0xff] %v7243_v23 }
 0x107   : > { %v674_v26 = vmax.f32 %v672_v24, 0.0  ;;  %v675_v5 = vmax.f32 %v673_v25, 0.0 }
 0x109   : > { %v7244_v27 = vpack.c.bf16 %v675_v5, %v674_v26 }
 0x10b   : > { %684 = vst [vmem:[#allocation2 + $0x38] sm:$0xff] %v7244_v27 }
 0x10c PF: > { %v727_v8 = vld [vmem:[%s8221_s18 + $0x8] sm:$0xff]  ;;  %v726_v10 = vld [vmem:[%s8221_s18] sm:$0xff]  ;;  %v744_v35 = vld [vmem:[%s8221_s18 + $0x90] sm:$0xff]  ;;  %s7245_s10 = sshll.u32 %s8026_s9, 5  ;;  %p7228_p7 = scmp.ne.s32.totalorder %s8026_s9, 1 }
 0x10d   : > { %v863_v9 = vld [vmem:[%s8221_s18 + $0x448] sm:$0xff]  ;;  %v1271_v28 = vunpack.c.l.s8.bf16 %v727_v8  ;;  %v1288_v29 = vunpack.c.h.s8.bf16 %v727_v8  ;;  %v862_v32 = vld [vmem:[%s8221_s18 + $0x440] sm:$0xff]  ;;  %v1270_v33 = vunpack.c.l.s8.bf16 %v726_v10  ;;  %v880_v36 = vld [vmem:[%s8221_s18 + $0x4d0] sm:$0xff]  ;;  %v1287_v37 = vunpack.c.h.s8.bf16 %v726_v10  ;;  %s8459_s23 = scalar_lea.vmem [#allocation2], %s7245_s10 }
 0x10e   : > { %v1543_v30 = vunpack.c.l.s8.bf16 %v863_v9  ;;  %v1560_v31 = vunpack.c.h.s8.bf16 %v863_v9  ;;  %v1542_v34 = vunpack.c.l.s8.bf16 %v862_v32  ;;  %v1559_v38 = vunpack.c.h.s8.bf16 %v862_v32  ;;  %v743_v41 = vld [vmem:[%s8221_s18 + $0x88] sm:$0xff]  ;;  %v761_v47 = vld [vmem:[%s8221_s18 + $0x118] sm:$0xff]  ;;  %v760_v53 = vld [vmem:[%s8221_s18 + $0x110] sm:$0xff] }
 0x10f   : > { %2386 = vmatprep.subr.bf16.mxu0 %v1271_v28  ;;  %v1305_v39 = vunpack.c.l.s8.bf16 %v744_v35  ;;  %v1577_v40 = vunpack.c.l.s8.bf16 %v880_v36  ;;  %v879_v42 = vld [vmem:[%s8221_s18 + $0x4c8] sm:$0xff]  ;;  %v1304_v43 = vunpack.c.l.s8.bf16 %v743_v41  ;;  %v1322_v45 = vunpack.c.h.s8.bf16 %v744_v35  ;;  %v897_v48 = vld [vmem:[%s8221_s18 + $0x558] sm:$0xff]  ;;  %v896_v54 = vld [vmem:[%s8221_s18 + $0x550] sm:$0xff] }
 0x110   : > { %2427 = vmatprep.subr.bf16.mxu1 %v1543_v30  ;;  %2387 = vmatpush1.bf16.msra.mxu0 %v1270_v33  ;;  %v1576_v44 = vunpack.c.l.s8.bf16 %v879_v42  ;;  %v1594_v46 = vunpack.c.h.s8.bf16 %v880_v36  ;;  %v1321_v49 = vunpack.c.h.s8.bf16 %v743_v41  ;;  %v1593_v50 = vunpack.c.h.s8.bf16 %v879_v42  ;;  %v778_v63 = vld [vmem:[%s8221_s18 + $0x1a0] sm:$0xff]  ;;  %v777_v13 = vld [vmem:[%s8221_s18 + $0x198] sm:$0xff]  ;;  %v795_v19 = vld [vmem:[%s8221_s18 + $0x228] sm:$0xff] }
 0x111   : > { %2428 = vmatpush1.bf16.msra.mxu1 %v1542_v34  ;;  %2388 = vmatprep.subr.bf16.mxu0 %v1288_v29  ;;  %v1339_v51 = vunpack.c.l.s8.bf16 %v761_v47  ;;  %v1611_v52 = vunpack.c.l.s8.bf16 %v897_v48  ;;  %v1338_v57 = vunpack.c.l.s8.bf16 %v760_v53  ;;  %v1610_v58 = vunpack.c.l.s8.bf16 %v896_v54  ;;  %v914_v0 = vld [vmem:[%s8221_s18 + $0x5e0] sm:$0xff]  ;;  %v913_v14 = vld [vmem:[%s8221_s18 + $0x5d8] sm:$0xff]  ;;  %v931_v1 = vld [vmem:[%s8221_s18 + $0x668] sm:$0xff] }
 0x112   : > { %2429 = vmatprep.subr.bf16.mxu1 %v1560_v31  ;;  %v8462_v55 = vld [vmem:[%s8459_s23] sm:$0xff]  ;;  %v8465_v56 = vld [vmem:[%s8459_s23 + $0x8] sm:$0xff]  ;;  %v1356_v59 = vunpack.c.h.s8.bf16 %v761_v47  ;;  %v1628_v60 = vunpack.c.h.s8.bf16 %v897_v48  ;;  %v1355_v6 = vunpack.c.h.s8.bf16 %v760_v53  ;;  %v1627_v7 = vunpack.c.h.s8.bf16 %v896_v54  ;;  %v812_v5 = vld [vmem:[%s8221_s18 + $0x2b0] sm:$0xff] }
 0x113   : > { %v8469_v61 = vcombine.high %v8462_v55, %v8462_v55  ;;  %v8473_v62 = vcombine.high %v8465_v56, %v8465_v56  ;;  %v1373_v11 = vunpack.c.l.s8.bf16 %v778_v63  ;;  %v1645_v12 = vunpack.c.l.s8.bf16 %v914_v0  ;;  %v794_v4 = vld [vmem:[%s8221_s18 + $0x220] sm:$0xff]  ;;  %v948_v27 = vld [vmem:[%s8221_s18 + $0x6f0] sm:$0xff]  ;;  %v811_v29 = vld [vmem:[%s8221_s18 + $0x2a8] sm:$0xff] }
 0x114   : > { %2389 = vmatpush1.bf16.msra.mxu0 %v1287_v37  ;;  %v1372_v15 = vunpack.c.l.s8.bf16 %v777_v13  ;;  %v1644_v16 = vunpack.c.l.s8.bf16 %v913_v14  ;;  %v1390_v17 = vunpack.c.h.s8.bf16 %v778_v63  ;;  %v1662_v18 = vunpack.c.h.s8.bf16 %v914_v0  ;;  %v930_v22 = vld [vmem:[%s8221_s18 + $0x660] sm:$0xff]  ;;  %v947_v30 = vld [vmem:[%s8221_s18 + $0x6e8] sm:$0xff]  ;;  %v829_v35 = vld [vmem:[%s8221_s18 + $0x338] sm:$0xff] }
 0x115   : > { %2430 = vmatpush1.bf16.msra.mxu1 %v1559_v38  ;;  %2390 = vmatprep.subr.bf16.mxu0 %v1305_v39  ;;  %v1389_v20 = vunpack.c.h.s8.bf16 %v777_v13  ;;  %v1661_v2 = vunpack.c.h.s8.bf16 %v913_v14  ;;  %v1407_v21 = vunpack.c.l.s8.bf16 %v795_v19  ;;  %v1679_v3 = vunpack.c.l.s8.bf16 %v931_v1  ;;  %v965_v36 = vld [vmem:[%s8221_s18 + $0x778] sm:$0xff]  ;;  %v828_v41 = vld [vmem:[%s8221_s18 + $0x330] sm:$0xff]  ;;  %v846_v47 = vld [vmem:[%s8221_s18 + $0x3c0] sm:$0xff] }
 0x116   : > { %2431 = vmatprep.subr.bf16.mxu1 %v1577_v40  ;;  %2418 = vmatprep.mubr.bf16.mxu0 %v8469_v61  ;;  %v1406_v23 = vunpack.c.l.s8.bf16 %v794_v4  ;;  %v1678_v24 = vunpack.c.l.s8.bf16 %v930_v22  ;;  %v1424_v25 = vunpack.c.h.s8.bf16 %v795_v19  ;;  %v1696_v26 = vunpack.c.h.s8.bf16 %v931_v1  ;;  %v964_v42 = vld [vmem:[%s8221_s18 + $0x770] sm:$0xff]  ;;  %v982_v48 = vld [vmem:[%s8221_s18 + $0x800] sm:$0xff]  ;;  %v845_v53 = vld [vmem:[%s8221_s18 + $0x3b8] sm:$0xff] }
 0x117   : > { %2459 = vmatprep.mubr.bf16.mxu1 %v8473_v62  ;;  %v1423_v8 = vunpack.c.h.s8.bf16 %v794_v4  ;;  %v1695_v9 = vunpack.c.h.s8.bf16 %v930_v22  ;;  %v1441_v10 = vunpack.c.l.s8.bf16 %v812_v5  ;;  %v1713_v28 = vunpack.c.l.s8.bf16 %v948_v27  ;;  %v981_v54 = vld [vmem:[%s8221_s18 + $0x7f8] sm:$0xff]  ;;  %v999_v63 = vld [vmem:[%s8221_s18 + $0x888] sm:$0xff]  ;;  %v998_v13 = vld [vmem:[%s8221_s18 + $0x880] sm:$0xff] }
 0x118   : > { %2391 = vmatpush1.bf16.msra.mxu0 %v1304_v43  ;;  %v1440_v31 = vunpack.c.l.s8.bf16 %v811_v29  ;;  %v1712_v32 = vunpack.c.l.s8.bf16 %v947_v30  ;;  %v1458_v33 = vunpack.c.h.s8.bf16 %v812_v5  ;;  %v1730_v34 = vunpack.c.h.s8.bf16 %v948_v27  ;;  %v1135_v0 = vld [vmem:[%s8221_s18 + $0xcc8] sm:$0xff]  ;;  %v1134_v14 = vld [vmem:[%s8221_s18 + $0xcc0] sm:$0xff] }
 0x119   : > { %2432 = vmatpush1.bf16.msra.mxu1 %v1576_v44  ;;  %2392 = vmatprep.subr.bf16.mxu0 %v1322_v45  ;;  %v1457_v37 = vunpack.c.h.s8.bf16 %v811_v29  ;;  %v1729_v38 = vunpack.c.h.s8.bf16 %v947_v30  ;;  %v1475_v39 = vunpack.c.l.s8.bf16 %v829_v35  ;;  %v1747_v40 = vunpack.c.l.s8.bf16 %v965_v36 }
 0x11a   : > { %2433 = vmatprep.subr.bf16.mxu1 %v1594_v46  ;;  %v1474_v43 = vunpack.c.l.s8.bf16 %v828_v41  ;;  %v1746_v44 = vunpack.c.l.s8.bf16 %v964_v42  ;;  %v1492_v45 = vunpack.c.h.s8.bf16 %v829_v35  ;;  %v1764_v46 = vunpack.c.h.s8.bf16 %v965_v36 }
 0x11b   : > { %v1814_v19 = vunpack.c.l.s8.bf16 %v998_v13  ;;  %v2086_v1 = vunpack.c.l.s8.bf16 %v1134_v14  ;;  %v1831_v4 = vunpack.c.h.s8.bf16 %v998_v13  ;;  %v2103_v22 = vunpack.c.h.s8.bf16 %v1134_v14 }
 0x11c   : > { %2393 = vmatpush1.bf16.msra.mxu0 %v1321_v49  ;;  %v1491_v49 = vunpack.c.h.s8.bf16 %v828_v41 }
 0x11d   : > { %2434 = vmatpush1.bf16.msra.mxu1 %v1593_v50  ;;  %2394 = vmatprep.subr.bf16.mxu0 %v1339_v51  ;;  %v1763_v50 = vunpack.c.h.s8.bf16 %v964_v42  ;;  %v1509_v51 = vunpack.c.l.s8.bf16 %v846_v47 }
 0x11e   : > { %2435 = vmatprep.subr.bf16.mxu1 %v1611_v52  ;;  %v1781_v52 = vunpack.c.l.s8.bf16 %v982_v48 }
 0x120   : > { %2395 = vmatpush1.bf16.msra.mxu0 %v1338_v57  ;;  %v1508_v57 = vunpack.c.l.s8.bf16 %v845_v53 }
 0x121   : > { %2436 = vmatpush1.bf16.msra.mxu1 %v1610_v58  ;;  %2396 = vmatprep.subr.bf16.mxu0 %v1356_v59  ;;  %v1780_v58 = vunpack.c.l.s8.bf16 %v981_v54  ;;  %v1526_v59 = vunpack.c.h.s8.bf16 %v846_v47 }
 0x122   : > { %2437 = vmatprep.subr.bf16.mxu1 %v1628_v60  ;;  %v1798_v60 = vunpack.c.h.s8.bf16 %v982_v48 }
 0x124   : > { %2397 = vmatpush1.bf16.msra.mxu0 %v1355_v6  ;;  %v1525_v6 = vunpack.c.h.s8.bf16 %v845_v53 }
 0x125   : > { %2438 = vmatpush1.bf16.msra.mxu1 %v1627_v7  ;;  %2398 = vmatprep.subr.bf16.mxu0 %v1373_v11  ;;  %v1797_v7 = vunpack.c.h.s8.bf16 %v981_v54  ;;  %v1815_v11 = vunpack.c.l.s8.bf16 %v999_v63 }
 0x126   : > { %2439 = vmatprep.subr.bf16.mxu1 %v1645_v12  ;;  %v2087_v12 = vunpack.c.l.s8.bf16 %v1135_v0 }
 0x128   : > { %2399 = vmatpush1.bf16.msra.mxu0 %v1372_v15  ;;  %v8503_v15 = vcombine.low %v8462_v55, %v8462_v55  ;;  %v1016_v55 = vld [vmem:[%s8221_s18 + $0x910] sm:$0xff] }
 0x129   : > { %2440 = vmatpush1.bf16.msra.mxu1 %v1644_v16  ;;  %2400 = vmatprep.subr.bf16.mxu0 %v1390_v17  ;;  %v8507_v16 = vcombine.low %v8465_v56, %v8465_v56  ;;  %v8510_v17 = vld [vmem:[%s8459_s23 + $0x10] sm:$0xff] }
 0x12a   : > { %2441 = vmatprep.subr.bf16.mxu1 %v1662_v18  ;;  %v8513_v18 = vld [vmem:[%s8459_s23 + $0x18] sm:$0xff]  ;;  %v8519_v56 = vcombine.high %v8510_v17, %v8510_v17 }
 0x12c   : > { %2401 = vmatpush1.bf16.msra.mxu0 %v1389_v20  ;;  %v1832_v20 = vunpack.c.h.s8.bf16 %v999_v63 }
 0x12d   : > { %2442 = vmatpush1.bf16.msra.mxu1 %v1661_v2  ;;  %2402 = vmatprep.subr.bf16.mxu0 %v1407_v21  ;;  %v2104_v2 = vunpack.c.h.s8.bf16 %v1135_v0  ;;  %v1152_v21 = vld [vmem:[%s8221_s18 + $0xd50] sm:$0xff] }
 0x12e   : > { %2443 = vmatprep.subr.bf16.mxu1 %v1679_v3  ;;  %v8523_v3 = vcombine.high %v8513_v18, %v8513_v18 }
 0x130   : > { %2403 = vmatpush1.bf16.msra.mxu0 %v1406_v23  ;;  %v1849_v23 = vunpack.c.l.s8.bf16 %v1016_v55 }
 0x131   : > { %2444 = vmatpush1.bf16.msra.mxu1 %v1678_v24  ;;  %2404 = vmatprep.subr.bf16.mxu0 %v1424_v25  ;;  %v2121_v24 = vunpack.c.l.s8.bf16 %v1152_v21  ;;  %v1015_v25 = vld [vmem:[%s8221_s18 + $0x908] sm:$0xff] }
 0x132   : > { %2445 = vmatprep.subr.bf16.mxu1 %v1696_v26  ;;  %v1151_v26 = vld [vmem:[%s8221_s18 + $0xd48] sm:$0xff]  ;;  %v1848_v5 = vunpack.c.l.s8.bf16 %v1015_v25  ;;  %v1865_v29 = vunpack.c.h.s8.bf16 %v1015_v25 }
 0x133   : > { %v2120_v27 = vunpack.c.l.s8.bf16 %v1151_v26  ;;  %v2137_v30 = vunpack.c.h.s8.bf16 %v1151_v26 }
 0x134   : > { %2405 = vmatpush1.bf16.msra.mxu0 %v1423_v8  ;;  %v1866_v8 = vunpack.c.h.s8.bf16 %v1016_v55 }
 0x135   : > { %2446 = vmatpush1.bf16.msra.mxu1 %v1695_v9  ;;  %2406 = vmatprep.subr.bf16.mxu0 %v1441_v10  ;;  %v2138_v9 = vunpack.c.h.s8.bf16 %v1152_v21  ;;  %v1033_v10 = vld [vmem:[%s8221_s18 + $0x998] sm:$0xff] }
 0x136   : > { %2447 = vmatprep.subr.bf16.mxu1 %v1713_v28  ;;  %v1169_v28 = vld [vmem:[%s8221_s18 + $0xdd8] sm:$0xff] }
 0x138   : > { %2407 = vmatpush1.bf16.msra.mxu0 %v1440_v31  ;;  %v1883_v31 = vunpack.c.l.s8.bf16 %v1033_v10 }
 0x139   : > { %2448 = vmatpush1.bf16.msra.mxu1 %v1712_v32  ;;  %2408 = vmatprep.subr.bf16.mxu0 %v1458_v33  ;;  %v2155_v32 = vunpack.c.l.s8.bf16 %v1169_v28  ;;  %v1032_v33 = vld [vmem:[%s8221_s18 + $0x990] sm:$0xff] }
 0x13a   : > { %2449 = vmatprep.subr.bf16.mxu1 %v1730_v34  ;;  %v1168_v34 = vld [vmem:[%s8221_s18 + $0xdd0] sm:$0xff]  ;;  %v1882_v35 = vunpack.c.l.s8.bf16 %v1032_v33  ;;  %v1899_v41 = vunpack.c.h.s8.bf16 %v1032_v33 }
 0x13b   : > { %v2154_v36 = vunpack.c.l.s8.bf16 %v1168_v34  ;;  %v2171_v42 = vunpack.c.h.s8.bf16 %v1168_v34 }
 0x13c   : > { %2409 = vmatpush1.bf16.msra.mxu0 %v1457_v37  ;;  %v1900_v37 = vunpack.c.h.s8.bf16 %v1033_v10 }
 0x13d   : > { %2450 = vmatpush1.bf16.msra.mxu1 %v1729_v38  ;;  %2410 = vmatprep.subr.bf16.mxu0 %v1475_v39  ;;  %v2172_v38 = vunpack.c.h.s8.bf16 %v1169_v28  ;;  %v1050_v39 = vld [vmem:[%s8221_s18 + $0xa20] sm:$0xff] }
 0x13e   : > { %2451 = vmatprep.subr.bf16.mxu1 %v1747_v40  ;;  %v1186_v40 = vld [vmem:[%s8221_s18 + $0xe60] sm:$0xff] }
 0x140   : > { %2411 = vmatpush1.bf16.msra.mxu0 %v1474_v43  ;;  %v1917_v43 = vunpack.c.l.s8.bf16 %v1050_v39 }
 0x141   : > { %2452 = vmatpush1.bf16.msra.mxu1 %v1746_v44  ;;  %2412 = vmatprep.subr.bf16.mxu0 %v1492_v45  ;;  %v2189_v44 = vunpack.c.l.s8.bf16 %v1186_v40  ;;  %v1049_v45 = vld [vmem:[%s8221_s18 + $0xa18] sm:$0xff] }
 0x142   : > { %2453 = vmatprep.subr.bf16.mxu1 %v1764_v46  ;;  %v1185_v46 = vld [vmem:[%s8221_s18 + $0xe58] sm:$0xff]  ;;  %v1916_v47 = vunpack.c.l.s8.bf16 %v1049_v45  ;;  %v1933_v53 = vunpack.c.h.s8.bf16 %v1049_v45 }
 0x143   : > { %v2188_v48 = vunpack.c.l.s8.bf16 %v1185_v46  ;;  %v2205_v54 = vunpack.c.h.s8.bf16 %v1185_v46 }
 0x144   : > { %2413 = vmatpush1.bf16.msra.mxu0 %v1491_v49  ;;  %v1934_v49 = vunpack.c.h.s8.bf16 %v1050_v39 }
 0x145   : > { %2454 = vmatpush1.bf16.msra.mxu1 %v1763_v50  ;;  %2414 = vmatprep.subr.bf16.mxu0 %v1509_v51  ;;  %v2206_v50 = vunpack.c.h.s8.bf16 %v1186_v40  ;;  %v1067_v51 = vld [vmem:[%s8221_s18 + $0xaa8] sm:$0xff] }
 0x146   : > { %2455 = vmatprep.subr.bf16.mxu1 %v1781_v52  ;;  %v1203_v52 = vld [vmem:[%s8221_s18 + $0xee8] sm:$0xff] }
 0x148   : > { %2415 = vmatpush1.bf16.msra.mxu0 %v1508_v57  ;;  %v1951_v57 = vunpack.c.l.s8.bf16 %v1067_v51 }
 0x149   : > { %2456 = vmatpush1.bf16.msra.mxu1 %v1780_v58  ;;  %2416 = vmatprep.subr.bf16.mxu0 %v1526_v59  ;;  %v2223_v58 = vunpack.c.l.s8.bf16 %v1203_v52  ;;  %v1066_v59 = vld [vmem:[%s8221_s18 + $0xaa0] sm:$0xff] }
 0x14a   : > { %2457 = vmatprep.subr.bf16.mxu1 %v1798_v60  ;;  %v1202_v60 = vld [vmem:[%s8221_s18 + $0xee0] sm:$0xff]  ;;  %v1950_v63 = vunpack.c.l.s8.bf16 %v1066_v59  ;;  %v1967_v13 = vunpack.c.h.s8.bf16 %v1066_v59 }
 0x14b   : > { %v2222_v0 = vunpack.c.l.s8.bf16 %v1202_v60  ;;  %v2239_v14 = vunpack.c.h.s8.bf16 %v1202_v60  ;;  %v746_v59 = vld [vmem:[%s8221_s18 + $0xa0] sm:$0xff] }
 0x14c   : > { %2417 = vmatpush1.bf16.msra.mxu0 %v1525_v6  ;;  %v1968_v6 = vunpack.c.h.s8.bf16 %v1067_v51  ;;  %v8561_v51 = vcombine.low %v8510_v17, %v8510_v17  ;;  %v882_v60 = vld [vmem:[%s8221_s18 + $0x4e0] sm:$0xff] }
 0x14d   : > { %2458 = vmatpush1.bf16.msra.mxu1 %v1797_v7  ;;  %2468 = vmatprep.subr.bf16.mxu0 %v1815_v11  ;;  %v2240_v7 = vunpack.c.h.s8.bf16 %v1203_v52  ;;  %v1084_v11 = vld [vmem:[%s8221_s18 + $0xb30] sm:$0xff]  ;;  %v8565_v52 = vcombine.low %v8513_v18, %v8513_v18 }
 0x14e   : > { %2509 = vmatprep.subr.bf16.mxu1 %v2087_v12  ;;  %v1220_v12 = vld [vmem:[%s8221_s18 + $0xf70] sm:$0xff] }
 0x14f   : > { %2419 = vmatmul.mubr.bf16.vlgmr.msra.gmra.mrb[0].mxu0 %v8503_v15 }
 0x150   : > { %2460 = vmatmul.mubr.bf16.vlgmr.msra.gmra.mrb[0].mxu1 %v8507_v16  ;;  %2469 = vmatpush1.bf16.msra.mxu0 %v1814_v19  ;;  %v1985_v19 = vunpack.c.l.s8.bf16 %v1084_v11 }
 0x151   : > { %2510 = vmatpush1.bf16.msra.mxu1 %v2086_v1  ;;  %2470 = vmatprep.subr.bf16.mxu0 %v1832_v20  ;;  %v2257_v1 = vunpack.c.l.s8.bf16 %v1220_v12  ;;  %v1083_v20 = vld [vmem:[%s8221_s18 + $0xb28] sm:$0xff] }
 0x152   : > { %2511 = vmatprep.subr.bf16.mxu1 %v2104_v2  ;;  %2500 = vmatprep.mubr.bf16.mxu0 %v8519_v56  ;;  %v1219_v2 = vld [vmem:[%s8221_s18 + $0xf68] sm:$0xff]  ;;  %v1984_v55 = vunpack.c.l.s8.bf16 %v1083_v20  ;;  %v2001_v25 = vunpack.c.h.s8.bf16 %v1083_v20 }
 0x153   : > { %2541 = vmatprep.mubr.bf16.mxu1 %v8523_v3  ;;  %v2256_v21 = vunpack.c.l.s8.bf16 %v1219_v2  ;;  %v2273_v26 = vunpack.c.h.s8.bf16 %v1219_v2 }
 0x154   : > { %2471 = vmatpush1.bf16.msra.mxu0 %v1831_v4  ;;  %v2002_v4 = vunpack.c.h.s8.bf16 %v1084_v11 }
 0x155   : > { %2512 = vmatpush1.bf16.msra.mxu1 %v2103_v22  ;;  %2472 = vmatprep.subr.bf16.mxu0 %v1849_v23  ;;  %v2274_v22 = vunpack.c.h.s8.bf16 %v1220_v12  ;;  %v1101_v23 = vld [vmem:[%s8221_s18 + $0xbb8] sm:$0xff] }
 0x156   : > { %2513 = vmatprep.subr.bf16.mxu1 %v2121_v24  ;;  %v1237_v24 = vld [vmem:[%s8221_s18 + $0xff8] sm:$0xff] }
 0x158   : > { %2473 = vmatpush1.bf16.msra.mxu0 %v1848_v5  ;;  %v2019_v5 = vunpack.c.l.s8.bf16 %v1101_v23 }
 0x159   : > { %2514 = vmatpush1.bf16.msra.mxu1 %v2120_v27  ;;  %2474 = vmatprep.subr.bf16.mxu0 %v1866_v8  ;;  %v2291_v27 = vunpack.c.l.s8.bf16 %v1237_v24  ;;  %v1100_v8 = vld [vmem:[%s8221_s18 + $0xbb0] sm:$0xff] }
 0x15a   : > { %2515 = vmatprep.subr.bf16.mxu1 %v2138_v9  ;;  %v1236_v9 = vld [vmem:[%s8221_s18 + $0xff0] sm:$0xff]  ;;  %v2018_v10 = vunpack.c.l.s8.bf16 %v1100_v8  ;;  %v2035_v33 = vunpack.c.h.s8.bf16 %v1100_v8 }
 0x15b   : > { %v2290_v28 = vunpack.c.l.s8.bf16 %v1236_v9  ;;  %v2307_v34 = vunpack.c.h.s8.bf16 %v1236_v9 }
 0x15c   : > { %2475 = vmatpush1.bf16.msra.mxu0 %v1865_v29  ;;  %v2036_v29 = vunpack.c.h.s8.bf16 %v1101_v23 }
 0x15d   : > { %2516 = vmatpush1.bf16.msra.mxu1 %v2137_v30  ;;  %2476 = vmatprep.subr.bf16.mxu0 %v1883_v31  ;;  %v2308_v30 = vunpack.c.h.s8.bf16 %v1237_v24  ;;  %v1118_v31 = vld [vmem:[%s8221_s18 + $0xc40] sm:$0xff] }
 0x15e   : > { %2517 = vmatprep.subr.bf16.mxu1 %v2155_v32  ;;  %v1254_v32 = vld [vmem:[%s8221_s18 + $0x1080] sm:$0xff] }
 0x160   : > { %2477 = vmatpush1.bf16.msra.mxu0 %v1882_v35  ;;  %v2053_v35 = vunpack.c.l.s8.bf16 %v1118_v31 }
 0x161   : > { %2518 = vmatpush1.bf16.msra.mxu1 %v2154_v36  ;;  %2478 = vmatprep.subr.bf16.mxu0 %v1900_v37  ;;  %v2325_v36 = vunpack.c.l.s8.bf16 %v1254_v32  ;;  %v1117_v37 = vld [vmem:[%s8221_s18 + $0xc38] sm:$0xff] }
 0x162   : > { %2519 = vmatprep.subr.bf16.mxu1 %v2172_v38  ;;  %v1253_v38 = vld [vmem:[%s8221_s18 + $0x1078] sm:$0xff]  ;;  %v2052_v39 = vunpack.c.l.s8.bf16 %v1117_v37  ;;  %v2069_v45 = vunpack.c.h.s8.bf16 %v1117_v37 }
 0x163   : > { %v2324_v40 = vunpack.c.l.s8.bf16 %v1253_v38  ;;  %v2341_v46 = vunpack.c.h.s8.bf16 %v1253_v38 }
 0x164   : > { %2479 = vmatpush1.bf16.msra.mxu0 %v1899_v41  ;;  %v2070_v41 = vunpack.c.h.s8.bf16 %v1118_v31 }
 0x165   : > { %2520 = vmatpush1.bf16.msra.mxu1 %v2171_v42  ;;  %2480 = vmatprep.subr.bf16.mxu0 %v1917_v43  ;;  %v2342_v42 = vunpack.c.h.s8.bf16 %v1254_v32  ;;  %v729_v43 = vld [vmem:[%s8221_s18 + $0x18] sm:$0xff] }
 0x166   : > { %2521 = vmatprep.subr.bf16.mxu1 %v2189_v44  ;;  %v865_v44 = vld [vmem:[%s8221_s18 + $0x458] sm:$0xff] }
 0x168   : > { %2481 = vmatpush1.bf16.msra.mxu0 %v1916_v47  ;;  %v1273_v47 = vunpack.c.l.s8.bf16 %v729_v43 }
 0x169   : > { %2522 = vmatpush1.bf16.msra.mxu1 %v2188_v48  ;;  %2482 = vmatprep.subr.bf16.mxu0 %v1934_v49  ;;  %v1545_v48 = vunpack.c.l.s8.bf16 %v865_v44  ;;  %v728_v49 = vld [vmem:[%s8221_s18 + $0x10] sm:$0xff] }
 0x16a   : > { %2523 = vmatprep.subr.bf16.mxu1 %v2206_v50  ;;  %v864_v50 = vld [vmem:[%s8221_s18 + $0x450] sm:$0xff]  ;;  %v1289_v17 = vunpack.c.h.s8.bf16 %v728_v49 }
 0x16b   : > { %v1561_v18 = vunpack.c.h.s8.bf16 %v864_v50 }
 0x16c   : > { %2483 = vmatpush1.bf16.msra.mxu0 %v1933_v53  ;;  %v1272_v53 = vunpack.c.l.s8.bf16 %v728_v49 }
 0x16d   : > { %2524 = vmatpush1.bf16.msra.mxu1 %v2205_v54  ;;  %2484 = vmatprep.subr.bf16.mxu0 %v1951_v57  ;;  %v1544_v54 = vunpack.c.l.s8.bf16 %v864_v50  ;;  %v1290_v57 = vunpack.c.h.s8.bf16 %v729_v43 }
 0x16e   : > { %2525 = vmatprep.subr.bf16.mxu1 %v2223_v58  ;;  %v1562_v58 = vunpack.c.h.s8.bf16 %v865_v44 }
 0x170   : > { %2485 = vmatpush1.bf16.msra.mxu0 %v1950_v63  ;;  %v1307_v63 = vunpack.c.l.s8.bf16 %v746_v59 }
 0x171   : > { %2526 = vmatpush1.bf16.msra.mxu1 %v2222_v0  ;;  %2486 = vmatprep.subr.bf16.mxu0 %v1968_v6  ;;  %v1579_v0 = vunpack.c.l.s8.bf16 %v882_v60  ;;  %v745_v6 = vld [vmem:[%s8221_s18 + $0x98] sm:$0xff] }
 0x172   : > { %2527 = vmatprep.subr.bf16.mxu1 %v2240_v7  ;;  %v881_v7 = vld [vmem:[%s8221_s18 + $0x4d8] sm:$0xff]  ;;  %v1306_v11 = vunpack.c.l.s8.bf16 %v745_v6  ;;  %v1323_v20 = vunpack.c.h.s8.bf16 %v745_v6 }
 0x173   : > { %v1578_v12 = vunpack.c.l.s8.bf16 %v881_v7  ;;  %v1595_v2 = vunpack.c.h.s8.bf16 %v881_v7 }
 0x174   : > { %2487 = vmatpush1.bf16.msra.mxu0 %v1967_v13  ;;  %v1324_v13 = vunpack.c.h.s8.bf16 %v746_v59 }
 0x175   : > { %2528 = vmatpush1.bf16.msra.mxu1 %v2239_v14  ;;  %2488 = vmatprep.subr.bf16.mxu0 %v1985_v19  ;;  %v1596_v14 = vunpack.c.h.s8.bf16 %v882_v60  ;;  %v763_v19 = vld [vmem:[%s8221_s18 + $0x128] sm:$0xff] }
 0x176   : > { %2529 = vmatprep.subr.bf16.mxu1 %v2257_v1  ;;  %v899_v1 = vld [vmem:[%s8221_s18 + $0x568] sm:$0xff] }
 0x178   : > { %2489 = vmatpush1.bf16.msra.mxu0 %v1984_v55  ;;  %v1341_v55 = vunpack.c.l.s8.bf16 %v763_v19 }
 0x179   : > { %2530 = vmatpush1.bf16.msra.mxu1 %v2256_v21  ;;  %2490 = vmatprep.subr.bf16.mxu0 %v2002_v4  ;;  %v1613_v21 = vunpack.c.l.s8.bf16 %v899_v1  ;;  %v762_v4 = vld [vmem:[%s8221_s18 + $0x120] sm:$0xff] }
 0x17a   : > { %2531 = vmatprep.subr.bf16.mxu1 %v2274_v22  ;;  %v898_v22 = vld [vmem:[%s8221_s18 + $0x560] sm:$0xff]  ;;  %v1340_v23 = vunpack.c.l.s8.bf16 %v762_v4  ;;  %v1357_v8 = vunpack.c.h.s8.bf16 %v762_v4 }
 0x17b   : > { %v1612_v24 = vunpack.c.l.s8.bf16 %v898_v22  ;;  %v1629_v9 = vunpack.c.h.s8.bf16 %v898_v22 }
 0x17c   : > { %2491 = vmatpush1.bf16.msra.mxu0 %v2001_v25  ;;  %v1358_v25 = vunpack.c.h.s8.bf16 %v763_v19 }
 0x17d   : > { %2532 = vmatpush1.bf16.msra.mxu1 %v2273_v26  ;;  %2492 = vmatprep.subr.bf16.mxu0 %v2019_v5  ;;  %v1630_v26 = vunpack.c.h.s8.bf16 %v899_v1  ;;  %v780_v5 = vld [vmem:[%s8221_s18 + $0x1b0] sm:$0xff] }
 0x17e   : > { %2533 = vmatprep.subr.bf16.mxu1 %v2291_v27  ;;  %v916_v27 = vld [vmem:[%s8221_s18 + $0x5f0] sm:$0xff] }
 0x180   : > { %2493 = vmatpush1.bf16.msra.mxu0 %v2018_v10  ;;  %v1375_v10 = vunpack.c.l.s8.bf16 %v780_v5 }
 0x181   : > { %2534 = vmatpush1.bf16.msra.mxu1 %v2290_v28  ;;  %2494 = vmatprep.subr.bf16.mxu0 %v2036_v29  ;;  %v1647_v28 = vunpack.c.l.s8.bf16 %v916_v27  ;;  %v779_v29 = vld [vmem:[%s8221_s18 + $0x1a8] sm:$0xff] }
 0x182   : > { %2535 = vmatprep.subr.bf16.mxu1 %v2308_v30  ;;  %v915_v30 = vld [vmem:[%s8221_s18 + $0x5e8] sm:$0xff]  ;;  %v1374_v31 = vunpack.c.l.s8.bf16 %v779_v29  ;;  %v1391_v37 = vunpack.c.h.s8.bf16 %v779_v29 }
 0x183   : > { %v1646_v32 = vunpack.c.l.s8.bf16 %v915_v30  ;;  %v1663_v38 = vunpack.c.h.s8.bf16 %v915_v30 }
 0x184   : > { %2495 = vmatpush1.bf16.msra.mxu0 %v2035_v33  ;;  %v1392_v33 = vunpack.c.h.s8.bf16 %v780_v5 }
 0x185   : > { %2536 = vmatpush1.bf16.msra.mxu1 %v2307_v34  ;;  %2496 = vmatprep.subr.bf16.mxu0 %v2053_v35  ;;  %v1664_v34 = vunpack.c.h.s8.bf16 %v916_v27  ;;  %v797_v35 = vld [vmem:[%s8221_s18 + $0x238] sm:$0xff] }
 0x186   : > { %2537 = vmatprep.subr.bf16.mxu1 %v2325_v36  ;;  %v933_v36 = vld [vmem:[%s8221_s18 + $0x678] sm:$0xff] }
 0x188   : > { %2497 = vmatpush1.bf16.msra.mxu0 %v2052_v39  ;;  %v1409_v39 = vunpack.c.l.s8.bf16 %v797_v35 }
 0x189   : > { %2538 = vmatpush1.bf16.msra.mxu1 %v2324_v40  ;;  %2498 = vmatprep.subr.bf16.mxu0 %v2070_v41  ;;  %v1681_v40 = vunpack.c.l.s8.bf16 %v933_v36  ;;  %v796_v41 = vld [vmem:[%s8221_s18 + $0x230] sm:$0xff] }
 0x18a   : > { %2539 = vmatprep.subr.bf16.mxu1 %v2342_v42  ;;  %v932_v42 = vld [vmem:[%s8221_s18 + $0x670] sm:$0xff]  ;;  %v1408_v43 = vunpack.c.l.s8.bf16 %v796_v41  ;;  %v1425_v49 = vunpack.c.h.s8.bf16 %v796_v41 }
 0x18b   : > { %v1680_v44 = vunpack.c.l.s8.bf16 %v932_v42  ;;  %v1697_v50 = vunpack.c.h.s8.bf16 %v932_v42 }
 0x18c   : > { %2499 = vmatpush1.bf16.msra.mxu0 %v2069_v45  ;;  %v1426_v45 = vunpack.c.h.s8.bf16 %v797_v35 }
 0x18d   : > { %2540 = vmatpush1.bf16.msra.mxu1 %v2341_v46  ;;  %2550 = vmatprep.subr.bf16.mxu0 %v1273_v47  ;;  %v1698_v46 = vunpack.c.h.s8.bf16 %v933_v36  ;;  %v814_v47 = vld [vmem:[%s8221_s18 + $0x2c0] sm:$0xff] }
 0x18e   : > { %2591 = vmatprep.subr.bf16.mxu1 %v1545_v48  ;;  %v950_v48 = vld [vmem:[%s8221_s18 + $0x700] sm:$0xff] }
 0x18f   : > { %2501 = vmatmul.mubr.bf16.vlgmr.msra.gmra.mrb[4].mxu0 %v8561_v51 }
 0x190   : > { %2542 = vmatmul.mubr.bf16.vlgmr.msra.gmra.mrb[4].mxu1 %v8565_v52  ;;  %2551 = vmatpush1.bf16.msra.mxu0 %v1272_v53  ;;  %v1443_v53 = vunpack.c.l.s8.bf16 %v814_v47 }
 0x191   : > { %2592 = vmatpush1.bf16.msra.mxu1 %v1544_v54  ;;  %2552 = vmatprep.subr.bf16.mxu0 %v1290_v57  ;;  %v1715_v54 = vunpack.c.l.s8.bf16 %v950_v48  ;;  %v813_v57 = vld [vmem:[%s8221_s18 + $0x2b8] sm:$0xff] }
 0x192   : > { %2593 = vmatprep.subr.bf16.mxu1 %v1562_v58  ;;  %2582 = vmatprep.mubr.bf16.mxu0 %v8469_v61  ;;  %v949_v58 = vld [vmem:[%s8221_s18 + $0x6f8] sm:$0xff]  ;;  %v1442_v59 = vunpack.c.l.s8.bf16 %v813_v57  ;;  %v1459_v6 = vunpack.c.h.s8.bf16 %v813_v57 }
 0x193   : > { %2623 = vmatprep.mubr.bf16.mxu1 %v8473_v62  ;;  %v1714_v60 = vunpack.c.l.s8.bf16 %v949_v58  ;;  %v1731_v7 = vunpack.c.h.s8.bf16 %v949_v58 }
 0x194   : > { %2553 = vmatpush1.bf16.msra.mxu0 %v1289_v17  ;;  %v1460_v17 = vunpack.c.h.s8.bf16 %v814_v47 }
 0x195   : > { %2594 = vmatpush1.bf16.msra.mxu1 %v1561_v18  ;;  %2554 = vmatprep.subr.bf16.mxu0 %v1307_v63  ;;  %v1732_v18 = vunpack.c.h.s8.bf16 %v950_v48  ;;  %v831_v63 = vld [vmem:[%s8221_s18 + $0x348] sm:$0xff] }
 0x196   : > { %2595 = vmatprep.subr.bf16.mxu1 %v1579_v0  ;;  %v967_v0 = vld [vmem:[%s8221_s18 + $0x788] sm:$0xff] }
 0x198   : > { %2555 = vmatpush1.bf16.msra.mxu0 %v1306_v11  ;;  %v1477_v11 = vunpack.c.l.s8.bf16 %v831_v63 }
 0x199   : > { %2596 = vmatpush1.bf16.msra.mxu1 %v1578_v12  ;;  %2556 = vmatprep.subr.bf16.mxu0 %v1324_v13  ;;  %v1749_v12 = vunpack.c.l.s8.bf16 %v967_v0  ;;  %v830_v13 = vld [vmem:[%s8221_s18 + $0x340] sm:$0xff] }
 0x19a   : > { %2597 = vmatprep.subr.bf16.mxu1 %v1596_v14  ;;  %v966_v14 = vld [vmem:[%s8221_s18 + $0x780] sm:$0xff]  ;;  %v1476_v19 = vunpack.c.l.s8.bf16 %v830_v13  ;;  %v1493_v4 = vunpack.c.h.s8.bf16 %v830_v13 }
 0x19b   : > { %v1748_v1 = vunpack.c.l.s8.bf16 %v966_v14  ;;  %v1765_v22 = vunpack.c.h.s8.bf16 %v966_v14 }
 0x19c   : > { %2557 = vmatpush1.bf16.msra.mxu0 %v1323_v20  ;;  %v1494_v20 = vunpack.c.h.s8.bf16 %v831_v63 }
 0x19d   : > { %2598 = vmatpush1.bf16.msra.mxu1 %v1595_v2  ;;  %2558 = vmatprep.subr.bf16.mxu0 %v1341_v55  ;;  %v1766_v2 = vunpack.c.h.s8.bf16 %v967_v0  ;;  %v848_v55 = vld [vmem:[%s8221_s18 + $0x3d0] sm:$0xff] }
 0x19e   : > { %2599 = vmatprep.subr.bf16.mxu1 %v1613_v21  ;;  %v984_v21 = vld [vmem:[%s8221_s18 + $0x810] sm:$0xff] }
 0x1a0   : > { %2559 = vmatpush1.bf16.msra.mxu0 %v1340_v23  ;;  %v1511_v23 = vunpack.c.l.s8.bf16 %v848_v55 }
 0x1a1   : > { %2600 = vmatpush1.bf16.msra.mxu1 %v1612_v24  ;;  %2560 = vmatprep.subr.bf16.mxu0 %v1358_v25  ;;  %v1783_v24 = vunpack.c.l.s8.bf16 %v984_v21  ;;  %v847_v25 = vld [vmem:[%s8221_s18 + $0x3c8] sm:$0xff] }
 0x1a2   : > { %2601 = vmatprep.subr.bf16.mxu1 %v1630_v26  ;;  %v983_v26 = vld [vmem:[%s8221_s18 + $0x808] sm:$0xff]  ;;  %v1510_v5 = vunpack.c.l.s8.bf16 %v847_v25  ;;  %v1527_v29 = vunpack.c.h.s8.bf16 %v847_v25 }
 0x1a3   : > { %v1782_v27 = vunpack.c.l.s8.bf16 %v983_v26  ;;  %v1799_v30 = vunpack.c.h.s8.bf16 %v983_v26 }
 0x1a4   : > { %2561 = vmatpush1.bf16.msra.mxu0 %v1357_v8  ;;  %v1528_v8 = vunpack.c.h.s8.bf16 %v848_v55 }
 0x1a5   : > { %2602 = vmatpush1.bf16.msra.mxu1 %v1629_v9  ;;  %2562 = vmatprep.subr.bf16.mxu0 %v1375_v10  ;;  %v1800_v9 = vunpack.c.h.s8.bf16 %v984_v21  ;;  %v1001_v10 = vld [vmem:[%s8221_s18 + $0x898] sm:$0xff] }
 0x1a6   : > { %2603 = vmatprep.subr.bf16.mxu1 %v1647_v28  ;;  %v1137_v28 = vld [vmem:[%s8221_s18 + $0xcd8] sm:$0xff] }
 0x1a8   : > { %2563 = vmatpush1.bf16.msra.mxu0 %v1374_v31  ;;  %v1817_v31 = vunpack.c.l.s8.bf16 %v1001_v10 }
 0x1a9   : > { %2604 = vmatpush1.bf16.msra.mxu1 %v1646_v32  ;;  %2564 = vmatprep.subr.bf16.mxu0 %v1392_v33  ;;  %v2089_v32 = vunpack.c.l.s8.bf16 %v1137_v28  ;;  %v1000_v33 = vld [vmem:[%s8221_s18 + $0x890] sm:$0xff] }
 0x1aa   : > { %2605 = vmatprep.subr.bf16.mxu1 %v1664_v34  ;;  %v1136_v34 = vld [vmem:[%s8221_s18 + $0xcd0] sm:$0xff]  ;;  %v1816_v35 = vunpack.c.l.s8.bf16 %v1000_v33  ;;  %v1833_v41 = vunpack.c.h.s8.bf16 %v1000_v33 }
 0x1ab   : > { %v2088_v36 = vunpack.c.l.s8.bf16 %v1136_v34  ;;  %v2105_v42 = vunpack.c.h.s8.bf16 %v1136_v34 }
 0x1ac   : > { %2565 = vmatpush1.bf16.msra.mxu0 %v1391_v37  ;;  %v1834_v37 = vunpack.c.h.s8.bf16 %v1001_v10 }
 0x1ad   : > { %2606 = vmatpush1.bf16.msra.mxu1 %v1663_v38  ;;  %2566 = vmatprep.subr.bf16.mxu0 %v1409_v39  ;;  %v2106_v38 = vunpack.c.h.s8.bf16 %v1137_v28  ;;  %v1018_v39 = vld [vmem:[%s8221_s18 + $0x920] sm:$0xff] }
 0x1ae   : > { %2607 = vmatprep.subr.bf16.mxu1 %v1681_v40  ;;  %v1154_v40 = vld [vmem:[%s8221_s18 + $0xd60] sm:$0xff] }
 0x1b0   : > { %2567 = vmatpush1.bf16.msra.mxu0 %v1408_v43  ;;  %v1851_v43 = vunpack.c.l.s8.bf16 %v1018_v39 }
 0x1b1   : > { %2608 = vmatpush1.bf16.msra.mxu1 %v1680_v44  ;;  %2568 = vmatprep.subr.bf16.mxu0 %v1426_v45  ;;  %v2123_v44 = vunpack.c.l.s8.bf16 %v1154_v40  ;;  %v1017_v45 = vld [vmem:[%s8221_s18 + $0x918] sm:$0xff] }
 0x1b2   : > { %2609 = vmatprep.subr.bf16.mxu1 %v1698_v46  ;;  %v1153_v46 = vld [vmem:[%s8221_s18 + $0xd58] sm:$0xff]  ;;  %v1850_v47 = vunpack.c.l.s8.bf16 %v1017_v45  ;;  %v1867_v57 = vunpack.c.h.s8.bf16 %v1017_v45 }
 0x1b3   : > { %v2122_v48 = vunpack.c.l.s8.bf16 %v1153_v46  ;;  %v2139_v58 = vunpack.c.h.s8.bf16 %v1153_v46 }
 0x1b4   : > { %2569 = vmatpush1.bf16.msra.mxu0 %v1425_v49  ;;  %v1868_v49 = vunpack.c.h.s8.bf16 %v1018_v39 }
 0x1b5   : > { %2610 = vmatpush1.bf16.msra.mxu1 %v1697_v50  ;;  %2570 = vmatprep.subr.bf16.mxu0 %v1443_v53  ;;  %v2140_v50 = vunpack.c.h.s8.bf16 %v1154_v40  ;;  %v1035_v53 = vld [vmem:[%s8221_s18 + $0x9a8] sm:$0xff] }
 0x1b6   : > { %2611 = vmatprep.subr.bf16.mxu1 %v1715_v54  ;;  %v1171_v54 = vld [vmem:[%s8221_s18 + $0xde8] sm:$0xff] }
 0x1b8   : > { %2571 = vmatpush1.bf16.msra.mxu0 %v1442_v59  ;;  %v1885_v59 = vunpack.c.l.s8.bf16 %v1035_v53 }
 0x1b9   : > { %2612 = vmatpush1.bf16.msra.mxu1 %v1714_v60  ;;  %2572 = vmatprep.subr.bf16.mxu0 %v1460_v17  ;;  %v2157_v60 = vunpack.c.l.s8.bf16 %v1171_v54  ;;  %v1034_v17 = vld [vmem:[%s8221_s18 + $0x9a0] sm:$0xff] }
 0x1ba   : > { %2613 = vmatprep.subr.bf16.mxu1 %v1732_v18  ;;  %v1170_v18 = vld [vmem:[%s8221_s18 + $0xde0] sm:$0xff]  ;;  %v1884_v63 = vunpack.c.l.s8.bf16 %v1034_v17  ;;  %v1901_v13 = vunpack.c.h.s8.bf16 %v1034_v17 }
 0x1bb   : > { %v2156_v0 = vunpack.c.l.s8.bf16 %v1170_v18  ;;  %v2173_v14 = vunpack.c.h.s8.bf16 %v1170_v18 }
 0x1bc   : > { %2573 = vmatpush1.bf16.msra.mxu0 %v1459_v6  ;;  %v1902_v6 = vunpack.c.h.s8.bf16 %v1035_v53 }
 0x1bd   : > { %2614 = vmatpush1.bf16.msra.mxu1 %v1731_v7  ;;  %2574 = vmatprep.subr.bf16.mxu0 %v1477_v11  ;;  %v2174_v7 = vunpack.c.h.s8.bf16 %v1171_v54  ;;  %v1052_v11 = vld [vmem:[%s8221_s18 + $0xa30] sm:$0xff] }
 0x1be   : > { %2615 = vmatprep.subr.bf16.mxu1 %v1749_v12  ;;  %v1188_v12 = vld [vmem:[%s8221_s18 + $0xe70] sm:$0xff] }
 0x1c0   : > { %2575 = vmatpush1.bf16.msra.mxu0 %v1476_v19  ;;  %v1919_v19 = vunpack.c.l.s8.bf16 %v1052_v11 }
 0x1c1   : > { %2616 = vmatpush1.bf16.msra.mxu1 %v1748_v1  ;;  %2576 = vmatprep.subr.bf16.mxu0 %v1494_v20  ;;  %v2191_v1 = vunpack.c.l.s8.bf16 %v1188_v12  ;;  %v1051_v20 = vld [vmem:[%s8221_s18 + $0xa28] sm:$0xff] }
 0x1c2   : > { %2617 = vmatprep.subr.bf16.mxu1 %v1766_v2  ;;  %v1187_v2 = vld [vmem:[%s8221_s18 + $0xe68] sm:$0xff]  ;;  %v1918_v55 = vunpack.c.l.s8.bf16 %v1051_v20  ;;  %v1935_v25 = vunpack.c.h.s8.bf16 %v1051_v20 }
 0x1c3   : > { %v2190_v21 = vunpack.c.l.s8.bf16 %v1187_v2  ;;  %v2207_v26 = vunpack.c.h.s8.bf16 %v1187_v2 }
 0x1c4   : > { %2577 = vmatpush1.bf16.msra.mxu0 %v1493_v4  ;;  %v1936_v4 = vunpack.c.h.s8.bf16 %v1052_v11 }
 0x1c5   : > { %2618 = vmatpush1.bf16.msra.mxu1 %v1765_v22  ;;  %2578 = vmatprep.subr.bf16.mxu0 %v1511_v23  ;;  %v2208_v22 = vunpack.c.h.s8.bf16 %v1188_v12  ;;  %v1069_v23 = vld [vmem:[%s8221_s18 + $0xab8] sm:$0xff] }
 0x1c6   : > { %2619 = vmatprep.subr.bf16.mxu1 %v1783_v24  ;;  %v1205_v24 = vld [vmem:[%s8221_s18 + $0xef8] sm:$0xff] }
 0x1c8   : > { %2579 = vmatpush1.bf16.msra.mxu0 %v1510_v5  ;;  %v1953_v5 = vunpack.c.l.s8.bf16 %v1069_v23 }
 0x1c9   : > { %2620 = vmatpush1.bf16.msra.mxu1 %v1782_v27  ;;  %2580 = vmatprep.subr.bf16.mxu0 %v1528_v8  ;;  %v2225_v27 = vunpack.c.l.s8.bf16 %v1205_v24  ;;  %v1068_v8 = vld [vmem:[%s8221_s18 + $0xab0] sm:$0xff] }
 0x1ca   : > { %2621 = vmatprep.subr.bf16.mxu1 %v1800_v9  ;;  %v1204_v9 = vld [vmem:[%s8221_s18 + $0xef0] sm:$0xff]  ;;  %v1952_v10 = vunpack.c.l.s8.bf16 %v1068_v8  ;;  %v1969_v33 = vunpack.c.h.s8.bf16 %v1068_v8 }
 0x1cb   : > { %v2224_v28 = vunpack.c.l.s8.bf16 %v1204_v9  ;;  %v2241_v34 = vunpack.c.h.s8.bf16 %v1204_v9 }
 0x1cc   : > { %2581 = vmatpush1.bf16.msra.mxu0 %v1527_v29  ;;  %v1970_v29 = vunpack.c.h.s8.bf16 %v1069_v23 }
 0x1cd   : > { %2622 = vmatpush1.bf16.msra.mxu1 %v1799_v30  ;;  %2632 = vmatprep.subr.bf16.mxu0 %v1817_v31  ;;  %v2242_v30 = vunpack.c.h.s8.bf16 %v1205_v24  ;;  %v1086_v31 = vld [vmem:[%s8221_s18 + $0xb40] sm:$0xff] }
 0x1ce   : > { %2673 = vmatprep.subr.bf16.mxu1 %v2089_v32  ;;  %v1222_v32 = vld [vmem:[%s8221_s18 + $0xf80] sm:$0xff] }
 0x1cf   : > { %2583 = vmatmul.mubr.bf16.vlgmr.msra.gmra.mrb[8].mxu0 %v8503_v15 }
 0x1d0   : > { %2624 = vmatmul.mubr.bf16.vlgmr.msra.gmra.mrb[8].mxu1 %v8507_v16  ;;  %2633 = vmatpush1.bf16.msra.mxu0 %v1816_v35  ;;  %v1987_v35 = vunpack.c.l.s8.bf16 %v1086_v31 }
 0x1d1   : > { %2674 = vmatpush1.bf16.msra.mxu1 %v2088_v36  ;;  %2634 = vmatprep.subr.bf16.mxu0 %v1834_v37  ;;  %v2259_v36 = vunpack.c.l.s8.bf16 %v1222_v32  ;;  %v1085_v37 = vld [vmem:[%s8221_s18 + $0xb38] sm:$0xff] }
 0x1d2   : > { %2675 = vmatprep.subr.bf16.mxu1 %v2106_v38  ;;  %2664 = vmatprep.mubr.bf16.mxu0 %v8519_v56  ;;  %v1221_v38 = vld [vmem:[%s8221_s18 + $0xf78] sm:$0xff]  ;;  %v1986_v39 = vunpack.c.l.s8.bf16 %v1085_v37  ;;  %v2003_v45 = vunpack.c.h.s8.bf16 %v1085_v37 }
 0x1d3   : > { %2705 = vmatprep.mubr.bf16.mxu1 %v8523_v3  ;;  %v2258_v40 = vunpack.c.l.s8.bf16 %v1221_v38  ;;  %v2275_v46 = vunpack.c.h.s8.bf16 %v1221_v38 }
 0x1d4   : > { %2635 = vmatpush1.bf16.msra.mxu0 %v1833_v41  ;;  %v2004_v41 = vunpack.c.h.s8.bf16 %v1086_v31 }
 0x1d5   : > { %2676 = vmatpush1.bf16.msra.mxu1 %v2105_v42  ;;  %2636 = vmatprep.subr.bf16.mxu0 %v1851_v43  ;;  %v2276_v42 = vunpack.c.h.s8.bf16 %v1222_v32  ;;  %v1103_v43 = vld [vmem:[%s8221_s18 + $0xbc8] sm:$0xff] }
 0x1d6   : > { %2677 = vmatprep.subr.bf16.mxu1 %v2123_v44  ;;  %v1239_v44 = vld [vmem:[%s8221_s18 + $0x1008] sm:$0xff] }
 0x1d8   : > { %2637 = vmatpush1.bf16.msra.mxu0 %v1850_v47  ;;  %v2021_v47 = vunpack.c.l.s8.bf16 %v1103_v43 }
 0x1d9   : > { %2678 = vmatpush1.bf16.msra.mxu1 %v2122_v48  ;;  %2638 = vmatprep.subr.bf16.mxu0 %v1868_v49  ;;  %v2293_v48 = vunpack.c.l.s8.bf16 %v1239_v44  ;;  %v1102_v49 = vld [vmem:[%s8221_s18 + $0xbc0] sm:$0xff] }
 0x1da   : > { %2679 = vmatprep.subr.bf16.mxu1 %v2140_v50  ;;  %v1238_v50 = vld [vmem:[%s8221_s18 + $0x1000] sm:$0xff]  ;;  %v2020_v53 = vunpack.c.l.s8.bf16 %v1102_v49  ;;  %v2037_v17 = vunpack.c.h.s8.bf16 %v1102_v49 }
 0x1db   : > { %v2292_v54 = vunpack.c.l.s8.bf16 %v1238_v50  ;;  %v2309_v18 = vunpack.c.h.s8.bf16 %v1238_v50 }
 0x1dc   : > { %2639 = vmatpush1.bf16.msra.mxu0 %v1867_v57  ;;  %v2038_v57 = vunpack.c.h.s8.bf16 %v1103_v43 }
 0x1dd   : > { %2680 = vmatpush1.bf16.msra.mxu1 %v2139_v58  ;;  %2640 = vmatprep.subr.bf16.mxu0 %v1885_v59  ;;  %v2310_v58 = vunpack.c.h.s8.bf16 %v1239_v44  ;;  %v1120_v59 = vld [vmem:[%s8221_s18 + $0xc50] sm:$0xff] }
 0x1de   : > { %2681 = vmatprep.subr.bf16.mxu1 %v2157_v60  ;;  %v1256_v60 = vld [vmem:[%s8221_s18 + $0x1090] sm:$0xff] }
 0x1e0   : > { %2641 = vmatpush1.bf16.msra.mxu0 %v1884_v63  ;;  %v2055_v63 = vunpack.c.l.s8.bf16 %v1120_v59 }
 0x1e1   : > { %2682 = vmatpush1.bf16.msra.mxu1 %v2156_v0  ;;  %2642 = vmatprep.subr.bf16.mxu0 %v1902_v6  ;;  %v2327_v0 = vunpack.c.l.s8.bf16 %v1256_v60  ;;  %v1119_v6 = vld [vmem:[%s8221_s18 + $0xc48] sm:$0xff] }
 0x1e2   : > { %2683 = vmatprep.subr.bf16.mxu1 %v2174_v7  ;;  %v1255_v7 = vld [vmem:[%s8221_s18 + $0x1088] sm:$0xff]  ;;  %v2054_v11 = vunpack.c.l.s8.bf16 %v1119_v6  ;;  %v2071_v20 = vunpack.c.h.s8.bf16 %v1119_v6 }
 0x1e3   : > { %v2326_v12 = vunpack.c.l.s8.bf16 %v1255_v7  ;;  %v2343_v2 = vunpack.c.h.s8.bf16 %v1255_v7 }
 0x1e4   : > { %2643 = vmatpush1.bf16.msra.mxu0 %v1901_v13  ;;  %v2072_v13 = vunpack.c.h.s8.bf16 %v1120_v59 }
 0x1e5   : > { %2684 = vmatpush1.bf16.msra.mxu1 %v2173_v14  ;;  %2644 = vmatprep.subr.bf16.mxu0 %v1919_v19  ;;  %v2344_v14 = vunpack.c.h.s8.bf16 %v1256_v60  ;;  %v731_v19 = vld [vmem:[%s8221_s18 + $0x28] sm:$0xff] }
 0x1e6   : > { %2685 = vmatprep.subr.bf16.mxu1 %v2191_v1  ;;  %v867_v1 = vld [vmem:[%s8221_s18 + $0x468] sm:$0xff] }
 0x1e8   : > { %2645 = vmatpush1.bf16.msra.mxu0 %v1918_v55  ;;  %v1275_v55 = vunpack.c.l.s8.bf16 %v731_v19 }
 0x1e9   : > { %2686 = vmatpush1.bf16.msra.mxu1 %v2190_v21  ;;  %2646 = vmatprep.subr.bf16.mxu0 %v1936_v4  ;;  %v1547_v21 = vunpack.c.l.s8.bf16 %v867_v1  ;;  %v730_v4 = vld [vmem:[%s8221_s18 + $0x20] sm:$0xff] }
 0x1ea   : > { %2687 = vmatprep.subr.bf16.mxu1 %v2208_v22  ;;  %v866_v22 = vld [vmem:[%s8221_s18 + $0x460] sm:$0xff]  ;;  %v1274_v23 = vunpack.c.l.s8.bf16 %v730_v4  ;;  %v1291_v8 = vunpack.c.h.s8.bf16 %v730_v4 }
 0x1eb   : > { %v1546_v24 = vunpack.c.l.s8.bf16 %v866_v22  ;;  %v1563_v9 = vunpack.c.h.s8.bf16 %v866_v22 }
 0x1ec   : > { %2647 = vmatpush1.bf16.msra.mxu0 %v1935_v25  ;;  %v1292_v25 = vunpack.c.h.s8.bf16 %v731_v19 }
 0x1ed   : > { %2688 = vmatpush1.bf16.msra.mxu1 %v2207_v26  ;;  %2648 = vmatprep.subr.bf16.mxu0 %v1953_v5  ;;  %v1564_v26 = vunpack.c.h.s8.bf16 %v867_v1  ;;  %v748_v5 = vld [vmem:[%s8221_s18 + $0xb0] sm:$0xff] }
 0x1ee   : > { %2689 = vmatprep.subr.bf16.mxu1 %v2225_v27  ;;  %v884_v27 = vld [vmem:[%s8221_s18 + $0x4f0] sm:$0xff] }
 0x1f0   : > { %2649 = vmatpush1.bf16.msra.mxu0 %v1952_v10  ;;  %v1309_v10 = vunpack.c.l.s8.bf16 %v748_v5 }
 0x1f1   : > { %2690 = vmatpush1.bf16.msra.mxu1 %v2224_v28  ;;  %2650 = vmatprep.subr.bf16.mxu0 %v1970_v29  ;;  %v1581_v28 = vunpack.c.l.s8.bf16 %v884_v27  ;;  %v747_v29 = vld [vmem:[%s8221_s18 + $0xa8] sm:$0xff] }
 0x1f2   : > { %2691 = vmatprep.subr.bf16.mxu1 %v2242_v30  ;;  %v883_v30 = vld [vmem:[%s8221_s18 + $0x4e8] sm:$0xff]  ;;  %v1308_v31 = vunpack.c.l.s8.bf16 %v747_v29  ;;  %v1325_v37 = vunpack.c.h.s8.bf16 %v747_v29 }
 0x1f3   : > { %v1580_v32 = vunpack.c.l.s8.bf16 %v883_v30  ;;  %v1597_v38 = vunpack.c.h.s8.bf16 %v883_v30 }
 0x1f4   : > { %2651 = vmatpush1.bf16.msra.mxu0 %v1969_v33  ;;  %v1326_v33 = vunpack.c.h.s8.bf16 %v748_v5 }
 0x1f5   : > { %2692 = vmatpush1.bf16.msra.mxu1 %v2241_v34  ;;  %2652 = vmatprep.subr.bf16.mxu0 %v1987_v35  ;;  %v1598_v34 = vunpack.c.h.s8.bf16 %v884_v27  ;;  %v765_v35 = vld [vmem:[%s8221_s18 + $0x138] sm:$0xff] }
 0x1f6   : > { %2693 = vmatprep.subr.bf16.mxu1 %v2259_v36  ;;  %v901_v36 = vld [vmem:[%s8221_s18 + $0x578] sm:$0xff] }
 0x1f8   : > { %2653 = vmatpush1.bf16.msra.mxu0 %v1986_v39  ;;  %v1343_v39 = vunpack.c.l.s8.bf16 %v765_v35 }
 0x1f9   : > { %2694 = vmatpush1.bf16.msra.mxu1 %v2258_v40  ;;  %2654 = vmatprep.subr.bf16.mxu0 %v2004_v41  ;;  %v1615_v40 = vunpack.c.l.s8.bf16 %v901_v36  ;;  %v764_v41 = vld [vmem:[%s8221_s18 + $0x130] sm:$0xff] }
 0x1fa   : > { %2695 = vmatprep.subr.bf16.mxu1 %v2276_v42  ;;  %v900_v42 = vld [vmem:[%s8221_s18 + $0x570] sm:$0xff]  ;;  %v1342_v43 = vunpack.c.l.s8.bf16 %v764_v41  ;;  %v1359_v49 = vunpack.c.h.s8.bf16 %v764_v41 }
 0x1fb   : > { %v1614_v44 = vunpack.c.l.s8.bf16 %v900_v42  ;;  %v1631_v50 = vunpack.c.h.s8.bf16 %v900_v42 }
 0x1fc   : > { %2655 = vmatpush1.bf16.msra.mxu0 %v2003_v45  ;;  %v1360_v45 = vunpack.c.h.s8.bf16 %v765_v35 }
 0x1fd   : > { %2696 = vmatpush1.bf16.msra.mxu1 %v2275_v46  ;;  %2656 = vmatprep.subr.bf16.mxu0 %v2021_v47  ;;  %v1632_v46 = vunpack.c.h.s8.bf16 %v901_v36  ;;  %v782_v47 = vld [vmem:[%s8221_s18 + $0x1c0] sm:$0xff] }
 0x1fe   : > { %2697 = vmatprep.subr.bf16.mxu1 %v2293_v48  ;;  %v918_v48 = vld [vmem:[%s8221_s18 + $0x600] sm:$0xff]  ;;  %v1394_v19 = vunpack.c.h.s8.bf16 %v782_v47 }
 0x1ff   : > { %v1666_v1 = vunpack.c.h.s8.bf16 %v918_v48 }
 0x200   : > { %2657 = vmatpush1.bf16.msra.mxu0 %v2020_v53  ;;  %v1377_v53 = vunpack.c.l.s8.bf16 %v782_v47 }
 0x201   : > { %2698 = vmatpush1.bf16.msra.mxu1 %v2292_v54  ;;  %2658 = vmatprep.subr.bf16.mxu0 %v2038_v57  ;;  %v1649_v54 = vunpack.c.l.s8.bf16 %v918_v48  ;;  %v781_v57 = vld [vmem:[%s8221_s18 + $0x1b8] sm:$0xff] }
 0x202   : > { %2699 = vmatprep.subr.bf16.mxu1 %v2310_v58  ;;  %v917_v58 = vld [vmem:[%s8221_s18 + $0x5f8] sm:$0xff] }
 0x204   : > { %2659 = vmatpush1.bf16.msra.mxu0 %v2037_v17 }
 0x205   : > { %2700 = vmatpush1.bf16.msra.mxu1 %v2309_v18  ;;  %2660 = vmatprep.subr.bf16.mxu0 %v2055_v63 }
 0x206   : > { %2701 = vmatprep.subr.bf16.mxu1 %v2327_v0 }
 0x208   : > { %2661 = vmatpush1.bf16.msra.mxu0 %v2054_v11  ;;  %v1376_v11 = vunpack.c.l.s8.bf16 %v781_v57 }
 0x209   : > { %2702 = vmatpush1.bf16.msra.mxu1 %v2326_v12  ;;  %2662 = vmatprep.subr.bf16.mxu0 %v2072_v13  ;;  %v1648_v12 = vunpack.c.l.s8.bf16 %v917_v58 }
 0x20a   : > { %2703 = vmatprep.subr.bf16.mxu1 %v2344_v14 }
 0x20c   : > { %2663 = vmatpush1.bf16.msra.mxu0 %v2071_v20  ;;  %v799_v20 = vld [vmem:[%s8221_s18 + $0x248] sm:$0xff] }
 0x20d   : > { %2704 = vmatpush1.bf16.msra.mxu1 %v2343_v2  ;;  %2714 = vmatprep.subr.bf16.mxu0 %v1275_v55  ;;  %v935_v2 = vld [vmem:[%s8221_s18 + $0x688] sm:$0xff]  ;;  %v1393_v55 = vunpack.c.h.s8.bf16 %v781_v57  ;;  %v1411_v4 = vunpack.c.l.s8.bf16 %v799_v20  ;;  %v1428_v5 = vunpack.c.h.s8.bf16 %v799_v20  ;;  %v1002_v20 = vld [vmem:[%s8221_s18 + $0x8a0] sm:$0xff] }
 0x20e   : > { %2755 = vmatprep.subr.bf16.mxu1 %v1547_v21  ;;  %v1665_v21 = vunpack.c.h.s8.bf16 %v917_v58  ;;  %v1683_v22 = vunpack.c.l.s8.bf16 %v935_v2  ;;  %v1700_v27 = vunpack.c.h.s8.bf16 %v935_v2  ;;  %v1138_v2 = vld [vmem:[%s8221_s18 + $0xce0] sm:$0xff] }
 0x20f   : > { %2665 = vmatmul.mubr.bf16.vlgmr.msra.gmra.mrb[12].mxu0 %v8561_v51 }
 0x210   : > { %2706 = vmatmul.mubr.bf16.vlgmr.msra.gmra.mrb[12].mxu1 %v8565_v52  ;;  %2715 = vmatpush1.bf16.msra.mxu0 %v1274_v23  ;;  %v798_v23 = vld [vmem:[%s8221_s18 + $0x240] sm:$0xff] }
 0x211   : > { %2756 = vmatpush1.bf16.msra.mxu1 %v1546_v24  ;;  %2716 = vmatprep.subr.bf16.mxu0 %v1292_v25  ;;  %v934_v24 = vld [vmem:[%s8221_s18 + $0x680] sm:$0xff]  ;;  %v1410_v25 = vunpack.c.l.s8.bf16 %v798_v23 }
 0x212   : > { %2757 = vmatprep.subr.bf16.mxu1 %v1564_v26  ;;  %2746 = vmatprep.mubr.bf16.mxu0 %v8469_v61  ;;  %v1682_v26 = vunpack.c.l.s8.bf16 %v934_v24 }
 0x213   : > { %2787 = vmatprep.mubr.bf16.mxu1 %v8473_v62 }
 0x214   : > { %2717 = vmatpush1.bf16.msra.mxu0 %v1291_v8  ;;  %v816_v8 = vld [vmem:[%s8221_s18 + $0x2d0] sm:$0xff] }
 0x215   : > { %2758 = vmatpush1.bf16.msra.mxu1 %v1563_v9  ;;  %2718 = vmatprep.subr.bf16.mxu0 %v1309_v10  ;;  %v952_v9 = vld [vmem:[%s8221_s18 + $0x710] sm:$0xff]  ;;  %v1427_v10 = vunpack.c.h.s8.bf16 %v798_v23  ;;  %v1445_v29 = vunpack.c.l.s8.bf16 %v816_v8  ;;  %v1462_v35 = vunpack.c.h.s8.bf16 %v816_v8  ;;  %v1019_v8 = vld [vmem:[%s8221_s18 + $0x928] sm:$0xff] }
 0x216   : > { %2759 = vmatprep.subr.bf16.mxu1 %v1581_v28  ;;  %v1699_v28 = vunpack.c.h.s8.bf16 %v934_v24  ;;  %v1717_v30 = vunpack.c.l.s8.bf16 %v952_v9  ;;  %v1734_v36 = vunpack.c.h.s8.bf16 %v952_v9  ;;  %v1020_v23 = vld [vmem:[%s8221_s18 + $0x930] sm:$0xff]  ;;  %v1155_v9 = vld [vmem:[%s8221_s18 + $0xd68] sm:$0xff] }
 0x217   : > { %v1156_v24 = vld [vmem:[%s8221_s18 + $0xd70] sm:$0xff] }
 0x218   : > { %2719 = vmatpush1.bf16.msra.mxu0 %v1308_v31  ;;  %v815_v31 = vld [vmem:[%s8221_s18 + $0x2c8] sm:$0xff] }
 0x219   : > { %2760 = vmatpush1.bf16.msra.mxu1 %v1580_v32  ;;  %2720 = vmatprep.subr.bf16.mxu0 %v1326_v33  ;;  %v951_v32 = vld [vmem:[%s8221_s18 + $0x708] sm:$0xff]  ;;  %v1444_v33 = vunpack.c.l.s8.bf16 %v815_v31 }
 0x21a   : > { %2761 = vmatprep.subr.bf16.mxu1 %v1598_v34  ;;  %v1716_v34 = vunpack.c.l.s8.bf16 %v951_v32 }
 0x21c   : > { %2721 = vmatpush1.bf16.msra.mxu0 %v1325_v37  ;;  %v833_v37 = vld [vmem:[%s8221_s18 + $0x358] sm:$0xff] }
 0x21d   : > { %2762 = vmatpush1.bf16.msra.mxu1 %v1597_v38  ;;  %2722 = vmatprep.subr.bf16.mxu0 %v1343_v39  ;;  %v969_v38 = vld [vmem:[%s8221_s18 + $0x798] sm:$0xff]  ;;  %v1461_v39 = vunpack.c.h.s8.bf16 %v815_v31  ;;  %v1479_v41 = vunpack.c.l.s8.bf16 %v833_v37  ;;  %v1496_v47 = vunpack.c.h.s8.bf16 %v833_v37  ;;  %v1036_v37 = vld [vmem:[%s8221_s18 + $0x9b0] sm:$0xff] }
 0x21e   : > { %2763 = vmatprep.subr.bf16.mxu1 %v1615_v40  ;;  %v1733_v40 = vunpack.c.h.s8.bf16 %v951_v32  ;;  %v1751_v42 = vunpack.c.l.s8.bf16 %v969_v38  ;;  %v1768_v48 = vunpack.c.h.s8.bf16 %v969_v38  ;;  %v1037_v31 = vld [vmem:[%s8221_s18 + $0x9b8] sm:$0xff]  ;;  %v1172_v38 = vld [vmem:[%s8221_s18 + $0xdf0] sm:$0xff] }
 0x21f   : > { %v1173_v32 = vld [vmem:[%s8221_s18 + $0xdf8] sm:$0xff] }
 0x220   : > { %2723 = vmatpush1.bf16.msra.mxu0 %v1342_v43  ;;  %v832_v43 = vld [vmem:[%s8221_s18 + $0x350] sm:$0xff] }
 0x221   : > { %2764 = vmatpush1.bf16.msra.mxu1 %v1614_v44  ;;  %2724 = vmatprep.subr.bf16.mxu0 %v1360_v45  ;;  %v968_v44 = vld [vmem:[%s8221_s18 + $0x790] sm:$0xff]  ;;  %v1478_v45 = vunpack.c.l.s8.bf16 %v832_v43 }
 0x222   : > { %2765 = vmatprep.subr.bf16.mxu1 %v1632_v46  ;;  %v2420_v59 = vpop.f32.mrb[0].mxu0  ;;  %v1750_v46 = vunpack.c.l.s8.bf16 %v968_v44 }
 0x223   : > { %v2461_v60 = vpop.f32.mrb[0].mxu1  ;;  %v2422_v18 = vpop.f32.mrb[1].mxu0 }
 0x224   : > { %v8655_v17 = vadd.f32 %v2461_v60, %v2420_v59  ;;  %v2463_v63 = vpop.f32.mrb[1].mxu1  ;;  %v2424_v6 = vpop.f32.mrb[2].mxu0  ;;  %2725 = vmatpush1.bf16.msra.mxu0 %v1359_v49  ;;  %v850_v49 = vld [vmem:[%s8221_s18 + $0x3e0] sm:$0xff]  ;;  %v849_v59 = vld [vmem:[%s8221_s18 + $0x3d8] sm:$0xff] }
 0x225   : > { %v8657_v0 = vadd.f32 %v2463_v63, %v2422_v18  ;;  %v2465_v7 = vpop.f32.mrb[2].mxu1  ;;  %2766 = vmatpush1.bf16.msra.mxu1 %v1631_v50  ;;  %v2425_v13 = vpop.f32.mrb[3].mxu0  ;;  %2726 = vmatprep.subr.bf16.mxu0 %v1377_v53  ;;  %v986_v50 = vld [vmem:[%s8221_s18 + $0x820] sm:$0xff]  ;;  %v1495_v53 = vunpack.c.h.s8.bf16 %v832_v43  ;;  %v1513_v57 = vunpack.c.l.s8.bf16 %v850_v49  ;;  %v985_v60 = vld [vmem:[%s8221_s18 + $0x818] sm:$0xff]  ;;  %v1512_v18 = vunpack.c.l.s8.bf16 %v849_v59 }
 0x226   : > { %v2466_v14 = vpop.f32.mrb[3].mxu1  ;;  %2767 = vmatprep.subr.bf16.mxu1 %v1649_v54  ;;  %v1767_v54 = vunpack.c.h.s8.bf16 %v968_v44  ;;  %v1785_v58 = vunpack.c.l.s8.bf16 %v986_v50  ;;  %v1784_v63 = vunpack.c.l.s8.bf16 %v985_v60  ;;  %v1530_v6 = vunpack.c.h.s8.bf16 %v850_v49  ;;  %v1054_v43 = vld [vmem:[%s8221_s18 + $0xa40] sm:$0xff]  ;;  %v1053_v49 = vld [vmem:[%s8221_s18 + $0xa38] sm:$0xff] }
 0x227   : > { %v1802_v7 = vunpack.c.h.s8.bf16 %v986_v50  ;;  %v1529_v13 = vunpack.c.h.s8.bf16 %v849_v59  ;;  %v1801_v14 = vunpack.c.h.s8.bf16 %v985_v60  ;;  %v1190_v44 = vld [vmem:[%s8221_s18 + $0xe80] sm:$0xff]  ;;  %v1189_v50 = vld [vmem:[%s8221_s18 + $0xe78] sm:$0xff] }
 0x228   : > { %2727 = vmatpush1.bf16.msra.mxu0 %v1376_v11  ;;  %v1003_v11 = vld [vmem:[%s8221_s18 + $0x8a8] sm:$0xff]  ;;  %v702_v60 = vld [vmem:[#allocation3] sm:$0xff] }
 0x229   : > { %2768 = vmatpush1.bf16.msra.mxu1 %v1648_v12  ;;  %2728 = vmatprep.subr.bf16.mxu0 %v1394_v19  ;;  %v1139_v12 = vld [vmem:[%s8221_s18 + $0xce8] sm:$0xff]  ;;  %v1819_v19 = vunpack.c.l.s8.bf16 %v1003_v11 }
 0x22a   : > { %2769 = vmatprep.subr.bf16.mxu1 %v1666_v1  ;;  %v2091_v1 = vunpack.c.l.s8.bf16 %v1139_v12 }
 0x22c   : > { %2729 = vmatpush1.bf16.msra.mxu0 %v1393_v55  ;;  %v1818_v55 = vunpack.c.l.s8.bf16 %v1002_v20 }
 0x22d   : > { %2770 = vmatpush1.bf16.msra.mxu1 %v1665_v21  ;;  %2730 = vmatprep.subr.bf16.mxu0 %v1411_v4  ;;  %v2090_v21 = vunpack.c.l.s8.bf16 %v1138_v2  ;;  %v1836_v4 = vunpack.c.h.s8.bf16 %v1003_v11  ;;  %v2192_v11 = vunpack.c.l.s8.bf16 %v1189_v50 }
 0x22e   : > { %2771 = vmatprep.subr.bf16.mxu1 %v1683_v22  ;;  %v2108_v22 = vunpack.c.h.s8.bf16 %v1139_v12 }
 0x230   : > { %2731 = vmatpush1.bf16.msra.mxu0 %v1410_v25  ;;  %v1835_v25 = vunpack.c.h.s8.bf16 %v1002_v20 }
 0x231   : > { %2772 = vmatpush1.bf16.msra.mxu1 %v1682_v26  ;;  %2732 = vmatprep.subr.bf16.mxu0 %v1428_v5  ;;  %v2107_v26 = vunpack.c.h.s8.bf16 %v1138_v2  ;;  %v1853_v5 = vunpack.c.l.s8.bf16 %v1020_v23  ;;  %v1207_v2 = vld [vmem:[%s8221_s18 + $0xf08] sm:$0xff] }
 0x232   : > { %2773 = vmatprep.subr.bf16.mxu1 %v1700_v27  ;;  %v2125_v27 = vunpack.c.l.s8.bf16 %v1156_v24 }
 0x234   : > { %2733 = vmatpush1.bf16.msra.mxu0 %v1427_v10  ;;  %v1852_v10 = vunpack.c.l.s8.bf16 %v1019_v8 }
 0x235   : > { %2774 = vmatpush1.bf16.msra.mxu1 %v1699_v28  ;;  %2734 = vmatprep.subr.bf16.mxu0 %v1445_v29  ;;  %v2124_v28 = vunpack.c.l.s8.bf16 %v1155_v9  ;;  %v1870_v29 = vunpack.c.h.s8.bf16 %v1020_v23 }
 0x236   : > { %2775 = vmatprep.subr.bf16.mxu1 %v1717_v30  ;;  %v2142_v30 = vunpack.c.h.s8.bf16 %v1156_v24  ;;  %v2227_v24 = vunpack.c.l.s8.bf16 %v1207_v2 }
 0x238   : > { %2735 = vmatpush1.bf16.msra.mxu0 %v1444_v33  ;;  %v1869_v33 = vunpack.c.h.s8.bf16 %v1019_v8 }
 0x239   : > { %2776 = vmatpush1.bf16.msra.mxu1 %v1716_v34  ;;  %2736 = vmatprep.subr.bf16.mxu0 %v1462_v35  ;;  %v2141_v34 = vunpack.c.h.s8.bf16 %v1155_v9  ;;  %v1887_v35 = vunpack.c.l.s8.bf16 %v1037_v31  ;;  %v2244_v9 = vunpack.c.h.s8.bf16 %v1207_v2  ;;  %v868_v2 = vld [vmem:[%s8221_s18 + $0x470] sm:$0xff] }
 0x23a   : > { %2777 = vmatprep.subr.bf16.mxu1 %v1734_v36  ;;  %v2159_v36 = vunpack.c.l.s8.bf16 %v1173_v32 }
 0x23c   : > { %2737 = vmatpush1.bf16.msra.mxu0 %v1461_v39  ;;  %v1886_v39 = vunpack.c.l.s8.bf16 %v1036_v37 }
 0x23d   : > { %2778 = vmatpush1.bf16.msra.mxu1 %v1733_v40  ;;  %2738 = vmatprep.subr.bf16.mxu0 %v1479_v41  ;;  %v2158_v40 = vunpack.c.l.s8.bf16 %v1172_v38  ;;  %v1904_v41 = vunpack.c.h.s8.bf16 %v1037_v31 }
 0x23e   : > { %2779 = vmatprep.subr.bf16.mxu1 %v1751_v42  ;;  %v2176_v42 = vunpack.c.h.s8.bf16 %v1173_v32 }
 0x240   : > { %2739 = vmatpush1.bf16.msra.mxu0 %v1478_v45  ;;  %v1903_v45 = vunpack.c.h.s8.bf16 %v1036_v37 }
 0x241   : > { %2780 = vmatpush1.bf16.msra.mxu1 %v1750_v46  ;;  %2740 = vmatprep.subr.bf16.mxu0 %v1496_v47  ;;  %v2175_v46 = vunpack.c.h.s8.bf16 %v1172_v38  ;;  %v1921_v47 = vunpack.c.l.s8.bf16 %v1054_v43 }
 0x242   : > { %2781 = vmatprep.subr.bf16.mxu1 %v1768_v48  ;;  %v2193_v48 = vunpack.c.l.s8.bf16 %v1190_v44 }
 0x244   : > { %2741 = vmatpush1.bf16.msra.mxu0 %v1495_v53 }
 0x245   : > { %2782 = vmatpush1.bf16.msra.mxu1 %v1767_v54  ;;  %2742 = vmatprep.subr.bf16.mxu0 %v1513_v57 }
 0x246   : > { %2783 = vmatprep.subr.bf16.mxu1 %v1785_v58 }
 0x248   : > { %2743 = vmatpush1.bf16.msra.mxu0 %v1512_v18 }
 0x249   : > { %2784 = vmatpush1.bf16.msra.mxu1 %v1784_v63  ;;  %2744 = vmatprep.subr.bf16.mxu0 %v1530_v6 }
 0x24a   : > { %2785 = vmatprep.subr.bf16.mxu1 %v1802_v7  ;;  %v1920_v7 = vunpack.c.l.s8.bf16 %v1053_v49 }
 0x24c   : > { %2745 = vmatpush1.bf16.msra.mxu0 %v1529_v13  ;;  %v703_v13 = vld [vmem:[#allocation3 + $0x8] sm:$0xff] }
 0x24d   : > { %2786 = vmatpush1.bf16.msra.mxu1 %v1801_v14  ;;  %2796 = vmatprep.subr.bf16.mxu0 %v1819_v19 }
 0x24e   : > { %2837 = vmatprep.subr.bf16.mxu1 %v2091_v1  ;;  %v2210_v1 = vunpack.c.h.s8.bf16 %v1190_v44 }
 0x24f   : > { %2747 = vmatmul.mubr.bf16.vlgmr.msra.gmra.mrb[16].mxu0 %v8503_v15 }
 0x250   : > { %2788 = vmatmul.mubr.bf16.vlgmr.msra.gmra.mrb[16].mxu1 %v8507_v16  ;;  %2797 = vmatpush1.bf16.msra.mxu0 %v1818_v55 }
 0x251   : > { %2838 = vmatpush1.bf16.msra.mxu1 %v2090_v21  ;;  %2798 = vmatprep.subr.bf16.mxu0 %v1836_v4  ;;  %v1937_v4 = vunpack.c.h.s8.bf16 %v1053_v49 }
 0x252   : > { %2839 = vmatprep.subr.bf16.mxu1 %v2108_v22  ;;  %2828 = vmatprep.mubr.bf16.mxu0 %v8519_v56  ;;  %v2209_v22 = vunpack.c.h.s8.bf16 %v1189_v50 }
 0x253   : > { %2869 = vmatprep.mubr.bf16.mxu1 %v8523_v3 }
 0x254   : > { %2799 = vmatpush1.bf16.msra.mxu0 %v1835_v25  ;;  %v1070_v25 = vld [vmem:[%s8221_s18 + $0xac0] sm:$0xff] }
 0x255   : > { %2840 = vmatpush1.bf16.msra.mxu1 %v2107_v26  ;;  %2800 = vmatprep.subr.bf16.mxu0 %v1853_v5  ;;  %v1206_v26 = vld [vmem:[%s8221_s18 + $0xf00] sm:$0xff]  ;;  %v1954_v5 = vunpack.c.l.s8.bf16 %v1070_v25 }
 0x256   : > { %2841 = vmatprep.subr.bf16.mxu1 %v2125_v27  ;;  %v2226_v27 = vunpack.c.l.s8.bf16 %v1206_v26 }
 0x258   : > { %2801 = vmatpush1.bf16.msra.mxu0 %v1852_v10  ;;  %v1088_v10 = vld [vmem:[%s8221_s18 + $0xb50] sm:$0xff] }
 0x259   : > { %2842 = vmatpush1.bf16.msra.mxu1 %v2124_v28  ;;  %2802 = vmatprep.subr.bf16.mxu0 %v1870_v29  ;;  %v1224_v28 = vld [vmem:[%s8221_s18 + $0xf90] sm:$0xff]  ;;  %v1971_v29 = vunpack.c.h.s8.bf16 %v1070_v25  ;;  %v1989_v31 = vunpack.c.l.s8.bf16 %v1088_v10  ;;  %v2006_v37 = vunpack.c.h.s8.bf16 %v1088_v10 }
 0x25a   : > { %2843 = vmatprep.subr.bf16.mxu1 %v2142_v30  ;;  %v2243_v30 = vunpack.c.h.s8.bf16 %v1206_v26  ;;  %v2261_v32 = vunpack.c.l.s8.bf16 %v1224_v28  ;;  %v2278_v38 = vunpack.c.h.s8.bf16 %v1224_v28  ;;  %v1565_v26 = vunpack.c.h.s8.bf16 %v868_v2 }
 0x25c   : > { %2803 = vmatpush1.bf16.msra.mxu0 %v1869_v33  ;;  %v1087_v33 = vld [vmem:[%s8221_s18 + $0xb48] sm:$0xff] }
 0x25d   : > { %2844 = vmatpush1.bf16.msra.mxu1 %v2141_v34  ;;  %2804 = vmatprep.subr.bf16.mxu0 %v1887_v35  ;;  %v1223_v34 = vld [vmem:[%s8221_s18 + $0xf88] sm:$0xff]  ;;  %v1988_v35 = vunpack.c.l.s8.bf16 %v1087_v33 }
 0x25e   : > { %2845 = vmatprep.subr.bf16.mxu1 %v2159_v36  ;;  %v2260_v36 = vunpack.c.l.s8.bf16 %v1223_v34 }
 0x260   : > { %2805 = vmatpush1.bf16.msra.mxu0 %v1886_v39  ;;  %v1105_v39 = vld [vmem:[%s8221_s18 + $0xbd8] sm:$0xff] }
 0x261   : > { %2846 = vmatpush1.bf16.msra.mxu1 %v2158_v40  ;;  %2806 = vmatprep.subr.bf16.mxu0 %v1904_v41  ;;  %v1241_v40 = vld [vmem:[%s8221_s18 + $0x1018] sm:$0xff]  ;;  %v2005_v41 = vunpack.c.h.s8.bf16 %v1087_v33  ;;  %v2040_v49 = vunpack.c.h.s8.bf16 %v1105_v39 }
 0x262   : > { %2847 = vmatprep.subr.bf16.mxu1 %v2176_v42  ;;  %v2502_v53 = vpop.f32.mrb[4].mxu0  ;;  %v2277_v42 = vunpack.c.h.s8.bf16 %v1223_v34  ;;  %v2295_v44 = vunpack.c.l.s8.bf16 %v1241_v40  ;;  %v2312_v50 = vunpack.c.h.s8.bf16 %v1241_v40 }
 0x263   : > { %v2543_v54 = vpop.f32.mrb[4].mxu1  ;;  %v2503_v57 = vadd.f32 %v2502_v53, %v8655_v17  ;;  %v2504_v58 = vpop.f32.mrb[5].mxu0  ;;  %v1938_v17 = vunpack.c.h.s8.bf16 %v1054_v43  ;;  %v2023_v43 = vunpack.c.l.s8.bf16 %v1105_v39  ;;  %v1122_v53 = vld [vmem:[%s8221_s18 + $0xc60] sm:$0xff] }
 0x264   : > { %v2545_v59 = vpop.f32.mrb[5].mxu1  ;;  %v2505_v18 = vadd.f32 %v2504_v58, %v8657_v0  ;;  %v2506_v63 = vpop.f32.mrb[6].mxu0  ;;  %2807 = vmatpush1.bf16.msra.mxu0 %v1903_v45  ;;  %v1071_v0 = vld [vmem:[%s8221_s18 + $0xac8] sm:$0xff]  ;;  %v1104_v45 = vld [vmem:[%s8221_s18 + $0xbd0] sm:$0xff] }
 0x265   : > { %v2547_v6 = vpop.f32.mrb[6].mxu1  ;;  %2848 = vmatpush1.bf16.msra.mxu1 %v2175_v46  ;;  %v2544_v12 = vadd.f32 %v2543_v54, %v2503_v57  ;;  %v2507_v14 = vpop.f32.mrb[7].mxu0  ;;  %2808 = vmatprep.subr.bf16.mxu0 %v1921_v47  ;;  %v1955_v23 = vunpack.c.l.s8.bf16 %v1071_v0  ;;  %v1972_v8 = vunpack.c.h.s8.bf16 %v1071_v0  ;;  %v1240_v46 = vld [vmem:[%s8221_s18 + $0x1010] sm:$0xff]  ;;  %v2022_v47 = vunpack.c.l.s8.bf16 %v1104_v45  ;;  %v1258_v54 = vld [vmem:[%s8221_s18 + $0x10a0] sm:$0xff]  ;;  %v1257_v63 = vld [vmem:[%s8221_s18 + $0x1098] sm:$0xff] }
 0x266   : > { %v2548_v19 = vpop.f32.mrb[7].mxu1  ;;  %2849 = vmatprep.subr.bf16.mxu1 %v2193_v48  ;;  %v2546_v20 = vadd.f32 %v2545_v59, %v2505_v18  ;;  %v2294_v48 = vunpack.c.l.s8.bf16 %v1240_v46  ;;  %v2039_v57 = vunpack.c.h.s8.bf16 %v1104_v45  ;;  %v2311_v58 = vunpack.c.h.s8.bf16 %v1240_v46  ;;  %v1121_v18 = vld [vmem:[%s8221_s18 + $0xc58] sm:$0xff]  ;;  %v732_v0 = vld [vmem:[%s8221_s18 + $0x30] sm:$0xff] }
 0x267   : > { %v3858_v55 = vadd.f32 %v2544_v12, %v702_v60  ;;  %v2057_v59 = vunpack.c.l.s8.bf16 %v1122_v53  ;;  %v2329_v60 = vunpack.c.l.s8.bf16 %v1258_v54  ;;  %v2056_v6 = vunpack.c.l.s8.bf16 %v1121_v18  ;;  %v869_v14 = vld [vmem:[%s8221_s18 + $0x478] sm:$0xff] }
 0x268   : > { %v3859_v21 = vadd.f32 %v2546_v20, %v703_v13  ;;  %2809 = vmatpush1.bf16.msra.mxu0 %v1920_v7  ;;  %v2328_v7 = vunpack.c.l.s8.bf16 %v1257_v63  ;;  %v2346_v12 = vunpack.c.h.s8.bf16 %v1258_v54  ;;  %v733_v13 = vld [vmem:[%s8221_s18 + $0x38] sm:$0xff]  ;;  %v2073_v19 = vunpack.c.h.s8.bf16 %v1121_v18 }
 0x269   : > { %2850 = vmatpush1.bf16.msra.mxu1 %v2192_v11  ;;  %3875 = vst [vmem:[#allocation3] sm:$0xff] %v3858_v55  ;;  %2810 = vmatprep.subr.bf16.mxu0 %v1938_v17  ;;  %v2074_v11 = vunpack.c.h.s8.bf16 %v1122_v53  ;;  %v2345_v17 = vunpack.c.h.s8.bf16 %v1257_v63  ;;  %v1549_v20 = vunpack.c.l.s8.bf16 %v869_v14  ;;  %v1276_v55 = vunpack.c.l.s8.bf16 %v732_v0 }
 0x26a   : > { %2851 = vmatprep.subr.bf16.mxu1 %v2210_v1  ;;  %3876 = vst [vmem:[#allocation3 + $0x8] sm:$0xff] %v3859_v21  ;;  %v1277_v1 = vunpack.c.l.s8.bf16 %v733_v13  ;;  %v1548_v21 = vunpack.c.l.s8.bf16 %v868_v2  ;;  %v1293_v25 = vunpack.c.h.s8.bf16 %v732_v0 }
 0x26c   : > { %2811 = vmatpush1.bf16.msra.mxu0 %v1937_v4  ;;  %v1294_v4 = vunpack.c.h.s8.bf16 %v733_v13 }
 0x26d   : > { %2852 = vmatpush1.bf16.msra.mxu1 %v2209_v22  ;;  %2812 = vmatprep.subr.bf16.mxu0 %v1955_v23  ;;  %v1566_v22 = vunpack.c.h.s8.bf16 %v869_v14  ;;  %v750_v23 = vld [vmem:[%s8221_s18 + $0xc0] sm:$0xff] }
 0x26e   : > { %2853 = vmatprep.subr.bf16.mxu1 %v2227_v24  ;;  %v886_v24 = vld [vmem:[%s8221_s18 + $0x500] sm:$0xff] }
 0x270   : > { %2813 = vmatpush1.bf16.msra.mxu0 %v1954_v5  ;;  %v1311_v5 = vunpack.c.l.s8.bf16 %v750_v23 }
 0x271   : > { %2854 = vmatpush1.bf16.msra.mxu1 %v2226_v27  ;;  %2814 = vmatprep.subr.bf16.mxu0 %v1972_v8  ;;  %v1583_v27 = vunpack.c.l.s8.bf16 %v886_v24  ;;  %v749_v8 = vld [vmem:[%s8221_s18 + $0xb8] sm:$0xff] }
 0x272   : > { %2855 = vmatprep.subr.bf16.mxu1 %v2244_v9  ;;  %v885_v9 = vld [vmem:[%s8221_s18 + $0x4f8] sm:$0xff]  ;;  %v1310_v10 = vunpack.c.l.s8.bf16 %v749_v8  ;;  %v1327_v33 = vunpack.c.h.s8.bf16 %v749_v8 }
 0x273   : > { %v1582_v28 = vunpack.c.l.s8.bf16 %v885_v9  ;;  %v1599_v34 = vunpack.c.h.s8.bf16 %v885_v9 }
 0x274   : > { %2815 = vmatpush1.bf16.msra.mxu0 %v1971_v29  ;;  %v1328_v29 = vunpack.c.h.s8.bf16 %v750_v23 }
 0x275   : > { %2856 = vmatpush1.bf16.msra.mxu1 %v2243_v30  ;;  %2816 = vmatprep.subr.bf16.mxu0 %v1989_v31  ;;  %v1600_v30 = vunpack.c.h.s8.bf16 %v886_v24  ;;  %v767_v31 = vld [vmem:[%s8221_s18 + $0x148] sm:$0xff] }
 0x276   : > { %2857 = vmatprep.subr.bf16.mxu1 %v2261_v32  ;;  %v903_v32 = vld [vmem:[%s8221_s18 + $0x588] sm:$0xff] }
 0x278   : > { %2817 = vmatpush1.bf16.msra.mxu0 %v1988_v35  ;;  %v1345_v35 = vunpack.c.l.s8.bf16 %v767_v31 }
 0x279   : > { %2858 = vmatpush1.bf16.msra.mxu1 %v2260_v36  ;;  %2818 = vmatprep.subr.bf16.mxu0 %v2006_v37  ;;  %v1617_v36 = vunpack.c.l.s8.bf16 %v903_v32  ;;  %v766_v37 = vld [vmem:[%s8221_s18 + $0x140] sm:$0xff] }
 0x27a   : > { %2859 = vmatprep.subr.bf16.mxu1 %v2278_v38  ;;  %v902_v38 = vld [vmem:[%s8221_s18 + $0x580] sm:$0xff]  ;;  %v1344_v39 = vunpack.c.l.s8.bf16 %v766_v37  ;;  %v1361_v45 = vunpack.c.h.s8.bf16 %v766_v37 }
 0x27b   : > { %v1616_v40 = vunpack.c.l.s8.bf16 %v902_v38  ;;  %v1633_v46 = vunpack.c.h.s8.bf16 %v902_v38 }
 0x27c   : > { %2819 = vmatpush1.bf16.msra.mxu0 %v2005_v41  ;;  %v1362_v41 = vunpack.c.h.s8.bf16 %v767_v31 }
 0x27d   : > { %2860 = vmatpush1.bf16.msra.mxu1 %v2277_v42  ;;  %2820 = vmatprep.subr.bf16.mxu0 %v2023_v43  ;;  %v1634_v42 = vunpack.c.h.s8.bf16 %v903_v32  ;;  %v784_v43 = vld [vmem:[%s8221_s18 + $0x1d0] sm:$0xff] }
 0x27e   : > { %2861 = vmatprep.subr.bf16.mxu1 %v2295_v44  ;;  %v920_v44 = vld [vmem:[%s8221_s18 + $0x610] sm:$0xff]  ;;  %v1396_v13 = vunpack.c.h.s8.bf16 %v784_v43 }
 0x27f   : > { %v1668_v14 = vunpack.c.h.s8.bf16 %v920_v44 }
 0x280   : > { %2821 = vmatpush1.bf16.msra.mxu0 %v2022_v47  ;;  %v1379_v47 = vunpack.c.l.s8.bf16 %v784_v43 }
 0x281   : > { %2862 = vmatpush1.bf16.msra.mxu1 %v2294_v48  ;;  %2822 = vmatprep.subr.bf16.mxu0 %v2040_v49  ;;  %v1651_v48 = vunpack.c.l.s8.bf16 %v920_v44  ;;  %v783_v49 = vld [vmem:[%s8221_s18 + $0x1c8] sm:$0xff] }
 0x282   : > { %2863 = vmatprep.subr.bf16.mxu1 %v2312_v50  ;;  %v919_v50 = vld [vmem:[%s8221_s18 + $0x608] sm:$0xff] }
 0x284   : > { %2823 = vmatpush1.bf16.msra.mxu0 %v2039_v57 }
 0x285   : > { %2864 = vmatpush1.bf16.msra.mxu1 %v2311_v58  ;;  %2824 = vmatprep.subr.bf16.mxu0 %v2057_v59 }
 0x286   : > { %2865 = vmatprep.subr.bf16.mxu1 %v2329_v60 }
 0x288   : > { %2825 = vmatpush1.bf16.msra.mxu0 %v2056_v6  ;;  %v1378_v6 = vunpack.c.l.s8.bf16 %v783_v49 }
 0x289   : > { %2866 = vmatpush1.bf16.msra.mxu1 %v2328_v7  ;;  %2826 = vmatprep.subr.bf16.mxu0 %v2074_v11  ;;  %v1650_v7 = vunpack.c.l.s8.bf16 %v919_v50 }
 0x28a   : > { %2867 = vmatprep.subr.bf16.mxu1 %v2346_v12 }
 0x28c   : > { %2827 = vmatpush1.bf16.msra.mxu0 %v2073_v19  ;;  %v801_v19 = vld [vmem:[%s8221_s18 + $0x258] sm:$0xff] }
 0x28d   : > { %2868 = vmatpush1.bf16.msra.mxu1 %v2345_v17  ;;  %2878 = vmatprep.subr.bf16.mxu0 %v1277_v1  ;;  %v937_v17 = vld [vmem:[%s8221_s18 + $0x698] sm:$0xff]  ;;  %v1395_v1 = vunpack.c.h.s8.bf16 %v783_v49  ;;  %v1413_v0 = vunpack.c.l.s8.bf16 %v801_v19  ;;  %v1430_v23 = vunpack.c.h.s8.bf16 %v801_v19  ;;  %v1004_v19 = vld [vmem:[%s8221_s18 + $0x8b0] sm:$0xff] }
 0x28e   : > { %2919 = vmatprep.subr.bf16.mxu1 %v1549_v20  ;;  %v1667_v20 = vunpack.c.h.s8.bf16 %v919_v50  ;;  %v1685_v2 = vunpack.c.l.s8.bf16 %v937_v17  ;;  %v1702_v24 = vunpack.c.h.s8.bf16 %v937_v17  ;;  %v1140_v17 = vld [vmem:[%s8221_s18 + $0xcf0] sm:$0xff] }
 0x28f   : > { %2829 = vmatmul.mubr.bf16.vlgmr.msra.gmra.mrb[20].mxu0 %v8561_v51 }
 0x290   : > { %2870 = vmatmul.mubr.bf16.vlgmr.msra.gmra.mrb[20].mxu1 %v8565_v52  ;;  %2879 = vmatpush1.bf16.msra.mxu0 %v1276_v55  ;;  %v800_v55 = vld [vmem:[%s8221_s18 + $0x250] sm:$0xff] }
 0x291   : > { %2920 = vmatpush1.bf16.msra.mxu1 %v1548_v21  ;;  %2880 = vmatprep.subr.bf16.mxu0 %v1294_v4  ;;  %v936_v21 = vld [vmem:[%s8221_s18 + $0x690] sm:$0xff]  ;;  %v1412_v4 = vunpack.c.l.s8.bf16 %v800_v55 }
 0x292   : > { %2921 = vmatprep.subr.bf16.mxu1 %v1566_v22  ;;  %2910 = vmatprep.mubr.bf16.mxu0 %v8469_v61  ;;  %v1684_v22 = vunpack.c.l.s8.bf16 %v936_v21 }
 0x293   : > { %2951 = vmatprep.mubr.bf16.mxu1 %v8473_v62 }
 0x294   : > { %2881 = vmatpush1.bf16.msra.mxu0 %v1293_v25  ;;  %v818_v25 = vld [vmem:[%s8221_s18 + $0x2e0] sm:$0xff] }
 0x295   : > { %2922 = vmatpush1.bf16.msra.mxu1 %v1565_v26  ;;  %2882 = vmatprep.subr.bf16.mxu0 %v1311_v5  ;;  %v954_v26 = vld [vmem:[%s8221_s18 + $0x720] sm:$0xff]  ;;  %v1429_v5 = vunpack.c.h.s8.bf16 %v800_v55  ;;  %v1447_v8 = vunpack.c.l.s8.bf16 %v818_v25  ;;  %v1464_v31 = vunpack.c.h.s8.bf16 %v818_v25  ;;  %v1021_v25 = vld [vmem:[%s8221_s18 + $0x938] sm:$0xff] }
 0x296   : > { %2923 = vmatprep.subr.bf16.mxu1 %v1583_v27  ;;  %v1701_v27 = vunpack.c.h.s8.bf16 %v936_v21  ;;  %v1719_v9 = vunpack.c.l.s8.bf16 %v954_v26  ;;  %v1736_v32 = vunpack.c.h.s8.bf16 %v954_v26  ;;  %v1022_v55 = vld [vmem:[%s8221_s18 + $0x940] sm:$0xff]  ;;  %v1157_v26 = vld [vmem:[%s8221_s18 + $0xd78] sm:$0xff] }
 0x297   : > { %v1158_v21 = vld [vmem:[%s8221_s18 + $0xd80] sm:$0xff] }
 0x298   : > { %2883 = vmatpush1.bf16.msra.mxu0 %v1310_v10  ;;  %v817_v10 = vld [vmem:[%s8221_s18 + $0x2d8] sm:$0xff] }
 0x299   : > { %2924 = vmatpush1.bf16.msra.mxu1 %v1582_v28  ;;  %2884 = vmatprep.subr.bf16.mxu0 %v1328_v29  ;;  %v953_v28 = vld [vmem:[%s8221_s18 + $0x718] sm:$0xff]  ;;  %v1446_v29 = vunpack.c.l.s8.bf16 %v817_v10 }
 0x29a   : > { %2925 = vmatprep.subr.bf16.mxu1 %v1600_v30  ;;  %v1718_v30 = vunpack.c.l.s8.bf16 %v953_v28 }
 0x29c   : > { %2885 = vmatpush1.bf16.msra.mxu0 %v1327_v33  ;;  %v835_v33 = vld [vmem:[%s8221_s18 + $0x368] sm:$0xff] }
 0x29d   : > { %2926 = vmatpush1.bf16.msra.mxu1 %v1599_v34  ;;  %2886 = vmatprep.subr.bf16.mxu0 %v1345_v35  ;;  %v971_v34 = vld [vmem:[%s8221_s18 + $0x7a8] sm:$0xff]  ;;  %v1463_v35 = vunpack.c.h.s8.bf16 %v817_v10  ;;  %v1481_v37 = vunpack.c.l.s8.bf16 %v835_v33  ;;  %v1498_v43 = vunpack.c.h.s8.bf16 %v835_v33  ;;  %v1038_v33 = vld [vmem:[%s8221_s18 + $0x9c0] sm:$0xff] }
 0x29e   : > { %2927 = vmatprep.subr.bf16.mxu1 %v1617_v36  ;;  %v1735_v36 = vunpack.c.h.s8.bf16 %v953_v28  ;;  %v1753_v38 = vunpack.c.l.s8.bf16 %v971_v34  ;;  %v1770_v44 = vunpack.c.h.s8.bf16 %v971_v34  ;;  %v1039_v10 = vld [vmem:[%s8221_s18 + $0x9c8] sm:$0xff]  ;;  %v1174_v34 = vld [vmem:[%s8221_s18 + $0xe00] sm:$0xff] }
 0x29f   : > { %v1175_v28 = vld [vmem:[%s8221_s18 + $0xe08] sm:$0xff] }
 0x2a0   : > { %2887 = vmatpush1.bf16.msra.mxu0 %v1344_v39  ;;  %v834_v39 = vld [vmem:[%s8221_s18 + $0x360] sm:$0xff] }
 0x2a1   : > { %2928 = vmatpush1.bf16.msra.mxu1 %v1616_v40  ;;  %2888 = vmatprep.subr.bf16.mxu0 %v1362_v41  ;;  %v970_v40 = vld [vmem:[%s8221_s18 + $0x7a0] sm:$0xff]  ;;  %v1480_v41 = vunpack.c.l.s8.bf16 %v834_v39 }
 0x2a2   : > { %2929 = vmatprep.subr.bf16.mxu1 %v1634_v42  ;;  %v2584_v53 = vpop.f32.mrb[8].mxu0  ;;  %v1752_v42 = vunpack.c.l.s8.bf16 %v970_v40 }
 0x2a3   : > { %v2625_v54 = vpop.f32.mrb[8].mxu1  ;;  %v2586_v58 = vpop.f32.mrb[9].mxu0 }
 0x2a4   : > { %v8733_v57 = vadd.f32 %v2625_v54, %v2584_v53  ;;  %v2627_v59 = vpop.f32.mrb[9].mxu1  ;;  %v2588_v18 = vpop.f32.mrb[10].mxu0  ;;  %2889 = vmatpush1.bf16.msra.mxu0 %v1361_v45  ;;  %v852_v45 = vld [vmem:[%s8221_s18 + $0x3f0] sm:$0xff]  ;;  %v851_v53 = vld [vmem:[%s8221_s18 + $0x3e8] sm:$0xff] }
 0x2a5   : > { %v8735_v60 = vadd.f32 %v2627_v59, %v2586_v58  ;;  %v2629_v63 = vpop.f32.mrb[10].mxu1  ;;  %2930 = vmatpush1.bf16.msra.mxu1 %v1633_v46  ;;  %v2589_v11 = vpop.f32.mrb[11].mxu0  ;;  %2890 = vmatprep.subr.bf16.mxu0 %v1379_v47  ;;  %v988_v46 = vld [vmem:[%s8221_s18 + $0x830] sm:$0xff]  ;;  %v1497_v47 = vunpack.c.h.s8.bf16 %v834_v39  ;;  %v1515_v49 = vunpack.c.l.s8.bf16 %v852_v45  ;;  %v987_v54 = vld [vmem:[%s8221_s18 + $0x828] sm:$0xff]  ;;  %v1514_v58 = vunpack.c.l.s8.bf16 %v851_v53 }
 0x2a6   : > { %v2630_v12 = vpop.f32.mrb[11].mxu1  ;;  %2931 = vmatprep.subr.bf16.mxu1 %v1651_v48  ;;  %v1769_v48 = vunpack.c.h.s8.bf16 %v970_v40  ;;  %v1787_v50 = vunpack.c.l.s8.bf16 %v988_v46  ;;  %v1786_v59 = vunpack.c.l.s8.bf16 %v987_v54  ;;  %v1532_v18 = vunpack.c.h.s8.bf16 %v852_v45  ;;  %v1056_v39 = vld [vmem:[%s8221_s18 + $0xa50] sm:$0xff]  ;;  %v1055_v45 = vld [vmem:[%s8221_s18 + $0xa48] sm:$0xff] }
 0x2a7   : > { %v1804_v63 = vunpack.c.h.s8.bf16 %v988_v46  ;;  %v1531_v11 = vunpack.c.h.s8.bf16 %v851_v53  ;;  %v1803_v12 = vunpack.c.h.s8.bf16 %v987_v54  ;;  %v1192_v40 = vld [vmem:[%s8221_s18 + $0xe90] sm:$0xff]  ;;  %v1191_v46 = vld [vmem:[%s8221_s18 + $0xe88] sm:$0xff] }
 0x2a8   : > { %2891 = vmatpush1.bf16.msra.mxu0 %v1378_v6  ;;  %v1005_v6 = vld [vmem:[%s8221_s18 + $0x8b8] sm:$0xff]  ;;  %v704_v54 = vld [vmem:[#allocation3 + $0x10] sm:$0xff] }
 0x2a9   : > { %2932 = vmatpush1.bf16.msra.mxu1 %v1650_v7  ;;  %2892 = vmatprep.subr.bf16.mxu0 %v1396_v13  ;;  %v1141_v7 = vld [vmem:[%s8221_s18 + $0xcf8] sm:$0xff]  ;;  %v1821_v13 = vunpack.c.l.s8.bf16 %v1005_v6 }
 0x2aa   : > { %2933 = vmatprep.subr.bf16.mxu1 %v1668_v14  ;;  %v2093_v14 = vunpack.c.l.s8.bf16 %v1141_v7 }
 0x2ac   : > { %2893 = vmatpush1.bf16.msra.mxu0 %v1395_v1  ;;  %v1820_v1 = vunpack.c.l.s8.bf16 %v1004_v19 }
 0x2ad   : > { %2934 = vmatpush1.bf16.msra.mxu1 %v1667_v20  ;;  %2894 = vmatprep.subr.bf16.mxu0 %v1413_v0  ;;  %v2092_v20 = vunpack.c.l.s8.bf16 %v1140_v17  ;;  %v1838_v0 = vunpack.c.h.s8.bf16 %v1005_v6  ;;  %v2194_v6 = vunpack.c.l.s8.bf16 %v1191_v46 }
 0x2ae   : > { %2935 = vmatprep.subr.bf16.mxu1 %v1685_v2  ;;  %v2110_v2 = vunpack.c.h.s8.bf16 %v1141_v7 }
 0x2b0   : > { %2895 = vmatpush1.bf16.msra.mxu0 %v1412_v4  ;;  %v1837_v4 = vunpack.c.h.s8.bf16 %v1004_v19 }
 0x2b1   : > { %2936 = vmatpush1.bf16.msra.mxu1 %v1684_v22  ;;  %2896 = vmatprep.subr.bf16.mxu0 %v1430_v23  ;;  %v2109_v22 = vunpack.c.h.s8.bf16 %v1140_v17  ;;  %v1855_v23 = vunpack.c.l.s8.bf16 %v1022_v55  ;;  %v1209_v17 = vld [vmem:[%s8221_s18 + $0xf18] sm:$0xff] }
 0x2b2   : > { %2937 = vmatprep.subr.bf16.mxu1 %v1702_v24  ;;  %v2127_v24 = vunpack.c.l.s8.bf16 %v1158_v21 }
 0x2b4   : > { %2897 = vmatpush1.bf16.msra.mxu0 %v1429_v5  ;;  %v1854_v5 = vunpack.c.l.s8.bf16 %v1021_v25 }
 0x2b5   : > { %2938 = vmatpush1.bf16.msra.mxu1 %v1701_v27  ;;  %2898 = vmatprep.subr.bf16.mxu0 %v1447_v8  ;;  %v2126_v27 = vunpack.c.l.s8.bf16 %v1157_v26  ;;  %v1872_v8 = vunpack.c.h.s8.bf16 %v1022_v55 }
 0x2b6   : > { %2939 = vmatprep.subr.bf16.mxu1 %v1719_v9  ;;  %v2144_v9 = vunpack.c.h.s8.bf16 %v1158_v21  ;;  %v2229_v21 = vunpack.c.l.s8.bf16 %v1209_v17 }
 0x2b8   : > { %2899 = vmatpush1.bf16.msra.mxu0 %v1446_v29  ;;  %v1871_v29 = vunpack.c.h.s8.bf16 %v1021_v25 }
 0x2b9   : > { %2940 = vmatpush1.bf16.msra.mxu1 %v1718_v30  ;;  %2900 = vmatprep.subr.bf16.mxu0 %v1464_v31  ;;  %v2143_v30 = vunpack.c.h.s8.bf16 %v1157_v26  ;;  %v1889_v31 = vunpack.c.l.s8.bf16 %v1039_v10  ;;  %v2246_v26 = vunpack.c.h.s8.bf16 %v1209_v17  ;;  %v870_v17 = vld [vmem:[%s8221_s18 + $0x480] sm:$0xff] }
 0x2ba   : > { %2941 = vmatprep.subr.bf16.mxu1 %v1736_v32  ;;  %v2161_v32 = vunpack.c.l.s8.bf16 %v1175_v28 }
 0x2bc   : > { %2901 = vmatpush1.bf16.msra.mxu0 %v1463_v35  ;;  %v1888_v35 = vunpack.c.l.s8.bf16 %v1038_v33 }
 0x2bd   : > { %2942 = vmatpush1.bf16.msra.mxu1 %v1735_v36  ;;  %2902 = vmatprep.subr.bf16.mxu0 %v1481_v37  ;;  %v2160_v36 = vunpack.c.l.s8.bf16 %v1174_v34  ;;  %v1906_v37 = vunpack.c.h.s8.bf16 %v1039_v10 }
 0x2be   : > { %2943 = vmatprep.subr.bf16.mxu1 %v1753_v38  ;;  %v2178_v38 = vunpack.c.h.s8.bf16 %v1175_v28 }
 0x2c0   : > { %2903 = vmatpush1.bf16.msra.mxu0 %v1480_v41  ;;  %v1905_v41 = vunpack.c.h.s8.bf16 %v1038_v33 }
 0x2c1   : > { %2944 = vmatpush1.bf16.msra.mxu1 %v1752_v42  ;;  %2904 = vmatprep.subr.bf16.mxu0 %v1498_v43  ;;  %v2177_v42 = vunpack.c.h.s8.bf16 %v1174_v34  ;;  %v1923_v43 = vunpack.c.l.s8.bf16 %v1056_v39 }
 0x2c2   : > { %2945 = vmatprep.subr.bf16.mxu1 %v1770_v44  ;;  %v2195_v44 = vunpack.c.l.s8.bf16 %v1192_v40 }
 0x2c4   : > { %2905 = vmatpush1.bf16.msra.mxu0 %v1497_v47 }
 0x2c5   : > { %2946 = vmatpush1.bf16.msra.mxu1 %v1769_v48  ;;  %2906 = vmatprep.subr.bf16.mxu0 %v1515_v49 }
 0x2c6   : > { %2947 = vmatprep.subr.bf16.mxu1 %v1787_v50 }
 0x2c8   : > { %2907 = vmatpush1.bf16.msra.mxu0 %v1514_v58 }
 0x2c9   : > { %2948 = vmatpush1.bf16.msra.mxu1 %v1786_v59  ;;  %2908 = vmatprep.subr.bf16.mxu0 %v1532_v18 }
 0x2ca   : > { %2949 = vmatprep.subr.bf16.mxu1 %v1804_v63  ;;  %v1922_v63 = vunpack.c.l.s8.bf16 %v1055_v45 }
 0x2cc   : > { %2909 = vmatpush1.bf16.msra.mxu0 %v1531_v11  ;;  %v705_v11 = vld [vmem:[#allocation3 + $0x18] sm:$0xff] }
 0x2cd   : > { %2950 = vmatpush1.bf16.msra.mxu1 %v1803_v12  ;;  %2960 = vmatprep.subr.bf16.mxu0 %v1821_v13 }
 0x2ce   : > { %3001 = vmatprep.subr.bf16.mxu1 %v2093_v14  ;;  %v2212_v14 = vunpack.c.h.s8.bf16 %v1192_v40 }
 0x2cf   : > { %2911 = vmatmul.mubr.bf16.vlgmr.msra.gmra.mrb[24].mxu0 %v8503_v15 }
 0x2d0   : > { %2952 = vmatmul.mubr.bf16.vlgmr.msra.gmra.mrb[24].mxu1 %v8507_v16  ;;  %2961 = vmatpush1.bf16.msra.mxu0 %v1820_v1 }
 0x2d1   : > { %3002 = vmatpush1.bf16.msra.mxu1 %v2092_v20  ;;  %2962 = vmatprep.subr.bf16.mxu0 %v1838_v0  ;;  %v1939_v0 = vunpack.c.h.s8.bf16 %v1055_v45 }
 0x2d2   : > { %3003 = vmatprep.subr.bf16.mxu1 %v2110_v2  ;;  %2992 = vmatprep.mubr.bf16.mxu0 %v8519_v56  ;;  %v2211_v2 = vunpack.c.h.s8.bf16 %v1191_v46 }
 0x2d3   : > { %3033 = vmatprep.mubr.bf16.mxu1 %v8523_v3 }
 0x2d4   : > { %2963 = vmatpush1.bf16.msra.mxu0 %v1837_v4  ;;  %v1072_v4 = vld [vmem:[%s8221_s18 + $0xad0] sm:$0xff] }
 0x2d5   : > { %3004 = vmatpush1.bf16.msra.mxu1 %v2109_v22  ;;  %2964 = vmatprep.subr.bf16.mxu0 %v1855_v23  ;;  %v1208_v22 = vld [vmem:[%s8221_s18 + $0xf10] sm:$0xff]  ;;  %v1956_v23 = vunpack.c.l.s8.bf16 %v1072_v4 }
 0x2d6   : > { %3005 = vmatprep.subr.bf16.mxu1 %v2127_v24  ;;  %v2228_v24 = vunpack.c.l.s8.bf16 %v1208_v22 }
 0x2d8   : > { %2965 = vmatpush1.bf16.msra.mxu0 %v1854_v5  ;;  %v1090_v5 = vld [vmem:[%s8221_s18 + $0xb60] sm:$0xff] }
 0x2d9   : > { %3006 = vmatpush1.bf16.msra.mxu1 %v2126_v27  ;;  %2966 = vmatprep.subr.bf16.mxu0 %v1872_v8  ;;  %v1226_v27 = vld [vmem:[%s8221_s18 + $0xfa0] sm:$0xff]  ;;  %v1973_v8 = vunpack.c.h.s8.bf16 %v1072_v4  ;;  %v1991_v10 = vunpack.c.l.s8.bf16 %v1090_v5  ;;  %v2008_v33 = vunpack.c.h.s8.bf16 %v1090_v5 }
 0x2da   : > { %3007 = vmatprep.subr.bf16.mxu1 %v2144_v9  ;;  %v2245_v9 = vunpack.c.h.s8.bf16 %v1208_v22  ;;  %v2263_v28 = vunpack.c.l.s8.bf16 %v1226_v27  ;;  %v2280_v34 = vunpack.c.h.s8.bf16 %v1226_v27  ;;  %v1567_v22 = vunpack.c.h.s8.bf16 %v870_v17 }
 0x2dc   : > { %2967 = vmatpush1.bf16.msra.mxu0 %v1871_v29  ;;  %v1089_v29 = vld [vmem:[%s8221_s18 + $0xb58] sm:$0xff] }
 0x2dd   : > { %3008 = vmatpush1.bf16.msra.mxu1 %v2143_v30  ;;  %2968 = vmatprep.subr.bf16.mxu0 %v1889_v31  ;;  %v1225_v30 = vld [vmem:[%s8221_s18 + $0xf98] sm:$0xff]  ;;  %v1990_v31 = vunpack.c.l.s8.bf16 %v1089_v29 }
 0x2de   : > { %3009 = vmatprep.subr.bf16.mxu1 %v2161_v32  ;;  %v2262_v32 = vunpack.c.l.s8.bf16 %v1225_v30 }
 0x2e0   : > { %2969 = vmatpush1.bf16.msra.mxu0 %v1888_v35  ;;  %v1107_v35 = vld [vmem:[%s8221_s18 + $0xbe8] sm:$0xff] }
 0x2e1   : > { %3010 = vmatpush1.bf16.msra.mxu1 %v2160_v36  ;;  %2970 = vmatprep.subr.bf16.mxu0 %v1906_v37  ;;  %v1243_v36 = vld [vmem:[%s8221_s18 + $0x1028] sm:$0xff]  ;;  %v2007_v37 = vunpack.c.h.s8.bf16 %v1089_v29  ;;  %v2042_v45 = vunpack.c.h.s8.bf16 %v1107_v35 }
 0x2e2   : > { %3011 = vmatprep.subr.bf16.mxu1 %v2178_v38  ;;  %v2666_v47 = vpop.f32.mrb[12].mxu0  ;;  %v2279_v38 = vunpack.c.h.s8.bf16 %v1225_v30  ;;  %v2297_v40 = vunpack.c.l.s8.bf16 %v1243_v36  ;;  %v2314_v46 = vunpack.c.h.s8.bf16 %v1243_v36 }
 0x2e3   : > { %v2707_v48 = vpop.f32.mrb[12].mxu1  ;;  %v2667_v49 = vadd.f32 %v2666_v47, %v8733_v57  ;;  %v2668_v50 = vpop.f32.mrb[13].mxu0  ;;  %v1940_v57 = vunpack.c.h.s8.bf16 %v1056_v39  ;;  %v2025_v39 = vunpack.c.l.s8.bf16 %v1107_v35  ;;  %v1124_v47 = vld [vmem:[%s8221_s18 + $0xc70] sm:$0xff] }
 0x2e4   : > { %v2709_v53 = vpop.f32.mrb[13].mxu1  ;;  %v2669_v58 = vadd.f32 %v2668_v50, %v8735_v60  ;;  %v2670_v59 = vpop.f32.mrb[14].mxu0  ;;  %2971 = vmatpush1.bf16.msra.mxu0 %v1905_v41  ;;  %v1073_v60 = vld [vmem:[%s8221_s18 + $0xad8] sm:$0xff]  ;;  %v1106_v41 = vld [vmem:[%s8221_s18 + $0xbe0] sm:$0xff] }
 0x2e5   : > { %v2711_v18 = vpop.f32.mrb[14].mxu1  ;;  %3012 = vmatpush1.bf16.msra.mxu1 %v2177_v42  ;;  %v2708_v7 = vadd.f32 %v2707_v48, %v2667_v49  ;;  %v2671_v12 = vpop.f32.mrb[15].mxu0  ;;  %2972 = vmatprep.subr.bf16.mxu0 %v1923_v43  ;;  %v1957_v55 = vunpack.c.l.s8.bf16 %v1073_v60  ;;  %v1974_v25 = vunpack.c.h.s8.bf16 %v1073_v60  ;;  %v1242_v42 = vld [vmem:[%s8221_s18 + $0x1020] sm:$0xff]  ;;  %v2024_v43 = vunpack.c.l.s8.bf16 %v1106_v41  ;;  %v1260_v48 = vld [vmem:[%s8221_s18 + $0x10b0] sm:$0xff]  ;;  %v1259_v59 = vld [vmem:[%s8221_s18 + $0x10a8] sm:$0xff] }
 0x2e6   : > { %v2712_v13 = vpop.f32.mrb[15].mxu1  ;;  %3013 = vmatprep.subr.bf16.mxu1 %v2195_v44  ;;  %v2710_v19 = vadd.f32 %v2709_v53, %v2669_v58  ;;  %v2296_v44 = vunpack.c.l.s8.bf16 %v1242_v42  ;;  %v2041_v49 = vunpack.c.h.s8.bf16 %v1106_v41  ;;  %v2313_v50 = vunpack.c.h.s8.bf16 %v1242_v42  ;;  %v1123_v58 = vld [vmem:[%s8221_s18 + $0xc68] sm:$0xff]  ;;  %v734_v60 = vld [vmem:[%s8221_s18 + $0x40] sm:$0xff] }
 0x2e7   : > { %v3860_v1 = vadd.f32 %v2708_v7, %v704_v54  ;;  %v2059_v53 = vunpack.c.l.s8.bf16 %v1124_v47  ;;  %v2331_v54 = vunpack.c.l.s8.bf16 %v1260_v48  ;;  %v2058_v18 = vunpack.c.l.s8.bf16 %v1123_v58  ;;  %v871_v12 = vld [vmem:[%s8221_s18 + $0x488] sm:$0xff] }
 0x2e8   : > { %v3861_v20 = vadd.f32 %v2710_v19, %v705_v11  ;;  %2973 = vmatpush1.bf16.msra.mxu0 %v1922_v63  ;;  %v2330_v63 = vunpack.c.l.s8.bf16 %v1259_v59  ;;  %v2348_v7 = vunpack.c.h.s8.bf16 %v1260_v48  ;;  %v735_v11 = vld [vmem:[%s8221_s18 + $0x48] sm:$0xff]  ;;  %v2075_v13 = vunpack.c.h.s8.bf16 %v1123_v58 }
 0x2e9   : > { %3014 = vmatpush1.bf16.msra.mxu1 %v2194_v6  ;;  %3877 = vst [vmem:[#allocation3 + $0x10] sm:$0xff] %v3860_v1  ;;  %2974 = vmatprep.subr.bf16.mxu0 %v1940_v57  ;;  %v2076_v6 = vunpack.c.h.s8.bf16 %v1124_v47  ;;  %v2347_v57 = vunpack.c.h.s8.bf16 %v1259_v59  ;;  %v1551_v19 = vunpack.c.l.s8.bf16 %v871_v12  ;;  %v1278_v1 = vunpack.c.l.s8.bf16 %v734_v60 }
 0x2ea   : > { %3015 = vmatprep.subr.bf16.mxu1 %v2212_v14  ;;  %3878 = vst [vmem:[#allocation3 + $0x18] sm:$0xff] %v3861_v20  ;;  %v1279_v14 = vunpack.c.l.s8.bf16 %v735_v11  ;;  %v1550_v20 = vunpack.c.l.s8.bf16 %v870_v17  ;;  %v1295_v4 = vunpack.c.h.s8.bf16 %v734_v60 }
 0x2ec   : > { %2975 = vmatpush1.bf16.msra.mxu0 %v1939_v0  ;;  %v1296_v0 = vunpack.c.h.s8.bf16 %v735_v11 }
 0x2ed   : > { %3016 = vmatpush1.bf16.msra.mxu1 %v2211_v2  ;;  %2976 = vmatprep.subr.bf16.mxu0 %v1957_v55  ;;  %v1568_v2 = vunpack.c.h.s8.bf16 %v871_v12  ;;  %v752_v55 = vld [vmem:[%s8221_s18 + $0xd0] sm:$0xff] }
 0x2ee   : > { %3017 = vmatprep.subr.bf16.mxu1 %v2229_v21  ;;  %v888_v21 = vld [vmem:[%s8221_s18 + $0x510] sm:$0xff] }
 0x2f0   : > { %2977 = vmatpush1.bf16.msra.mxu0 %v1956_v23  ;;  %v1313_v23 = vunpack.c.l.s8.bf16 %v752_v55 }
 0x2f1   : > { %3018 = vmatpush1.bf16.msra.mxu1 %v2228_v24  ;;  %2978 = vmatprep.subr.bf16.mxu0 %v1974_v25  ;;  %v1585_v24 = vunpack.c.l.s8.bf16 %v888_v21  ;;  %v751_v25 = vld [vmem:[%s8221_s18 + $0xc8] sm:$0xff] }
 0x2f2   : > { %3019 = vmatprep.subr.bf16.mxu1 %v2246_v26  ;;  %v887_v26 = vld [vmem:[%s8221_s18 + $0x508] sm:$0xff]  ;;  %v1312_v5 = vunpack.c.l.s8.bf16 %v751_v25  ;;  %v1329_v29 = vunpack.c.h.s8.bf16 %v751_v25 }
 0x2f3   : > { %v1584_v27 = vunpack.c.l.s8.bf16 %v887_v26  ;;  %v1601_v30 = vunpack.c.h.s8.bf16 %v887_v26 }
 0x2f4   : > { %2979 = vmatpush1.bf16.msra.mxu0 %v1973_v8  ;;  %v1330_v8 = vunpack.c.h.s8.bf16 %v752_v55 }
 0x2f5   : > { %3020 = vmatpush1.bf16.msra.mxu1 %v2245_v9  ;;  %2980 = vmatprep.subr.bf16.mxu0 %v1991_v10  ;;  %v1602_v9 = vunpack.c.h.s8.bf16 %v888_v21  ;;  %v769_v10 = vld [vmem:[%s8221_s18 + $0x158] sm:$0xff] }
 0x2f6   : > { %3021 = vmatprep.subr.bf16.mxu1 %v2263_v28  ;;  %v905_v28 = vld [vmem:[%s8221_s18 + $0x598] sm:$0xff] }
 0x2f8   : > { %2981 = vmatpush1.bf16.msra.mxu0 %v1990_v31  ;;  %v1347_v31 = vunpack.c.l.s8.bf16 %v769_v10 }
 0x2f9   : > { %3022 = vmatpush1.bf16.msra.mxu1 %v2262_v32  ;;  %2982 = vmatprep.subr.bf16.mxu0 %v2008_v33  ;;  %v1619_v32 = vunpack.c.l.s8.bf16 %v905_v28  ;;  %v768_v33 = vld [vmem:[%s8221_s18 + $0x150] sm:$0xff] }
 0x2fa   : > { %3023 = vmatprep.subr.bf16.mxu1 %v2280_v34  ;;  %v904_v34 = vld [vmem:[%s8221_s18 + $0x590] sm:$0xff]  ;;  %v1346_v35 = vunpack.c.l.s8.bf16 %v768_v33  ;;  %v1363_v41 = vunpack.c.h.s8.bf16 %v768_v33 }
 0x2fb   : > { %v1618_v36 = vunpack.c.l.s8.bf16 %v904_v34  ;;  %v1635_v42 = vunpack.c.h.s8.bf16 %v904_v34 }
 0x2fc   : > { %2983 = vmatpush1.bf16.msra.mxu0 %v2007_v37  ;;  %v1364_v37 = vunpack.c.h.s8.bf16 %v769_v10 }
 0x2fd   : > { %3024 = vmatpush1.bf16.msra.mxu1 %v2279_v38  ;;  %2984 = vmatprep.subr.bf16.mxu0 %v2025_v39  ;;  %v1636_v38 = vunpack.c.h.s8.bf16 %v905_v28  ;;  %v786_v39 = vld [vmem:[%s8221_s18 + $0x1e0] sm:$0xff] }
 0x2fe   : > { %3025 = vmatprep.subr.bf16.mxu1 %v2297_v40  ;;  %v922_v40 = vld [vmem:[%s8221_s18 + $0x620] sm:$0xff]  ;;  %v1398_v11 = vunpack.c.h.s8.bf16 %v786_v39 }
 0x2ff   : > { %v1670_v12 = vunpack.c.h.s8.bf16 %v922_v40 }
 0x300   : > { %2985 = vmatpush1.bf16.msra.mxu0 %v2024_v43  ;;  %v1381_v43 = vunpack.c.l.s8.bf16 %v786_v39 }
 0x301   : > { %3026 = vmatpush1.bf16.msra.mxu1 %v2296_v44  ;;  %2986 = vmatprep.subr.bf16.mxu0 %v2042_v45  ;;  %v1653_v44 = vunpack.c.l.s8.bf16 %v922_v40  ;;  %v785_v45 = vld [vmem:[%s8221_s18 + $0x1d8] sm:$0xff] }
 0x302   : > { %3027 = vmatprep.subr.bf16.mxu1 %v2314_v46  ;;  %v921_v46 = vld [vmem:[%s8221_s18 + $0x618] sm:$0xff] }
 0x304   : > { %2987 = vmatpush1.bf16.msra.mxu0 %v2041_v49 }
 0x305   : > { %3028 = vmatpush1.bf16.msra.mxu1 %v2313_v50  ;;  %2988 = vmatprep.subr.bf16.mxu0 %v2059_v53 }
 0x306   : > { %3029 = vmatprep.subr.bf16.mxu1 %v2331_v54 }
 0x308   : > { %2989 = vmatpush1.bf16.msra.mxu0 %v2058_v18  ;;  %v1380_v18 = vunpack.c.l.s8.bf16 %v785_v45 }
 0x309   : > { %3030 = vmatpush1.bf16.msra.mxu1 %v2330_v63  ;;  %2990 = vmatprep.subr.bf16.mxu0 %v2076_v6  ;;  %v1652_v63 = vunpack.c.l.s8.bf16 %v921_v46 }
 0x30a   : > { %3031 = vmatprep.subr.bf16.mxu1 %v2348_v7 }
 0x30c   : > { %2991 = vmatpush1.bf16.msra.mxu0 %v2075_v13  ;;  %v803_v13 = vld [vmem:[%s8221_s18 + $0x268] sm:$0xff] }
 0x30d   : > { %3032 = vmatpush1.bf16.msra.mxu1 %v2347_v57  ;;  %3042 = vmatprep.subr.bf16.mxu0 %v1279_v14  ;;  %v939_v57 = vld [vmem:[%s8221_s18 + $0x6a8] sm:$0xff]  ;;  %v1397_v14 = vunpack.c.h.s8.bf16 %v785_v45  ;;  %v1415_v60 = vunpack.c.l.s8.bf16 %v803_v13  ;;  %v1432_v55 = vunpack.c.h.s8.bf16 %v803_v13  ;;  %v1006_v13 = vld [vmem:[%s8221_s18 + $0x8c0] sm:$0xff] }
 0x30e   : > { %3083 = vmatprep.subr.bf16.mxu1 %v1551_v19  ;;  %v1669_v19 = vunpack.c.h.s8.bf16 %v921_v46  ;;  %v1687_v17 = vunpack.c.l.s8.bf16 %v939_v57  ;;  %v1704_v21 = vunpack.c.h.s8.bf16 %v939_v57  ;;  %v1142_v57 = vld [vmem:[%s8221_s18 + $0xd00] sm:$0xff] }
 0x30f   : > { %2993 = vmatmul.mubr.bf16.vlgmr.msra.gmra.mrb[28].mxu0 %v8561_v51 }
 0x310   : > { %3034 = vmatmul.mubr.bf16.vlgmr.msra.gmra.mrb[28].mxu1 %v8565_v52  ;;  %3043 = vmatpush1.bf16.msra.mxu0 %v1278_v1  ;;  %v802_v1 = vld [vmem:[%s8221_s18 + $0x260] sm:$0xff] }
 0x311   : > { %3084 = vmatpush1.bf16.msra.mxu1 %v1550_v20  ;;  %3044 = vmatprep.subr.bf16.mxu0 %v1296_v0  ;;  %v938_v20 = vld [vmem:[%s8221_s18 + $0x6a0] sm:$0xff]  ;;  %v1414_v0 = vunpack.c.l.s8.bf16 %v802_v1 }
 0x312   : > { %3085 = vmatprep.subr.bf16.mxu1 %v1568_v2  ;;  %3074 = vmatprep.mubr.bf16.mxu0 %v8469_v61  ;;  %v1686_v2 = vunpack.c.l.s8.bf16 %v938_v20 }
 0x313   : > { %3115 = vmatprep.mubr.bf16.mxu1 %v8473_v62 }
 0x314   : > { %3045 = vmatpush1.bf16.msra.mxu0 %v1295_v4  ;;  %v820_v4 = vld [vmem:[%s8221_s18 + $0x2f0] sm:$0xff] }
 0x315   : > { %3086 = vmatpush1.bf16.msra.mxu1 %v1567_v22  ;;  %3046 = vmatprep.subr.bf16.mxu0 %v1313_v23  ;;  %v956_v22 = vld [vmem:[%s8221_s18 + $0x730] sm:$0xff]  ;;  %v1431_v23 = vunpack.c.h.s8.bf16 %v802_v1  ;;  %v1449_v25 = vunpack.c.l.s8.bf16 %v820_v4  ;;  %v1466_v10 = vunpack.c.h.s8.bf16 %v820_v4  ;;  %v1023_v4 = vld [vmem:[%s8221_s18 + $0x948] sm:$0xff] }
 0x316   : > { %3087 = vmatprep.subr.bf16.mxu1 %v1585_v24  ;;  %v1703_v24 = vunpack.c.h.s8.bf16 %v938_v20  ;;  %v1721_v26 = vunpack.c.l.s8.bf16 %v956_v22  ;;  %v1738_v28 = vunpack.c.h.s8.bf16 %v956_v22  ;;  %v1024_v1 = vld [vmem:[%s8221_s18 + $0x950] sm:$0xff]  ;;  %v1159_v22 = vld [vmem:[%s8221_s18 + $0xd88] sm:$0xff] }
 0x317   : > { %v1160_v20 = vld [vmem:[%s8221_s18 + $0xd90] sm:$0xff] }
 0x318   : > { %3047 = vmatpush1.bf16.msra.mxu0 %v1312_v5  ;;  %v819_v5 = vld [vmem:[%s8221_s18 + $0x2e8] sm:$0xff] }
 0x319   : > { %3088 = vmatpush1.bf16.msra.mxu1 %v1584_v27  ;;  %3048 = vmatprep.subr.bf16.mxu0 %v1330_v8  ;;  %v955_v27 = vld [vmem:[%s8221_s18 + $0x728] sm:$0xff]  ;;  %v1448_v8 = vunpack.c.l.s8.bf16 %v819_v5 }
 0x31a   : > { %3089 = vmatprep.subr.bf16.mxu1 %v1602_v9  ;;  %v1720_v9 = vunpack.c.l.s8.bf16 %v955_v27 }
 0x31c   : > { %3049 = vmatpush1.bf16.msra.mxu0 %v1329_v29  ;;  %v837_v29 = vld [vmem:[%s8221_s18 + $0x378] sm:$0xff] }
 0x31d   : > { %3090 = vmatpush1.bf16.msra.mxu1 %v1601_v30  ;;  %3050 = vmatprep.subr.bf16.mxu0 %v1347_v31  ;;  %v973_v30 = vld [vmem:[%s8221_s18 + $0x7b8] sm:$0xff]  ;;  %v1465_v31 = vunpack.c.h.s8.bf16 %v819_v5  ;;  %v1483_v33 = vunpack.c.l.s8.bf16 %v837_v29  ;;  %v1500_v39 = vunpack.c.h.s8.bf16 %v837_v29  ;;  %v1040_v29 = vld [vmem:[%s8221_s18 + $0x9d0] sm:$0xff] }
 0x31e   : > { %3091 = vmatprep.subr.bf16.mxu1 %v1619_v32  ;;  %v1737_v32 = vunpack.c.h.s8.bf16 %v955_v27  ;;  %v1755_v34 = vunpack.c.l.s8.bf16 %v973_v30  ;;  %v1772_v40 = vunpack.c.h.s8.bf16 %v973_v30  ;;  %v1041_v5 = vld [vmem:[%s8221_s18 + $0x9d8] sm:$0xff]  ;;  %v1176_v30 = vld [vmem:[%s8221_s18 + $0xe10] sm:$0xff] }
 0x31f   : > { %v1177_v27 = vld [vmem:[%s8221_s18 + $0xe18] sm:$0xff] }
 0x320   : > { %3051 = vmatpush1.bf16.msra.mxu0 %v1346_v35  ;;  %v836_v35 = vld [vmem:[%s8221_s18 + $0x370] sm:$0xff] }
 0x321   : > { %3092 = vmatpush1.bf16.msra.mxu1 %v1618_v36  ;;  %3052 = vmatprep.subr.bf16.mxu0 %v1364_v37  ;;  %v972_v36 = vld [vmem:[%s8221_s18 + $0x7b0] sm:$0xff]  ;;  %v1482_v37 = vunpack.c.l.s8.bf16 %v836_v35 }
 0x322   : > { %3093 = vmatprep.subr.bf16.mxu1 %v1636_v38  ;;  %v2748_v47 = vpop.f32.mrb[16].mxu0  ;;  %v1754_v38 = vunpack.c.l.s8.bf16 %v972_v36 }
 0x323   : > { %v2789_v48 = vpop.f32.mrb[16].mxu1  ;;  %v2750_v50 = vpop.f32.mrb[17].mxu0 }
 0x324   : > { %v8811_v49 = vadd.f32 %v2789_v48, %v2748_v47  ;;  %v2791_v53 = vpop.f32.mrb[17].mxu1  ;;  %v2752_v58 = vpop.f32.mrb[18].mxu0  ;;  %3053 = vmatpush1.bf16.msra.mxu0 %v1363_v41  ;;  %v854_v41 = vld [vmem:[%s8221_s18 + $0x400] sm:$0xff]  ;;  %v853_v47 = vld [vmem:[%s8221_s18 + $0x3f8] sm:$0xff] }
 0x325   : > { %v8813_v54 = vadd.f32 %v2791_v53, %v2750_v50  ;;  %v2793_v59 = vpop.f32.mrb[18].mxu1  ;;  %3094 = vmatpush1.bf16.msra.mxu1 %v1635_v42  ;;  %v2753_v6 = vpop.f32.mrb[19].mxu0  ;;  %3054 = vmatprep.subr.bf16.mxu0 %v1381_v43  ;;  %v990_v42 = vld [vmem:[%s8221_s18 + $0x840] sm:$0xff]  ;;  %v1499_v43 = vunpack.c.h.s8.bf16 %v836_v35  ;;  %v1517_v45 = vunpack.c.l.s8.bf16 %v854_v41  ;;  %v989_v48 = vld [vmem:[%s8221_s18 + $0x838] sm:$0xff]  ;;  %v1516_v50 = vunpack.c.l.s8.bf16 %v853_v47 }
 0x326   : > { %v2794_v7 = vpop.f32.mrb[19].mxu1  ;;  %3095 = vmatprep.subr.bf16.mxu1 %v1653_v44  ;;  %v1771_v44 = vunpack.c.h.s8.bf16 %v972_v36  ;;  %v1789_v46 = vunpack.c.l.s8.bf16 %v990_v42  ;;  %v1788_v53 = vunpack.c.l.s8.bf16 %v989_v48  ;;  %v1534_v58 = vunpack.c.h.s8.bf16 %v854_v41  ;;  %v1058_v35 = vld [vmem:[%s8221_s18 + $0xa60] sm:$0xff]  ;;  %v1057_v41 = vld [vmem:[%s8221_s18 + $0xa58] sm:$0xff] }
 0x327   : > { %v1806_v59 = vunpack.c.h.s8.bf16 %v990_v42  ;;  %v1533_v6 = vunpack.c.h.s8.bf16 %v853_v47  ;;  %v1805_v7 = vunpack.c.h.s8.bf16 %v989_v48  ;;  %v1194_v36 = vld [vmem:[%s8221_s18 + $0xea0] sm:$0xff]  ;;  %v1193_v42 = vld [vmem:[%s8221_s18 + $0xe98] sm:$0xff] }
 0x328   : > { %3055 = vmatpush1.bf16.msra.mxu0 %v1380_v18  ;;  %v1007_v18 = vld [vmem:[%s8221_s18 + $0x8c8] sm:$0xff]  ;;  %v706_v48 = vld [vmem:[#allocation3 + $0x20] sm:$0xff] }
 0x329   : > { %3096 = vmatpush1.bf16.msra.mxu1 %v1652_v63  ;;  %3056 = vmatprep.subr.bf16.mxu0 %v1398_v11  ;;  %v1143_v63 = vld [vmem:[%s8221_s18 + $0xd08] sm:$0xff]  ;;  %v1823_v11 = vunpack.c.l.s8.bf16 %v1007_v18 }
 0x32a   : > { %3097 = vmatprep.subr.bf16.mxu1 %v1670_v12  ;;  %v2095_v12 = vunpack.c.l.s8.bf16 %v1143_v63 }
 0x32c   : > { %3057 = vmatpush1.bf16.msra.mxu0 %v1397_v14  ;;  %v1822_v14 = vunpack.c.l.s8.bf16 %v1006_v13 }
 0x32d   : > { %3098 = vmatpush1.bf16.msra.mxu1 %v1669_v19  ;;  %3058 = vmatprep.subr.bf16.mxu0 %v1415_v60  ;;  %v2094_v19 = vunpack.c.l.s8.bf16 %v1142_v57  ;;  %v1840_v60 = vunpack.c.h.s8.bf16 %v1007_v18  ;;  %v2196_v18 = vunpack.c.l.s8.bf16 %v1193_v42 }
 0x32e   : > { %3099 = vmatprep.subr.bf16.mxu1 %v1687_v17  ;;  %v2112_v17 = vunpack.c.h.s8.bf16 %v1143_v63 }
 0x330   : > { %3059 = vmatpush1.bf16.msra.mxu0 %v1414_v0  ;;  %v1839_v0 = vunpack.c.h.s8.bf16 %v1006_v13 }
 0x331   : > { %3100 = vmatpush1.bf16.msra.mxu1 %v1686_v2  ;;  %3060 = vmatprep.subr.bf16.mxu0 %v1432_v55  ;;  %v2111_v2 = vunpack.c.h.s8.bf16 %v1142_v57  ;;  %v1857_v55 = vunpack.c.l.s8.bf16 %v1024_v1  ;;  %v1211_v57 = vld [vmem:[%s8221_s18 + $0xf28] sm:$0xff] }
 0x332   : > { %3101 = vmatprep.subr.bf16.mxu1 %v1704_v21  ;;  %v2129_v21 = vunpack.c.l.s8.bf16 %v1160_v20 }
 0x334   : > { %3061 = vmatpush1.bf16.msra.mxu0 %v1431_v23  ;;  %v1856_v23 = vunpack.c.l.s8.bf16 %v1023_v4 }
 0x335   : > { %3102 = vmatpush1.bf16.msra.mxu1 %v1703_v24  ;;  %3062 = vmatprep.subr.bf16.mxu0 %v1449_v25  ;;  %v2128_v24 = vunpack.c.l.s8.bf16 %v1159_v22  ;;  %v1874_v25 = vunpack.c.h.s8.bf16 %v1024_v1 }
 0x336   : > { %3103 = vmatprep.subr.bf16.mxu1 %v1721_v26  ;;  %v2146_v26 = vunpack.c.h.s8.bf16 %v1160_v20  ;;  %v2231_v20 = vunpack.c.l.s8.bf16 %v1211_v57 }
 0x338   : > { %3063 = vmatpush1.bf16.msra.mxu0 %v1448_v8  ;;  %v1873_v8 = vunpack.c.h.s8.bf16 %v1023_v4 }
 0x339   : > { %3104 = vmatpush1.bf16.msra.mxu1 %v1720_v9  ;;  %3064 = vmatprep.subr.bf16.mxu0 %v1466_v10  ;;  %v2145_v9 = vunpack.c.h.s8.bf16 %v1159_v22  ;;  %v1891_v10 = vunpack.c.l.s8.bf16 %v1041_v5  ;;  %v2248_v22 = vunpack.c.h.s8.bf16 %v1211_v57  ;;  %v872_v57 = vld [vmem:[%s8221_s18 + $0x490] sm:$0xff] }
 0x33a   : > { %3105 = vmatprep.subr.bf16.mxu1 %v1738_v28  ;;  %v2163_v28 = vunpack.c.l.s8.bf16 %v1177_v27 }
 0x33c   : > { %3065 = vmatpush1.bf16.msra.mxu0 %v1465_v31  ;;  %v1890_v31 = vunpack.c.l.s8.bf16 %v1040_v29 }
 0x33d   : > { %3106 = vmatpush1.bf16.msra.mxu1 %v1737_v32  ;;  %3066 = vmatprep.subr.bf16.mxu0 %v1483_v33  ;;  %v2162_v32 = vunpack.c.l.s8.bf16 %v1176_v30  ;;  %v1908_v33 = vunpack.c.h.s8.bf16 %v1041_v5 }
 0x33e   : > { %3107 = vmatprep.subr.bf16.mxu1 %v1755_v34  ;;  %v2180_v34 = vunpack.c.h.s8.bf16 %v1177_v27 }
 0x340   : > { %3067 = vmatpush1.bf16.msra.mxu0 %v1482_v37  ;;  %v1907_v37 = vunpack.c.h.s8.bf16 %v1040_v29 }
 0x341   : > { %3108 = vmatpush1.bf16.msra.mxu1 %v1754_v38  ;;  %3068 = vmatprep.subr.bf16.mxu0 %v1500_v39  ;;  %v2179_v38 = vunpack.c.h.s8.bf16 %v1176_v30  ;;  %v1925_v39 = vunpack.c.l.s8.bf16 %v1058_v35 }
 0x342   : > { %3109 = vmatprep.subr.bf16.mxu1 %v1772_v40  ;;  %v2197_v40 = vunpack.c.l.s8.bf16 %v1194_v36 }
 0x344   : > { %3069 = vmatpush1.bf16.msra.mxu0 %v1499_v43 }
 0x345   : > { %3110 = vmatpush1.bf16.msra.mxu1 %v1771_v44  ;;  %3070 = vmatprep.subr.bf16.mxu0 %v1517_v45 }
 0x346   : > { %3111 = vmatprep.subr.bf16.mxu1 %v1789_v46 }
 0x348   : > { %3071 = vmatpush1.bf16.msra.mxu0 %v1516_v50 }
 0x349   : > { %3112 = vmatpush1.bf16.msra.mxu1 %v1788_v53  ;;  %3072 = vmatprep.subr.bf16.mxu0 %v1534_v58 }
 0x34a   : > { %3113 = vmatprep.subr.bf16.mxu1 %v1806_v59  ;;  %v1924_v59 = vunpack.c.l.s8.bf16 %v1057_v41 }
 0x34c   : > { %3073 = vmatpush1.bf16.msra.mxu0 %v1533_v6  ;;  %v707_v6 = vld [vmem:[#allocation3 + $0x28] sm:$0xff] }
 0x34d   : > { %3114 = vmatpush1.bf16.msra.mxu1 %v1805_v7  ;;  %3124 = vmatprep.subr.bf16.mxu0 %v1823_v11 }
 0x34e   : > { %3165 = vmatprep.subr.bf16.mxu1 %v2095_v12  ;;  %v2214_v12 = vunpack.c.h.s8.bf16 %v1194_v36 }
 0x34f   : > { %3075 = vmatmul.mubr.bf16.vlgmr.msra.gmra.mrb[32].mxu0 %v8503_v15 }
 0x350   : > { %3116 = vmatmul.mubr.bf16.vlgmr.msra.gmra.mrb[32].mxu1 %v8507_v16  ;;  %3125 = vmatpush1.bf16.msra.mxu0 %v1822_v14 }
 0x351   : > { %3166 = vmatpush1.bf16.msra.mxu1 %v2094_v19  ;;  %3126 = vmatprep.subr.bf16.mxu0 %v1840_v60  ;;  %v1941_v60 = vunpack.c.h.s8.bf16 %v1057_v41 }
 0x352   : > { %3167 = vmatprep.subr.bf16.mxu1 %v2112_v17  ;;  %3156 = vmatprep.mubr.bf16.mxu0 %v8519_v56  ;;  %v2213_v17 = vunpack.c.h.s8.bf16 %v1193_v42 }
 0x353   : > { %3197 = vmatprep.mubr.bf16.mxu1 %v8523_v3 }
 0x354   : > { %3127 = vmatpush1.bf16.msra.mxu0 %v1839_v0  ;;  %v1074_v0 = vld [vmem:[%s8221_s18 + $0xae0] sm:$0xff] }
 0x355   : > { %3168 = vmatpush1.bf16.msra.mxu1 %v2111_v2  ;;  %3128 = vmatprep.subr.bf16.mxu0 %v1857_v55  ;;  %v1210_v2 = vld [vmem:[%s8221_s18 + $0xf20] sm:$0xff]  ;;  %v1958_v55 = vunpack.c.l.s8.bf16 %v1074_v0 }
 0x356   : > { %3169 = vmatprep.subr.bf16.mxu1 %v2129_v21  ;;  %v2230_v21 = vunpack.c.l.s8.bf16 %v1210_v2 }
 0x358   : > { %3129 = vmatpush1.bf16.msra.mxu0 %v1856_v23  ;;  %v1092_v23 = vld [vmem:[%s8221_s18 + $0xb70] sm:$0xff] }
 0x359   : > { %3170 = vmatpush1.bf16.msra.mxu1 %v2128_v24  ;;  %3130 = vmatprep.subr.bf16.mxu0 %v1874_v25  ;;  %v1228_v24 = vld [vmem:[%s8221_s18 + $0xfb0] sm:$0xff]  ;;  %v1975_v25 = vunpack.c.h.s8.bf16 %v1074_v0  ;;  %v1993_v5 = vunpack.c.l.s8.bf16 %v1092_v23  ;;  %v2010_v29 = vunpack.c.h.s8.bf16 %v1092_v23 }
 0x35a   : > { %3171 = vmatprep.subr.bf16.mxu1 %v2146_v26  ;;  %v2247_v26 = vunpack.c.h.s8.bf16 %v1210_v2  ;;  %v2265_v27 = vunpack.c.l.s8.bf16 %v1228_v24  ;;  %v2282_v30 = vunpack.c.h.s8.bf16 %v1228_v24  ;;  %v1569_v2 = vunpack.c.h.s8.bf16 %v872_v57 }
 0x35c   : > { %3131 = vmatpush1.bf16.msra.mxu0 %v1873_v8  ;;  %v1091_v8 = vld [vmem:[%s8221_s18 + $0xb68] sm:$0xff] }
 0x35d   : > { %3172 = vmatpush1.bf16.msra.mxu1 %v2145_v9  ;;  %3132 = vmatprep.subr.bf16.mxu0 %v1891_v10  ;;  %v1227_v9 = vld [vmem:[%s8221_s18 + $0xfa8] sm:$0xff]  ;;  %v1992_v10 = vunpack.c.l.s8.bf16 %v1091_v8 }
 0x35e   : > { %3173 = vmatprep.subr.bf16.mxu1 %v2163_v28  ;;  %v2264_v28 = vunpack.c.l.s8.bf16 %v1227_v9 }
 0x360   : > { %3133 = vmatpush1.bf16.msra.mxu0 %v1890_v31  ;;  %v1109_v31 = vld [vmem:[%s8221_s18 + $0xbf8] sm:$0xff] }
 0x361   : > { %3174 = vmatpush1.bf16.msra.mxu1 %v2162_v32  ;;  %3134 = vmatprep.subr.bf16.mxu0 %v1908_v33  ;;  %v1245_v32 = vld [vmem:[%s8221_s18 + $0x1038] sm:$0xff]  ;;  %v2009_v33 = vunpack.c.h.s8.bf16 %v1091_v8  ;;  %v2044_v41 = vunpack.c.h.s8.bf16 %v1109_v31 }
 0x362   : > { %3175 = vmatprep.subr.bf16.mxu1 %v2180_v34  ;;  %v2830_v43 = vpop.f32.mrb[20].mxu0  ;;  %v2281_v34 = vunpack.c.h.s8.bf16 %v1227_v9  ;;  %v2299_v36 = vunpack.c.l.s8.bf16 %v1245_v32  ;;  %v2316_v42 = vunpack.c.h.s8.bf16 %v1245_v32 }
 0x363   : > { %v2871_v44 = vpop.f32.mrb[20].mxu1  ;;  %v2831_v45 = vadd.f32 %v2830_v43, %v8811_v49  ;;  %v2832_v46 = vpop.f32.mrb[21].mxu0  ;;  %v1942_v49 = vunpack.c.h.s8.bf16 %v1058_v35  ;;  %v2027_v35 = vunpack.c.l.s8.bf16 %v1109_v31  ;;  %v1126_v43 = vld [vmem:[%s8221_s18 + $0xc80] sm:$0xff] }
 0x364   : > { %v2873_v47 = vpop.f32.mrb[21].mxu1  ;;  %v2833_v50 = vadd.f32 %v2832_v46, %v8813_v54  ;;  %v2834_v53 = vpop.f32.mrb[22].mxu0  ;;  %3135 = vmatpush1.bf16.msra.mxu0 %v1907_v37  ;;  %v1075_v54 = vld [vmem:[%s8221_s18 + $0xae8] sm:$0xff]  ;;  %v1108_v37 = vld [vmem:[%s8221_s18 + $0xbf0] sm:$0xff] }
 0x365   : > { %v2875_v58 = vpop.f32.mrb[22].mxu1  ;;  %3176 = vmatpush1.bf16.msra.mxu1 %v2179_v38  ;;  %v2872_v63 = vadd.f32 %v2871_v44, %v2831_v45  ;;  %v2835_v7 = vpop.f32.mrb[23].mxu0  ;;  %3136 = vmatprep.subr.bf16.mxu0 %v1925_v39  ;;  %v1959_v1 = vunpack.c.l.s8.bf16 %v1075_v54  ;;  %v1976_v4 = vunpack.c.h.s8.bf16 %v1075_v54  ;;  %v1244_v38 = vld [vmem:[%s8221_s18 + $0x1030] sm:$0xff]  ;;  %v2026_v39 = vunpack.c.l.s8.bf16 %v1108_v37  ;;  %v1262_v44 = vld [vmem:[%s8221_s18 + $0x10c0] sm:$0xff]  ;;  %v1261_v53 = vld [vmem:[%s8221_s18 + $0x10b8] sm:$0xff] }
 0x366   : > { %v2876_v11 = vpop.f32.mrb[23].mxu1  ;;  %3177 = vmatprep.subr.bf16.mxu1 %v2197_v40  ;;  %v2874_v13 = vadd.f32 %v2873_v47, %v2833_v50  ;;  %v2298_v40 = vunpack.c.l.s8.bf16 %v1244_v38  ;;  %v2043_v45 = vunpack.c.h.s8.bf16 %v1108_v37  ;;  %v2315_v46 = vunpack.c.h.s8.bf16 %v1244_v38  ;;  %v1125_v50 = vld [vmem:[%s8221_s18 + $0xc78] sm:$0xff]  ;;  %v736_v54 = vld [vmem:[%s8221_s18 + $0x50] sm:$0xff] }
 0x367   : > { %v3862_v14 = vadd.f32 %v2872_v63, %v706_v48  ;;  %v2061_v47 = vunpack.c.l.s8.bf16 %v1126_v43  ;;  %v2333_v48 = vunpack.c.l.s8.bf16 %v1262_v44  ;;  %v2060_v58 = vunpack.c.l.s8.bf16 %v1125_v50  ;;  %v873_v7 = vld [vmem:[%s8221_s18 + $0x498] sm:$0xff] }
 0x368   : > { %v3863_v19 = vadd.f32 %v2874_v13, %v707_v6  ;;  %3137 = vmatpush1.bf16.msra.mxu0 %v1924_v59  ;;  %v2332_v59 = vunpack.c.l.s8.bf16 %v1261_v53  ;;  %v2350_v63 = vunpack.c.h.s8.bf16 %v1262_v44  ;;  %v737_v6 = vld [vmem:[%s8221_s18 + $0x58] sm:$0xff]  ;;  %v2077_v11 = vunpack.c.h.s8.bf16 %v1125_v50 }
 0x369   : > { %3178 = vmatpush1.bf16.msra.mxu1 %v2196_v18  ;;  %3879 = vst [vmem:[#allocation3 + $0x20] sm:$0xff] %v3862_v14  ;;  %3138 = vmatprep.subr.bf16.mxu0 %v1942_v49  ;;  %v2078_v18 = vunpack.c.h.s8.bf16 %v1126_v43  ;;  %v2349_v49 = vunpack.c.h.s8.bf16 %v1261_v53  ;;  %v1553_v13 = vunpack.c.l.s8.bf16 %v873_v7  ;;  %v1280_v14 = vunpack.c.l.s8.bf16 %v736_v54 }
 0x36a   : > { %3179 = vmatprep.subr.bf16.mxu1 %v2214_v12  ;;  %3880 = vst [vmem:[#allocation3 + $0x28] sm:$0xff] %v3863_v19  ;;  %v1281_v12 = vunpack.c.l.s8.bf16 %v737_v6  ;;  %v1552_v19 = vunpack.c.l.s8.bf16 %v872_v57  ;;  %v1297_v0 = vunpack.c.h.s8.bf16 %v736_v54 }
 0x36c   : > { %3139 = vmatpush1.bf16.msra.mxu0 %v1941_v60  ;;  %v1298_v60 = vunpack.c.h.s8.bf16 %v737_v6 }
 0x36d   : > { %3180 = vmatpush1.bf16.msra.mxu1 %v2213_v17  ;;  %3140 = vmatprep.subr.bf16.mxu0 %v1959_v1  ;;  %v1570_v17 = vunpack.c.h.s8.bf16 %v873_v7  ;;  %v754_v1 = vld [vmem:[%s8221_s18 + $0xe0] sm:$0xff] }
 0x36e   : > { %3181 = vmatprep.subr.bf16.mxu1 %v2231_v20  ;;  %v890_v20 = vld [vmem:[%s8221_s18 + $0x520] sm:$0xff] }
 0x370   : > { %3141 = vmatpush1.bf16.msra.mxu0 %v1958_v55  ;;  %v1315_v55 = vunpack.c.l.s8.bf16 %v754_v1 }
 0x371   : > { %3182 = vmatpush1.bf16.msra.mxu1 %v2230_v21  ;;  %3142 = vmatprep.subr.bf16.mxu0 %v1976_v4  ;;  %v1587_v21 = vunpack.c.l.s8.bf16 %v890_v20  ;;  %v753_v4 = vld [vmem:[%s8221_s18 + $0xd8] sm:$0xff] }
 0x372   : > { %3183 = vmatprep.subr.bf16.mxu1 %v2248_v22  ;;  %v889_v22 = vld [vmem:[%s8221_s18 + $0x518] sm:$0xff]  ;;  %v1314_v23 = vunpack.c.l.s8.bf16 %v753_v4  ;;  %v1331_v8 = vunpack.c.h.s8.bf16 %v753_v4 }
 0x373   : > { %v1586_v24 = vunpack.c.l.s8.bf16 %v889_v22  ;;  %v1603_v9 = vunpack.c.h.s8.bf16 %v889_v22 }
 0x374   : > { %3143 = vmatpush1.bf16.msra.mxu0 %v1975_v25  ;;  %v1332_v25 = vunpack.c.h.s8.bf16 %v754_v1 }
 0x375   : > { %3184 = vmatpush1.bf16.msra.mxu1 %v2247_v26  ;;  %3144 = vmatprep.subr.bf16.mxu0 %v1993_v5  ;;  %v1604_v26 = vunpack.c.h.s8.bf16 %v890_v20  ;;  %v771_v5 = vld [vmem:[%s8221_s18 + $0x168] sm:$0xff] }
 0x376   : > { %3185 = vmatprep.subr.bf16.mxu1 %v2265_v27  ;;  %v907_v27 = vld [vmem:[%s8221_s18 + $0x5a8] sm:$0xff] }
 0x378   : > { %3145 = vmatpush1.bf16.msra.mxu0 %v1992_v10  ;;  %v1349_v10 = vunpack.c.l.s8.bf16 %v771_v5 }
 0x379   : > { %3186 = vmatpush1.bf16.msra.mxu1 %v2264_v28  ;;  %3146 = vmatprep.subr.bf16.mxu0 %v2010_v29  ;;  %v1621_v28 = vunpack.c.l.s8.bf16 %v907_v27  ;;  %v770_v29 = vld [vmem:[%s8221_s18 + $0x160] sm:$0xff] }
 0x37a   : > { %3187 = vmatprep.subr.bf16.mxu1 %v2282_v30  ;;  %v906_v30 = vld [vmem:[%s8221_s18 + $0x5a0] sm:$0xff]  ;;  %v1348_v31 = vunpack.c.l.s8.bf16 %v770_v29  ;;  %v1365_v37 = vunpack.c.h.s8.bf16 %v770_v29 }
 0x37b   : > { %v1620_v32 = vunpack.c.l.s8.bf16 %v906_v30  ;;  %v1637_v38 = vunpack.c.h.s8.bf16 %v906_v30 }
 0x37c   : > { %3147 = vmatpush1.bf16.msra.mxu0 %v2009_v33  ;;  %v1366_v33 = vunpack.c.h.s8.bf16 %v771_v5 }
 0x37d   : > { %3188 = vmatpush1.bf16.msra.mxu1 %v2281_v34  ;;  %3148 = vmatprep.subr.bf16.mxu0 %v2027_v35  ;;  %v1638_v34 = vunpack.c.h.s8.bf16 %v907_v27  ;;  %v788_v35 = vld [vmem:[%s8221_s18 + $0x1f0] sm:$0xff] }
 0x37e   : > { %3189 = vmatprep.subr.bf16.mxu1 %v2299_v36  ;;  %v924_v36 = vld [vmem:[%s8221_s18 + $0x630] sm:$0xff]  ;;  %v1400_v6 = vunpack.c.h.s8.bf16 %v788_v35 }
 0x37f   : > { %v1672_v7 = vunpack.c.h.s8.bf16 %v924_v36 }
 0x380   : > { %3149 = vmatpush1.bf16.msra.mxu0 %v2026_v39  ;;  %v1383_v39 = vunpack.c.l.s8.bf16 %v788_v35 }
 0x381   : > { %3190 = vmatpush1.bf16.msra.mxu1 %v2298_v40  ;;  %3150 = vmatprep.subr.bf16.mxu0 %v2044_v41  ;;  %v1655_v40 = vunpack.c.l.s8.bf16 %v924_v36  ;;  %v787_v41 = vld [vmem:[%s8221_s18 + $0x1e8] sm:$0xff] }
 0x382   : > { %3191 = vmatprep.subr.bf16.mxu1 %v2316_v42  ;;  %v923_v42 = vld [vmem:[%s8221_s18 + $0x628] sm:$0xff] }
 0x384   : > { %3151 = vmatpush1.bf16.msra.mxu0 %v2043_v45 }
 0x385   : > { %3192 = vmatpush1.bf16.msra.mxu1 %v2315_v46  ;;  %3152 = vmatprep.subr.bf16.mxu0 %v2061_v47 }
 0x386   : > { %3193 = vmatprep.subr.bf16.mxu1 %v2333_v48 }
 0x388   : > { %3153 = vmatpush1.bf16.msra.mxu0 %v2060_v58  ;;  %v1382_v58 = vunpack.c.l.s8.bf16 %v787_v41 }
 0x389   : > { %3194 = vmatpush1.bf16.msra.mxu1 %v2332_v59  ;;  %3154 = vmatprep.subr.bf16.mxu0 %v2078_v18  ;;  %v1654_v59 = vunpack.c.l.s8.bf16 %v923_v42 }
 0x38a   : > { %3195 = vmatprep.subr.bf16.mxu1 %v2350_v63 }
 0x38c   : > { %3155 = vmatpush1.bf16.msra.mxu0 %v2077_v11  ;;  %v805_v11 = vld [vmem:[%s8221_s18 + $0x278] sm:$0xff] }
 0x38d   : > { %3196 = vmatpush1.bf16.msra.mxu1 %v2349_v49  ;;  %3206 = vmatprep.subr.bf16.mxu0 %v1281_v12  ;;  %v941_v49 = vld [vmem:[%s8221_s18 + $0x6b8] sm:$0xff]  ;;  %v1399_v12 = vunpack.c.h.s8.bf16 %v787_v41  ;;  %v1417_v54 = vunpack.c.l.s8.bf16 %v805_v11  ;;  %v1434_v1 = vunpack.c.h.s8.bf16 %v805_v11  ;;  %v1008_v11 = vld [vmem:[%s8221_s18 + $0x8d0] sm:$0xff] }
 0x38e   : > { %3247 = vmatprep.subr.bf16.mxu1 %v1553_v13  ;;  %v1671_v13 = vunpack.c.h.s8.bf16 %v923_v42  ;;  %v1689_v57 = vunpack.c.l.s8.bf16 %v941_v49  ;;  %v1706_v20 = vunpack.c.h.s8.bf16 %v941_v49  ;;  %v1144_v49 = vld [vmem:[%s8221_s18 + $0xd10] sm:$0xff] }
 0x38f   : > { %3157 = vmatmul.mubr.bf16.vlgmr.msra.gmra.mrb[36].mxu0 %v8561_v51 }
 0x390   : > { %3198 = vmatmul.mubr.bf16.vlgmr.msra.gmra.mrb[36].mxu1 %v8565_v52  ;;  %3207 = vmatpush1.bf16.msra.mxu0 %v1280_v14  ;;  %v804_v14 = vld [vmem:[%s8221_s18 + $0x270] sm:$0xff] }
 0x391   : > { %3248 = vmatpush1.bf16.msra.mxu1 %v1552_v19  ;;  %3208 = vmatprep.subr.bf16.mxu0 %v1298_v60  ;;  %v940_v19 = vld [vmem:[%s8221_s18 + $0x6b0] sm:$0xff]  ;;  %v1416_v60 = vunpack.c.l.s8.bf16 %v804_v14 }
 0x392   : > { %3249 = vmatprep.subr.bf16.mxu1 %v1570_v17  ;;  %3238 = vmatprep.mubr.bf16.mxu0 %v8469_v61  ;;  %v1688_v17 = vunpack.c.l.s8.bf16 %v940_v19 }
 0x393   : > { %3279 = vmatprep.mubr.bf16.mxu1 %v8473_v62 }
 0x394   : > { %3209 = vmatpush1.bf16.msra.mxu0 %v1297_v0  ;;  %v822_v0 = vld [vmem:[%s8221_s18 + $0x300] sm:$0xff] }
 0x395   : > { %3250 = vmatpush1.bf16.msra.mxu1 %v1569_v2  ;;  %3210 = vmatprep.subr.bf16.mxu0 %v1315_v55  ;;  %v958_v2 = vld [vmem:[%s8221_s18 + $0x740] sm:$0xff]  ;;  %v1433_v55 = vunpack.c.h.s8.bf16 %v804_v14  ;;  %v1451_v4 = vunpack.c.l.s8.bf16 %v822_v0  ;;  %v1468_v5 = vunpack.c.h.s8.bf16 %v822_v0  ;;  %v1025_v0 = vld [vmem:[%s8221_s18 + $0x958] sm:$0xff] }
 0x396   : > { %3251 = vmatprep.subr.bf16.mxu1 %v1587_v21  ;;  %v1705_v21 = vunpack.c.h.s8.bf16 %v940_v19  ;;  %v1723_v22 = vunpack.c.l.s8.bf16 %v958_v2  ;;  %v1740_v27 = vunpack.c.h.s8.bf16 %v958_v2  ;;  %v1026_v14 = vld [vmem:[%s8221_s18 + $0x960] sm:$0xff]  ;;  %v1161_v2 = vld [vmem:[%s8221_s18 + $0xd98] sm:$0xff] }
 0x397   : > { %v1162_v19 = vld [vmem:[%s8221_s18 + $0xda0] sm:$0xff] }
 0x398   : > { %3211 = vmatpush1.bf16.msra.mxu0 %v1314_v23  ;;  %v821_v23 = vld [vmem:[%s8221_s18 + $0x2f8] sm:$0xff] }
 0x399   : > { %3252 = vmatpush1.bf16.msra.mxu1 %v1586_v24  ;;  %3212 = vmatprep.subr.bf16.mxu0 %v1332_v25  ;;  %v957_v24 = vld [vmem:[%s8221_s18 + $0x738] sm:$0xff]  ;;  %v1450_v25 = vunpack.c.l.s8.bf16 %v821_v23 }
 0x39a   : > { %3253 = vmatprep.subr.bf16.mxu1 %v1604_v26  ;;  %v1722_v26 = vunpack.c.l.s8.bf16 %v957_v24 }
 0x39c   : > { %3213 = vmatpush1.bf16.msra.mxu0 %v1331_v8  ;;  %v839_v8 = vld [vmem:[%s8221_s18 + $0x388] sm:$0xff] }
 0x39d   : > { %3254 = vmatpush1.bf16.msra.mxu1 %v1603_v9  ;;  %3214 = vmatprep.subr.bf16.mxu0 %v1349_v10  ;;  %v975_v9 = vld [vmem:[%s8221_s18 + $0x7c8] sm:$0xff]  ;;  %v1467_v10 = vunpack.c.h.s8.bf16 %v821_v23  ;;  %v1485_v29 = vunpack.c.l.s8.bf16 %v839_v8  ;;  %v1502_v35 = vunpack.c.h.s8.bf16 %v839_v8  ;;  %v1042_v8 = vld [vmem:[%s8221_s18 + $0x9e0] sm:$0xff] }
 0x39e   : > { %3255 = vmatprep.subr.bf16.mxu1 %v1621_v28  ;;  %v1739_v28 = vunpack.c.h.s8.bf16 %v957_v24  ;;  %v1757_v30 = vunpack.c.l.s8.bf16 %v975_v9  ;;  %v1774_v36 = vunpack.c.h.s8.bf16 %v975_v9  ;;  %v1043_v23 = vld [vmem:[%s8221_s18 + $0x9e8] sm:$0xff]  ;;  %v1178_v9 = vld [vmem:[%s8221_s18 + $0xe20] sm:$0xff] }
 0x39f   : > { %v1179_v24 = vld [vmem:[%s8221_s18 + $0xe28] sm:$0xff] }
 0x3a0   : > { %3215 = vmatpush1.bf16.msra.mxu0 %v1348_v31  ;;  %v838_v31 = vld [vmem:[%s8221_s18 + $0x380] sm:$0xff] }
 0x3a1   : > { %3256 = vmatpush1.bf16.msra.mxu1 %v1620_v32  ;;  %3216 = vmatprep.subr.bf16.mxu0 %v1366_v33  ;;  %v974_v32 = vld [vmem:[%s8221_s18 + $0x7c0] sm:$0xff]  ;;  %v1484_v33 = vunpack.c.l.s8.bf16 %v838_v31 }
 0x3a2   : > { %3257 = vmatprep.subr.bf16.mxu1 %v1638_v34  ;;  %v2912_v43 = vpop.f32.mrb[24].mxu0  ;;  %v1756_v34 = vunpack.c.l.s8.bf16 %v974_v32 }
 0x3a3   : > { %v2953_v44 = vpop.f32.mrb[24].mxu1  ;;  %v2914_v46 = vpop.f32.mrb[25].mxu0 }
 0x3a4   : > { %v8889_v45 = vadd.f32 %v2953_v44, %v2912_v43  ;;  %v2955_v47 = vpop.f32.mrb[25].mxu1  ;;  %v2916_v50 = vpop.f32.mrb[26].mxu0  ;;  %3217 = vmatpush1.bf16.msra.mxu0 %v1365_v37  ;;  %v856_v37 = vld [vmem:[%s8221_s18 + $0x410] sm:$0xff]  ;;  %v855_v43 = vld [vmem:[%s8221_s18 + $0x408] sm:$0xff] }
 0x3a5   : > { %v8891_v48 = vadd.f32 %v2955_v47, %v2914_v46  ;;  %v2957_v53 = vpop.f32.mrb[26].mxu1  ;;  %3258 = vmatpush1.bf16.msra.mxu1 %v1637_v38  ;;  %v2917_v18 = vpop.f32.mrb[27].mxu0  ;;  %3218 = vmatprep.subr.bf16.mxu0 %v1383_v39  ;;  %v992_v38 = vld [vmem:[%s8221_s18 + $0x850] sm:$0xff]  ;;  %v1501_v39 = vunpack.c.h.s8.bf16 %v838_v31  ;;  %v1519_v41 = vunpack.c.l.s8.bf16 %v856_v37  ;;  %v991_v44 = vld [vmem:[%s8221_s18 + $0x848] sm:$0xff]  ;;  %v1518_v46 = vunpack.c.l.s8.bf16 %v855_v43 }
 0x3a6   : > { %v2958_v63 = vpop.f32.mrb[27].mxu1  ;;  %3259 = vmatprep.subr.bf16.mxu1 %v1655_v40  ;;  %v1773_v40 = vunpack.c.h.s8.bf16 %v974_v32  ;;  %v1791_v42 = vunpack.c.l.s8.bf16 %v992_v38  ;;  %v1790_v47 = vunpack.c.l.s8.bf16 %v991_v44  ;;  %v1536_v50 = vunpack.c.h.s8.bf16 %v856_v37  ;;  %v1060_v31 = vld [vmem:[%s8221_s18 + $0xa70] sm:$0xff]  ;;  %v1059_v37 = vld [vmem:[%s8221_s18 + $0xa68] sm:$0xff] }
 0x3a7   : > { %v1808_v53 = vunpack.c.h.s8.bf16 %v992_v38  ;;  %v1535_v18 = vunpack.c.h.s8.bf16 %v855_v43  ;;  %v1807_v63 = vunpack.c.h.s8.bf16 %v991_v44  ;;  %v1196_v32 = vld [vmem:[%s8221_s18 + $0xeb0] sm:$0xff]  ;;  %v1195_v38 = vld [vmem:[%s8221_s18 + $0xea8] sm:$0xff] }
 0x3a8   : > { %3219 = vmatpush1.bf16.msra.mxu0 %v1382_v58  ;;  %v1009_v58 = vld [vmem:[%s8221_s18 + $0x8d8] sm:$0xff]  ;;  %v708_v44 = vld [vmem:[#allocation3 + $0x30] sm:$0xff] }
 0x3a9   : > { %3260 = vmatpush1.bf16.msra.mxu1 %v1654_v59  ;;  %3220 = vmatprep.subr.bf16.mxu0 %v1400_v6  ;;  %v1145_v59 = vld [vmem:[%s8221_s18 + $0xd18] sm:$0xff]  ;;  %v1825_v6 = vunpack.c.l.s8.bf16 %v1009_v58 }
 0x3aa   : > { %3261 = vmatprep.subr.bf16.mxu1 %v1672_v7  ;;  %v2097_v7 = vunpack.c.l.s8.bf16 %v1145_v59 }
 0x3ac   : > { %3221 = vmatpush1.bf16.msra.mxu0 %v1399_v12  ;;  %v1824_v12 = vunpack.c.l.s8.bf16 %v1008_v11 }
 0x3ad   : > { %3262 = vmatpush1.bf16.msra.mxu1 %v1671_v13  ;;  %3222 = vmatprep.subr.bf16.mxu0 %v1417_v54  ;;  %v2096_v13 = vunpack.c.l.s8.bf16 %v1144_v49  ;;  %v1842_v54 = vunpack.c.h.s8.bf16 %v1009_v58  ;;  %v2198_v58 = vunpack.c.l.s8.bf16 %v1195_v38 }
 0x3ae   : > { %3263 = vmatprep.subr.bf16.mxu1 %v1689_v57  ;;  %v2114_v57 = vunpack.c.h.s8.bf16 %v1145_v59 }
 0x3b0   : > { %3223 = vmatpush1.bf16.msra.mxu0 %v1416_v60  ;;  %v1841_v60 = vunpack.c.h.s8.bf16 %v1008_v11 }
 0x3b1   : > { %3264 = vmatpush1.bf16.msra.mxu1 %v1688_v17  ;;  %3224 = vmatprep.subr.bf16.mxu0 %v1434_v1  ;;  %v2113_v17 = vunpack.c.h.s8.bf16 %v1144_v49  ;;  %v1859_v1 = vunpack.c.l.s8.bf16 %v1026_v14  ;;  %v1213_v49 = vld [vmem:[%s8221_s18 + $0xf38] sm:$0xff] }
 0x3b2   : > { %3265 = vmatprep.subr.bf16.mxu1 %v1706_v20  ;;  %v2131_v20 = vunpack.c.l.s8.bf16 %v1162_v19 }
 0x3b4   : > { %3225 = vmatpush1.bf16.msra.mxu0 %v1433_v55  ;;  %v1858_v55 = vunpack.c.l.s8.bf16 %v1025_v0 }
 0x3b5   : > { %3266 = vmatpush1.bf16.msra.mxu1 %v1705_v21  ;;  %3226 = vmatprep.subr.bf16.mxu0 %v1451_v4  ;;  %v2130_v21 = vunpack.c.l.s8.bf16 %v1161_v2  ;;  %v1876_v4 = vunpack.c.h.s8.bf16 %v1026_v14 }
 0x3b6   : > { %3267 = vmatprep.subr.bf16.mxu1 %v1723_v22  ;;  %v2148_v22 = vunpack.c.h.s8.bf16 %v1162_v19  ;;  %v2233_v19 = vunpack.c.l.s8.bf16 %v1213_v49 }
 0x3b8   : > { %3227 = vmatpush1.bf16.msra.mxu0 %v1450_v25  ;;  %v1875_v25 = vunpack.c.h.s8.bf16 %v1025_v0 }
 0x3b9   : > { %3268 = vmatpush1.bf16.msra.mxu1 %v1722_v26  ;;  %3228 = vmatprep.subr.bf16.mxu0 %v1468_v5  ;;  %v2147_v26 = vunpack.c.h.s8.bf16 %v1161_v2  ;;  %v1893_v5 = vunpack.c.l.s8.bf16 %v1043_v23  ;;  %v2250_v2 = vunpack.c.h.s8.bf16 %v1213_v49  ;;  %v874_v49 = vld [vmem:[%s8221_s18 + $0x4a0] sm:$0xff] }
 0x3ba   : > { %3269 = vmatprep.subr.bf16.mxu1 %v1740_v27  ;;  %v2165_v27 = vunpack.c.l.s8.bf16 %v1179_v24 }
 0x3bc   : > { %3229 = vmatpush1.bf16.msra.mxu0 %v1467_v10  ;;  %v1892_v10 = vunpack.c.l.s8.bf16 %v1042_v8 }
 0x3bd   : > { %3270 = vmatpush1.bf16.msra.mxu1 %v1739_v28  ;;  %3230 = vmatprep.subr.bf16.mxu0 %v1485_v29  ;;  %v2164_v28 = vunpack.c.l.s8.bf16 %v1178_v9  ;;  %v1910_v29 = vunpack.c.h.s8.bf16 %v1043_v23 }
 0x3be   : > { %3271 = vmatprep.subr.bf16.mxu1 %v1757_v30  ;;  %v2182_v30 = vunpack.c.h.s8.bf16 %v1179_v24 }
 0x3c0   : > { %3231 = vmatpush1.bf16.msra.mxu0 %v1484_v33  ;;  %v1909_v33 = vunpack.c.h.s8.bf16 %v1042_v8 }
 0x3c1   : > { %3272 = vmatpush1.bf16.msra.mxu1 %v1756_v34  ;;  %3232 = vmatprep.subr.bf16.mxu0 %v1502_v35  ;;  %v2181_v34 = vunpack.c.h.s8.bf16 %v1178_v9  ;;  %v1927_v35 = vunpack.c.l.s8.bf16 %v1060_v31 }
 0x3c2   : > { %3273 = vmatprep.subr.bf16.mxu1 %v1774_v36  ;;  %v2199_v36 = vunpack.c.l.s8.bf16 %v1196_v32 }
 0x3c4   : > { %3233 = vmatpush1.bf16.msra.mxu0 %v1501_v39 }
 0x3c5   : > { %3274 = vmatpush1.bf16.msra.mxu1 %v1773_v40  ;;  %3234 = vmatprep.subr.bf16.mxu0 %v1519_v41 }
 0x3c6   : > { %3275 = vmatprep.subr.bf16.mxu1 %v1791_v42 }
 0x3c8   : > { %3235 = vmatpush1.bf16.msra.mxu0 %v1518_v46 }
 0x3c9   : > { %3276 = vmatpush1.bf16.msra.mxu1 %v1790_v47  ;;  %3236 = vmatprep.subr.bf16.mxu0 %v1536_v50 }
 0x3ca   : > { %3277 = vmatprep.subr.bf16.mxu1 %v1808_v53  ;;  %v1926_v53 = vunpack.c.l.s8.bf16 %v1059_v37 }
 0x3cc   : > { %3237 = vmatpush1.bf16.msra.mxu0 %v1535_v18  ;;  %v709_v18 = vld [vmem:[#allocation3 + $0x38] sm:$0xff] }
 0x3cd   : > { %3278 = vmatpush1.bf16.msra.mxu1 %v1807_v63  ;;  %3288 = vmatprep.subr.bf16.mxu0 %v1825_v6 }
 0x3ce   : > { %3329 = vmatprep.subr.bf16.mxu1 %v2097_v7  ;;  %v2216_v7 = vunpack.c.h.s8.bf16 %v1196_v32 }
 0x3cf   : > { %3239 = vmatmul.mubr.bf16.vlgmr.msra.gmra.mrb[40].mxu0 %v8503_v15 }
 0x3d0   : > { %3280 = vmatmul.mubr.bf16.vlgmr.msra.gmra.mrb[40].mxu1 %v8507_v16  ;;  %3289 = vmatpush1.bf16.msra.mxu0 %v1824_v12 }
 0x3d1   : > { %3330 = vmatpush1.bf16.msra.mxu1 %v2096_v13  ;;  %3290 = vmatprep.subr.bf16.mxu0 %v1842_v54  ;;  %v1943_v54 = vunpack.c.h.s8.bf16 %v1059_v37 }
 0x3d2   : > { %3331 = vmatprep.subr.bf16.mxu1 %v2114_v57  ;;  %3320 = vmatprep.mubr.bf16.mxu0 %v8519_v56  ;;  %v2215_v57 = vunpack.c.h.s8.bf16 %v1195_v38 }
 0x3d3   : > { %3361 = vmatprep.mubr.bf16.mxu1 %v8523_v3 }
 0x3d4   : > { %3291 = vmatpush1.bf16.msra.mxu0 %v1841_v60  ;;  %v1076_v60 = vld [vmem:[%s8221_s18 + $0xaf0] sm:$0xff] }
 0x3d5   : > { %3332 = vmatpush1.bf16.msra.mxu1 %v2113_v17  ;;  %3292 = vmatprep.subr.bf16.mxu0 %v1859_v1  ;;  %v1212_v17 = vld [vmem:[%s8221_s18 + $0xf30] sm:$0xff]  ;;  %v1960_v1 = vunpack.c.l.s8.bf16 %v1076_v60 }
 0x3d6   : > { %3333 = vmatprep.subr.bf16.mxu1 %v2131_v20  ;;  %v2232_v20 = vunpack.c.l.s8.bf16 %v1212_v17 }
 0x3d8   : > { %3293 = vmatpush1.bf16.msra.mxu0 %v1858_v55  ;;  %v1094_v55 = vld [vmem:[%s8221_s18 + $0xb80] sm:$0xff] }
 0x3d9   : > { %3334 = vmatpush1.bf16.msra.mxu1 %v2130_v21  ;;  %3294 = vmatprep.subr.bf16.mxu0 %v1876_v4  ;;  %v1230_v21 = vld [vmem:[%s8221_s18 + $0xfc0] sm:$0xff]  ;;  %v1977_v4 = vunpack.c.h.s8.bf16 %v1076_v60  ;;  %v1995_v23 = vunpack.c.l.s8.bf16 %v1094_v55  ;;  %v2012_v8 = vunpack.c.h.s8.bf16 %v1094_v55 }
 0x3da   : > { %3335 = vmatprep.subr.bf16.mxu1 %v2148_v22  ;;  %v2249_v22 = vunpack.c.h.s8.bf16 %v1212_v17  ;;  %v2267_v24 = vunpack.c.l.s8.bf16 %v1230_v21  ;;  %v2284_v9 = vunpack.c.h.s8.bf16 %v1230_v21  ;;  %v1571_v17 = vunpack.c.h.s8.bf16 %v874_v49 }
 0x3dc   : > { %3295 = vmatpush1.bf16.msra.mxu0 %v1875_v25  ;;  %v1093_v25 = vld [vmem:[%s8221_s18 + $0xb78] sm:$0xff] }
 0x3dd   : > { %3336 = vmatpush1.bf16.msra.mxu1 %v2147_v26  ;;  %3296 = vmatprep.subr.bf16.mxu0 %v1893_v5  ;;  %v1229_v26 = vld [vmem:[%s8221_s18 + $0xfb8] sm:$0xff]  ;;  %v1994_v5 = vunpack.c.l.s8.bf16 %v1093_v25 }
 0x3de   : > { %3337 = vmatprep.subr.bf16.mxu1 %v2165_v27  ;;  %v2266_v27 = vunpack.c.l.s8.bf16 %v1229_v26 }
 0x3e0   : > { %3297 = vmatpush1.bf16.msra.mxu0 %v1892_v10  ;;  %v1111_v10 = vld [vmem:[%s8221_s18 + $0xc08] sm:$0xff] }
 0x3e1   : > { %3338 = vmatpush1.bf16.msra.mxu1 %v2164_v28  ;;  %3298 = vmatprep.subr.bf16.mxu0 %v1910_v29  ;;  %v1247_v28 = vld [vmem:[%s8221_s18 + $0x1048] sm:$0xff]  ;;  %v2011_v29 = vunpack.c.h.s8.bf16 %v1093_v25  ;;  %v2046_v37 = vunpack.c.h.s8.bf16 %v1111_v10 }
 0x3e2   : > { %3339 = vmatprep.subr.bf16.mxu1 %v2182_v30  ;;  %v2994_v39 = vpop.f32.mrb[28].mxu0  ;;  %v2283_v30 = vunpack.c.h.s8.bf16 %v1229_v26  ;;  %v2301_v32 = vunpack.c.l.s8.bf16 %v1247_v28  ;;  %v2318_v38 = vunpack.c.h.s8.bf16 %v1247_v28 }
 0x3e3   : > { %v3035_v40 = vpop.f32.mrb[28].mxu1  ;;  %v2995_v41 = vadd.f32 %v2994_v39, %v8889_v45  ;;  %v2996_v42 = vpop.f32.mrb[29].mxu0  ;;  %v1944_v45 = vunpack.c.h.s8.bf16 %v1060_v31  ;;  %v2029_v31 = vunpack.c.l.s8.bf16 %v1111_v10  ;;  %v1128_v39 = vld [vmem:[%s8221_s18 + $0xc90] sm:$0xff] }
 0x3e4   : > { %v3037_v43 = vpop.f32.mrb[29].mxu1  ;;  %v2997_v46 = vadd.f32 %v2996_v42, %v8891_v48  ;;  %v2998_v47 = vpop.f32.mrb[30].mxu0  ;;  %3299 = vmatpush1.bf16.msra.mxu0 %v1909_v33  ;;  %v1077_v48 = vld [vmem:[%s8221_s18 + $0xaf8] sm:$0xff]  ;;  %v1110_v33 = vld [vmem:[%s8221_s18 + $0xc00] sm:$0xff] }
 0x3e5   : > { %v3039_v50 = vpop.f32.mrb[30].mxu1  ;;  %3340 = vmatpush1.bf16.msra.mxu1 %v2181_v34  ;;  %v3036_v59 = vadd.f32 %v3035_v40, %v2995_v41  ;;  %v2999_v63 = vpop.f32.mrb[31].mxu0  ;;  %3300 = vmatprep.subr.bf16.mxu0 %v1927_v35  ;;  %v1961_v14 = vunpack.c.l.s8.bf16 %v1077_v48  ;;  %v1978_v0 = vunpack.c.h.s8.bf16 %v1077_v48  ;;  %v1246_v34 = vld [vmem:[%s8221_s18 + $0x1040] sm:$0xff]  ;;  %v2028_v35 = vunpack.c.l.s8.bf16 %v1110_v33  ;;  %v1264_v40 = vld [vmem:[%s8221_s18 + $0x10d0] sm:$0xff]  ;;  %v1263_v47 = vld [vmem:[%s8221_s18 + $0x10c8] sm:$0xff] }
 0x3e6   : > { %v3040_v6 = vpop.f32.mrb[31].mxu1  ;;  %3341 = vmatprep.subr.bf16.mxu1 %v2199_v36  ;;  %v3038_v11 = vadd.f32 %v3037_v43, %v2997_v46  ;;  %v2300_v36 = vunpack.c.l.s8.bf16 %v1246_v34  ;;  %v2045_v41 = vunpack.c.h.s8.bf16 %v1110_v33  ;;  %v2317_v42 = vunpack.c.h.s8.bf16 %v1246_v34  ;;  %v1127_v46 = vld [vmem:[%s8221_s18 + $0xc88] sm:$0xff]  ;;  %v738_v48 = vld [vmem:[%s8221_s18 + $0x60] sm:$0xff] }
 0x3e7   : > { %v3864_v12 = vadd.f32 %v3036_v59, %v708_v44  ;;  %v2063_v43 = vunpack.c.l.s8.bf16 %v1128_v39  ;;  %v2335_v44 = vunpack.c.l.s8.bf16 %v1264_v40  ;;  %v2062_v50 = vunpack.c.l.s8.bf16 %v1127_v46  ;;  %v875_v63 = vld [vmem:[%s8221_s18 + $0x4a8] sm:$0xff] }
 0x3e8   : > { %v3865_v13 = vadd.f32 %v3038_v11, %v709_v18  ;;  %3301 = vmatpush1.bf16.msra.mxu0 %v1926_v53  ;;  %v2334_v53 = vunpack.c.l.s8.bf16 %v1263_v47  ;;  %v2352_v59 = vunpack.c.h.s8.bf16 %v1264_v40  ;;  %v739_v18 = vld [vmem:[%s8221_s18 + $0x68] sm:$0xff]  ;;  %v2079_v6 = vunpack.c.h.s8.bf16 %v1127_v46 }
 0x3e9   : > { %3342 = vmatpush1.bf16.msra.mxu1 %v2198_v58  ;;  %3881 = vst [vmem:[#allocation3 + $0x30] sm:$0xff] %v3864_v12  ;;  %3302 = vmatprep.subr.bf16.mxu0 %v1944_v45  ;;  %v2080_v58 = vunpack.c.h.s8.bf16 %v1128_v39  ;;  %v2351_v45 = vunpack.c.h.s8.bf16 %v1263_v47  ;;  %v1555_v11 = vunpack.c.l.s8.bf16 %v875_v63  ;;  %v1282_v12 = vunpack.c.l.s8.bf16 %v738_v48 }
 0x3ea   : > { %3343 = vmatprep.subr.bf16.mxu1 %v2216_v7  ;;  %3882 = vst [vmem:[#allocation3 + $0x38] sm:$0xff] %v3865_v13  ;;  %v1283_v7 = vunpack.c.l.s8.bf16 %v739_v18  ;;  %v1554_v13 = vunpack.c.l.s8.bf16 %v874_v49  ;;  %v1299_v60 = vunpack.c.h.s8.bf16 %v738_v48 }
 0x3ec   : > { %3303 = vmatpush1.bf16.msra.mxu0 %v1943_v54  ;;  %v1300_v54 = vunpack.c.h.s8.bf16 %v739_v18 }
 0x3ed   : > { %3344 = vmatpush1.bf16.msra.mxu1 %v2215_v57  ;;  %3304 = vmatprep.subr.bf16.mxu0 %v1961_v14  ;;  %v1572_v57 = vunpack.c.h.s8.bf16 %v875_v63  ;;  %v756_v14 = vld [vmem:[%s8221_s18 + $0xf0] sm:$0xff] }
 0x3ee   : > { %3345 = vmatprep.subr.bf16.mxu1 %v2233_v19  ;;  %v892_v19 = vld [vmem:[%s8221_s18 + $0x530] sm:$0xff] }
 0x3f0   : > { %3305 = vmatpush1.bf16.msra.mxu0 %v1960_v1  ;;  %v1317_v1 = vunpack.c.l.s8.bf16 %v756_v14 }
 0x3f1   : > { %3346 = vmatpush1.bf16.msra.mxu1 %v2232_v20  ;;  %3306 = vmatprep.subr.bf16.mxu0 %v1978_v0  ;;  %v1589_v20 = vunpack.c.l.s8.bf16 %v892_v19  ;;  %v755_v0 = vld [vmem:[%s8221_s18 + $0xe8] sm:$0xff] }
 0x3f2   : > { %3347 = vmatprep.subr.bf16.mxu1 %v2250_v2  ;;  %v891_v2 = vld [vmem:[%s8221_s18 + $0x528] sm:$0xff]  ;;  %v1316_v55 = vunpack.c.l.s8.bf16 %v755_v0  ;;  %v1333_v25 = vunpack.c.h.s8.bf16 %v755_v0 }
 0x3f3   : > { %v1588_v21 = vunpack.c.l.s8.bf16 %v891_v2  ;;  %v1605_v26 = vunpack.c.h.s8.bf16 %v891_v2 }
 0x3f4   : > { %3307 = vmatpush1.bf16.msra.mxu0 %v1977_v4  ;;  %v1334_v4 = vunpack.c.h.s8.bf16 %v756_v14 }
 0x3f5   : > { %3348 = vmatpush1.bf16.msra.mxu1 %v2249_v22  ;;  %3308 = vmatprep.subr.bf16.mxu0 %v1995_v23  ;;  %v1606_v22 = vunpack.c.h.s8.bf16 %v892_v19  ;;  %v773_v23 = vld [vmem:[%s8221_s18 + $0x178] sm:$0xff] }
 0x3f6   : > { %3349 = vmatprep.subr.bf16.mxu1 %v2267_v24  ;;  %v909_v24 = vld [vmem:[%s8221_s18 + $0x5b8] sm:$0xff] }
 0x3f8   : > { %3309 = vmatpush1.bf16.msra.mxu0 %v1994_v5  ;;  %v1351_v5 = vunpack.c.l.s8.bf16 %v773_v23 }
 0x3f9   : > { %3350 = vmatpush1.bf16.msra.mxu1 %v2266_v27  ;;  %3310 = vmatprep.subr.bf16.mxu0 %v2012_v8  ;;  %v1623_v27 = vunpack.c.l.s8.bf16 %v909_v24  ;;  %v772_v8 = vld [vmem:[%s8221_s18 + $0x170] sm:$0xff] }
 0x3fa   : > { %3351 = vmatprep.subr.bf16.mxu1 %v2284_v9  ;;  %v908_v9 = vld [vmem:[%s8221_s18 + $0x5b0] sm:$0xff]  ;;  %v1350_v10 = vunpack.c.l.s8.bf16 %v772_v8  ;;  %v1367_v33 = vunpack.c.h.s8.bf16 %v772_v8 }
 0x3fb   : > { %v1622_v28 = vunpack.c.l.s8.bf16 %v908_v9  ;;  %v1639_v34 = vunpack.c.h.s8.bf16 %v908_v9 }
 0x3fc   : > { %3311 = vmatpush1.bf16.msra.mxu0 %v2011_v29  ;;  %v1368_v29 = vunpack.c.h.s8.bf16 %v773_v23 }
 0x3fd   : > { %3352 = vmatpush1.bf16.msra.mxu1 %v2283_v30  ;;  %3312 = vmatprep.subr.bf16.mxu0 %v2029_v31  ;;  %v1640_v30 = vunpack.c.h.s8.bf16 %v909_v24  ;;  %v790_v31 = vld [vmem:[%s8221_s18 + $0x200] sm:$0xff] }
 0x3fe   : > { %3353 = vmatprep.subr.bf16.mxu1 %v2301_v32  ;;  %v926_v32 = vld [vmem:[%s8221_s18 + $0x640] sm:$0xff]  ;;  %v1402_v18 = vunpack.c.h.s8.bf16 %v790_v31 }
 0x3ff   : > { %v1674_v63 = vunpack.c.h.s8.bf16 %v926_v32 }
 0x400   : > { %3313 = vmatpush1.bf16.msra.mxu0 %v2028_v35  ;;  %v1385_v35 = vunpack.c.l.s8.bf16 %v790_v31 }
 0x401   : > { %3354 = vmatpush1.bf16.msra.mxu1 %v2300_v36  ;;  %3314 = vmatprep.subr.bf16.mxu0 %v2046_v37  ;;  %v1657_v36 = vunpack.c.l.s8.bf16 %v926_v32  ;;  %v789_v37 = vld [vmem:[%s8221_s18 + $0x1f8] sm:$0xff] }
 0x402   : > { %3355 = vmatprep.subr.bf16.mxu1 %v2318_v38  ;;  %v925_v38 = vld [vmem:[%s8221_s18 + $0x638] sm:$0xff] }
 0x404   : > { %3315 = vmatpush1.bf16.msra.mxu0 %v2045_v41 }
 0x405   : > { %3356 = vmatpush1.bf16.msra.mxu1 %v2317_v42  ;;  %3316 = vmatprep.subr.bf16.mxu0 %v2063_v43 }
 0x406   : > { %3357 = vmatprep.subr.bf16.mxu1 %v2335_v44 }
 0x408   : > { %3317 = vmatpush1.bf16.msra.mxu0 %v2062_v50  ;;  %v1384_v50 = vunpack.c.l.s8.bf16 %v789_v37 }
 0x409   : > { %3358 = vmatpush1.bf16.msra.mxu1 %v2334_v53  ;;  %3318 = vmatprep.subr.bf16.mxu0 %v2080_v58  ;;  %v1656_v53 = vunpack.c.l.s8.bf16 %v925_v38 }
 0x40a   : > { %3359 = vmatprep.subr.bf16.mxu1 %v2352_v59 }
 0x40c   : > { %3319 = vmatpush1.bf16.msra.mxu0 %v2079_v6  ;;  %v807_v6 = vld [vmem:[%s8221_s18 + $0x288] sm:$0xff] }
 0x40d   : > { %3360 = vmatpush1.bf16.msra.mxu1 %v2351_v45  ;;  %3370 = vmatprep.subr.bf16.mxu0 %v1283_v7  ;;  %v943_v45 = vld [vmem:[%s8221_s18 + $0x6c8] sm:$0xff]  ;;  %v1401_v7 = vunpack.c.h.s8.bf16 %v789_v37  ;;  %v1419_v48 = vunpack.c.l.s8.bf16 %v807_v6  ;;  %v1436_v14 = vunpack.c.h.s8.bf16 %v807_v6  ;;  %v1010_v6 = vld [vmem:[%s8221_s18 + $0x8e0] sm:$0xff] }
 0x40e   : > { %3411 = vmatprep.subr.bf16.mxu1 %v1555_v11  ;;  %v1673_v11 = vunpack.c.h.s8.bf16 %v925_v38  ;;  %v1691_v49 = vunpack.c.l.s8.bf16 %v943_v45  ;;  %v1708_v19 = vunpack.c.h.s8.bf16 %v943_v45  ;;  %v1146_v45 = vld [vmem:[%s8221_s18 + $0xd20] sm:$0xff] }
 0x40f   : > { %3321 = vmatmul.mubr.bf16.vlgmr.msra.gmra.mrb[44].mxu0 %v8561_v51 }
 0x410   : > { %3362 = vmatmul.mubr.bf16.vlgmr.msra.gmra.mrb[44].mxu1 %v8565_v52  ;;  %3371 = vmatpush1.bf16.msra.mxu0 %v1282_v12  ;;  %v806_v12 = vld [vmem:[%s8221_s18 + $0x280] sm:$0xff] }
 0x411   : > { %3412 = vmatpush1.bf16.msra.mxu1 %v1554_v13  ;;  %3372 = vmatprep.subr.bf16.mxu0 %v1300_v54  ;;  %v942_v13 = vld [vmem:[%s8221_s18 + $0x6c0] sm:$0xff]  ;;  %v1418_v54 = vunpack.c.l.s8.bf16 %v806_v12 }
 0x412   : > { %3413 = vmatprep.subr.bf16.mxu1 %v1572_v57  ;;  %3402 = vmatprep.mubr.bf16.mxu0 %v8469_v61  ;;  %v1690_v57 = vunpack.c.l.s8.bf16 %v942_v13 }
 0x413   : > { %3443 = vmatprep.mubr.bf16.mxu1 %v8473_v62 }
 0x414   : > { %3373 = vmatpush1.bf16.msra.mxu0 %v1299_v60  ;;  %v824_v60 = vld [vmem:[%s8221_s18 + $0x310] sm:$0xff] }
 0x415   : > { %3414 = vmatpush1.bf16.msra.mxu1 %v1571_v17  ;;  %3374 = vmatprep.subr.bf16.mxu0 %v1317_v1  ;;  %v960_v17 = vld [vmem:[%s8221_s18 + $0x750] sm:$0xff]  ;;  %v1435_v1 = vunpack.c.h.s8.bf16 %v806_v12  ;;  %v1453_v0 = vunpack.c.l.s8.bf16 %v824_v60  ;;  %v1470_v23 = vunpack.c.h.s8.bf16 %v824_v60  ;;  %v1027_v60 = vld [vmem:[%s8221_s18 + $0x968] sm:$0xff] }
 0x416   : > { %3415 = vmatprep.subr.bf16.mxu1 %v1589_v20  ;;  %v1707_v20 = vunpack.c.h.s8.bf16 %v942_v13  ;;  %v1725_v2 = vunpack.c.l.s8.bf16 %v960_v17  ;;  %v1742_v24 = vunpack.c.h.s8.bf16 %v960_v17  ;;  %v1028_v12 = vld [vmem:[%s8221_s18 + $0x970] sm:$0xff]  ;;  %v1163_v17 = vld [vmem:[%s8221_s18 + $0xda8] sm:$0xff] }
 0x417   : > { %v1164_v13 = vld [vmem:[%s8221_s18 + $0xdb0] sm:$0xff] }
 0x418   : > { %3375 = vmatpush1.bf16.msra.mxu0 %v1316_v55  ;;  %v823_v55 = vld [vmem:[%s8221_s18 + $0x308] sm:$0xff] }
 0x419   : > { %3416 = vmatpush1.bf16.msra.mxu1 %v1588_v21  ;;  %3376 = vmatprep.subr.bf16.mxu0 %v1334_v4  ;;  %v959_v21 = vld [vmem:[%s8221_s18 + $0x748] sm:$0xff]  ;;  %v1452_v4 = vunpack.c.l.s8.bf16 %v823_v55 }
 0x41a   : > { %3417 = vmatprep.subr.bf16.mxu1 %v1606_v22  ;;  %v1724_v22 = vunpack.c.l.s8.bf16 %v959_v21 }
 0x41c   : > { %3377 = vmatpush1.bf16.msra.mxu0 %v1333_v25  ;;  %v841_v25 = vld [vmem:[%s8221_s18 + $0x398] sm:$0xff] }
 0x41d   : > { %3418 = vmatpush1.bf16.msra.mxu1 %v1605_v26  ;;  %3378 = vmatprep.subr.bf16.mxu0 %v1351_v5  ;;  %v977_v26 = vld [vmem:[%s8221_s18 + $0x7d8] sm:$0xff]  ;;  %v1469_v5 = vunpack.c.h.s8.bf16 %v823_v55  ;;  %v1487_v8 = vunpack.c.l.s8.bf16 %v841_v25  ;;  %v1504_v31 = vunpack.c.h.s8.bf16 %v841_v25  ;;  %v1044_v25 = vld [vmem:[%s8221_s18 + $0x9f0] sm:$0xff] }
 0x41e   : > { %3419 = vmatprep.subr.bf16.mxu1 %v1623_v27  ;;  %v1741_v27 = vunpack.c.h.s8.bf16 %v959_v21  ;;  %v1759_v9 = vunpack.c.l.s8.bf16 %v977_v26  ;;  %v1776_v32 = vunpack.c.h.s8.bf16 %v977_v26  ;;  %v1045_v55 = vld [vmem:[%s8221_s18 + $0x9f8] sm:$0xff]  ;;  %v1180_v26 = vld [vmem:[%s8221_s18 + $0xe30] sm:$0xff] }
 0x41f   : > { %v1181_v21 = vld [vmem:[%s8221_s18 + $0xe38] sm:$0xff] }
 0x420   : > { %3379 = vmatpush1.bf16.msra.mxu0 %v1350_v10  ;;  %v840_v10 = vld [vmem:[%s8221_s18 + $0x390] sm:$0xff] }
 0x421   : > { %3420 = vmatpush1.bf16.msra.mxu1 %v1622_v28  ;;  %3380 = vmatprep.subr.bf16.mxu0 %v1368_v29  ;;  %v976_v28 = vld [vmem:[%s8221_s18 + $0x7d0] sm:$0xff]  ;;  %v1486_v29 = vunpack.c.l.s8.bf16 %v840_v10 }
 0x422   : > { %3421 = vmatprep.subr.bf16.mxu1 %v1640_v30  ;;  %v3076_v39 = vpop.f32.mrb[32].mxu0  ;;  %v1758_v30 = vunpack.c.l.s8.bf16 %v976_v28 }
 0x423   : > { %v3117_v40 = vpop.f32.mrb[32].mxu1  ;;  %v3078_v42 = vpop.f32.mrb[33].mxu0 }
 0x424   : > { %v8967_v41 = vadd.f32 %v3117_v40, %v3076_v39  ;;  %v3119_v43 = vpop.f32.mrb[33].mxu1  ;;  %v3080_v46 = vpop.f32.mrb[34].mxu0  ;;  %3381 = vmatpush1.bf16.msra.mxu0 %v1367_v33  ;;  %v858_v33 = vld [vmem:[%s8221_s18 + $0x420] sm:$0xff]  ;;  %v857_v39 = vld [vmem:[%s8221_s18 + $0x418] sm:$0xff] }
 0x425   : > { %v8969_v44 = vadd.f32 %v3119_v43, %v3078_v42  ;;  %v3121_v47 = vpop.f32.mrb[34].mxu1  ;;  %3422 = vmatpush1.bf16.msra.mxu1 %v1639_v34  ;;  %v3081_v58 = vpop.f32.mrb[35].mxu0  ;;  %3382 = vmatprep.subr.bf16.mxu0 %v1385_v35  ;;  %v994_v34 = vld [vmem:[%s8221_s18 + $0x860] sm:$0xff]  ;;  %v1503_v35 = vunpack.c.h.s8.bf16 %v840_v10  ;;  %v1521_v37 = vunpack.c.l.s8.bf16 %v858_v33  ;;  %v993_v40 = vld [vmem:[%s8221_s18 + $0x858] sm:$0xff]  ;;  %v1520_v42 = vunpack.c.l.s8.bf16 %v857_v39 }
 0x426   : > { %v3122_v59 = vpop.f32.mrb[35].mxu1  ;;  %3423 = vmatprep.subr.bf16.mxu1 %v1657_v36  ;;  %v1775_v36 = vunpack.c.h.s8.bf16 %v976_v28  ;;  %v1793_v38 = vunpack.c.l.s8.bf16 %v994_v34  ;;  %v1792_v43 = vunpack.c.l.s8.bf16 %v993_v40  ;;  %v1538_v46 = vunpack.c.h.s8.bf16 %v858_v33  ;;  %v1062_v10 = vld [vmem:[%s8221_s18 + $0xa80] sm:$0xff]  ;;  %v1061_v33 = vld [vmem:[%s8221_s18 + $0xa78] sm:$0xff] }
 0x427   : > { %v1810_v47 = vunpack.c.h.s8.bf16 %v994_v34  ;;  %v1537_v58 = vunpack.c.h.s8.bf16 %v857_v39  ;;  %v1809_v59 = vunpack.c.h.s8.bf16 %v993_v40  ;;  %v1198_v28 = vld [vmem:[%s8221_s18 + $0xec0] sm:$0xff]  ;;  %v1197_v34 = vld [vmem:[%s8221_s18 + $0xeb8] sm:$0xff] }
 0x428   : > { %3383 = vmatpush1.bf16.msra.mxu0 %v1384_v50  ;;  %v1011_v50 = vld [vmem:[%s8221_s18 + $0x8e8] sm:$0xff]  ;;  %v710_v40 = vld [vmem:[#allocation3 + $0x40] sm:$0xff] }
 0x429   : > { %3424 = vmatpush1.bf16.msra.mxu1 %v1656_v53  ;;  %3384 = vmatprep.subr.bf16.mxu0 %v1402_v18  ;;  %v1147_v53 = vld [vmem:[%s8221_s18 + $0xd28] sm:$0xff]  ;;  %v1827_v18 = vunpack.c.l.s8.bf16 %v1011_v50 }
 0x42a   : > { %3425 = vmatprep.subr.bf16.mxu1 %v1674_v63  ;;  %v2099_v63 = vunpack.c.l.s8.bf16 %v1147_v53 }
 0x42c   : > { %3385 = vmatpush1.bf16.msra.mxu0 %v1401_v7  ;;  %v1826_v7 = vunpack.c.l.s8.bf16 %v1010_v6 }
 0x42d   : > { %3426 = vmatpush1.bf16.msra.mxu1 %v1673_v11  ;;  %3386 = vmatprep.subr.bf16.mxu0 %v1419_v48  ;;  %v2098_v11 = vunpack.c.l.s8.bf16 %v1146_v45  ;;  %v1844_v48 = vunpack.c.h.s8.bf16 %v1011_v50  ;;  %v2200_v50 = vunpack.c.l.s8.bf16 %v1197_v34 }
 0x42e   : > { %3427 = vmatprep.subr.bf16.mxu1 %v1691_v49  ;;  %v2116_v49 = vunpack.c.h.s8.bf16 %v1147_v53 }
 0x430   : > { %3387 = vmatpush1.bf16.msra.mxu0 %v1418_v54  ;;  %v1843_v54 = vunpack.c.h.s8.bf16 %v1010_v6 }
 0x431   : > { %3428 = vmatpush1.bf16.msra.mxu1 %v1690_v57  ;;  %3388 = vmatprep.subr.bf16.mxu0 %v1436_v14  ;;  %v2115_v57 = vunpack.c.h.s8.bf16 %v1146_v45  ;;  %v1861_v14 = vunpack.c.l.s8.bf16 %v1028_v12  ;;  %v1215_v45 = vld [vmem:[%s8221_s18 + $0xf48] sm:$0xff] }
 0x432   : > { %3429 = vmatprep.subr.bf16.mxu1 %v1708_v19  ;;  %v2133_v19 = vunpack.c.l.s8.bf16 %v1164_v13 }
 0x434   : > { %3389 = vmatpush1.bf16.msra.mxu0 %v1435_v1  ;;  %v1860_v1 = vunpack.c.l.s8.bf16 %v1027_v60 }
 0x435   : > { %3430 = vmatpush1.bf16.msra.mxu1 %v1707_v20  ;;  %3390 = vmatprep.subr.bf16.mxu0 %v1453_v0  ;;  %v2132_v20 = vunpack.c.l.s8.bf16 %v1163_v17  ;;  %v1878_v0 = vunpack.c.h.s8.bf16 %v1028_v12 }
 0x436   : > { %3431 = vmatprep.subr.bf16.mxu1 %v1725_v2  ;;  %v2150_v2 = vunpack.c.h.s8.bf16 %v1164_v13  ;;  %v2235_v13 = vunpack.c.l.s8.bf16 %v1215_v45 }
 0x438   : > { %3391 = vmatpush1.bf16.msra.mxu0 %v1452_v4  ;;  %v1877_v4 = vunpack.c.h.s8.bf16 %v1027_v60 }
 0x439   : > { %3432 = vmatpush1.bf16.msra.mxu1 %v1724_v22  ;;  %3392 = vmatprep.subr.bf16.mxu0 %v1470_v23  ;;  %v2149_v22 = vunpack.c.h.s8.bf16 %v1163_v17  ;;  %v1895_v23 = vunpack.c.l.s8.bf16 %v1045_v55  ;;  %v2252_v17 = vunpack.c.h.s8.bf16 %v1215_v45  ;;  %v876_v45 = vld [vmem:[%s8221_s18 + $0x4b0] sm:$0xff] }
 0x43a   : > { %3433 = vmatprep.subr.bf16.mxu1 %v1742_v24  ;;  %v2167_v24 = vunpack.c.l.s8.bf16 %v1181_v21 }
 0x43c   : > { %3393 = vmatpush1.bf16.msra.mxu0 %v1469_v5  ;;  %v1894_v5 = vunpack.c.l.s8.bf16 %v1044_v25 }
 0x43d   : > { %3434 = vmatpush1.bf16.msra.mxu1 %v1741_v27  ;;  %3394 = vmatprep.subr.bf16.mxu0 %v1487_v8  ;;  %v2166_v27 = vunpack.c.l.s8.bf16 %v1180_v26  ;;  %v1912_v8 = vunpack.c.h.s8.bf16 %v1045_v55 }
 0x43e   : > { %3435 = vmatprep.subr.bf16.mxu1 %v1759_v9  ;;  %v2184_v9 = vunpack.c.h.s8.bf16 %v1181_v21 }
 0x440   : > { %3395 = vmatpush1.bf16.msra.mxu0 %v1486_v29  ;;  %v1911_v29 = vunpack.c.h.s8.bf16 %v1044_v25 }
 0x441   : > { %3436 = vmatpush1.bf16.msra.mxu1 %v1758_v30  ;;  %3396 = vmatprep.subr.bf16.mxu0 %v1504_v31  ;;  %v2183_v30 = vunpack.c.h.s8.bf16 %v1180_v26  ;;  %v1929_v31 = vunpack.c.l.s8.bf16 %v1062_v10 }
 0x442   : > { %3437 = vmatprep.subr.bf16.mxu1 %v1776_v32  ;;  %v2201_v32 = vunpack.c.l.s8.bf16 %v1198_v28 }
 0x444   : > { %3397 = vmatpush1.bf16.msra.mxu0 %v1503_v35 }
 0x445   : > { %3438 = vmatpush1.bf16.msra.mxu1 %v1775_v36  ;;  %3398 = vmatprep.subr.bf16.mxu0 %v1521_v37 }
 0x446   : > { %3439 = vmatprep.subr.bf16.mxu1 %v1793_v38 }
 0x448   : > { %3399 = vmatpush1.bf16.msra.mxu0 %v1520_v42 }
 0x449   : > { %3440 = vmatpush1.bf16.msra.mxu1 %v1792_v43  ;;  %3400 = vmatprep.subr.bf16.mxu0 %v1538_v46 }
 0x44a   : > { %3441 = vmatprep.subr.bf16.mxu1 %v1810_v47  ;;  %v1928_v47 = vunpack.c.l.s8.bf16 %v1061_v33 }
 0x44c   : > { %3401 = vmatpush1.bf16.msra.mxu0 %v1537_v58  ;;  %v711_v58 = vld [vmem:[#allocation3 + $0x48] sm:$0xff] }
 0x44d   : > { %3442 = vmatpush1.bf16.msra.mxu1 %v1809_v59  ;;  %3452 = vmatprep.subr.bf16.mxu0 %v1827_v18 }
 0x44e   : > { %3493 = vmatprep.subr.bf16.mxu1 %v2099_v63  ;;  %v2218_v63 = vunpack.c.h.s8.bf16 %v1198_v28 }
 0x44f   : > { %3403 = vmatmul.mubr.bf16.vlgmr.msra.gmra.mrb[48].mxu0 %v8503_v15 }
 0x450   : > { %3444 = vmatmul.mubr.bf16.vlgmr.msra.gmra.mrb[48].mxu1 %v8507_v16  ;;  %3453 = vmatpush1.bf16.msra.mxu0 %v1826_v7 }
 0x451   : > { %3494 = vmatpush1.bf16.msra.mxu1 %v2098_v11  ;;  %3454 = vmatprep.subr.bf16.mxu0 %v1844_v48  ;;  %v1945_v48 = vunpack.c.h.s8.bf16 %v1061_v33 }
 0x452   : > { %3495 = vmatprep.subr.bf16.mxu1 %v2116_v49  ;;  %3484 = vmatprep.mubr.bf16.mxu0 %v8519_v56  ;;  %v2217_v49 = vunpack.c.h.s8.bf16 %v1197_v34 }
 0x453   : > { %3525 = vmatprep.mubr.bf16.mxu1 %v8523_v3 }
 0x454   : > { %3455 = vmatpush1.bf16.msra.mxu0 %v1843_v54  ;;  %v1078_v54 = vld [vmem:[%s8221_s18 + $0xb00] sm:$0xff] }
 0x455   : > { %3496 = vmatpush1.bf16.msra.mxu1 %v2115_v57  ;;  %3456 = vmatprep.subr.bf16.mxu0 %v1861_v14  ;;  %v1214_v57 = vld [vmem:[%s8221_s18 + $0xf40] sm:$0xff]  ;;  %v1962_v14 = vunpack.c.l.s8.bf16 %v1078_v54 }
 0x456   : > { %3497 = vmatprep.subr.bf16.mxu1 %v2133_v19  ;;  %v2234_v19 = vunpack.c.l.s8.bf16 %v1214_v57 }
 0x458   : > { %3457 = vmatpush1.bf16.msra.mxu0 %v1860_v1  ;;  %v1096_v1 = vld [vmem:[%s8221_s18 + $0xb90] sm:$0xff] }
 0x459   : > { %3498 = vmatpush1.bf16.msra.mxu1 %v2132_v20  ;;  %3458 = vmatprep.subr.bf16.mxu0 %v1878_v0  ;;  %v1232_v20 = vld [vmem:[%s8221_s18 + $0xfd0] sm:$0xff]  ;;  %v1979_v0 = vunpack.c.h.s8.bf16 %v1078_v54  ;;  %v1997_v55 = vunpack.c.l.s8.bf16 %v1096_v1  ;;  %v2014_v25 = vunpack.c.h.s8.bf16 %v1096_v1 }
 0x45a   : > { %3499 = vmatprep.subr.bf16.mxu1 %v2150_v2  ;;  %v2251_v2 = vunpack.c.h.s8.bf16 %v1214_v57  ;;  %v2269_v21 = vunpack.c.l.s8.bf16 %v1232_v20  ;;  %v2286_v26 = vunpack.c.h.s8.bf16 %v1232_v20  ;;  %v1573_v57 = vunpack.c.h.s8.bf16 %v876_v45 }
 0x45c   : > { %3459 = vmatpush1.bf16.msra.mxu0 %v1877_v4  ;;  %v1095_v4 = vld [vmem:[%s8221_s18 + $0xb88] sm:$0xff] }
 0x45d   : > { %3500 = vmatpush1.bf16.msra.mxu1 %v2149_v22  ;;  %3460 = vmatprep.subr.bf16.mxu0 %v1895_v23  ;;  %v1231_v22 = vld [vmem:[%s8221_s18 + $0xfc8] sm:$0xff]  ;;  %v1996_v23 = vunpack.c.l.s8.bf16 %v1095_v4 }
 0x45e   : > { %3501 = vmatprep.subr.bf16.mxu1 %v2167_v24  ;;  %v2268_v24 = vunpack.c.l.s8.bf16 %v1231_v22 }
 0x460   : > { %3461 = vmatpush1.bf16.msra.mxu0 %v1894_v5  ;;  %v1113_v5 = vld [vmem:[%s8221_s18 + $0xc18] sm:$0xff] }
 0x461   : > { %3502 = vmatpush1.bf16.msra.mxu1 %v2166_v27  ;;  %3462 = vmatprep.subr.bf16.mxu0 %v1912_v8  ;;  %v1249_v27 = vld [vmem:[%s8221_s18 + $0x1058] sm:$0xff]  ;;  %v2013_v8 = vunpack.c.h.s8.bf16 %v1095_v4  ;;  %v2048_v33 = vunpack.c.h.s8.bf16 %v1113_v5 }
 0x462   : > { %3503 = vmatprep.subr.bf16.mxu1 %v2184_v9  ;;  %v3158_v35 = vpop.f32.mrb[36].mxu0  ;;  %v2285_v9 = vunpack.c.h.s8.bf16 %v1231_v22  ;;  %v2303_v28 = vunpack.c.l.s8.bf16 %v1249_v27  ;;  %v2320_v34 = vunpack.c.h.s8.bf16 %v1249_v27 }
 0x463   : > { %v3199_v36 = vpop.f32.mrb[36].mxu1  ;;  %v3159_v37 = vadd.f32 %v3158_v35, %v8967_v41  ;;  %v3160_v38 = vpop.f32.mrb[37].mxu0  ;;  %v1946_v41 = vunpack.c.h.s8.bf16 %v1062_v10  ;;  %v2031_v10 = vunpack.c.l.s8.bf16 %v1113_v5  ;;  %v1130_v35 = vld [vmem:[%s8221_s18 + $0xca0] sm:$0xff] }
 0x464   : > { %v3201_v39 = vpop.f32.mrb[37].mxu1  ;;  %v3161_v42 = vadd.f32 %v3160_v38, %v8969_v44  ;;  %v3162_v43 = vpop.f32.mrb[38].mxu0  ;;  %3463 = vmatpush1.bf16.msra.mxu0 %v1911_v29  ;;  %v1079_v44 = vld [vmem:[%s8221_s18 + $0xb08] sm:$0xff]  ;;  %v1112_v29 = vld [vmem:[%s8221_s18 + $0xc10] sm:$0xff] }
 0x465   : > { %v3203_v46 = vpop.f32.mrb[38].mxu1  ;;  %3504 = vmatpush1.bf16.msra.mxu1 %v2183_v30  ;;  %v3200_v53 = vadd.f32 %v3199_v36, %v3159_v37  ;;  %v3163_v59 = vpop.f32.mrb[39].mxu0  ;;  %3464 = vmatprep.subr.bf16.mxu0 %v1929_v31  ;;  %v1963_v12 = vunpack.c.l.s8.bf16 %v1079_v44  ;;  %v1980_v60 = vunpack.c.h.s8.bf16 %v1079_v44  ;;  %v1248_v30 = vld [vmem:[%s8221_s18 + $0x1050] sm:$0xff]  ;;  %v2030_v31 = vunpack.c.l.s8.bf16 %v1112_v29  ;;  %v1266_v36 = vld [vmem:[%s8221_s18 + $0x10e0] sm:$0xff]  ;;  %v1265_v43 = vld [vmem:[%s8221_s18 + $0x10d8] sm:$0xff] }
 0x466   : > { %v3204_v18 = vpop.f32.mrb[39].mxu1  ;;  %3505 = vmatprep.subr.bf16.mxu1 %v2201_v32  ;;  %v3202_v6 = vadd.f32 %v3201_v39, %v3161_v42  ;;  %v2302_v32 = vunpack.c.l.s8.bf16 %v1248_v30  ;;  %v2047_v37 = vunpack.c.h.s8.bf16 %v1112_v29  ;;  %v2319_v38 = vunpack.c.h.s8.bf16 %v1248_v30  ;;  %v1129_v42 = vld [vmem:[%s8221_s18 + $0xc98] sm:$0xff]  ;;  %v740_v44 = vld [vmem:[%s8221_s18 + $0x70] sm:$0xff] }
 0x467   : > { %v3866_v7 = vadd.f32 %v3200_v53, %v710_v40  ;;  %v2065_v39 = vunpack.c.l.s8.bf16 %v1130_v35  ;;  %v2337_v40 = vunpack.c.l.s8.bf16 %v1266_v36  ;;  %v2064_v46 = vunpack.c.l.s8.bf16 %v1129_v42  ;;  %v877_v59 = vld [vmem:[%s8221_s18 + $0x4b8] sm:$0xff] }
 0x468   : > { %v3867_v11 = vadd.f32 %v3202_v6, %v711_v58  ;;  %3465 = vmatpush1.bf16.msra.mxu0 %v1928_v47  ;;  %v2336_v47 = vunpack.c.l.s8.bf16 %v1265_v43  ;;  %v2354_v53 = vunpack.c.h.s8.bf16 %v1266_v36  ;;  %v741_v58 = vld [vmem:[%s8221_s18 + $0x78] sm:$0xff]  ;;  %v2081_v18 = vunpack.c.h.s8.bf16 %v1129_v42 }
 0x469   : > { %3506 = vmatpush1.bf16.msra.mxu1 %v2200_v50  ;;  %3883 = vst [vmem:[#allocation3 + $0x40] sm:$0xff] %v3866_v7  ;;  %3466 = vmatprep.subr.bf16.mxu0 %v1946_v41  ;;  %v2082_v50 = vunpack.c.h.s8.bf16 %v1130_v35  ;;  %v2353_v41 = vunpack.c.h.s8.bf16 %v1265_v43  ;;  %v1557_v6 = vunpack.c.l.s8.bf16 %v877_v59  ;;  %v1284_v7 = vunpack.c.l.s8.bf16 %v740_v44 }
 0x46a   : > { %3507 = vmatprep.subr.bf16.mxu1 %v2218_v63  ;;  %3884 = vst [vmem:[#allocation3 + $0x48] sm:$0xff] %v3867_v11  ;;  %v1285_v63 = vunpack.c.l.s8.bf16 %v741_v58  ;;  %v1556_v11 = vunpack.c.l.s8.bf16 %v876_v45  ;;  %v1301_v54 = vunpack.c.h.s8.bf16 %v740_v44 }
 0x46c   : > { %3467 = vmatpush1.bf16.msra.mxu0 %v1945_v48  ;;  %v1302_v48 = vunpack.c.h.s8.bf16 %v741_v58 }
 0x46d   : > { %3508 = vmatpush1.bf16.msra.mxu1 %v2217_v49  ;;  %3468 = vmatprep.subr.bf16.mxu0 %v1963_v12  ;;  %v1574_v49 = vunpack.c.h.s8.bf16 %v877_v59  ;;  %v758_v12 = vld [vmem:[%s8221_s18 + $0x100] sm:$0xff] }
 0x46e   : > { %3509 = vmatprep.subr.bf16.mxu1 %v2235_v13  ;;  %v894_v13 = vld [vmem:[%s8221_s18 + $0x540] sm:$0xff] }
 0x470   : > { %3469 = vmatpush1.bf16.msra.mxu0 %v1962_v14  ;;  %v1319_v14 = vunpack.c.l.s8.bf16 %v758_v12 }
 0x471   : > { %3510 = vmatpush1.bf16.msra.mxu1 %v2234_v19  ;;  %3470 = vmatprep.subr.bf16.mxu0 %v1980_v60  ;;  %v1591_v19 = vunpack.c.l.s8.bf16 %v894_v13  ;;  %v757_v60 = vld [vmem:[%s8221_s18 + $0xf8] sm:$0xff] }
 0x472   : > { %3511 = vmatprep.subr.bf16.mxu1 %v2252_v17  ;;  %v893_v17 = vld [vmem:[%s8221_s18 + $0x538] sm:$0xff]  ;;  %v1318_v1 = vunpack.c.l.s8.bf16 %v757_v60  ;;  %v1335_v4 = vunpack.c.h.s8.bf16 %v757_v60 }
 0x473   : > { %v1590_v20 = vunpack.c.l.s8.bf16 %v893_v17  ;;  %v1607_v22 = vunpack.c.h.s8.bf16 %v893_v17 }
 0x474   : > { %3471 = vmatpush1.bf16.msra.mxu0 %v1979_v0  ;;  %v1336_v0 = vunpack.c.h.s8.bf16 %v758_v12 }
 0x475   : > { %3512 = vmatpush1.bf16.msra.mxu1 %v2251_v2  ;;  %3472 = vmatprep.subr.bf16.mxu0 %v1997_v55  ;;  %v1608_v2 = vunpack.c.h.s8.bf16 %v894_v13  ;;  %v775_v55 = vld [vmem:[%s8221_s18 + $0x188] sm:$0xff] }
 0x476   : > { %3513 = vmatprep.subr.bf16.mxu1 %v2269_v21  ;;  %v911_v21 = vld [vmem:[%s8221_s18 + $0x5c8] sm:$0xff] }
 0x478   : > { %3473 = vmatpush1.bf16.msra.mxu0 %v1996_v23  ;;  %v1353_v23 = vunpack.c.l.s8.bf16 %v775_v55 }
 0x479   : > { %3514 = vmatpush1.bf16.msra.mxu1 %v2268_v24  ;;  %3474 = vmatprep.subr.bf16.mxu0 %v2014_v25  ;;  %v1625_v24 = vunpack.c.l.s8.bf16 %v911_v21  ;;  %v774_v25 = vld [vmem:[%s8221_s18 + $0x180] sm:$0xff] }
 0x47a   : > { %3515 = vmatprep.subr.bf16.mxu1 %v2286_v26  ;;  %v910_v26 = vld [vmem:[%s8221_s18 + $0x5c0] sm:$0xff]  ;;  %v1352_v5 = vunpack.c.l.s8.bf16 %v774_v25  ;;  %v1369_v29 = vunpack.c.h.s8.bf16 %v774_v25 }
 0x47b   : > { %v1624_v27 = vunpack.c.l.s8.bf16 %v910_v26  ;;  %v1641_v30 = vunpack.c.h.s8.bf16 %v910_v26 }
 0x47c   : > { %3475 = vmatpush1.bf16.msra.mxu0 %v2013_v8  ;;  %v1370_v8 = vunpack.c.h.s8.bf16 %v775_v55 }
 0x47d   : > { %3516 = vmatpush1.bf16.msra.mxu1 %v2285_v9  ;;  %3476 = vmatprep.subr.bf16.mxu0 %v2031_v10  ;;  %v1642_v9 = vunpack.c.h.s8.bf16 %v911_v21  ;;  %v792_v10 = vld [vmem:[%s8221_s18 + $0x210] sm:$0xff] }
 0x47e   : > { %3517 = vmatprep.subr.bf16.mxu1 %v2303_v28  ;;  %v928_v28 = vld [vmem:[%s8221_s18 + $0x650] sm:$0xff]  ;;  %v1404_v58 = vunpack.c.h.s8.bf16 %v792_v10 }
 0x47f   : > { %v1676_v59 = vunpack.c.h.s8.bf16 %v928_v28 }
 0x480   : > { %3477 = vmatpush1.bf16.msra.mxu0 %v2030_v31  ;;  %v1387_v31 = vunpack.c.l.s8.bf16 %v792_v10 }
 0x481   : > { %3518 = vmatpush1.bf16.msra.mxu1 %v2302_v32  ;;  %3478 = vmatprep.subr.bf16.mxu0 %v2048_v33  ;;  %v1659_v32 = vunpack.c.l.s8.bf16 %v928_v28  ;;  %v791_v33 = vld [vmem:[%s8221_s18 + $0x208] sm:$0xff] }
 0x482   : > { %3519 = vmatprep.subr.bf16.mxu1 %v2320_v34  ;;  %v927_v34 = vld [vmem:[%s8221_s18 + $0x648] sm:$0xff] }
 0x484   : > { %3479 = vmatpush1.bf16.msra.mxu0 %v2047_v37 }
 0x485   : > { %3520 = vmatpush1.bf16.msra.mxu1 %v2319_v38  ;;  %3480 = vmatprep.subr.bf16.mxu0 %v2065_v39 }
 0x486   : > { %3521 = vmatprep.subr.bf16.mxu1 %v2337_v40 }
 0x488   : > { %3481 = vmatpush1.bf16.msra.mxu0 %v2064_v46  ;;  %v1386_v46 = vunpack.c.l.s8.bf16 %v791_v33 }
 0x489   : > { %3522 = vmatpush1.bf16.msra.mxu1 %v2336_v47  ;;  %3482 = vmatprep.subr.bf16.mxu0 %v2082_v50  ;;  %v1658_v47 = vunpack.c.l.s8.bf16 %v927_v34 }
 0x48a   : > { %3523 = vmatprep.subr.bf16.mxu1 %v2354_v53 }
 0x48c   : > { %3483 = vmatpush1.bf16.msra.mxu0 %v2081_v18  ;;  %v809_v18 = vld [vmem:[%s8221_s18 + $0x298] sm:$0xff] }
 0x48d   : > { %3524 = vmatpush1.bf16.msra.mxu1 %v2353_v41  ;;  %3534 = vmatprep.subr.bf16.mxu0 %v1285_v63  ;;  %v945_v41 = vld [vmem:[%s8221_s18 + $0x6d8] sm:$0xff]  ;;  %v1403_v63 = vunpack.c.h.s8.bf16 %v791_v33  ;;  %v1421_v44 = vunpack.c.l.s8.bf16 %v809_v18  ;;  %v1438_v12 = vunpack.c.h.s8.bf16 %v809_v18  ;;  %v1012_v18 = vld [vmem:[%s8221_s18 + $0x8f0] sm:$0xff] }
 0x48e   : > { %3575 = vmatprep.subr.bf16.mxu1 %v1557_v6  ;;  %v1675_v6 = vunpack.c.h.s8.bf16 %v927_v34  ;;  %v1693_v45 = vunpack.c.l.s8.bf16 %v945_v41  ;;  %v1710_v13 = vunpack.c.h.s8.bf16 %v945_v41  ;;  %v1148_v41 = vld [vmem:[%s8221_s18 + $0xd30] sm:$0xff] }
 0x48f   : > { %3485 = vmatmul.mubr.bf16.vlgmr.msra.gmra.mrb[52].mxu0 %v8561_v51 }
 0x490   : > { %3526 = vmatmul.mubr.bf16.vlgmr.msra.gmra.mrb[52].mxu1 %v8565_v52  ;;  %3535 = vmatpush1.bf16.msra.mxu0 %v1284_v7  ;;  %v808_v7 = vld [vmem:[%s8221_s18 + $0x290] sm:$0xff] }
 0x491   : > { %3576 = vmatpush1.bf16.msra.mxu1 %v1556_v11  ;;  %3536 = vmatprep.subr.bf16.mxu0 %v1302_v48  ;;  %v944_v11 = vld [vmem:[%s8221_s18 + $0x6d0] sm:$0xff]  ;;  %v1420_v48 = vunpack.c.l.s8.bf16 %v808_v7 }
 0x492   : > { %3577 = vmatprep.subr.bf16.mxu1 %v1574_v49  ;;  %3566 = vmatprep.mubr.bf16.mxu0 %v8469_v61  ;;  %v1692_v49 = vunpack.c.l.s8.bf16 %v944_v11 }
 0x493   : > { %3607 = vmatprep.mubr.bf16.mxu1 %v8473_v62 }
 0x494   : > { %3537 = vmatpush1.bf16.msra.mxu0 %v1301_v54  ;;  %v826_v54 = vld [vmem:[%s8221_s18 + $0x320] sm:$0xff] }
 0x495   : > { %3578 = vmatpush1.bf16.msra.mxu1 %v1573_v57  ;;  %3538 = vmatprep.subr.bf16.mxu0 %v1319_v14  ;;  %v962_v57 = vld [vmem:[%s8221_s18 + $0x760] sm:$0xff]  ;;  %v1437_v14 = vunpack.c.h.s8.bf16 %v808_v7  ;;  %v1455_v60 = vunpack.c.l.s8.bf16 %v826_v54  ;;  %v1472_v55 = vunpack.c.h.s8.bf16 %v826_v54  ;;  %v1029_v54 = vld [vmem:[%s8221_s18 + $0x978] sm:$0xff] }
 0x496   : > { %3579 = vmatprep.subr.bf16.mxu1 %v1591_v19  ;;  %v1709_v19 = vunpack.c.h.s8.bf16 %v944_v11  ;;  %v1727_v17 = vunpack.c.l.s8.bf16 %v962_v57  ;;  %v1744_v21 = vunpack.c.h.s8.bf16 %v962_v57  ;;  %v1030_v7 = vld [vmem:[%s8221_s18 + $0x980] sm:$0xff]  ;;  %v1165_v57 = vld [vmem:[%s8221_s18 + $0xdb8] sm:$0xff] }
 0x497   : > { %v1166_v11 = vld [vmem:[%s8221_s18 + $0xdc0] sm:$0xff] }
 0x498   : > { %3539 = vmatpush1.bf16.msra.mxu0 %v1318_v1  ;;  %v825_v1 = vld [vmem:[%s8221_s18 + $0x318] sm:$0xff] }
 0x499   : > { %3580 = vmatpush1.bf16.msra.mxu1 %v1590_v20  ;;  %3540 = vmatprep.subr.bf16.mxu0 %v1336_v0  ;;  %v961_v20 = vld [vmem:[%s8221_s18 + $0x758] sm:$0xff]  ;;  %v1454_v0 = vunpack.c.l.s8.bf16 %v825_v1 }
 0x49a   : > { %3581 = vmatprep.subr.bf16.mxu1 %v1608_v2  ;;  %v1726_v2 = vunpack.c.l.s8.bf16 %v961_v20 }
 0x49c   : > { %3541 = vmatpush1.bf16.msra.mxu0 %v1335_v4  ;;  %v843_v4 = vld [vmem:[%s8221_s18 + $0x3a8] sm:$0xff] }
 0x49d   : > { %3582 = vmatpush1.bf16.msra.mxu1 %v1607_v22  ;;  %3542 = vmatprep.subr.bf16.mxu0 %v1353_v23  ;;  %v979_v22 = vld [vmem:[%s8221_s18 + $0x7e8] sm:$0xff]  ;;  %v1471_v23 = vunpack.c.h.s8.bf16 %v825_v1  ;;  %v1489_v25 = vunpack.c.l.s8.bf16 %v843_v4  ;;  %v1506_v10 = vunpack.c.h.s8.bf16 %v843_v4  ;;  %v1046_v4 = vld [vmem:[%s8221_s18 + $0xa00] sm:$0xff] }
 0x49e   : > { %3583 = vmatprep.subr.bf16.mxu1 %v1625_v24  ;;  %v1743_v24 = vunpack.c.h.s8.bf16 %v961_v20  ;;  %v1761_v26 = vunpack.c.l.s8.bf16 %v979_v22  ;;  %v1778_v28 = vunpack.c.h.s8.bf16 %v979_v22  ;;  %v1047_v1 = vld [vmem:[%s8221_s18 + $0xa08] sm:$0xff]  ;;  %v1182_v22 = vld [vmem:[%s8221_s18 + $0xe40] sm:$0xff] }
 0x49f   : > { %v1183_v20 = vld [vmem:[%s8221_s18 + $0xe48] sm:$0xff] }
 0x4a0   : > { %3543 = vmatpush1.bf16.msra.mxu0 %v1352_v5  ;;  %v842_v5 = vld [vmem:[%s8221_s18 + $0x3a0] sm:$0xff] }
 0x4a1   : > { %3584 = vmatpush1.bf16.msra.mxu1 %v1624_v27  ;;  %3544 = vmatprep.subr.bf16.mxu0 %v1370_v8  ;;  %v978_v27 = vld [vmem:[%s8221_s18 + $0x7e0] sm:$0xff]  ;;  %v1488_v8 = vunpack.c.l.s8.bf16 %v842_v5 }
 0x4a2   : > { %3585 = vmatprep.subr.bf16.mxu1 %v1642_v9  ;;  %v3240_v35 = vpop.f32.mrb[40].mxu0  ;;  %v1760_v9 = vunpack.c.l.s8.bf16 %v978_v27 }
 0x4a3   : > { %v3281_v36 = vpop.f32.mrb[40].mxu1  ;;  %v3242_v38 = vpop.f32.mrb[41].mxu0 }
 0x4a4   : > { %v9045_v37 = vadd.f32 %v3281_v36, %v3240_v35  ;;  %v3283_v39 = vpop.f32.mrb[41].mxu1  ;;  %v3244_v42 = vpop.f32.mrb[42].mxu0  ;;  %3545 = vmatpush1.bf16.msra.mxu0 %v1369_v29  ;;  %v860_v29 = vld [vmem:[%s8221_s18 + $0x430] sm:$0xff]  ;;  %v859_v35 = vld [vmem:[%s8221_s18 + $0x428] sm:$0xff] }
 0x4a5   : > { %v9047_v40 = vadd.f32 %v3283_v39, %v3242_v38  ;;  %v3285_v43 = vpop.f32.mrb[42].mxu1  ;;  %3586 = vmatpush1.bf16.msra.mxu1 %v1641_v30  ;;  %v3245_v50 = vpop.f32.mrb[43].mxu0  ;;  %3546 = vmatprep.subr.bf16.mxu0 %v1387_v31  ;;  %v996_v30 = vld [vmem:[%s8221_s18 + $0x870] sm:$0xff]  ;;  %v1505_v31 = vunpack.c.h.s8.bf16 %v842_v5  ;;  %v1523_v33 = vunpack.c.l.s8.bf16 %v860_v29  ;;  %v995_v36 = vld [vmem:[%s8221_s18 + $0x868] sm:$0xff]  ;;  %v1522_v38 = vunpack.c.l.s8.bf16 %v859_v35 }
 0x4a6   : > { %v3286_v53 = vpop.f32.mrb[43].mxu1  ;;  %3587 = vmatprep.subr.bf16.mxu1 %v1659_v32  ;;  %v1777_v32 = vunpack.c.h.s8.bf16 %v978_v27  ;;  %v1795_v34 = vunpack.c.l.s8.bf16 %v996_v30  ;;  %v1794_v39 = vunpack.c.l.s8.bf16 %v995_v36  ;;  %v1540_v42 = vunpack.c.h.s8.bf16 %v860_v29  ;;  %v1064_v5 = vld [vmem:[%s8221_s18 + $0xa90] sm:$0xff]  ;;  %v1063_v29 = vld [vmem:[%s8221_s18 + $0xa88] sm:$0xff] }
 0x4a7   : > { %v1812_v43 = vunpack.c.h.s8.bf16 %v996_v30  ;;  %v1539_v50 = vunpack.c.h.s8.bf16 %v859_v35  ;;  %v1811_v53 = vunpack.c.h.s8.bf16 %v995_v36  ;;  %v1200_v27 = vld [vmem:[%s8221_s18 + $0xed0] sm:$0xff]  ;;  %v1199_v30 = vld [vmem:[%s8221_s18 + $0xec8] sm:$0xff] }
 0x4a8   : > { %3547 = vmatpush1.bf16.msra.mxu0 %v1386_v46  ;;  %v1013_v46 = vld [vmem:[%s8221_s18 + $0x8f8] sm:$0xff]  ;;  %v712_v36 = vld [vmem:[#allocation3 + $0x50] sm:$0xff] }
 0x4a9   : > { %3588 = vmatpush1.bf16.msra.mxu1 %v1658_v47  ;;  %3548 = vmatprep.subr.bf16.mxu0 %v1404_v58  ;;  %v1149_v47 = vld [vmem:[%s8221_s18 + $0xd38] sm:$0xff]  ;;  %v1829_v58 = vunpack.c.l.s8.bf16 %v1013_v46 }
 0x4aa   : > { %3589 = vmatprep.subr.bf16.mxu1 %v1676_v59  ;;  %v2101_v59 = vunpack.c.l.s8.bf16 %v1149_v47 }
 0x4ac   : > { %3549 = vmatpush1.bf16.msra.mxu0 %v1403_v63  ;;  %v1828_v63 = vunpack.c.l.s8.bf16 %v1012_v18 }
 0x4ad   : > { %3590 = vmatpush1.bf16.msra.mxu1 %v1675_v6  ;;  %3550 = vmatprep.subr.bf16.mxu0 %v1421_v44  ;;  %v2100_v6 = vunpack.c.l.s8.bf16 %v1148_v41  ;;  %v1846_v44 = vunpack.c.h.s8.bf16 %v1013_v46  ;;  %v2202_v46 = vunpack.c.l.s8.bf16 %v1199_v30 }
 0x4ae   : > { %3591 = vmatprep.subr.bf16.mxu1 %v1693_v45  ;;  %v2118_v45 = vunpack.c.h.s8.bf16 %v1149_v47 }
 0x4b0   : > { %3551 = vmatpush1.bf16.msra.mxu0 %v1420_v48  ;;  %v1845_v48 = vunpack.c.h.s8.bf16 %v1012_v18 }
 0x4b1   : > { %3592 = vmatpush1.bf16.msra.mxu1 %v1692_v49  ;;  %3552 = vmatprep.subr.bf16.mxu0 %v1438_v12  ;;  %v2117_v49 = vunpack.c.h.s8.bf16 %v1148_v41  ;;  %v1863_v12 = vunpack.c.l.s8.bf16 %v1030_v7  ;;  %v1217_v41 = vld [vmem:[%s8221_s18 + $0xf58] sm:$0xff] }
 0x4b2   : > { %3593 = vmatprep.subr.bf16.mxu1 %v1710_v13  ;;  %v2135_v13 = vunpack.c.l.s8.bf16 %v1166_v11 }
 0x4b4   : > { %3553 = vmatpush1.bf16.msra.mxu0 %v1437_v14  ;;  %v1862_v14 = vunpack.c.l.s8.bf16 %v1029_v54 }
 0x4b5   : > { %3594 = vmatpush1.bf16.msra.mxu1 %v1709_v19  ;;  %3554 = vmatprep.subr.bf16.mxu0 %v1455_v60  ;;  %v2134_v19 = vunpack.c.l.s8.bf16 %v1165_v57  ;;  %v1880_v60 = vunpack.c.h.s8.bf16 %v1030_v7 }
 0x4b6   : > { %3595 = vmatprep.subr.bf16.mxu1 %v1727_v17  ;;  %v2152_v17 = vunpack.c.h.s8.bf16 %v1166_v11  ;;  %v2237_v11 = vunpack.c.l.s8.bf16 %v1217_v41 }
 0x4b8   : > { %3555 = vmatpush1.bf16.msra.mxu0 %v1454_v0  ;;  %v1879_v0 = vunpack.c.h.s8.bf16 %v1029_v54 }
 0x4b9   : > { %3596 = vmatpush1.bf16.msra.mxu1 %v1726_v2  ;;  %3556 = vmatprep.subr.bf16.mxu0 %v1472_v55  ;;  %v2151_v2 = vunpack.c.h.s8.bf16 %v1165_v57  ;;  %v1897_v55 = vunpack.c.l.s8.bf16 %v1047_v1  ;;  %v2254_v57 = vunpack.c.h.s8.bf16 %v1217_v41  ;;  %v878_v41 = vld [vmem:[%s8221_s18 + $0x4c0] sm:$0xff] }
 0x4ba   : > { %3597 = vmatprep.subr.bf16.mxu1 %v1744_v21  ;;  %v2169_v21 = vunpack.c.l.s8.bf16 %v1183_v20 }
 0x4bc   : > { %3557 = vmatpush1.bf16.msra.mxu0 %v1471_v23  ;;  %v1896_v23 = vunpack.c.l.s8.bf16 %v1046_v4 }
 0x4bd   : > { %3598 = vmatpush1.bf16.msra.mxu1 %v1743_v24  ;;  %3558 = vmatprep.subr.bf16.mxu0 %v1489_v25  ;;  %v2168_v24 = vunpack.c.l.s8.bf16 %v1182_v22  ;;  %v1914_v25 = vunpack.c.h.s8.bf16 %v1047_v1 }
 0x4be   : > { %3599 = vmatprep.subr.bf16.mxu1 %v1761_v26  ;;  %v2186_v26 = vunpack.c.h.s8.bf16 %v1183_v20 }
 0x4c0   : > { %3559 = vmatpush1.bf16.msra.mxu0 %v1488_v8  ;;  %v1913_v8 = vunpack.c.h.s8.bf16 %v1046_v4 }
 0x4c1   : > { %3600 = vmatpush1.bf16.msra.mxu1 %v1760_v9  ;;  %3560 = vmatprep.subr.bf16.mxu0 %v1506_v10  ;;  %v2185_v9 = vunpack.c.h.s8.bf16 %v1182_v22  ;;  %v1931_v10 = vunpack.c.l.s8.bf16 %v1064_v5 }
 0x4c2   : > { %3601 = vmatprep.subr.bf16.mxu1 %v1778_v28  ;;  %v2203_v28 = vunpack.c.l.s8.bf16 %v1200_v27 }
 0x4c4   : > { %3561 = vmatpush1.bf16.msra.mxu0 %v1505_v31 }
 0x4c5   : > { %3602 = vmatpush1.bf16.msra.mxu1 %v1777_v32  ;;  %3562 = vmatprep.subr.bf16.mxu0 %v1523_v33 }
 0x4c6   : > { %3603 = vmatprep.subr.bf16.mxu1 %v1795_v34 }
 0x4c8   : > { %3563 = vmatpush1.bf16.msra.mxu0 %v1522_v38 }
 0x4c9   : > { %3604 = vmatpush1.bf16.msra.mxu1 %v1794_v39  ;;  %3564 = vmatprep.subr.bf16.mxu0 %v1540_v42 }
 0x4ca   : > { %3605 = vmatprep.subr.bf16.mxu1 %v1812_v43  ;;  %v1930_v43 = vunpack.c.l.s8.bf16 %v1063_v29 }
 0x4cc   : > { %3565 = vmatpush1.bf16.msra.mxu0 %v1539_v50  ;;  %v713_v50 = vld [vmem:[#allocation3 + $0x58] sm:$0xff] }
 0x4cd   : > { %3606 = vmatpush1.bf16.msra.mxu1 %v1811_v53  ;;  %3616 = vmatprep.subr.bf16.mxu0 %v1829_v58 }
 0x4ce   : > { %3657 = vmatprep.subr.bf16.mxu1 %v2101_v59  ;;  %v2220_v59 = vunpack.c.h.s8.bf16 %v1200_v27 }
 0x4cf   : > { %3567 = vmatmul.mubr.bf16.vlgmr.msra.gmra.mrb[56].mxu0 %v8503_v15 }
 0x4d0   : > { %3608 = vmatmul.mubr.bf16.vlgmr.msra.gmra.mrb[56].mxu1 %v8507_v16  ;;  %3617 = vmatpush1.bf16.msra.mxu0 %v1828_v63 }
 0x4d1   : > { %3658 = vmatpush1.bf16.msra.mxu1 %v2100_v6  ;;  %3618 = vmatprep.subr.bf16.mxu0 %v1846_v44  ;;  %v1947_v44 = vunpack.c.h.s8.bf16 %v1063_v29 }
 0x4d2   : > { %3659 = vmatprep.subr.bf16.mxu1 %v2118_v45  ;;  %3648 = vmatprep.mubr.bf16.mxu0 %v8519_v56  ;;  %v2219_v45 = vunpack.c.h.s8.bf16 %v1199_v30 }
 0x4d3   : > { %3689 = vmatprep.mubr.bf16.mxu1 %v8523_v3 }
 0x4d4   : > { %3619 = vmatpush1.bf16.msra.mxu0 %v1845_v48  ;;  %v1080_v48 = vld [vmem:[%s8221_s18 + $0xb10] sm:$0xff] }
 0x4d5   : > { %3660 = vmatpush1.bf16.msra.mxu1 %v2117_v49  ;;  %3620 = vmatprep.subr.bf16.mxu0 %v1863_v12  ;;  %v1216_v49 = vld [vmem:[%s8221_s18 + $0xf50] sm:$0xff]  ;;  %v1964_v12 = vunpack.c.l.s8.bf16 %v1080_v48 }
 0x4d6   : > { %3661 = vmatprep.subr.bf16.mxu1 %v2135_v13  ;;  %v2236_v13 = vunpack.c.l.s8.bf16 %v1216_v49 }
 0x4d8   : > { %3621 = vmatpush1.bf16.msra.mxu0 %v1862_v14  ;;  %v1098_v14 = vld [vmem:[%s8221_s18 + $0xba0] sm:$0xff] }
 0x4d9   : > { %3662 = vmatpush1.bf16.msra.mxu1 %v2134_v19  ;;  %3622 = vmatprep.subr.bf16.mxu0 %v1880_v60  ;;  %v1234_v19 = vld [vmem:[%s8221_s18 + $0xfe0] sm:$0xff]  ;;  %v1981_v60 = vunpack.c.h.s8.bf16 %v1080_v48  ;;  %v1999_v1 = vunpack.c.l.s8.bf16 %v1098_v14  ;;  %v2016_v4 = vunpack.c.h.s8.bf16 %v1098_v14 }
 0x4da   : > { %3663 = vmatprep.subr.bf16.mxu1 %v2152_v17  ;;  %v2253_v17 = vunpack.c.h.s8.bf16 %v1216_v49  ;;  %v2271_v20 = vunpack.c.l.s8.bf16 %v1234_v19  ;;  %v2288_v22 = vunpack.c.h.s8.bf16 %v1234_v19  ;;  %v1575_v49 = vunpack.c.h.s8.bf16 %v878_v41 }
 0x4dc   : > { %3623 = vmatpush1.bf16.msra.mxu0 %v1879_v0  ;;  %v1097_v0 = vld [vmem:[%s8221_s18 + $0xb98] sm:$0xff] }
 0x4dd   : > { %3664 = vmatpush1.bf16.msra.mxu1 %v2151_v2  ;;  %3624 = vmatprep.subr.bf16.mxu0 %v1897_v55  ;;  %v1233_v2 = vld [vmem:[%s8221_s18 + $0xfd8] sm:$0xff]  ;;  %v1998_v55 = vunpack.c.l.s8.bf16 %v1097_v0 }
 0x4de   : > { %3665 = vmatprep.subr.bf16.mxu1 %v2169_v21  ;;  %v2270_v21 = vunpack.c.l.s8.bf16 %v1233_v2 }
 0x4e0   : > { %3625 = vmatpush1.bf16.msra.mxu0 %v1896_v23  ;;  %v1115_v23 = vld [vmem:[%s8221_s18 + $0xc28] sm:$0xff] }
 0x4e1   : > { %3666 = vmatpush1.bf16.msra.mxu1 %v2168_v24  ;;  %3626 = vmatprep.subr.bf16.mxu0 %v1914_v25  ;;  %v1251_v24 = vld [vmem:[%s8221_s18 + $0x1068] sm:$0xff]  ;;  %v2015_v25 = vunpack.c.h.s8.bf16 %v1097_v0  ;;  %v2050_v29 = vunpack.c.h.s8.bf16 %v1115_v23 }
 0x4e2   : > { %3667 = vmatprep.subr.bf16.mxu1 %v2186_v26  ;;  %v3322_v31 = vpop.f32.mrb[44].mxu0  ;;  %v2287_v26 = vunpack.c.h.s8.bf16 %v1233_v2  ;;  %v2305_v27 = vunpack.c.l.s8.bf16 %v1251_v24  ;;  %v2322_v30 = vunpack.c.h.s8.bf16 %v1251_v24 }
 0x4e3   : > { %v3363_v32 = vpop.f32.mrb[44].mxu1  ;;  %v3323_v33 = vadd.f32 %v3322_v31, %v9045_v37  ;;  %v3324_v34 = vpop.f32.mrb[45].mxu0  ;;  %v1948_v37 = vunpack.c.h.s8.bf16 %v1064_v5  ;;  %v2033_v5 = vunpack.c.l.s8.bf16 %v1115_v23  ;;  %v1132_v31 = vld [vmem:[%s8221_s18 + $0xcb0] sm:$0xff] }
 0x4e4   : > { %v3365_v35 = vpop.f32.mrb[45].mxu1  ;;  %v3325_v38 = vadd.f32 %v3324_v34, %v9047_v40  ;;  %v3326_v39 = vpop.f32.mrb[46].mxu0  ;;  %3627 = vmatpush1.bf16.msra.mxu0 %v1913_v8  ;;  %v1081_v40 = vld [vmem:[%s8221_s18 + $0xb18] sm:$0xff]  ;;  %v1114_v8 = vld [vmem:[%s8221_s18 + $0xc20] sm:$0xff] }
 0x4e5   : > { %v3367_v42 = vpop.f32.mrb[46].mxu1  ;;  %3668 = vmatpush1.bf16.msra.mxu1 %v2185_v9  ;;  %v3364_v47 = vadd.f32 %v3363_v32, %v3323_v33  ;;  %v3327_v53 = vpop.f32.mrb[47].mxu0  ;;  %3628 = vmatprep.subr.bf16.mxu0 %v1931_v10  ;;  %v1965_v7 = vunpack.c.l.s8.bf16 %v1081_v40  ;;  %v1982_v54 = vunpack.c.h.s8.bf16 %v1081_v40  ;;  %v1250_v9 = vld [vmem:[%s8221_s18 + $0x1060] sm:$0xff]  ;;  %v2032_v10 = vunpack.c.l.s8.bf16 %v1114_v8  ;;  %v1268_v32 = vld [vmem:[%s8221_s18 + $0x10f0] sm:$0xff]  ;;  %v1267_v39 = vld [vmem:[%s8221_s18 + $0x10e8] sm:$0xff] }
 0x4e6   : > { %v3368_v58 = vpop.f32.mrb[47].mxu1  ;;  %3669 = vmatprep.subr.bf16.mxu1 %v2203_v28  ;;  %v3366_v18 = vadd.f32 %v3365_v35, %v3325_v38  ;;  %v2304_v28 = vunpack.c.l.s8.bf16 %v1250_v9  ;;  %v2049_v33 = vunpack.c.h.s8.bf16 %v1114_v8  ;;  %v2321_v34 = vunpack.c.h.s8.bf16 %v1250_v9  ;;  %v1131_v38 = vld [vmem:[%s8221_s18 + $0xca8] sm:$0xff]  ;;  %v946_v53 = vld [vmem:[%s8221_s18 + $0x6e0] sm:$0xff] }
 0x4e7   : > { %v3868_v63 = vadd.f32 %v3364_v47, %v712_v36  ;;  %v2067_v35 = vunpack.c.l.s8.bf16 %v1132_v31  ;;  %v2339_v36 = vunpack.c.l.s8.bf16 %v1268_v32  ;;  %v2066_v42 = vunpack.c.l.s8.bf16 %v1131_v38  ;;  %v742_v40 = vld [vmem:[%s8221_s18 + $0x80] sm:$0xff] }
 0x4e8   : > { %v3869_v6 = vadd.f32 %v3366_v18, %v713_v50  ;;  %3629 = vmatpush1.bf16.msra.mxu0 %v1930_v43  ;;  %v2338_v43 = vunpack.c.l.s8.bf16 %v1267_v39  ;;  %v2356_v47 = vunpack.c.h.s8.bf16 %v1268_v32  ;;  %v810_v50 = vld [vmem:[%s8221_s18 + $0x2a0] sm:$0xff]  ;;  %v2083_v58 = vunpack.c.h.s8.bf16 %v1131_v38 }
 0x4e9   : > { %3670 = vmatpush1.bf16.msra.mxu1 %v2202_v46  ;;  %3885 = vst [vmem:[#allocation3 + $0x50] sm:$0xff] %v3868_v63  ;;  %3630 = vmatprep.subr.bf16.mxu0 %v1948_v37  ;;  %v2084_v46 = vunpack.c.h.s8.bf16 %v1132_v31  ;;  %v2355_v37 = vunpack.c.h.s8.bf16 %v1267_v39  ;;  %v1694_v18 = vunpack.c.l.s8.bf16 %v946_v53  ;;  %v1286_v63 = vunpack.c.l.s8.bf16 %v742_v40 }
 0x4ea   : > { %3671 = vmatprep.subr.bf16.mxu1 %v2220_v59  ;;  %3886 = vst [vmem:[#allocation3 + $0x58] sm:$0xff] %v3869_v6  ;;  %v1422_v59 = vunpack.c.l.s8.bf16 %v810_v50  ;;  %v1558_v6 = vunpack.c.l.s8.bf16 %v878_v41  ;;  %v1303_v48 = vunpack.c.h.s8.bf16 %v742_v40  ;;  %v1014_v40 = vld [vmem:[%s8221_s18 + $0x900] sm:$0xff] }
 0x4eb   : > { %v1150_v41 = vld [vmem:[%s8221_s18 + $0xd40] sm:$0xff] }
 0x4ec   : > { %3631 = vmatpush1.bf16.msra.mxu0 %v1947_v44  ;;  %v1439_v44 = vunpack.c.h.s8.bf16 %v810_v50  ;;  %v1082_v50 = vld [vmem:[%s8221_s18 + $0xb20] sm:$0xff] }
 0x4ed   : > { %3672 = vmatpush1.bf16.msra.mxu1 %v2219_v45  ;;  %3632 = vmatprep.subr.bf16.mxu0 %v1965_v7  ;;  %v1711_v45 = vunpack.c.h.s8.bf16 %v946_v53  ;;  %v827_v7 = vld [vmem:[%s8221_s18 + $0x328] sm:$0xff]  ;;  %v1218_v53 = vld [vmem:[%s8221_s18 + $0xf60] sm:$0xff] }
 0x4ee   : > { %3673 = vmatprep.subr.bf16.mxu1 %v2237_v11  ;;  %v963_v11 = vld [vmem:[%s8221_s18 + $0x768] sm:$0xff] }
 0x4f0   : > { %3633 = vmatpush1.bf16.msra.mxu0 %v1964_v12  ;;  %v1456_v12 = vunpack.c.l.s8.bf16 %v827_v7 }
 0x4f1   : > { %3674 = vmatpush1.bf16.msra.mxu1 %v2236_v13  ;;  %3634 = vmatprep.subr.bf16.mxu0 %v1982_v54  ;;  %v1728_v13 = vunpack.c.l.s8.bf16 %v963_v11  ;;  %v759_v54 = vld [vmem:[%s8221_s18 + $0x108] sm:$0xff] }
 0x4f2   : > { %3675 = vmatprep.subr.bf16.mxu1 %v2254_v57  ;;  %v895_v57 = vld [vmem:[%s8221_s18 + $0x548] sm:$0xff]  ;;  %v1320_v14 = vunpack.c.l.s8.bf16 %v759_v54  ;;  %v1337_v0 = vunpack.c.h.s8.bf16 %v759_v54 }
 0x4f3   : > { %v1592_v19 = vunpack.c.l.s8.bf16 %v895_v57  ;;  %v1609_v2 = vunpack.c.h.s8.bf16 %v895_v57  ;;  %v1031_v54 = vld [vmem:[%s8221_s18 + $0x988] sm:$0xff] }
 0x4f4   : > { %3635 = vmatpush1.bf16.msra.mxu0 %v1981_v60  ;;  %v1473_v60 = vunpack.c.h.s8.bf16 %v827_v7  ;;  %v1099_v7 = vld [vmem:[%s8221_s18 + $0xba8] sm:$0xff] }
 0x4f5   : > { %3676 = vmatpush1.bf16.msra.mxu1 %v2253_v17  ;;  %3636 = vmatprep.subr.bf16.mxu0 %v1999_v1  ;;  %v1745_v17 = vunpack.c.h.s8.bf16 %v963_v11  ;;  %v844_v1 = vld [vmem:[%s8221_s18 + $0x3b0] sm:$0xff]  ;;  %v1235_v11 = vld [vmem:[%s8221_s18 + $0xfe8] sm:$0xff] }
 0x4f6   : > { %3677 = vmatprep.subr.bf16.mxu1 %v2271_v20  ;;  %v980_v20 = vld [vmem:[%s8221_s18 + $0x7f0] sm:$0xff]  ;;  %v1507_v23 = vunpack.c.h.s8.bf16 %v844_v1  ;;  %v1167_v57 = vld [vmem:[%s8221_s18 + $0xdc8] sm:$0xff] }
 0x4f7   : > { %v1779_v24 = vunpack.c.h.s8.bf16 %v980_v20 }
 0x4f8   : > { %3637 = vmatpush1.bf16.msra.mxu0 %v1998_v55  ;;  %v776_v55 = vld [vmem:[%s8221_s18 + $0x190] sm:$0xff] }
 0x4f9   : > { %3678 = vmatpush1.bf16.msra.mxu1 %v2270_v21  ;;  %3638 = vmatprep.subr.bf16.mxu0 %v2016_v4  ;;  %v912_v21 = vld [vmem:[%s8221_s18 + $0x5d0] sm:$0xff]  ;;  %v1354_v4 = vunpack.c.l.s8.bf16 %v776_v55 }
 0x4fa   : > { %3679 = vmatprep.subr.bf16.mxu1 %v2288_v22  ;;  %v1626_v22 = vunpack.c.l.s8.bf16 %v912_v21 }
 0x4fc   : > { %3639 = vmatpush1.bf16.msra.mxu0 %v2015_v25  ;;  %v861_v25 = vld [vmem:[%s8221_s18 + $0x438] sm:$0xff] }
 0x4fd   : > { %3680 = vmatpush1.bf16.msra.mxu1 %v2287_v26  ;;  %3640 = vmatprep.subr.bf16.mxu0 %v2033_v5  ;;  %v997_v26 = vld [vmem:[%s8221_s18 + $0x878] sm:$0xff]  ;;  %v1371_v5 = vunpack.c.h.s8.bf16 %v776_v55  ;;  %v1524_v8 = vunpack.c.l.s8.bf16 %v861_v25 }
 0x4fe   : > { %3681 = vmatprep.subr.bf16.mxu1 %v2305_v27  ;;  %v1643_v27 = vunpack.c.h.s8.bf16 %v912_v21  ;;  %v1796_v9 = vunpack.c.l.s8.bf16 %v997_v26 }
 0x500   : > { %3641 = vmatpush1.bf16.msra.mxu0 %v2032_v10  ;;  %v793_v10 = vld [vmem:[%s8221_s18 + $0x218] sm:$0xff] }
 0x501   : > { %3682 = vmatpush1.bf16.msra.mxu1 %v2304_v28  ;;  %3642 = vmatprep.subr.bf16.mxu0 %v2050_v29  ;;  %v929_v28 = vld [vmem:[%s8221_s18 + $0x658] sm:$0xff]  ;;  %v1388_v38 = vunpack.c.l.s8.bf16 %v793_v10 }
 0x502   : > { %3683 = vmatprep.subr.bf16.mxu1 %v2322_v30  ;;  %v1660_v39 = vunpack.c.l.s8.bf16 %v929_v28 }
 0x504   : > { %3643 = vmatpush1.bf16.msra.mxu0 %v2049_v33 }
 0x505   : > { %3684 = vmatpush1.bf16.msra.mxu1 %v2321_v34  ;;  %3644 = vmatprep.subr.bf16.mxu0 %v2067_v35 }
 0x506   : > { %3685 = vmatprep.subr.bf16.mxu1 %v2339_v36 }
 0x508   : > { %3645 = vmatpush1.bf16.msra.mxu0 %v2066_v42 }
 0x509   : > { %3686 = vmatpush1.bf16.msra.mxu1 %v2338_v43  ;;  %3646 = vmatprep.subr.bf16.mxu0 %v2084_v46  ;;  %v1541_v46 = vunpack.c.h.s8.bf16 %v861_v25 }
 0x50a   : > { %3687 = vmatprep.subr.bf16.mxu1 %v2356_v47  ;;  %v1813_v47 = vunpack.c.h.s8.bf16 %v997_v26 }
 0x50c   : > { %3647 = vmatpush1.bf16.msra.mxu0 %v2083_v58  ;;  %v1405_v58 = vunpack.c.h.s8.bf16 %v793_v10 }
 0x50d   : > { %3688 = vmatpush1.bf16.msra.mxu1 %v2355_v37  ;;  %7246 = vmatprep.subr.bf16.mxu0 %v1422_v59  ;;  %v1677_v37 = vunpack.c.h.s8.bf16 %v929_v28  ;;  %v1966_v59 = vunpack.c.l.s8.bf16 %v1082_v50 }
 0x50e   : > { %7268 = vmatprep.subr.bf16.mxu1 %v1694_v18  ;;  %v2238_v18 = vunpack.c.l.s8.bf16 %v1218_v53 }
 0x50f   : > { %3649 = vmatmul.mubr.bf16.vlgmr.msra.gmra.mrb[60].mxu0 %v8561_v51 }
 0x510   : > { %3690 = vmatmul.mubr.bf16.vlgmr.msra.gmra.mrb[60].mxu1 %v8565_v52  ;;  %7247 = vmatpush3.bf16.msra.mxu0 %v1286_v63  ;;  %v1830_v63 = vunpack.c.l.s8.bf16 %v1014_v40 }
 0x511   : > { %7269 = vmatpush3.bf16.msra.mxu1 %v1558_v6  ;;  %7248 = vmatprep.subr.bf16.mxu0 %v1439_v44  ;;  %v2102_v6 = vunpack.c.l.s8.bf16 %v1150_v41  ;;  %v1983_v44 = vunpack.c.h.s8.bf16 %v1082_v50  ;;  %v715_v50 = vld [vmem:[#allocation3 + $0x68] sm:$0xff] }
 0x512   : > { %7270 = vmatprep.subr.bf16.mxu1 %v1711_v45  ;;  %3730 = vmatprep.mubr.bf16.mxu0 %v8469_v61  ;;  %v1490_v61 = vunpack.c.l.s8.bf16 %v844_v1  ;;  %v2255_v45 = vunpack.c.h.s8.bf16 %v1218_v53  ;;  %v1881_v1 = vunpack.c.h.s8.bf16 %v1031_v54 }
 0x513   : > { %3770 = vmatprep.mubr.bf16.mxu1 %v8473_v62  ;;  %v1762_v62 = vunpack.c.l.s8.bf16 %v980_v20  ;;  %v2153_v20 = vunpack.c.h.s8.bf16 %v1167_v57 }
 0x514   : > { %7249 = vmatpush3.bf16.msra.mxu0 %v1303_v48  ;;  %v1847_v48 = vunpack.c.h.s8.bf16 %v1014_v40 }
 0x515   : > { %7271 = vmatpush3.bf16.msra.mxu1 %v1575_v49  ;;  %7250 = vmatprep.subr.bf16.mxu0 %v1456_v12  ;;  %v2119_v49 = vunpack.c.h.s8.bf16 %v1150_v41  ;;  %v2000_v12 = vunpack.c.l.s8.bf16 %v1099_v7 }
 0x516   : > { %7272 = vmatprep.subr.bf16.mxu1 %v1728_v13  ;;  %v2272_v13 = vunpack.c.l.s8.bf16 %v1235_v11 }
 0x518   : > { %7251 = vmatpush3.bf16.msra.mxu0 %v1320_v14  ;;  %v2017_v14 = vunpack.c.h.s8.bf16 %v1099_v7 }
 0x519   : > { %7273 = vmatpush3.bf16.msra.mxu1 %v1592_v19  ;;  %7252 = vmatprep.subr.bf16.mxu0 %v1473_v60  ;;  %v2289_v19 = vunpack.c.h.s8.bf16 %v1235_v11  ;;  %v1116_v60 = vld [vmem:[%s8221_s18 + $0xc30] sm:$0xff] }
 0x51a   : > { %7274 = vmatprep.subr.bf16.mxu1 %v1745_v17  ;;  %v1252_v17 = vld [vmem:[%s8221_s18 + $0x1070] sm:$0xff]  ;;  %v2051_v55 = vunpack.c.h.s8.bf16 %v1116_v60 }
 0x51b   : > { %v2323_v21 = vunpack.c.h.s8.bf16 %v1252_v17 }
 0x51c   : > { %7253 = vmatpush3.bf16.msra.mxu0 %v1337_v0  ;;  %v1048_v0 = vld [vmem:[%s8221_s18 + $0xa10] sm:$0xff] }
 0x51d   : > { %7275 = vmatpush3.bf16.msra.mxu1 %v1609_v2  ;;  %7254 = vmatprep.subr.bf16.mxu0 %v1490_v61  ;;  %v1184_v2 = vld [vmem:[%s8221_s18 + $0xe50] sm:$0xff]  ;;  %v1898_v61 = vunpack.c.l.s8.bf16 %v1048_v0 }
 0x51e   : > { %7276 = vmatprep.subr.bf16.mxu1 %v1762_v62  ;;  %v2170_v62 = vunpack.c.l.s8.bf16 %v1184_v2 }
 0x520   : > { %7255 = vmatpush3.bf16.msra.mxu0 %v1354_v4  ;;  %v1133_v4 = vld [vmem:[%s8221_s18 + $0xcb8] sm:$0xff] }
 0x521   : > { %7277 = vmatpush3.bf16.msra.mxu1 %v1626_v22  ;;  %7256 = vmatprep.subr.bf16.mxu0 %v1507_v23  ;;  %v1269_v22 = vld [vmem:[%s8221_s18 + $0x10f8] sm:$0xff]  ;;  %v1915_v23 = vunpack.c.h.s8.bf16 %v1048_v0  ;;  %v2068_v25 = vunpack.c.l.s8.bf16 %v1133_v4  ;;  %v2085_v10 = vunpack.c.h.s8.bf16 %v1133_v4 }
 0x522   : > { %7278 = vmatprep.subr.bf16.mxu1 %v1779_v24  ;;  %v3404_v29 = vpop.f32.mrb[48].mxu0  ;;  %v2187_v24 = vunpack.c.h.s8.bf16 %v1184_v2  ;;  %v2340_v26 = vunpack.c.l.s8.bf16 %v1269_v22  ;;  %v2357_v28 = vunpack.c.h.s8.bf16 %v1269_v22 }
 0x523   : > { %v3445_v30 = vpop.f32.mrb[48].mxu1  ;;  %v3406_v32 = vpop.f32.mrb[49].mxu0 }
 0x524   : > { %v9123_v31 = vadd.f32 %v3445_v30, %v3404_v29  ;;  %v3447_v33 = vpop.f32.mrb[49].mxu1  ;;  %v3408_v35 = vpop.f32.mrb[50].mxu0  ;;  %7257 = vmatpush3.bf16.msra.mxu0 %v1371_v5  ;;  %v1065_v5 = vld [vmem:[%s8221_s18 + $0xa98] sm:$0xff] }
 0x525   : > { %v9125_v34 = vadd.f32 %v3447_v33, %v3406_v32  ;;  %v3449_v36 = vpop.f32.mrb[50].mxu1  ;;  %7279 = vmatpush3.bf16.msra.mxu1 %v1643_v27  ;;  %v3409_v42 = vpop.f32.mrb[51].mxu0  ;;  %7258 = vmatprep.subr.bf16.mxu0 %v1524_v8  ;;  %v1201_v27 = vld [vmem:[%s8221_s18 + $0xed8] sm:$0xff]  ;;  %v1932_v8 = vunpack.c.l.s8.bf16 %v1065_v5  ;;  %v1949_v29 = vunpack.c.h.s8.bf16 %v1065_v5 }
 0x526   : > { %v3450_v43 = vpop.f32.mrb[51].mxu1  ;;  %7280 = vmatprep.subr.bf16.mxu1 %v1796_v9  ;;  %v2204_v9 = vunpack.c.l.s8.bf16 %v1201_v27  ;;  %v2221_v30 = vunpack.c.h.s8.bf16 %v1201_v27 }
 0x528   : > { %7259 = vmatpush3.bf16.msra.mxu0 %v1388_v38 }
 0x529   : > { %7281 = vmatpush3.bf16.msra.mxu1 %v1660_v39  ;;  %7260 = vmatprep.subr.bf16.mxu0 %v1541_v46  ;;  %v714_v39 = vld [vmem:[#allocation3 + $0x60] sm:$0xff] }
 0x52a   : > { %7282 = vmatprep.subr.bf16.mxu1 %v1813_v47 }
 0x52c   : > { %7261 = vmatpush3.bf16.msra.mxu0 %v1405_v58 }
 0x52d   : > { %7283 = vmatpush3.bf16.msra.mxu1 %v1677_v37  ;;  %7290 = vmatprep.subr.bf16.mxu0 %v1966_v59 }
 0x52e   : > { %7312 = vmatprep.subr.bf16.mxu1 %v2238_v18 }
 0x52f   : > { %3731 = vmatmul.mubr.bf16.vlgmr.msra.gmra.mrb[64].mxu0 %v8503_v15  ;;  %v1864_v15 = vunpack.c.l.s8.bf16 %v1031_v54 }
 0x530   : > { %3771 = vmatmul.mubr.bf16.vlgmr.msra.gmra.mrb[64].mxu1 %v8507_v16  ;;  %7291 = vmatpush3.bf16.msra.mxu0 %v1830_v63  ;;  %v2136_v16 = vunpack.c.l.s8.bf16 %v1167_v57 }
 0x531   : > { %7313 = vmatpush3.bf16.msra.mxu1 %v2102_v6  ;;  %7292 = vmatprep.subr.bf16.mxu0 %v1983_v44 }
 0x532   : > { %7314 = vmatprep.subr.bf16.mxu1 %v2255_v45  ;;  %3810 = vmatprep.mubr.bf16.mxu0 %v8519_v56  ;;  %v2034_v56 = vunpack.c.l.s8.bf16 %v1116_v60 }
 0x533   : > { %3850 = vmatprep.mubr.bf16.mxu1 %v8523_v3  ;;  %v2306_v3 = vunpack.c.l.s8.bf16 %v1252_v17 }
 0x534   : > { %7293 = vmatpush3.bf16.msra.mxu0 %v1847_v48 }
 0x535   : > { %7315 = vmatpush3.bf16.msra.mxu1 %v2119_v49  ;;  %7294 = vmatprep.subr.bf16.mxu0 %v2000_v12 }
 0x536   : > { %7316 = vmatprep.subr.bf16.mxu1 %v2272_v13  ;;  %v716_v13 = vld [vmem:[#allocation3 + $0x70] sm:$0xff] }
 0x538   : > { %7295 = vmatpush3.bf16.msra.mxu0 %v1864_v15 }
 0x539   : > { %7317 = vmatpush3.bf16.msra.mxu1 %v2136_v16  ;;  %7296 = vmatprep.subr.bf16.mxu0 %v2017_v14  ;;  %v717_v14 = vld [vmem:[#allocation3 + $0x78] sm:$0xff] }
 0x53a   : > { %7318 = vmatprep.subr.bf16.mxu1 %v2289_v19 }
 0x53c   : > { %7297 = vmatpush3.bf16.msra.mxu0 %v1881_v1 }
 0x53d   : > { %7319 = vmatpush3.bf16.msra.mxu1 %v2153_v20  ;;  %7298 = vmatprep.subr.bf16.mxu0 %v2034_v56 }
 0x53e   : > { %7320 = vmatprep.subr.bf16.mxu1 %v2306_v3 }
 0x540   : > { %7299 = vmatpush3.bf16.msra.mxu0 %v1898_v61 }
 0x541   : > { %7321 = vmatpush3.bf16.msra.mxu1 %v2170_v62  ;;  %7300 = vmatprep.subr.bf16.mxu0 %v2051_v55 }
 0x542   : > { %7322 = vmatprep.subr.bf16.mxu1 %v2323_v21 }
 0x544   : > { %7301 = vmatpush3.bf16.msra.mxu0 %v1915_v23 }
 0x545   : > { %7323 = vmatpush3.bf16.msra.mxu1 %v2187_v24  ;;  %7302 = vmatprep.subr.bf16.mxu0 %v2068_v25 }
 0x546   : > { %7324 = vmatprep.subr.bf16.mxu1 %v2340_v26 }
 0x548   : > { %7303 = vmatpush3.bf16.msra.mxu0 %v1932_v8 }
 0x549   : > { %7325 = vmatpush3.bf16.msra.mxu1 %v2204_v9  ;;  %7304 = vmatprep.subr.bf16.mxu0 %v2085_v10 }
 0x54a   : > { %7326 = vmatprep.subr.bf16.mxu1 %v2357_v28 }
 0x54c   : > { %7305 = vmatpush3.bf16.msra.mxu0 %v1949_v29 }
 0x54d   : > { %7327 = vmatpush3.bf16.msra.mxu1 %v2221_v30 }
 0x54f   : > { %3811 = vmatmul.mubr.bf16.vlgmr.msra.gmra.mrb[68].mxu0 %v8561_v51 }
 0x550   : > { %3851 = vmatmul.mubr.bf16.vlgmr.msra.gmra.mrb[68].mxu1 %v8565_v52 }
 0x562   : > { %v3486_v32 = vpop.f32.mrb[52].mxu0 }
 0x563   : > { %v3527_v33 = vpop.f32.mrb[52].mxu1  ;;  %v3487_v35 = vadd.f32 %v3486_v32, %v9123_v31  ;;  %v3488_v36 = vpop.f32.mrb[53].mxu0  ;;  %v718_v32 = vld [vmem:[#allocation3 + $0x80] sm:$0xff] }
 0x564   : > { %v3529_v38 = vpop.f32.mrb[53].mxu1  ;;  %v3489_v42 = vadd.f32 %v3488_v36, %v9125_v34  ;;  %v3490_v43 = vpop.f32.mrb[54].mxu0 }
 0x565   : > { %v3531_v46 = vpop.f32.mrb[54].mxu1  ;;  %v3528_v47 = vadd.f32 %v3527_v33, %v3487_v35  ;;  %v3491_v53 = vpop.f32.mrb[55].mxu0 }
 0x566   : > { %v3532_v58 = vpop.f32.mrb[55].mxu1  ;;  %v3530_v37 = vadd.f32 %v3529_v38, %v3489_v42 }
 0x567   : > { %v3870_v59 = vadd.f32 %v3528_v47, %v714_v39 }
 0x568   : > { %v3871_v51 = vadd.f32 %v3530_v37, %v715_v50 }
 0x569   : > { %3887 = vst [vmem:[#allocation3 + $0x60] sm:$0xff] %v3870_v59 }
 0x56a   : > { %3888 = vst [vmem:[#allocation3 + $0x68] sm:$0xff] %v3871_v51 }
 0x5a2   : > { %v3568_v52 = vpop.f32.mrb[56].mxu0 }
 0x5a3   : > { %v3609_v18 = vpop.f32.mrb[56].mxu1  ;;  %v3570_v31 = vpop.f32.mrb[57].mxu0 }
 0x5a4   : > { %v3610_v40 = vadd.f32 %v3609_v18, %v3568_v52  ;;  %v3611_v41 = vpop.f32.mrb[57].mxu1  ;;  %v3572_v6 = vpop.f32.mrb[58].mxu0 }
 0x5a5   : > { %v3612_v63 = vadd.f32 %v3611_v41, %v3570_v31  ;;  %v3613_v44 = vpop.f32.mrb[58].mxu1  ;;  %v3573_v34 = vpop.f32.mrb[59].mxu0 }
 0x5a6   : > { %v3614_v45 = vpop.f32.mrb[59].mxu1 }
 0x5e2   : > { %v3650_v7 = vpop.f32.mrb[60].mxu0 }
 0x5e3   : > { %v3691_v11 = vpop.f32.mrb[60].mxu1  ;;  %v3651_v48 = vadd.f32 %v3650_v7, %v3610_v40  ;;  %v3652_v49 = vpop.f32.mrb[61].mxu0 }
 0x5e4   : > { %v3693_v12 = vpop.f32.mrb[61].mxu1  ;;  %v3653_v54 = vadd.f32 %v3652_v49, %v3612_v63  ;;  %v3654_v57 = vpop.f32.mrb[62].mxu0 }
 0x5e5   : > { %v3695_v15 = vpop.f32.mrb[62].mxu1  ;;  %v3692_v16 = vadd.f32 %v3691_v11, %v3651_v48  ;;  %v3655_v19 = vpop.f32.mrb[63].mxu0 }
 0x5e6   : > { %v3696_v60 = vpop.f32.mrb[63].mxu1  ;;  %v3694_v17 = vadd.f32 %v3693_v12, %v3653_v54 }
 0x5e7   : > { %v3872_v1 = vadd.f32 %v3692_v16, %v716_v13 }
 0x5e8   : > { %v3873_v20 = vadd.f32 %v3694_v17, %v717_v14 }
 0x5e9   : > { %3889 = vst [vmem:[#allocation3 + $0x70] sm:$0xff] %v3872_v1 }
 0x5ea   : > { %3890 = vst [vmem:[#allocation3 + $0x78] sm:$0xff] %v3873_v20 }
 0x602   : > { %v7262_v56 = vpop.f32.mrb[64].mxu0 }
 0x603   : > { %v7284_v3 = vpop.f32.mrb[64].mxu1  ;;  %v7263_v0 = vpop.f32.mrb[65].mxu0 }
 0x604   : > { %v7285_v2 = vpop.f32.mrb[65].mxu1  ;;  %v7264_v61 = vadd.f32 %v7263_v0, %v7262_v56  ;;  %v7265_v55 = vpop.f32.mrb[66].mxu0 }
 0x605   : > { %v7286_v62 = vadd.f32 %v7285_v2, %v7284_v3  ;;  %v7287_v21 = vpop.f32.mrb[66].mxu1  ;;  %v7266_v4 = vpop.f32.mrb[67].mxu0 }
 0x606   : > { %v7288_v22 = vpop.f32.mrb[67].mxu1 }
 0x607   : > { %v3773_v23 = vadd.f32 %v7286_v62, %v7264_v61 }
 0x622   : > { %v7306_v24 = vpop.f32.mrb[68].mxu0 }
 0x623   : > { %v7328_v25 = vpop.f32.mrb[68].mxu1  ;;  %v7307_v26 = vpop.f32.mrb[69].mxu0 }
 0x624   : > { %v7329_v5 = vpop.f32.mrb[69].mxu1  ;;  %v7308_v27 = vadd.f32 %v7307_v26, %v7306_v24  ;;  %v7309_v9 = vpop.f32.mrb[70].mxu0 }
 0x625   : > { %v7330_v8 = vadd.f32 %v7329_v5, %v7328_v25  ;;  %v7331_v10 = vpop.f32.mrb[70].mxu1  ;;  %v7310_v28 = vpop.f32.mrb[71].mxu0 }
 0x626   : > { %v7332_v29 = vpop.f32.mrb[71].mxu1  ;;  %v3813_v30 = vadd.f32 %v7308_v27, %v3773_v23  ;;  %3895 = sbr.rel (%p7228_p7) target bundleno = 3113 (0xc29), region = 80 }
 0x628   : > { %v3853_v33 = vadd.f32 %v7330_v8, %v3813_v30 }
 0x62a   : > { %v3874_v35 = vadd.f32 %v3853_v33, %v718_v32 }
 0x62c   : > { %3891 = vst [vmem:[#allocation3 + $0x80] sm:$0xff] %v3874_v35 }
 0x62d   : > { %7914 = dma.done.wait [#allocation6], 139264 }
 0x62e   : > { %7915 = vsyncadd [#allocation6], 4294828032 }
 0x62f   : > { %7916 = dma.done.wait [#allocation6 + $0x1], 8192 }
 0x630   : > { %7917 = vsyncadd [#allocation6 + $0x1], 4294959104  ;;  %v4175_v36 = vld [vmem:[#allocation4 + $0x8] sm:$0xff]  ;;  %v4177_v38 = vld [vmem:[#allocation4 + $0x18] sm:$0xff]  ;;  %v3928_v18 = vlaneseq }
 0x631   : > { %v4174_v39 = vld [vmem:[#allocation4] sm:$0xff]  ;;  %5305 = vmatprep.subr.bf16.mxu0 %v4175_v36  ;;  %5674 = vmatprep.subr.bf16.mxu1 %v4177_v38  ;;  %v4176_v42 = vld [vmem:[#allocation4 + $0x10] sm:$0xff]  ;;  %v4183_v43 = vld [vmem:[#allocation4 + $0x48] sm:$0xff] }
 0x632   : > { %v4185_v46 = vld [vmem:[#allocation4 + $0x58] sm:$0xff]  ;;  %5306 = vmatpush1.bf16.msra.mxu0 %v4174_v39  ;;  %5675 = vmatpush1.bf16.msra.mxu1 %v4176_v42  ;;  %v4182_v47 = vld [vmem:[#allocation4 + $0x40] sm:$0xff]  ;;  %v4184_v50 = vld [vmem:[#allocation4 + $0x50] sm:$0xff]  ;;  %v9152_v6 = vshrl.u32 %v3928_v18, 7 }
 0x633   : > { %5307 = vmatprep.subr.bf16.mxu0 %v4183_v43  ;;  %5676 = vmatprep.subr.bf16.mxu1 %v4185_v46  ;;  %v4191_v53 = vld [vmem:[#allocation4 + $0x88] sm:$0xff]  ;;  %v4193_v58 = vld [vmem:[#allocation4 + $0x98] sm:$0xff]  ;;  %v4190_v37 = vld [vmem:[#allocation4 + $0x80] sm:$0xff] }
 0x634   : > { %v4192_v59 = vld [vmem:[#allocation4 + $0x90] sm:$0xff]  ;;  %v4199_v51 = vld [vmem:[#allocation4 + $0xc8] sm:$0xff]  ;;  %v4201_v52 = vld [vmem:[#allocation4 + $0xd8] sm:$0xff]  ;;  %v9155_v11 = vsub.s32 1, %v9152_v6  ;;  %v9170_v28 = vsub.s32 0, %v9152_v6  ;;  %v9173_v35 = vsub.s32 3, %v9152_v6 }
 0x635   : > { %v4198_v40 = vld [vmem:[#allocation4 + $0xc0] sm:$0xff]  ;;  %v4200_v31 = vld [vmem:[#allocation4 + $0xd0] sm:$0xff]  ;;  %v4207_v41 = vld [vmem:[#allocation4 + $0x108] sm:$0xff] }
 0x636   : > { %5308 = vmatpush1.bf16.msra.mxu0 %v4182_v47  ;;  %5677 = vmatpush1.bf16.msra.mxu1 %v4184_v50  ;;  %v4209_v63 = vld [vmem:[#allocation4 + $0x118] sm:$0xff]  ;;  %v4206_v44 = vld [vmem:[#allocation4 + $0x100] sm:$0xff]  ;;  %v4208_v34 = vld [vmem:[#allocation4 + $0x110] sm:$0xff] }
 0x637   : > { %5309 = vmatprep.subr.bf16.mxu0 %v4191_v53  ;;  %5678 = vmatprep.subr.bf16.mxu1 %v4193_v58  ;;  %v4215_v45 = vld [vmem:[#allocation4 + $0x148] sm:$0xff]  ;;  %v4217_v7 = vld [vmem:[#allocation4 + $0x158] sm:$0xff]  ;;  %v4214_v48 = vld [vmem:[#allocation4 + $0x140] sm:$0xff] }
 0x638   : > { %v4216_v49 = vld [vmem:[#allocation4 + $0x150] sm:$0xff]  ;;  %v4223_v12 = vld [vmem:[#allocation4 + $0x188] sm:$0xff]  ;;  %v4225_v13 = vld [vmem:[#allocation4 + $0x198] sm:$0xff] }
 0x639   : > { %v3906_v54 = vld [vmem:[#allocation3 + $0x8] sm:$0xff]  ;;  %v4224_v19 = vld [vmem:[#allocation4 + $0x190] sm:$0xff]  ;;  %v4231_v17 = vld [vmem:[#allocation4 + $0x1c8] sm:$0xff] }
 0x63a   : > { %5310 = vmatpush1.bf16.msra.mxu0 %v4190_v37  ;;  %5679 = vmatpush1.bf16.msra.mxu1 %v4192_v59  ;;  %v9157_v57 = vld [vmem:[#allocation16] sm:$0xff]  ;;  %v4233_v1 = vld [vmem:[#allocation4 + $0x1d8] sm:$0xff]  ;;  %v4232_v0 = vld [vmem:[#allocation4 + $0x1d0] sm:$0xff] }
 0x63b   : > { %5311 = vmatprep.subr.bf16.mxu0 %v4199_v51  ;;  %5680 = vmatprep.subr.bf16.mxu1 %v4201_v52  ;;  %v3935_v15 = vrot.slane %v9157_v57, %v9155_v11  ;;  %v9161_v16 = vld [vmem:[#allocation17] ss:$4 sm:$0xff]  ;;  %v3931_v36 = vrot.slane %v9157_v57, %v9170_v28  ;;  %v3943_v47 = vrot.slane %v9157_v57, %v9173_v35 }
 0x63c   : > { %v4222_v14 = vld [vmem:[#allocation4 + $0x180] sm:$0xff]  ;;  %v4045_v60 = vrot.slane %v9161_v16, %v9155_v11  ;;  %v4239_v2 = vld [vmem:[#allocation4 + $0x208] sm:$0xff]  ;;  %v4241_v61 = vld [vmem:[#allocation4 + $0x218] sm:$0xff]  ;;  %v4041_v53 = vrot.slane %v9161_v16, %v9170_v28 }
 0x63d   : > { %v4014_v20 = vmul.f32 %v3935_v15, %v3906_v54  ;;  %v4230_v3 = vld [vmem:[#allocation4 + $0x1c0] sm:$0xff]  ;;  %v4240_v4 = vld [vmem:[#allocation4 + $0x210] sm:$0xff]  ;;  %v4247_v22 = vld [vmem:[#allocation4 + $0x248] sm:$0xff] }
 0x63e   : > { %5312 = vmatpush1.bf16.msra.mxu0 %v4198_v40  ;;  %5681 = vmatpush1.bf16.msra.mxu1 %v4200_v31  ;;  %v4238_v21 = vld [vmem:[#allocation4 + $0x200] sm:$0xff]  ;;  %v4249_v23 = vld [vmem:[#allocation4 + $0x258] sm:$0xff]  ;;  %v4248_v25 = vld [vmem:[#allocation4 + $0x250] sm:$0xff]  ;;  %v4053_v40 = vrot.slane %v9161_v16, %v9173_v35 }
 0x63f   : > { %5313 = vmatprep.subr.bf16.mxu0 %v4207_v41  ;;  %5682 = vmatprep.subr.bf16.mxu1 %v4209_v63  ;;  %v4124_v56 = vadd.f32 %v4045_v60, %v4014_v20  ;;  %v4246_v24 = vld [vmem:[#allocation4 + $0x240] sm:$0xff]  ;;  %v4255_v26 = vld [vmem:[#allocation4 + $0x288] sm:$0xff]  ;;  %v4257_v5 = vld [vmem:[#allocation4 + $0x298] sm:$0xff] }
 0x640   : > { %v4254_v27 = vld [vmem:[#allocation4 + $0x280] sm:$0xff]  ;;  %v4256_v8 = vld [vmem:[#allocation4 + $0x290] sm:$0xff]  ;;  %v4263_v9 = vld [vmem:[#allocation4 + $0x2c8] sm:$0xff] }
 0x641   : > { %v4141_v62 = vmax.f32 %v4124_v56, 0.0  ;;  %v4265_v10 = vld [vmem:[#allocation4 + $0x2d8] sm:$0xff]  ;;  %v4262_v29 = vld [vmem:[#allocation4 + $0x2c0] sm:$0xff]  ;;  %v4264_v30 = vld [vmem:[#allocation4 + $0x2d0] sm:$0xff] }
 0x642   : > { %5314 = vmatpush1.bf16.msra.mxu0 %v4206_v44  ;;  %5683 = vmatpush1.bf16.msra.mxu1 %v4208_v34  ;;  %v4271_v32 = vld [vmem:[#allocation4 + $0x308] sm:$0xff]  ;;  %v4273_v33 = vld [vmem:[#allocation4 + $0x318] sm:$0xff]  ;;  %v4270_v39 = vld [vmem:[#allocation4 + $0x300] sm:$0xff] }
 0x643   : > { %5315 = vmatprep.subr.bf16.mxu0 %v4215_v45  ;;  %5684 = vmatprep.subr.bf16.mxu1 %v4217_v7  ;;  %v9165_v55 = vpack.c.bf16 %v4141_v62, %v4141_v62  ;;  %v3905_v38 = vld [vmem:[#allocation3] sm:$0xff]  ;;  %v4272_v42 = vld [vmem:[#allocation4 + $0x310] sm:$0xff]  ;;  %v4279_v43 = vld [vmem:[#allocation4 + $0x348] sm:$0xff] }
 0x644   : > { %v4281_v46 = vld [vmem:[#allocation4 + $0x358] sm:$0xff]  ;;  %v4013_v50 = vmul.f32 %v3931_v36, %v3905_v38  ;;  %v3908_v58 = vld [vmem:[#allocation3 + $0x18] sm:$0xff]  ;;  %v4278_v37 = vld [vmem:[#allocation4 + $0x340] sm:$0xff] }
 0x645   : > { %5337 = vmatprep.mubr.bf16.mxu0 %v9165_v55  ;;  %5706 = vmatprep.mubr.bf16.mxu1 %v9165_v55  ;;  %v4280_v59 = vld [vmem:[#allocation4 + $0x350] sm:$0xff]  ;;  %v4287_v51 = vld [vmem:[#allocation4 + $0x388] sm:$0xff]  ;;  %v4289_v52 = vld [vmem:[#allocation4 + $0x398] sm:$0xff]  ;;  %v4016_v18 = vmul.f32 %v3943_v47, %v3908_v58 }
 0x646   : > { %5316 = vmatpush1.bf16.msra.mxu0 %v4214_v48  ;;  %5685 = vmatpush1.bf16.msra.mxu1 %v4216_v49  ;;  %v4123_v31 = vadd.f32 %v4041_v53, %v4013_v50  ;;  %v4286_v41 = vld [vmem:[#allocation4 + $0x380] sm:$0xff]  ;;  %v4288_v63 = vld [vmem:[#allocation4 + $0x390] sm:$0xff]  ;;  %v4295_v44 = vld [vmem:[#allocation4 + $0x3c8] sm:$0xff] }
 0x647   : > { %5317 = vmatprep.subr.bf16.mxu0 %v4223_v12  ;;  %5686 = vmatprep.subr.bf16.mxu1 %v4225_v13  ;;  %v4297_v34 = vld [vmem:[#allocation4 + $0x3d8] sm:$0xff]  ;;  %v4126_v45 = vadd.f32 %v4053_v40, %v4016_v18  ;;  %v4294_v48 = vld [vmem:[#allocation4 + $0x3c0] sm:$0xff]  ;;  %v4296_v49 = vld [vmem:[#allocation4 + $0x3d0] sm:$0xff] }
 0x648   : > { %v4140_v7 = vmax.f32 %v4123_v31, 0.0  ;;  %v4303_v12 = vld [vmem:[#allocation4 + $0x408] sm:$0xff]  ;;  %v4305_v13 = vld [vmem:[#allocation4 + $0x418] sm:$0xff]  ;;  %v4310_v20 = vld [vmem:[#allocation4 + $0x440] sm:$0xff] }
 0x649   : > { %v4143_v54 = vmax.f32 %v4126_v45, 0.0  ;;  %v4311_v60 = vld [vmem:[#allocation4 + $0x448] sm:$0xff]  ;;  %v4312_v56 = vld [vmem:[#allocation4 + $0x450] sm:$0xff]  ;;  %v4361_v36 = vld [vmem:[#allocation4 + $0x5d8] sm:$0xff] }
 0x64a   : > { %5318 = vmatpush1.bf16.msra.mxu0 %v4222_v14  ;;  %5687 = vmatpush1.bf16.msra.mxu1 %v4224_v19  ;;  %v9183_v15 = vpack.c.bf16 %v4140_v7, %v4140_v7  ;;  %v4302_v14 = vld [vmem:[#allocation4 + $0x400] sm:$0xff]  ;;  %v4304_v19 = vld [vmem:[#allocation4 + $0x410] sm:$0xff]  ;;  %v4327_v62 = vld [vmem:[#allocation4 + $0x4c8] sm:$0xff]  ;;  %v9195_v7 = vsub.s32 5, %v9152_v6 }
 0x64b   : > { %5319 = vmatprep.subr.bf16.mxu0 %v4231_v17  ;;  %5688 = vmatprep.subr.bf16.mxu1 %v4233_v1  ;;  %v4313_v17 = vld [vmem:[#allocation4 + $0x458] sm:$0xff]  ;;  %v9185_v1 = vpack.c.bf16 %v4143_v54, %v4143_v54  ;;  %v4358_v38 = vld [vmem:[#allocation4 + $0x5c0] sm:$0xff]  ;;  %v4368_v47 = vld [vmem:[#allocation4 + $0x610] sm:$0xff] }
 0x64c   : > { %v4375_v50 = vld [vmem:[#allocation4 + $0x648] sm:$0xff]  ;;  %v4377_v53 = vld [vmem:[#allocation4 + $0x658] sm:$0xff]  ;;  %v4374_v58 = vld [vmem:[#allocation4 + $0x640] sm:$0xff] }
 0x64d   : > { %v4384_v18 = vld [vmem:[#allocation4 + $0x690] sm:$0xff]  ;;  %v4391_v40 = vld [vmem:[#allocation4 + $0x6c8] sm:$0xff]  ;;  %v4393_v31 = vld [vmem:[#allocation4 + $0x6d8] sm:$0xff] }
 0x64e   : > { %5320 = vmatpush1.bf16.msra.mxu0 %v4230_v3  ;;  %5689 = vmatpush1.bf16.msra.mxu1 %v4232_v0  ;;  %v4319_v3 = vld [vmem:[#allocation4 + $0x488] sm:$0xff]  ;;  %v4321_v0 = vld [vmem:[#allocation4 + $0x498] sm:$0xff] }
 0x64f   : > { %5321 = vmatprep.subr.bf16.mxu0 %v4239_v2  ;;  %5690 = vmatprep.subr.bf16.mxu1 %v4241_v61  ;;  %v4318_v2 = vld [vmem:[#allocation4 + $0x480] sm:$0xff]  ;;  %v4320_v61 = vld [vmem:[#allocation4 + $0x490] sm:$0xff]  ;;  %v4401_v45 = vld [vmem:[#allocation4 + $0x718] sm:$0xff] }
 0x650   : > { %v4407_v54 = vld [vmem:[#allocation4 + $0x748] sm:$0xff] }
 0x652   : > { %5322 = vmatpush1.bf16.msra.mxu0 %v4238_v21  ;;  %5691 = vmatpush1.bf16.msra.mxu1 %v4240_v4  ;;  %v4329_v21 = vld [vmem:[#allocation4 + $0x4d8] sm:$0xff]  ;;  %v4326_v4 = vld [vmem:[#allocation4 + $0x4c0] sm:$0xff] }
 0x653   : > { %5323 = vmatprep.subr.bf16.mxu0 %v4247_v22  ;;  %5692 = vmatprep.subr.bf16.mxu1 %v4249_v23  ;;  %v4328_v22 = vld [vmem:[#allocation4 + $0x4d0] sm:$0xff]  ;;  %v4335_v23 = vld [vmem:[#allocation4 + $0x508] sm:$0xff] }
 0x656   : > { %5324 = vmatpush1.bf16.msra.mxu0 %v4246_v24  ;;  %5693 = vmatpush1.bf16.msra.mxu1 %v4248_v25  ;;  %v4337_v24 = vld [vmem:[#allocation4 + $0x518] sm:$0xff]  ;;  %v4334_v25 = vld [vmem:[#allocation4 + $0x500] sm:$0xff] }
 0x657   : > { %5325 = vmatprep.subr.bf16.mxu0 %v4255_v26  ;;  %5694 = vmatprep.subr.bf16.mxu1 %v4257_v5  ;;  %v4336_v26 = vld [vmem:[#allocation4 + $0x510] sm:$0xff]  ;;  %v4343_v5 = vld [vmem:[#allocation4 + $0x548] sm:$0xff] }
 0x65a   : > { %5326 = vmatpush1.bf16.msra.mxu0 %v4254_v27  ;;  %5695 = vmatpush1.bf16.msra.mxu1 %v4256_v8  ;;  %v4345_v27 = vld [vmem:[#allocation4 + $0x558] sm:$0xff]  ;;  %v4342_v8 = vld [vmem:[#allocation4 + $0x540] sm:$0xff] }
 0x65b   : > { %5327 = vmatprep.subr.bf16.mxu0 %v4263_v9  ;;  %5696 = vmatprep.subr.bf16.mxu1 %v4265_v10  ;;  %v4344_v9 = vld [vmem:[#allocation4 + $0x550] sm:$0xff]  ;;  %v4351_v10 = vld [vmem:[#allocation4 + $0x588] sm:$0xff] }
 0x65e   : > { %5328 = vmatpush1.bf16.msra.mxu0 %v4262_v29  ;;  %5697 = vmatpush1.bf16.msra.mxu1 %v4264_v30  ;;  %v4353_v29 = vld [vmem:[#allocation4 + $0x598] sm:$0xff]  ;;  %v4350_v30 = vld [vmem:[#allocation4 + $0x580] sm:$0xff] }
 0x65f   : > { %5329 = vmatprep.subr.bf16.mxu0 %v4271_v32  ;;  %5698 = vmatprep.subr.bf16.mxu1 %v4273_v33  ;;  %v4352_v32 = vld [vmem:[#allocation4 + $0x590] sm:$0xff]  ;;  %v4359_v33 = vld [vmem:[#allocation4 + $0x5c8] sm:$0xff] }
 0x662   : > { %5330 = vmatpush1.bf16.msra.mxu0 %v4270_v39  ;;  %5699 = vmatpush1.bf16.msra.mxu1 %v4272_v42  ;;  %v4360_v39 = vld [vmem:[#allocation4 + $0x5d0] sm:$0xff]  ;;  %v4367_v42 = vld [vmem:[#allocation4 + $0x608] sm:$0xff] }
 0x663   : > { %5331 = vmatprep.subr.bf16.mxu0 %v4279_v43  ;;  %5700 = vmatprep.subr.bf16.mxu1 %v4281_v46  ;;  %v4369_v43 = vld [vmem:[#allocation4 + $0x618] sm:$0xff]  ;;  %v4366_v46 = vld [vmem:[#allocation4 + $0x600] sm:$0xff] }
 0x666   : > { %5332 = vmatpush1.bf16.msra.mxu0 %v4278_v37  ;;  %5701 = vmatpush1.bf16.msra.mxu1 %v4280_v59  ;;  %v4376_v37 = vld [vmem:[#allocation4 + $0x650] sm:$0xff]  ;;  %v4383_v59 = vld [vmem:[#allocation4 + $0x688] sm:$0xff] }
 0x667   : > { %5333 = vmatprep.subr.bf16.mxu0 %v4287_v51  ;;  %5702 = vmatprep.subr.bf16.mxu1 %v4289_v52  ;;  %v4385_v51 = vld [vmem:[#allocation4 + $0x698] sm:$0xff]  ;;  %v4382_v52 = vld [vmem:[#allocation4 + $0x680] sm:$0xff] }
 0x66a   : > { %5334 = vmatpush1.bf16.msra.mxu0 %v4286_v41  ;;  %5703 = vmatpush1.bf16.msra.mxu1 %v4288_v63  ;;  %v9192_v41 = vsub.s32 2, %v9152_v6  ;;  %v4390_v63 = vld [vmem:[#allocation4 + $0x6c0] sm:$0xff] }
 0x66b   : > { %5335 = vmatprep.subr.bf16.mxu0 %v4295_v44  ;;  %5704 = vmatprep.subr.bf16.mxu1 %v4297_v34  ;;  %v4392_v44 = vld [vmem:[#allocation4 + $0x6d0] sm:$0xff]  ;;  %v4399_v34 = vld [vmem:[#allocation4 + $0x708] sm:$0xff] }
 0x66e   : > { %5336 = vmatpush1.bf16.msra.mxu0 %v4294_v48  ;;  %5705 = vmatpush1.bf16.msra.mxu1 %v4296_v49  ;;  %v3939_v48 = vrot.slane %v9157_v57, %v9192_v41  ;;  %v3907_v49 = vld [vmem:[#allocation3 + $0x10] sm:$0xff] }
 0x66f   : > { %5346 = vmatprep.subr.bf16.mxu0 %v4303_v12  ;;  %5715 = vmatprep.subr.bf16.mxu1 %v4305_v13  ;;  %v4398_v12 = vld [vmem:[#allocation4 + $0x700] sm:$0xff]  ;;  %v4400_v13 = vld [vmem:[#allocation4 + $0x710] sm:$0xff] }
 0x671   : > { %5338 = vmatmul.mubr.bf16.vlgmr.msra.gmra.mrb[0].mxu0 %v9183_v15  ;;  %5707 = vmatmul.mubr.bf16.vlgmr.msra.gmra.mrb[0].mxu1 %v9183_v15 }
 0x672   : > { %5347 = vmatpush1.bf16.msra.mxu0 %v4302_v14  ;;  %5716 = vmatpush1.bf16.msra.mxu1 %v4304_v19  ;;  %v4409_v14 = vld [vmem:[#allocation4 + $0x758] sm:$0xff]  ;;  %v3951_v19 = vrot.slane %v9157_v57, %v9195_v7 }
 0x673   : > { %5348 = vmatprep.subr.bf16.mxu0 %v4311_v60  ;;  %5717 = vmatprep.subr.bf16.mxu1 %v4313_v17  ;;  %v4015_v60 = vmul.f32 %v3939_v48, %v3907_v49  ;;  %v4049_v17 = vrot.slane %v9161_v16, %v9192_v41  ;;  %v4481_v48 = vld [vmem:[#allocation4 + $0x998] sm:$0xff]  ;;  %v4478_v49 = vld [vmem:[#allocation4 + $0x980] sm:$0xff] }
 0x674   : > { %5378 = vmatprep.mubr.bf16.mxu0 %v9185_v1  ;;  %5747 = vmatprep.mubr.bf16.mxu1 %v9185_v1 }
 0x676   : > { %5349 = vmatpush1.bf16.msra.mxu0 %v4310_v20  ;;  %5718 = vmatpush1.bf16.msra.mxu1 %v4312_v56  ;;  %v3910_v20 = vld [vmem:[#allocation3 + $0x28] sm:$0xff] }
 0x677   : > { %5350 = vmatprep.subr.bf16.mxu0 %v4319_v3  ;;  %5719 = vmatprep.subr.bf16.mxu1 %v4321_v0  ;;  %v4406_v56 = vld [vmem:[#allocation4 + $0x740] sm:$0xff]  ;;  %v4408_v3 = vld [vmem:[#allocation4 + $0x750] sm:$0xff]  ;;  %v4415_v0 = vld [vmem:[#allocation4 + $0x788] sm:$0xff] }
 0x67a   : > { %5351 = vmatpush1.bf16.msra.mxu0 %v4318_v2  ;;  %5720 = vmatpush1.bf16.msra.mxu1 %v4320_v61  ;;  %v4417_v2 = vld [vmem:[#allocation4 + $0x798] sm:$0xff]  ;;  %v4018_v61 = vmul.f32 %v3951_v19, %v3910_v20  ;;  %v4488_v19 = vld [vmem:[#allocation4 + $0x9d0] sm:$0xff]  ;;  %v4494_v20 = vld [vmem:[#allocation4 + $0xa00] sm:$0xff] }
 0x67b   : > { %5352 = vmatprep.subr.bf16.mxu0 %v4327_v62  ;;  %5721 = vmatprep.subr.bf16.mxu1 %v4329_v21  ;;  %v4061_v62 = vrot.slane %v9161_v16, %v9195_v7  ;;  %v4125_v21 = vadd.f32 %v4049_v17, %v4015_v60  ;;  %v4495_v60 = vld [vmem:[#allocation4 + $0xa08] sm:$0xff]  ;;  %v4497_v17 = vld [vmem:[#allocation4 + $0xa18] sm:$0xff] }
 0x67e   : > { %5353 = vmatpush1.bf16.msra.mxu0 %v4326_v4  ;;  %5722 = vmatpush1.bf16.msra.mxu1 %v4328_v22  ;;  %v4414_v4 = vld [vmem:[#allocation4 + $0x780] sm:$0xff]  ;;  %v4416_v22 = vld [vmem:[#allocation4 + $0x790] sm:$0xff] }
 0x67f   : > { %5354 = vmatprep.subr.bf16.mxu0 %v4335_v23  ;;  %5723 = vmatprep.subr.bf16.mxu1 %v4337_v24  ;;  %v4423_v23 = vld [vmem:[#allocation4 + $0x7c8] sm:$0xff]  ;;  %v4425_v24 = vld [vmem:[#allocation4 + $0x7d8] sm:$0xff] }
 0x682   : > { %5355 = vmatpush1.bf16.msra.mxu0 %v4334_v25  ;;  %5724 = vmatpush1.bf16.msra.mxu1 %v4336_v26  ;;  %v4128_v25 = vadd.f32 %v4061_v62, %v4018_v61  ;;  %v4142_v26 = vmax.f32 %v4125_v21, 0.0  ;;  %v4504_v61 = vld [vmem:[#allocation4 + $0xa50] sm:$0xff]  ;;  %v4511_v62 = vld [vmem:[#allocation4 + $0xa88] sm:$0xff]  ;;  %v4513_v21 = vld [vmem:[#allocation4 + $0xa98] sm:$0xff] }
 0x683   : > { %5356 = vmatprep.subr.bf16.mxu0 %v4343_v5  ;;  %5725 = vmatprep.subr.bf16.mxu1 %v4345_v27  ;;  %v4422_v5 = vld [vmem:[#allocation4 + $0x7c0] sm:$0xff]  ;;  %v4424_v27 = vld [vmem:[#allocation4 + $0x7d0] sm:$0xff] }
 0x686   : > { %5357 = vmatpush1.bf16.msra.mxu0 %v4342_v8  ;;  %5726 = vmatpush1.bf16.msra.mxu1 %v4344_v9  ;;  %v4431_v8 = vld [vmem:[#allocation4 + $0x808] sm:$0xff]  ;;  %v4433_v9 = vld [vmem:[#allocation4 + $0x818] sm:$0xff] }
 0x687   : > { %5358 = vmatprep.subr.bf16.mxu0 %v4351_v10  ;;  %5727 = vmatprep.subr.bf16.mxu1 %v4353_v29  ;;  %v4145_v10 = vmax.f32 %v4128_v25, 0.0  ;;  %v9205_v29 = vpack.c.bf16 %v4142_v26, %v4142_v26  ;;  %v9214_v25 = vsub.s32 4, %v9152_v6  ;;  %v4518_v26 = vld [vmem:[#allocation4 + $0xac0] sm:$0xff] }
 0x68a   : > { %5359 = vmatpush1.bf16.msra.mxu0 %v4350_v30  ;;  %5728 = vmatpush1.bf16.msra.mxu1 %v4352_v32  ;;  %v4430_v30 = vld [vmem:[#allocation4 + $0x800] sm:$0xff]  ;;  %v4432_v32 = vld [vmem:[#allocation4 + $0x810] sm:$0xff] }
 0x68b   : > { %5360 = vmatprep.subr.bf16.mxu0 %v4359_v33  ;;  %5729 = vmatprep.subr.bf16.mxu1 %v4361_v36  ;;  %v4439_v33 = vld [vmem:[#allocation4 + $0x848] sm:$0xff]  ;;  %v4441_v36 = vld [vmem:[#allocation4 + $0x858] sm:$0xff] }
 0x68e   : > { %5361 = vmatpush1.bf16.msra.mxu0 %v4358_v38  ;;  %5730 = vmatpush1.bf16.msra.mxu1 %v4360_v39  ;;  %v9207_v38 = vpack.c.bf16 %v4145_v10, %v4145_v10  ;;  %v4438_v39 = vld [vmem:[#allocation4 + $0x840] sm:$0xff]  ;;  %v3947_v10 = vrot.slane %v9157_v57, %v9214_v25 }
 0x68f   : > { %5362 = vmatprep.subr.bf16.mxu0 %v4367_v42  ;;  %5731 = vmatprep.subr.bf16.mxu1 %v4369_v43  ;;  %v4440_v42 = vld [vmem:[#allocation4 + $0x850] sm:$0xff]  ;;  %v4447_v43 = vld [vmem:[#allocation4 + $0x888] sm:$0xff] }
 0x692   : > { %5363 = vmatpush1.bf16.msra.mxu0 %v4366_v46  ;;  %5732 = vmatpush1.bf16.msra.mxu1 %v4368_v47  ;;  %v4449_v46 = vld [vmem:[#allocation4 + $0x898] sm:$0xff]  ;;  %v4446_v47 = vld [vmem:[#allocation4 + $0x880] sm:$0xff] }
 0x693   : > { %5364 = vmatprep.subr.bf16.mxu0 %v4375_v50  ;;  %5733 = vmatprep.subr.bf16.mxu1 %v4377_v53  ;;  %v4448_v50 = vld [vmem:[#allocation4 + $0x890] sm:$0xff]  ;;  %v4455_v53 = vld [vmem:[#allocation4 + $0x8c8] sm:$0xff] }
 0x696   : > { %5365 = vmatpush1.bf16.msra.mxu0 %v4374_v58  ;;  %5734 = vmatpush1.bf16.msra.mxu1 %v4376_v37  ;;  %v4457_v58 = vld [vmem:[#allocation4 + $0x8d8] sm:$0xff]  ;;  %v4454_v37 = vld [vmem:[#allocation4 + $0x8c0] sm:$0xff] }
 0x697   : > { %5366 = vmatprep.subr.bf16.mxu0 %v4383_v59  ;;  %5735 = vmatprep.subr.bf16.mxu1 %v4385_v51  ;;  %v4456_v59 = vld [vmem:[#allocation4 + $0x8d0] sm:$0xff]  ;;  %v4463_v51 = vld [vmem:[#allocation4 + $0x908] sm:$0xff] }
 0x69a   : > { %5367 = vmatpush1.bf16.msra.mxu0 %v4382_v52  ;;  %5736 = vmatpush1.bf16.msra.mxu1 %v4384_v18  ;;  %v4465_v52 = vld [vmem:[#allocation4 + $0x918] sm:$0xff]  ;;  %v4462_v18 = vld [vmem:[#allocation4 + $0x900] sm:$0xff] }
 0x69b   : > { %5368 = vmatprep.subr.bf16.mxu0 %v4391_v40  ;;  %5737 = vmatprep.subr.bf16.mxu1 %v4393_v31  ;;  %v4464_v40 = vld [vmem:[#allocation4 + $0x910] sm:$0xff]  ;;  %v4471_v31 = vld [vmem:[#allocation4 + $0x948] sm:$0xff] }
 0x69e   : > { %5369 = vmatpush1.bf16.msra.mxu0 %v4390_v63  ;;  %5738 = vmatpush1.bf16.msra.mxu1 %v4392_v44  ;;  %v4473_v63 = vld [vmem:[#allocation4 + $0x958] sm:$0xff]  ;;  %v4470_v44 = vld [vmem:[#allocation4 + $0x940] sm:$0xff] }
 0x69f   : > { %5370 = vmatprep.subr.bf16.mxu0 %v4399_v34  ;;  %5739 = vmatprep.subr.bf16.mxu1 %v4401_v45  ;;  %v4472_v34 = vld [vmem:[#allocation4 + $0x950] sm:$0xff]  ;;  %v4479_v45 = vld [vmem:[#allocation4 + $0x988] sm:$0xff] }
 0x6a2   : > { %5371 = vmatpush1.bf16.msra.mxu0 %v4398_v12  ;;  %5740 = vmatpush1.bf16.msra.mxu1 %v4400_v13  ;;  %v4480_v12 = vld [vmem:[#allocation4 + $0x990] sm:$0xff]  ;;  %v4487_v13 = vld [vmem:[#allocation4 + $0x9c8] sm:$0xff] }
 0x6a3   : > { %5372 = vmatprep.subr.bf16.mxu0 %v4407_v54  ;;  %5741 = vmatprep.subr.bf16.mxu1 %v4409_v14  ;;  %v4489_v54 = vld [vmem:[#allocation4 + $0x9d8] sm:$0xff]  ;;  %v4486_v14 = vld [vmem:[#allocation4 + $0x9c0] sm:$0xff] }
 0x6a6   : > { %5373 = vmatpush1.bf16.msra.mxu0 %v4406_v56  ;;  %5742 = vmatpush1.bf16.msra.mxu1 %v4408_v3  ;;  %v4496_v56 = vld [vmem:[#allocation4 + $0xa10] sm:$0xff]  ;;  %v4503_v3 = vld [vmem:[#allocation4 + $0xa48] sm:$0xff] }
 0x6a7   : > { %5374 = vmatprep.subr.bf16.mxu0 %v4415_v0  ;;  %5743 = vmatprep.subr.bf16.mxu1 %v4417_v2  ;;  %v4505_v0 = vld [vmem:[#allocation4 + $0xa58] sm:$0xff]  ;;  %v4502_v2 = vld [vmem:[#allocation4 + $0xa40] sm:$0xff] }
 0x6aa   : > { %5375 = vmatpush1.bf16.msra.mxu0 %v4414_v4  ;;  %5744 = vmatpush1.bf16.msra.mxu1 %v4416_v22  ;;  %v4510_v4 = vld [vmem:[#allocation4 + $0xa80] sm:$0xff]  ;;  %v4512_v22 = vld [vmem:[#allocation4 + $0xa90] sm:$0xff] }
 0x6ab   : > { %5376 = vmatprep.subr.bf16.mxu0 %v4423_v23  ;;  %5745 = vmatprep.subr.bf16.mxu1 %v4425_v24  ;;  %v4519_v23 = vld [vmem:[#allocation4 + $0xac8] sm:$0xff]  ;;  %v4521_v24 = vld [vmem:[#allocation4 + $0xad8] sm:$0xff] }
 0x6ae   : > { %5377 = vmatpush1.bf16.msra.mxu0 %v4422_v5  ;;  %5746 = vmatpush1.bf16.msra.mxu1 %v4424_v27  ;;  %v4520_v5 = vld [vmem:[#allocation4 + $0xad0] sm:$0xff]  ;;  %v4527_v27 = vld [vmem:[#allocation4 + $0xb08] sm:$0xff] }
 0x6af   : > { %5387 = vmatprep.subr.bf16.mxu0 %v4431_v8  ;;  %5756 = vmatprep.subr.bf16.mxu1 %v4433_v9  ;;  %v4529_v8 = vld [vmem:[#allocation4 + $0xb18] sm:$0xff]  ;;  %v9217_v9 = vsub.s32 7, %v9152_v6 }
 0x6b1   : > { %5379 = vmatmul.mubr.bf16.vlgmr.msra.gmra.mrb[0].mxu0 %v9205_v29  ;;  %5748 = vmatmul.mubr.bf16.vlgmr.msra.gmra.mrb[0].mxu1 %v9205_v29 }
 0x6b2   : > { %5388 = vmatpush1.bf16.msra.mxu0 %v4430_v30  ;;  %5757 = vmatpush1.bf16.msra.mxu1 %v4432_v32  ;;  %v3909_v30 = vld [vmem:[#allocation3 + $0x20] sm:$0xff]  ;;  %v4526_v32 = vld [vmem:[#allocation4 + $0xb00] sm:$0xff] }
 0x6b3   : > { %5389 = vmatprep.subr.bf16.mxu0 %v4439_v33  ;;  %5758 = vmatprep.subr.bf16.mxu1 %v4441_v36  ;;  %v4528_v33 = vld [vmem:[#allocation4 + $0xb10] sm:$0xff]  ;;  %v4535_v36 = vld [vmem:[#allocation4 + $0xb48] sm:$0xff] }
 0x6b4   : > { %5419 = vmatprep.mubr.bf16.mxu0 %v9207_v38  ;;  %5788 = vmatprep.mubr.bf16.mxu1 %v9207_v38 }
 0x6b6   : > { %5390 = vmatpush1.bf16.msra.mxu0 %v4438_v39  ;;  %5759 = vmatpush1.bf16.msra.mxu1 %v4440_v42  ;;  %v4537_v39 = vld [vmem:[#allocation4 + $0xb58] sm:$0xff]  ;;  %v3959_v42 = vrot.slane %v9157_v57, %v9217_v9 }
 0x6b7   : > { %5391 = vmatprep.subr.bf16.mxu0 %v4447_v43  ;;  %5760 = vmatprep.subr.bf16.mxu1 %v4449_v46  ;;  %v4017_v43 = vmul.f32 %v3947_v10, %v3909_v30  ;;  %v4057_v46 = vrot.slane %v9161_v16, %v9214_v25  ;;  %v4598_v10 = vld [vmem:[#allocation4 + $0xd40] sm:$0xff]  ;;  %v4600_v30 = vld [vmem:[#allocation4 + $0xd50] sm:$0xff] }
 0x6ba   : > { %5392 = vmatpush1.bf16.msra.mxu0 %v4446_v47  ;;  %5761 = vmatpush1.bf16.msra.mxu1 %v4448_v50  ;;  %v3912_v47 = vld [vmem:[#allocation3 + $0x38] sm:$0xff]  ;;  %v4534_v50 = vld [vmem:[#allocation4 + $0xb40] sm:$0xff] }
 0x6bb   : > { %5393 = vmatprep.subr.bf16.mxu0 %v4455_v53  ;;  %5762 = vmatprep.subr.bf16.mxu1 %v4457_v58  ;;  %v4536_v53 = vld [vmem:[#allocation4 + $0xb50] sm:$0xff]  ;;  %v4543_v58 = vld [vmem:[#allocation4 + $0xb88] sm:$0xff] }
 0x6be   : > { %5394 = vmatpush1.bf16.msra.mxu0 %v4454_v37  ;;  %5763 = vmatpush1.bf16.msra.mxu1 %v4456_v59  ;;  %v4545_v37 = vld [vmem:[#allocation4 + $0xb98] sm:$0xff]  ;;  %v4020_v59 = vmul.f32 %v3959_v42, %v3912_v47  ;;  %v4615_v42 = vld [vmem:[#allocation4 + $0xdc8] sm:$0xff]  ;;  %v4616_v47 = vld [vmem:[#allocation4 + $0xdd0] sm:$0xff] }
 0x6bf   : > { %5395 = vmatprep.subr.bf16.mxu0 %v4463_v51  ;;  %5764 = vmatprep.subr.bf16.mxu1 %v4465_v52  ;;  %v4069_v51 = vrot.slane %v9161_v16, %v9217_v9  ;;  %v4127_v52 = vadd.f32 %v4057_v46, %v4017_v43  ;;  %v4617_v43 = vld [vmem:[#allocation4 + $0xdd8] sm:$0xff]  ;;  %v4614_v46 = vld [vmem:[#allocation4 + $0xdc0] sm:$0xff] }
 0x6c2   : > { %5396 = vmatpush1.bf16.msra.mxu0 %v4462_v18  ;;  %5765 = vmatpush1.bf16.msra.mxu1 %v4464_v40  ;;  %v4542_v18 = vld [vmem:[#allocation4 + $0xb80] sm:$0xff]  ;;  %v4544_v40 = vld [vmem:[#allocation4 + $0xb90] sm:$0xff] }
 0x6c3   : > { %5397 = vmatprep.subr.bf16.mxu0 %v4471_v31  ;;  %5766 = vmatprep.subr.bf16.mxu1 %v4473_v63  ;;  %v4551_v31 = vld [vmem:[#allocation4 + $0xbc8] sm:$0xff]  ;;  %v4553_v63 = vld [vmem:[#allocation4 + $0xbd8] sm:$0xff] }
 0x6c6   : > { %5398 = vmatpush1.bf16.msra.mxu0 %v4470_v44  ;;  %5767 = vmatpush1.bf16.msra.mxu1 %v4472_v34  ;;  %v4130_v44 = vadd.f32 %v4069_v51, %v4020_v59  ;;  %v4144_v34 = vmax.f32 %v4127_v52, 0.0  ;;  %v4631_v59 = vld [vmem:[#allocation4 + $0xe48] sm:$0xff]  ;;  %v4633_v51 = vld [vmem:[#allocation4 + $0xe58] sm:$0xff]  ;;  %v4630_v52 = vld [vmem:[#allocation4 + $0xe40] sm:$0xff] }
 0x6c7   : > { %5399 = vmatprep.subr.bf16.mxu0 %v4479_v45  ;;  %5768 = vmatprep.subr.bf16.mxu1 %v4481_v48  ;;  %v4550_v45 = vld [vmem:[#allocation4 + $0xbc0] sm:$0xff]  ;;  %v4552_v48 = vld [vmem:[#allocation4 + $0xbd0] sm:$0xff] }
 0x6c8   : > { %v4147_v16 = vmax.f32 %v4130_v44, 0.0  ;;  %v4640_v44 = vld [vmem:[#allocation4 + $0xe90] sm:$0xff] }
 0x6ca   : > { %5400 = vmatpush1.bf16.msra.mxu0 %v4478_v49  ;;  %5769 = vmatpush1.bf16.msra.mxu1 %v4480_v12  ;;  %v4559_v49 = vld [vmem:[#allocation4 + $0xc08] sm:$0xff]  ;;  %v4561_v12 = vld [vmem:[#allocation4 + $0xc18] sm:$0xff] }
 0x6cb   : > { %5401 = vmatprep.subr.bf16.mxu0 %v4487_v13  ;;  %5770 = vmatprep.subr.bf16.mxu1 %v4489_v54  ;;  %v9227_v13 = vpack.c.bf16 %v4144_v34, %v4144_v34  ;;  %v4558_v54 = vld [vmem:[#allocation4 + $0xc00] sm:$0xff]  ;;  %v4647_v34 = vld [vmem:[#allocation4 + $0xec8] sm:$0xff] }
 0x6ce   : > { %5402 = vmatpush1.bf16.msra.mxu0 %v4486_v14  ;;  %5771 = vmatpush1.bf16.msra.mxu1 %v4488_v19  ;;  %v4560_v14 = vld [vmem:[#allocation4 + $0xc10] sm:$0xff]  ;;  %v4567_v19 = vld [vmem:[#allocation4 + $0xc48] sm:$0xff] }
 0x6cf   : > { %5403 = vmatprep.subr.bf16.mxu0 %v4495_v60  ;;  %5772 = vmatprep.subr.bf16.mxu1 %v4497_v17  ;;  %v4569_v60 = vld [vmem:[#allocation4 + $0xc58] sm:$0xff]  ;;  %v9229_v17 = vpack.c.bf16 %v4147_v16, %v4147_v16  ;;  %v4655_v16 = vld [vmem:[#allocation4 + $0xf08] sm:$0xff] }
 0x6d2   : > { %5404 = vmatpush1.bf16.msra.mxu0 %v4494_v20  ;;  %5773 = vmatpush1.bf16.msra.mxu1 %v4496_v56  ;;  %v4566_v20 = vld [vmem:[#allocation4 + $0xc40] sm:$0xff]  ;;  %v4568_v56 = vld [vmem:[#allocation4 + $0xc50] sm:$0xff] }
 0x6d3   : > { %5405 = vmatprep.subr.bf16.mxu0 %v4503_v3  ;;  %5774 = vmatprep.subr.bf16.mxu1 %v4505_v0  ;;  %v4575_v3 = vld [vmem:[#allocation4 + $0xc88] sm:$0xff]  ;;  %v4577_v0 = vld [vmem:[#allocation4 + $0xc98] sm:$0xff] }
 0x6d6   : > { %5406 = vmatpush1.bf16.msra.mxu0 %v4502_v2  ;;  %5775 = vmatpush1.bf16.msra.mxu1 %v4504_v61  ;;  %v4574_v2 = vld [vmem:[#allocation4 + $0xc80] sm:$0xff]  ;;  %v4576_v61 = vld [vmem:[#allocation4 + $0xc90] sm:$0xff] }
 0x6d7   : > { %5407 = vmatprep.subr.bf16.mxu0 %v4511_v62  ;;  %5776 = vmatprep.subr.bf16.mxu1 %v4513_v21  ;;  %v4583_v62 = vld [vmem:[#allocation4 + $0xcc8] sm:$0xff]  ;;  %v4585_v21 = vld [vmem:[#allocation4 + $0xcd8] sm:$0xff] }
 0x6da   : > { %5408 = vmatpush1.bf16.msra.mxu0 %v4510_v4  ;;  %5777 = vmatpush1.bf16.msra.mxu1 %v4512_v22  ;;  %v4582_v4 = vld [vmem:[#allocation4 + $0xcc0] sm:$0xff]  ;;  %v4584_v22 = vld [vmem:[#allocation4 + $0xcd0] sm:$0xff] }
 0x6db   : > { %5409 = vmatprep.subr.bf16.mxu0 %v4519_v23  ;;  %5778 = vmatprep.subr.bf16.mxu1 %v4521_v24  ;;  %v4591_v23 = vld [vmem:[#allocation4 + $0xd08] sm:$0xff]  ;;  %v4593_v24 = vld [vmem:[#allocation4 + $0xd18] sm:$0xff] }
 0x6de   : > { %5410 = vmatpush1.bf16.msra.mxu0 %v4518_v26  ;;  %5779 = vmatpush1.bf16.msra.mxu1 %v4520_v5  ;;  %v4590_v26 = vld [vmem:[#allocation4 + $0xd00] sm:$0xff]  ;;  %v4592_v5 = vld [vmem:[#allocation4 + $0xd10] sm:$0xff] }
 0x6df   : > { %5411 = vmatprep.subr.bf16.mxu0 %v4527_v27  ;;  %5780 = vmatprep.subr.bf16.mxu1 %v4529_v8  ;;  %v4599_v27 = vld [vmem:[#allocation4 + $0xd48] sm:$0xff]  ;;  %v4601_v8 = vld [vmem:[#allocation4 + $0xd58] sm:$0xff] }
 0x6e2   : > { %5412 = vmatpush1.bf16.msra.mxu0 %v4526_v32  ;;  %5781 = vmatpush1.bf16.msra.mxu1 %v4528_v33  ;;  %v4607_v32 = vld [vmem:[#allocation4 + $0xd88] sm:$0xff]  ;;  %v4609_v33 = vld [vmem:[#allocation4 + $0xd98] sm:$0xff] }
 0x6e3   : > { %5413 = vmatprep.subr.bf16.mxu0 %v4535_v36  ;;  %5782 = vmatprep.subr.bf16.mxu1 %v4537_v39  ;;  %v4606_v36 = vld [vmem:[#allocation4 + $0xd80] sm:$0xff]  ;;  %v4608_v39 = vld [vmem:[#allocation4 + $0xd90] sm:$0xff] }
 0x6e6   : > { %5414 = vmatpush1.bf16.msra.mxu0 %v4534_v50  ;;  %5783 = vmatpush1.bf16.msra.mxu1 %v4536_v53  ;;  %v4623_v50 = vld [vmem:[#allocation4 + $0xe08] sm:$0xff]  ;;  %v4625_v53 = vld [vmem:[#allocation4 + $0xe18] sm:$0xff] }
 0x6e7   : > { %5415 = vmatprep.subr.bf16.mxu0 %v4543_v58  ;;  %5784 = vmatprep.subr.bf16.mxu1 %v4545_v37  ;;  %v4622_v58 = vld [vmem:[#allocation4 + $0xe00] sm:$0xff]  ;;  %v4624_v37 = vld [vmem:[#allocation4 + $0xe10] sm:$0xff] }
 0x6ea   : > { %5416 = vmatpush1.bf16.msra.mxu0 %v4542_v18  ;;  %5785 = vmatpush1.bf16.msra.mxu1 %v4544_v40  ;;  %v4632_v18 = vld [vmem:[#allocation4 + $0xe50] sm:$0xff]  ;;  %v4639_v40 = vld [vmem:[#allocation4 + $0xe88] sm:$0xff] }
 0x6eb   : > { %5417 = vmatprep.subr.bf16.mxu0 %v4551_v31  ;;  %5786 = vmatprep.subr.bf16.mxu1 %v4553_v63  ;;  %v4641_v31 = vld [vmem:[#allocation4 + $0xe98] sm:$0xff]  ;;  %v4638_v63 = vld [vmem:[#allocation4 + $0xe80] sm:$0xff] }
 0x6ee   : > { %5418 = vmatpush1.bf16.msra.mxu0 %v4550_v45  ;;  %5787 = vmatpush1.bf16.msra.mxu1 %v4552_v48  ;;  %v4649_v45 = vld [vmem:[#allocation4 + $0xed8] sm:$0xff]  ;;  %v9236_v48 = vsub.s32 6, %v9152_v6  ;;  %v4654_v6 = vld [vmem:[#allocation4 + $0xf00] sm:$0xff] }
 0x6ef   : > { %5428 = vmatprep.subr.bf16.mxu0 %v4559_v49  ;;  %5797 = vmatprep.subr.bf16.mxu1 %v4561_v12  ;;  %v4646_v49 = vld [vmem:[#allocation4 + $0xec0] sm:$0xff]  ;;  %v4648_v12 = vld [vmem:[#allocation4 + $0xed0] sm:$0xff] }
 0x6f1   : > { %5420 = vmatmul.mubr.bf16.vlgmr.msra.gmra.mrb[0].mxu0 %v9227_v13  ;;  %5789 = vmatmul.mubr.bf16.vlgmr.msra.gmra.mrb[0].mxu1 %v9227_v13 }
 0x6f2   : > { %5429 = vmatpush1.bf16.msra.mxu0 %v4558_v54  ;;  %5798 = vmatpush1.bf16.msra.mxu1 %v4560_v14  ;;  %v4657_v54 = vld [vmem:[#allocation4 + $0xf18] sm:$0xff]  ;;  %v3955_v14 = vrot.slane %v9157_v57, %v9236_v48 }
 0x6f3   : > { %5430 = vmatprep.subr.bf16.mxu0 %v4567_v19  ;;  %5799 = vmatprep.subr.bf16.mxu1 %v4569_v60  ;;  %v9240_v19 = vld [vmem:[#allocation16 + $0x8] sm:$0xff] }
 0x6f4   : > { %5460 = vmatprep.mubr.bf16.mxu0 %v9229_v17  ;;  %5829 = vmatprep.mubr.bf16.mxu1 %v9229_v17  ;;  %v3911_v60 = vld [vmem:[#allocation3 + $0x30] sm:$0xff] }
 0x6f5   : > { %v9245_v57 = vld [vmem:[#allocation17 + $0x20] ss:$4 sm:$0xff] }
 0x6f6   : > { %5431 = vmatpush1.bf16.msra.mxu0 %v4566_v20  ;;  %5800 = vmatpush1.bf16.msra.mxu1 %v4568_v56  ;;  %v4656_v20 = vld [vmem:[#allocation4 + $0xf10] sm:$0xff]  ;;  %v4663_v56 = vld [vmem:[#allocation4 + $0xf48] sm:$0xff] }
 0x6f7   : > { %5432 = vmatprep.subr.bf16.mxu0 %v4575_v3  ;;  %5801 = vmatprep.subr.bf16.mxu1 %v4577_v0  ;;  %v4665_v3 = vld [vmem:[#allocation4 + $0xf58] sm:$0xff]  ;;  %v3967_v0 = vrot.slane %v9240_v19, %v9155_v11 }
 0x6fa   : > { %5433 = vmatpush1.bf16.msra.mxu0 %v4574_v2  ;;  %5802 = vmatpush1.bf16.msra.mxu1 %v4576_v61  ;;  %v4019_v2 = vmul.f32 %v3955_v14, %v3911_v60  ;;  %v7683_v61 = vld [vmem:[#allocation17] ss:$4 sm:$0xff] }
 0x6fb   : > { %5434 = vmatprep.subr.bf16.mxu0 %v4583_v62  ;;  %5803 = vmatprep.subr.bf16.mxu1 %v4585_v21  ;;  %v4065_v62 = vrot.slane %v7683_v61, %v9236_v48  ;;  %v3914_v21 = vld [vmem:[#allocation3 + $0x48] sm:$0xff]  ;;  %v4720_v60 = vld [vmem:[#allocation4 + $0x1110] sm:$0xff] }
 0x6fc   : > { %v4718_v14 = vld [vmem:[#allocation4 + $0x1100] sm:$0xff] }
 0x6fd   : > { %v4734_v61 = vld [vmem:[#allocation4 + $0x1180] sm:$0xff] }
 0x6fe   : > { %5435 = vmatpush1.bf16.msra.mxu0 %v4582_v4  ;;  %5804 = vmatpush1.bf16.msra.mxu1 %v4584_v22  ;;  %v4662_v4 = vld [vmem:[#allocation4 + $0xf40] sm:$0xff]  ;;  %v4664_v22 = vld [vmem:[#allocation4 + $0xf50] sm:$0xff] }
 0x6ff   : > { %5436 = vmatprep.subr.bf16.mxu0 %v4591_v23  ;;  %5805 = vmatprep.subr.bf16.mxu1 %v4593_v24  ;;  %v4671_v23 = vld [vmem:[#allocation4 + $0xf88] sm:$0xff]  ;;  %v4673_v24 = vld [vmem:[#allocation4 + $0xf98] sm:$0xff] }
 0x702   : > { %5437 = vmatpush1.bf16.msra.mxu0 %v4590_v26  ;;  %5806 = vmatpush1.bf16.msra.mxu1 %v4592_v5  ;;  %v4022_v26 = vmul.f32 %v3967_v0, %v3914_v21  ;;  %v4077_v5 = vrot.slane %v9245_v57, %v9155_v11  ;;  %v4735_v0 = vld [vmem:[#allocation4 + $0x1188] sm:$0xff] }
 0x703   : > { %5438 = vmatprep.subr.bf16.mxu0 %v4599_v27  ;;  %5807 = vmatprep.subr.bf16.mxu1 %v4601_v8  ;;  %v4129_v27 = vadd.f32 %v4065_v62, %v4019_v2  ;;  %v4670_v8 = vld [vmem:[#allocation4 + $0xf80] sm:$0xff]  ;;  %v4737_v2 = vld [vmem:[#allocation4 + $0x1198] sm:$0xff]  ;;  %v4736_v62 = vld [vmem:[#allocation4 + $0x1190] sm:$0xff] }
 0x704   : > { %v4743_v21 = vld [vmem:[#allocation4 + $0x11c8] sm:$0xff] }
 0x706   : > { %5439 = vmatpush1.bf16.msra.mxu0 %v4598_v10  ;;  %5808 = vmatpush1.bf16.msra.mxu1 %v4600_v30  ;;  %v4672_v10 = vld [vmem:[#allocation4 + $0xf90] sm:$0xff]  ;;  %v4679_v30 = vld [vmem:[#allocation4 + $0xfc8] sm:$0xff] }
 0x707   : > { %5440 = vmatprep.subr.bf16.mxu0 %v4607_v32  ;;  %5809 = vmatprep.subr.bf16.mxu1 %v4609_v33  ;;  %v4681_v32 = vld [vmem:[#allocation4 + $0xfd8] sm:$0xff]  ;;  %v4132_v33 = vadd.f32 %v4077_v5, %v4022_v26  ;;  %v4750_v5 = vld [vmem:[#allocation4 + $0x1200] sm:$0xff] }
 0x708   : > { %v4753_v26 = vld [vmem:[#allocation4 + $0x1218] sm:$0xff] }
 0x70a   : > { %5441 = vmatpush1.bf16.msra.mxu0 %v4606_v36  ;;  %5810 = vmatpush1.bf16.msra.mxu1 %v4608_v39  ;;  %v4146_v36 = vmax.f32 %v4129_v27, 0.0  ;;  %v4678_v39 = vld [vmem:[#allocation4 + $0xfc0] sm:$0xff]  ;;  %v4752_v27 = vld [vmem:[#allocation4 + $0x1210] sm:$0xff] }
 0x70b   : > { %5442 = vmatprep.subr.bf16.mxu0 %v4615_v42  ;;  %5811 = vmatprep.subr.bf16.mxu1 %v4617_v43  ;;  %v4680_v42 = vld [vmem:[#allocation4 + $0xfd0] sm:$0xff]  ;;  %v4687_v43 = vld [vmem:[#allocation4 + $0x1008] sm:$0xff] }
 0x70e   : > { %5443 = vmatpush1.bf16.msra.mxu0 %v4614_v46  ;;  %5812 = vmatpush1.bf16.msra.mxu1 %v4616_v47  ;;  %v4689_v46 = vld [vmem:[#allocation4 + $0x1018] sm:$0xff]  ;;  %v4149_v47 = vmax.f32 %v4132_v33, 0.0  ;;  %v4767_v33 = vld [vmem:[#allocation4 + $0x1288] sm:$0xff] }
 0x70f   : > { %5444 = vmatprep.subr.bf16.mxu0 %v4623_v50  ;;  %5813 = vmatprep.subr.bf16.mxu1 %v4625_v53  ;;  %v9249_v50 = vpack.c.bf16 %v4146_v36, %v4146_v36  ;;  %v4686_v53 = vld [vmem:[#allocation4 + $0x1000] sm:$0xff]  ;;  %v4769_v36 = vld [vmem:[#allocation4 + $0x1298] sm:$0xff] }
 0x712   : > { %5445 = vmatpush1.bf16.msra.mxu0 %v4622_v58  ;;  %5814 = vmatpush1.bf16.msra.mxu1 %v4624_v37  ;;  %v4688_v58 = vld [vmem:[#allocation4 + $0x1010] sm:$0xff]  ;;  %v4695_v37 = vld [vmem:[#allocation4 + $0x1048] sm:$0xff] }
 0x713   : > { %5446 = vmatprep.subr.bf16.mxu0 %v4631_v59  ;;  %5815 = vmatprep.subr.bf16.mxu1 %v4633_v51  ;;  %v4697_v59 = vld [vmem:[#allocation4 + $0x1058] sm:$0xff]  ;;  %v9251_v51 = vpack.c.bf16 %v4149_v47, %v4149_v47  ;;  %v4774_v47 = vld [vmem:[#allocation4 + $0x12c0] sm:$0xff] }
 0x716   : > { %5447 = vmatpush1.bf16.msra.mxu0 %v4630_v52  ;;  %5816 = vmatpush1.bf16.msra.mxu1 %v4632_v18  ;;  %v4694_v52 = vld [vmem:[#allocation4 + $0x1040] sm:$0xff]  ;;  %v4696_v18 = vld [vmem:[#allocation4 + $0x1050] sm:$0xff] }
 0x717   : > { %5448 = vmatprep.subr.bf16.mxu0 %v4639_v40  ;;  %5817 = vmatprep.subr.bf16.mxu1 %v4641_v31  ;;  %v4703_v40 = vld [vmem:[#allocation4 + $0x1088] sm:$0xff]  ;;  %v4705_v31 = vld [vmem:[#allocation4 + $0x1098] sm:$0xff] }
 0x71a   : > { %5449 = vmatpush1.bf16.msra.mxu0 %v4638_v63  ;;  %5818 = vmatpush1.bf16.msra.mxu1 %v4640_v44  ;;  %v4702_v63 = vld [vmem:[#allocation4 + $0x1080] sm:$0xff]  ;;  %v4704_v44 = vld [vmem:[#allocation4 + $0x1090] sm:$0xff] }
 0x71b   : > { %5450 = vmatprep.subr.bf16.mxu0 %v4647_v34  ;;  %5819 = vmatprep.subr.bf16.mxu1 %v4649_v45  ;;  %v4711_v34 = vld [vmem:[#allocation4 + $0x10c8] sm:$0xff]  ;;  %v4713_v45 = vld [vmem:[#allocation4 + $0x10d8] sm:$0xff] }
 0x71e   : > { %5451 = vmatpush1.bf16.msra.mxu0 %v4646_v49  ;;  %5820 = vmatpush1.bf16.msra.mxu1 %v4648_v12  ;;  %v4710_v49 = vld [vmem:[#allocation4 + $0x10c0] sm:$0xff]  ;;  %v4712_v12 = vld [vmem:[#allocation4 + $0x10d0] sm:$0xff] }
 0x71f   : > { %5452 = vmatprep.subr.bf16.mxu0 %v4655_v16  ;;  %5821 = vmatprep.subr.bf16.mxu1 %v4657_v54  ;;  %v4719_v16 = vld [vmem:[#allocation4 + $0x1108] sm:$0xff]  ;;  %v4721_v54 = vld [vmem:[#allocation4 + $0x1118] sm:$0xff] }
 0x722   : > { %5453 = vmatpush1.bf16.msra.mxu0 %v4654_v6  ;;  %5822 = vmatpush1.bf16.msra.mxu1 %v4656_v20  ;;  %v4727_v6 = vld [vmem:[#allocation4 + $0x1148] sm:$0xff]  ;;  %v4729_v20 = vld [vmem:[#allocation4 + $0x1158] sm:$0xff] }
 0x723   : > { %5454 = vmatprep.subr.bf16.mxu0 %v4663_v56  ;;  %5823 = vmatprep.subr.bf16.mxu1 %v4665_v3  ;;  %v4726_v56 = vld [vmem:[#allocation4 + $0x1140] sm:$0xff]  ;;  %v4728_v3 = vld [vmem:[#allocation4 + $0x1150] sm:$0xff] }
 0x726   : > { %5455 = vmatpush1.bf16.msra.mxu0 %v4662_v4  ;;  %5824 = vmatpush1.bf16.msra.mxu1 %v4664_v22  ;;  %v4745_v4 = vld [vmem:[#allocation4 + $0x11d8] sm:$0xff]  ;;  %v4742_v22 = vld [vmem:[#allocation4 + $0x11c0] sm:$0xff] }
 0x727   : > { %5456 = vmatprep.subr.bf16.mxu0 %v4671_v23  ;;  %5825 = vmatprep.subr.bf16.mxu1 %v4673_v24  ;;  %v4744_v23 = vld [vmem:[#allocation4 + $0x11d0] sm:$0xff]  ;;  %v4751_v24 = vld [vmem:[#allocation4 + $0x1208] sm:$0xff] }
 0x72a   : > { %5457 = vmatpush1.bf16.msra.mxu0 %v4670_v8  ;;  %5826 = vmatpush1.bf16.msra.mxu1 %v4672_v10  ;;  %v4759_v8 = vld [vmem:[#allocation4 + $0x1248] sm:$0xff]  ;;  %v4761_v10 = vld [vmem:[#allocation4 + $0x1258] sm:$0xff] }
 0x72b   : > { %5458 = vmatprep.subr.bf16.mxu0 %v4679_v30  ;;  %5827 = vmatprep.subr.bf16.mxu1 %v4681_v32  ;;  %v4758_v30 = vld [vmem:[#allocation4 + $0x1240] sm:$0xff]  ;;  %v4760_v32 = vld [vmem:[#allocation4 + $0x1250] sm:$0xff] }
 0x72e   : > { %5459 = vmatpush1.bf16.msra.mxu0 %v4678_v39  ;;  %5828 = vmatpush1.bf16.msra.mxu1 %v4680_v42  ;;  %v4766_v39 = vld [vmem:[#allocation4 + $0x1280] sm:$0xff]  ;;  %v4768_v42 = vld [vmem:[#allocation4 + $0x1290] sm:$0xff] }
 0x72f   : > { %5469 = vmatprep.subr.bf16.mxu0 %v4687_v43  ;;  %5838 = vmatprep.subr.bf16.mxu1 %v4689_v46  ;;  %v4775_v43 = vld [vmem:[#allocation4 + $0x12c8] sm:$0xff]  ;;  %v4777_v46 = vld [vmem:[#allocation4 + $0x12d8] sm:$0xff] }
 0x731   : > { %5461 = vmatmul.mubr.bf16.vlgmr.msra.gmra.mrb[0].mxu0 %v9249_v50  ;;  %5830 = vmatmul.mubr.bf16.vlgmr.msra.gmra.mrb[0].mxu1 %v9249_v50 }
 0x732   : > { %5470 = vmatpush1.bf16.msra.mxu0 %v4686_v53  ;;  %5839 = vmatpush1.bf16.msra.mxu1 %v4688_v58  ;;  %v4776_v53 = vld [vmem:[#allocation4 + $0x12d0] sm:$0xff]  ;;  %v4783_v58 = vld [vmem:[#allocation4 + $0x1308] sm:$0xff] }
 0x733   : > { %5471 = vmatprep.subr.bf16.mxu0 %v4695_v37  ;;  %5840 = vmatprep.subr.bf16.mxu1 %v4697_v59  ;;  %v4785_v37 = vld [vmem:[#allocation4 + $0x1318] sm:$0xff]  ;;  %v3963_v59 = vrot.slane %v9240_v19, %v9170_v28 }
 0x734   : > { %5501 = vmatprep.mubr.bf16.mxu0 %v9251_v51  ;;  %5870 = vmatprep.mubr.bf16.mxu1 %v9251_v51 }
 0x736   : > { %5472 = vmatpush1.bf16.msra.mxu0 %v4694_v52  ;;  %5841 = vmatpush1.bf16.msra.mxu1 %v4696_v18  ;;  %v3913_v52 = vld [vmem:[#allocation3 + $0x40] sm:$0xff]  ;;  %v4782_v18 = vld [vmem:[#allocation4 + $0x1300] sm:$0xff] }
 0x737   : > { %5473 = vmatprep.subr.bf16.mxu0 %v4703_v40  ;;  %5842 = vmatprep.subr.bf16.mxu1 %v4705_v31  ;;  %v4784_v40 = vld [vmem:[#allocation4 + $0x1310] sm:$0xff]  ;;  %v4791_v31 = vld [vmem:[#allocation4 + $0x1348] sm:$0xff] }
 0x73a   : > { %5474 = vmatpush1.bf16.msra.mxu0 %v4702_v63  ;;  %5843 = vmatpush1.bf16.msra.mxu1 %v4704_v44  ;;  %v4793_v63 = vld [vmem:[#allocation4 + $0x1358] sm:$0xff]  ;;  %v3975_v44 = vrot.slane %v9240_v19, %v9173_v35 }
 0x73b   : > { %5475 = vmatprep.subr.bf16.mxu0 %v4711_v34  ;;  %5844 = vmatprep.subr.bf16.mxu1 %v4713_v45  ;;  %v4021_v34 = vmul.f32 %v3963_v59, %v3913_v52  ;;  %v4073_v45 = vrot.slane %v9245_v57, %v9170_v28  ;;  %v4849_v59 = vld [vmem:[#allocation4 + $0x1518] sm:$0xff]  ;;  %v4846_v52 = vld [vmem:[#allocation4 + $0x1500] sm:$0xff] }
 0x73e   : > { %5476 = vmatpush1.bf16.msra.mxu0 %v4710_v49  ;;  %5845 = vmatpush1.bf16.msra.mxu1 %v4712_v12  ;;  %v3916_v49 = vld [vmem:[#allocation3 + $0x58] sm:$0xff]  ;;  %v4790_v12 = vld [vmem:[#allocation4 + $0x1340] sm:$0xff] }
 0x73f   : > { %5477 = vmatprep.subr.bf16.mxu0 %v4719_v16  ;;  %5846 = vmatprep.subr.bf16.mxu1 %v4721_v54  ;;  %v4792_v16 = vld [vmem:[#allocation4 + $0x1350] sm:$0xff]  ;;  %v4799_v54 = vld [vmem:[#allocation4 + $0x1388] sm:$0xff] }
 0x742   : > { %5478 = vmatpush1.bf16.msra.mxu0 %v4718_v14  ;;  %5847 = vmatpush1.bf16.msra.mxu1 %v4720_v60  ;;  %v4801_v14 = vld [vmem:[#allocation4 + $0x1398] sm:$0xff]  ;;  %v4024_v60 = vmul.f32 %v3975_v44, %v3916_v49  ;;  %v4856_v44 = vld [vmem:[#allocation4 + $0x1550] sm:$0xff]  ;;  %v4862_v49 = vld [vmem:[#allocation4 + $0x1580] sm:$0xff] }
 0x743   : > { %5479 = vmatprep.subr.bf16.mxu0 %v4727_v6  ;;  %5848 = vmatprep.subr.bf16.mxu1 %v4729_v20  ;;  %v4085_v6 = vrot.slane %v9245_v57, %v9173_v35  ;;  %v4131_v20 = vadd.f32 %v4073_v45, %v4021_v34  ;;  %v4863_v34 = vld [vmem:[#allocation4 + $0x1588] sm:$0xff]  ;;  %v4865_v45 = vld [vmem:[#allocation4 + $0x1598] sm:$0xff] }
 0x746   : > { %5480 = vmatpush1.bf16.msra.mxu0 %v4726_v56  ;;  %5849 = vmatpush1.bf16.msra.mxu1 %v4728_v3  ;;  %v4798_v56 = vld [vmem:[#allocation4 + $0x1380] sm:$0xff]  ;;  %v4800_v3 = vld [vmem:[#allocation4 + $0x1390] sm:$0xff] }
 0x747   : > { %5481 = vmatprep.subr.bf16.mxu0 %v4735_v0  ;;  %5850 = vmatprep.subr.bf16.mxu1 %v4737_v2  ;;  %v4807_v0 = vld [vmem:[#allocation4 + $0x13c8] sm:$0xff]  ;;  %v4809_v2 = vld [vmem:[#allocation4 + $0x13d8] sm:$0xff] }
 0x74a   : > { %5482 = vmatpush1.bf16.msra.mxu0 %v4734_v61  ;;  %5851 = vmatpush1.bf16.msra.mxu1 %v4736_v62  ;;  %v4134_v61 = vadd.f32 %v4085_v6, %v4024_v60  ;;  %v4148_v62 = vmax.f32 %v4131_v20, 0.0  ;;  %v4872_v60 = vld [vmem:[#allocation4 + $0x15d0] sm:$0xff]  ;;  %v4879_v6 = vld [vmem:[#allocation4 + $0x1608] sm:$0xff]  ;;  %v4881_v20 = vld [vmem:[#allocation4 + $0x1618] sm:$0xff] }
 0x74b   : > { %5483 = vmatprep.subr.bf16.mxu0 %v4743_v21  ;;  %5852 = vmatprep.subr.bf16.mxu1 %v4745_v4  ;;  %v4806_v21 = vld [vmem:[#allocation4 + $0x13c0] sm:$0xff]  ;;  %v4808_v4 = vld [vmem:[#allocation4 + $0x13d0] sm:$0xff] }
 0x74e   : > { %5484 = vmatpush1.bf16.msra.mxu0 %v4742_v22  ;;  %5853 = vmatpush1.bf16.msra.mxu1 %v4744_v23  ;;  %v4815_v22 = vld [vmem:[#allocation4 + $0x1408] sm:$0xff]  ;;  %v4817_v23 = vld [vmem:[#allocation4 + $0x1418] sm:$0xff] }
 0x74f   : > { %5485 = vmatprep.subr.bf16.mxu0 %v4751_v24  ;;  %5854 = vmatprep.subr.bf16.mxu1 %v4753_v26  ;;  %v4151_v24 = vmax.f32 %v4134_v61, 0.0  ;;  %v9265_v26 = vpack.c.bf16 %v4148_v62, %v4148_v62  ;;  %v4886_v61 = vld [vmem:[#allocation4 + $0x1640] sm:$0xff]  ;;  %v4888_v62 = vld [vmem:[#allocation4 + $0x1650] sm:$0xff] }
 0x752   : > { %5486 = vmatpush1.bf16.msra.mxu0 %v4750_v5  ;;  %5855 = vmatpush1.bf16.msra.mxu1 %v4752_v27  ;;  %v4814_v5 = vld [vmem:[#allocation4 + $0x1400] sm:$0xff]  ;;  %v4816_v27 = vld [vmem:[#allocation4 + $0x1410] sm:$0xff] }
 0x753   : > { %5487 = vmatprep.subr.bf16.mxu0 %v4759_v8  ;;  %5856 = vmatprep.subr.bf16.mxu1 %v4761_v10  ;;  %v4823_v8 = vld [vmem:[#allocation4 + $0x1448] sm:$0xff]  ;;  %v4825_v10 = vld [vmem:[#allocation4 + $0x1458] sm:$0xff] }
 0x756   : > { %5488 = vmatpush1.bf16.msra.mxu0 %v4758_v30  ;;  %5857 = vmatpush1.bf16.msra.mxu1 %v4760_v32  ;;  %v9267_v30 = vpack.c.bf16 %v4151_v24, %v4151_v24  ;;  %v4822_v32 = vld [vmem:[#allocation4 + $0x1440] sm:$0xff]  ;;  %v4903_v24 = vld [vmem:[#allocation4 + $0x16c8] sm:$0xff] }
 0x757   : > { %5489 = vmatprep.subr.bf16.mxu0 %v4767_v33  ;;  %5858 = vmatprep.subr.bf16.mxu1 %v4769_v36  ;;  %v4824_v33 = vld [vmem:[#allocation4 + $0x1450] sm:$0xff]  ;;  %v4831_v36 = vld [vmem:[#allocation4 + $0x1488] sm:$0xff] }
 0x75a   : > { %5490 = vmatpush1.bf16.msra.mxu0 %v4766_v39  ;;  %5859 = vmatpush1.bf16.msra.mxu1 %v4768_v42  ;;  %v4833_v39 = vld [vmem:[#allocation4 + $0x1498] sm:$0xff]  ;;  %v4830_v42 = vld [vmem:[#allocation4 + $0x1480] sm:$0xff] }
 0x75b   : > { %5491 = vmatprep.subr.bf16.mxu0 %v4775_v43  ;;  %5860 = vmatprep.subr.bf16.mxu1 %v4777_v46  ;;  %v4832_v43 = vld [vmem:[#allocation4 + $0x1490] sm:$0xff]  ;;  %v4839_v46 = vld [vmem:[#allocation4 + $0x14c8] sm:$0xff] }
 0x75e   : > { %5492 = vmatpush1.bf16.msra.mxu0 %v4774_v47  ;;  %5861 = vmatpush1.bf16.msra.mxu1 %v4776_v53  ;;  %v4841_v47 = vld [vmem:[#allocation4 + $0x14d8] sm:$0xff]  ;;  %v4838_v53 = vld [vmem:[#allocation4 + $0x14c0] sm:$0xff] }
 0x75f   : > { %5493 = vmatprep.subr.bf16.mxu0 %v4783_v58  ;;  %5862 = vmatprep.subr.bf16.mxu1 %v4785_v37  ;;  %v4840_v58 = vld [vmem:[#allocation4 + $0x14d0] sm:$0xff]  ;;  %v4847_v37 = vld [vmem:[#allocation4 + $0x1508] sm:$0xff] }
 0x762   : > { %5494 = vmatpush1.bf16.msra.mxu0 %v4782_v18  ;;  %5863 = vmatpush1.bf16.msra.mxu1 %v4784_v40  ;;  %v4848_v18 = vld [vmem:[#allocation4 + $0x1510] sm:$0xff]  ;;  %v4855_v40 = vld [vmem:[#allocation4 + $0x1548] sm:$0xff] }
 0x763   : > { %5495 = vmatprep.subr.bf16.mxu0 %v4791_v31  ;;  %5864 = vmatprep.subr.bf16.mxu1 %v4793_v63  ;;  %v4857_v31 = vld [vmem:[#allocation4 + $0x1558] sm:$0xff]  ;;  %v4854_v63 = vld [vmem:[#allocation4 + $0x1540] sm:$0xff] }
 0x766   : > { %5496 = vmatpush1.bf16.msra.mxu0 %v4790_v12  ;;  %5865 = vmatpush1.bf16.msra.mxu1 %v4792_v16  ;;  %v4864_v12 = vld [vmem:[#allocation4 + $0x1590] sm:$0xff]  ;;  %v4871_v16 = vld [vmem:[#allocation4 + $0x15c8] sm:$0xff] }
 0x767   : > { %5497 = vmatprep.subr.bf16.mxu0 %v4799_v54  ;;  %5866 = vmatprep.subr.bf16.mxu1 %v4801_v14  ;;  %v4873_v54 = vld [vmem:[#allocation4 + $0x15d8] sm:$0xff]  ;;  %v4870_v14 = vld [vmem:[#allocation4 + $0x15c0] sm:$0xff] }
 0x76a   : > { %5498 = vmatpush1.bf16.msra.mxu0 %v4798_v56  ;;  %5867 = vmatpush1.bf16.msra.mxu1 %v4800_v3  ;;  %v4878_v56 = vld [vmem:[#allocation4 + $0x1600] sm:$0xff]  ;;  %v4880_v3 = vld [vmem:[#allocation4 + $0x1610] sm:$0xff] }
 0x76b   : > { %5499 = vmatprep.subr.bf16.mxu0 %v4807_v0  ;;  %5868 = vmatprep.subr.bf16.mxu1 %v4809_v2  ;;  %v4887_v0 = vld [vmem:[#allocation4 + $0x1648] sm:$0xff]  ;;  %v4889_v2 = vld [vmem:[#allocation4 + $0x1658] sm:$0xff] }
 0x76e   : > { %5500 = vmatpush1.bf16.msra.mxu0 %v4806_v21  ;;  %5869 = vmatpush1.bf16.msra.mxu1 %v4808_v4  ;;  %v4895_v21 = vld [vmem:[#allocation4 + $0x1688] sm:$0xff]  ;;  %v4897_v4 = vld [vmem:[#allocation4 + $0x1698] sm:$0xff] }
 0x76f   : > { %5510 = vmatprep.subr.bf16.mxu0 %v4815_v22  ;;  %5879 = vmatprep.subr.bf16.mxu1 %v4817_v23  ;;  %v4894_v22 = vld [vmem:[#allocation4 + $0x1680] sm:$0xff]  ;;  %v4896_v23 = vld [vmem:[#allocation4 + $0x1690] sm:$0xff] }
 0x771   : > { %5502 = vmatmul.mubr.bf16.vlgmr.msra.gmra.mrb[0].mxu0 %v9265_v26  ;;  %5871 = vmatmul.mubr.bf16.vlgmr.msra.gmra.mrb[0].mxu1 %v9265_v26 }
 0x772   : > { %5511 = vmatpush1.bf16.msra.mxu0 %v4814_v5  ;;  %5880 = vmatpush1.bf16.msra.mxu1 %v4816_v27  ;;  %v4905_v5 = vld [vmem:[#allocation4 + $0x16d8] sm:$0xff]  ;;  %v4902_v27 = vld [vmem:[#allocation4 + $0x16c0] sm:$0xff] }
 0x773   : > { %5512 = vmatprep.subr.bf16.mxu0 %v4823_v8  ;;  %5881 = vmatprep.subr.bf16.mxu1 %v4825_v10  ;;  %v4904_v8 = vld [vmem:[#allocation4 + $0x16d0] sm:$0xff]  ;;  %v4911_v10 = vld [vmem:[#allocation4 + $0x1708] sm:$0xff] }
 0x774   : > { %5542 = vmatprep.mubr.bf16.mxu0 %v9267_v30  ;;  %5911 = vmatprep.mubr.bf16.mxu1 %v9267_v30 }
 0x776   : > { %5513 = vmatpush1.bf16.msra.mxu0 %v4822_v32  ;;  %5882 = vmatpush1.bf16.msra.mxu1 %v4824_v33  ;;  %v4913_v32 = vld [vmem:[#allocation4 + $0x1718] sm:$0xff]  ;;  %v3971_v33 = vrot.slane %v9240_v19, %v9192_v41 }
 0x777   : > { %5514 = vmatprep.subr.bf16.mxu0 %v4831_v36  ;;  %5883 = vmatprep.subr.bf16.mxu1 %v4833_v39  ;;  %v3915_v36 = vld [vmem:[#allocation3 + $0x50] sm:$0xff]  ;;  %v4910_v39 = vld [vmem:[#allocation4 + $0x1700] sm:$0xff] }
 0x77a   : > { %5515 = vmatpush1.bf16.msra.mxu0 %v4830_v42  ;;  %5884 = vmatpush1.bf16.msra.mxu1 %v4832_v43  ;;  %v4912_v42 = vld [vmem:[#allocation4 + $0x1710] sm:$0xff]  ;;  %v4919_v43 = vld [vmem:[#allocation4 + $0x1748] sm:$0xff] }
 0x77b   : > { %5516 = vmatprep.subr.bf16.mxu0 %v4839_v46  ;;  %5885 = vmatprep.subr.bf16.mxu1 %v4841_v47  ;;  %v4921_v46 = vld [vmem:[#allocation4 + $0x1758] sm:$0xff]  ;;  %v3983_v47 = vrot.slane %v9240_v19, %v9195_v7 }
 0x77e   : > { %5517 = vmatpush1.bf16.msra.mxu0 %v4838_v53  ;;  %5886 = vmatpush1.bf16.msra.mxu1 %v4840_v58  ;;  %v4023_v53 = vmul.f32 %v3971_v33, %v3915_v36  ;;  %v4081_v58 = vrot.slane %v9245_v57, %v9192_v41  ;;  %v4968_v33 = vld [vmem:[#allocation4 + $0x18d0] sm:$0xff]  ;;  %v4975_v36 = vld [vmem:[#allocation4 + $0x1908] sm:$0xff] }
 0x77f   : > { %5518 = vmatprep.subr.bf16.mxu0 %v4847_v37  ;;  %5887 = vmatprep.subr.bf16.mxu1 %v4849_v59  ;;  %v3918_v37 = vld [vmem:[#allocation3 + $0x68] sm:$0xff] }
 0x780   : > { %v4918_v59 = vld [vmem:[#allocation4 + $0x1740] sm:$0xff] }
 0x782   : > { %5519 = vmatpush1.bf16.msra.mxu0 %v4846_v52  ;;  %5888 = vmatpush1.bf16.msra.mxu1 %v4848_v18  ;;  %v4920_v52 = vld [vmem:[#allocation4 + $0x1750] sm:$0xff]  ;;  %v4927_v18 = vld [vmem:[#allocation4 + $0x1788] sm:$0xff] }
 0x783   : > { %5520 = vmatprep.subr.bf16.mxu0 %v4855_v40  ;;  %5889 = vmatprep.subr.bf16.mxu1 %v4857_v31  ;;  %v4929_v40 = vld [vmem:[#allocation4 + $0x1798] sm:$0xff]  ;;  %v4026_v31 = vmul.f32 %v3983_v47, %v3918_v37  ;;  %v4991_v37 = vld [vmem:[#allocation4 + $0x1988] sm:$0xff] }
 0x784   : > { %v4985_v47 = vld [vmem:[#allocation4 + $0x1958] sm:$0xff] }
 0x786   : > { %5521 = vmatpush1.bf16.msra.mxu0 %v4854_v63  ;;  %5890 = vmatpush1.bf16.msra.mxu1 %v4856_v44  ;;  %v4093_v63 = vrot.slane %v9245_v57, %v9195_v7  ;;  %v4133_v44 = vadd.f32 %v4081_v58, %v4023_v53  ;;  %v4982_v53 = vld [vmem:[#allocation4 + $0x1940] sm:$0xff]  ;;  %v4984_v58 = vld [vmem:[#allocation4 + $0x1950] sm:$0xff] }
 0x787   : > { %5522 = vmatprep.subr.bf16.mxu0 %v4863_v34  ;;  %5891 = vmatprep.subr.bf16.mxu1 %v4865_v45  ;;  %v4926_v34 = vld [vmem:[#allocation4 + $0x1780] sm:$0xff]  ;;  %v4928_v45 = vld [vmem:[#allocation4 + $0x1790] sm:$0xff] }
 0x78a   : > { %5523 = vmatpush1.bf16.msra.mxu0 %v4862_v49  ;;  %5892 = vmatpush1.bf16.msra.mxu1 %v4864_v12  ;;  %v4935_v49 = vld [vmem:[#allocation4 + $0x17c8] sm:$0xff]  ;;  %v4937_v12 = vld [vmem:[#allocation4 + $0x17d8] sm:$0xff] }
 0x78b   : > { %5524 = vmatprep.subr.bf16.mxu0 %v4871_v16  ;;  %5893 = vmatprep.subr.bf16.mxu1 %v4873_v54  ;;  %v4136_v16 = vadd.f32 %v4093_v63, %v4026_v31  ;;  %v4150_v54 = vmax.f32 %v4133_v44, 0.0  ;;  %v5001_v31 = vld [vmem:[#allocation4 + $0x19d8] sm:$0xff]  ;;  %v4998_v63 = vld [vmem:[#allocation4 + $0x19c0] sm:$0xff]  ;;  %v5000_v44 = vld [vmem:[#allocation4 + $0x19d0] sm:$0xff] }
 0x78e   : > { %5525 = vmatpush1.bf16.msra.mxu0 %v4870_v14  ;;  %5894 = vmatpush1.bf16.msra.mxu1 %v4872_v60  ;;  %v4934_v14 = vld [vmem:[#allocation4 + $0x17c0] sm:$0xff]  ;;  %v4936_v60 = vld [vmem:[#allocation4 + $0x17d0] sm:$0xff] }
 0x78f   : > { %5526 = vmatprep.subr.bf16.mxu0 %v4879_v6  ;;  %5895 = vmatprep.subr.bf16.mxu1 %v4881_v20  ;;  %v4943_v6 = vld [vmem:[#allocation4 + $0x1808] sm:$0xff]  ;;  %v4945_v20 = vld [vmem:[#allocation4 + $0x1818] sm:$0xff] }
 0x792   : > { %5527 = vmatpush1.bf16.msra.mxu0 %v4878_v56  ;;  %5896 = vmatpush1.bf16.msra.mxu1 %v4880_v3  ;;  %v4153_v56 = vmax.f32 %v4136_v16, 0.0  ;;  %v9281_v3 = vpack.c.bf16 %v4150_v54, %v4150_v54  ;;  %v5015_v16 = vld [vmem:[#allocation4 + $0x1a48] sm:$0xff]  ;;  %v5017_v54 = vld [vmem:[#allocation4 + $0x1a58] sm:$0xff] }
 0x793   : > { %5528 = vmatprep.subr.bf16.mxu0 %v4887_v0  ;;  %5897 = vmatprep.subr.bf16.mxu1 %v4889_v2  ;;  %v4942_v0 = vld [vmem:[#allocation4 + $0x1800] sm:$0xff]  ;;  %v4944_v2 = vld [vmem:[#allocation4 + $0x1810] sm:$0xff] }
 0x796   : > { %5529 = vmatpush1.bf16.msra.mxu0 %v4886_v61  ;;  %5898 = vmatpush1.bf16.msra.mxu1 %v4888_v62  ;;  %v4951_v61 = vld [vmem:[#allocation4 + $0x1848] sm:$0xff]  ;;  %v4953_v62 = vld [vmem:[#allocation4 + $0x1858] sm:$0xff] }
 0x797   : > { %5530 = vmatprep.subr.bf16.mxu0 %v4895_v21  ;;  %5899 = vmatprep.subr.bf16.mxu1 %v4897_v4  ;;  %v9283_v21 = vpack.c.bf16 %v4153_v56, %v4153_v56  ;;  %v4950_v4 = vld [vmem:[#allocation4 + $0x1840] sm:$0xff] }
 0x798   : > { %v5022_v56 = vld [vmem:[#allocation4 + $0x1a80] sm:$0xff] }
 0x79a   : > { %5531 = vmatpush1.bf16.msra.mxu0 %v4894_v22  ;;  %5900 = vmatpush1.bf16.msra.mxu1 %v4896_v23  ;;  %v4952_v22 = vld [vmem:[#allocation4 + $0x1850] sm:$0xff]  ;;  %v4959_v23 = vld [vmem:[#allocation4 + $0x1888] sm:$0xff] }
 0x79b   : > { %5532 = vmatprep.subr.bf16.mxu0 %v4903_v24  ;;  %5901 = vmatprep.subr.bf16.mxu1 %v4905_v5  ;;  %v4961_v24 = vld [vmem:[#allocation4 + $0x1898] sm:$0xff]  ;;  %v4958_v5 = vld [vmem:[#allocation4 + $0x1880] sm:$0xff] }
 0x79e   : > { %5533 = vmatpush1.bf16.msra.mxu0 %v4902_v27  ;;  %5902 = vmatpush1.bf16.msra.mxu1 %v4904_v8  ;;  %v4960_v27 = vld [vmem:[#allocation4 + $0x1890] sm:$0xff]  ;;  %v4967_v8 = vld [vmem:[#allocation4 + $0x18c8] sm:$0xff] }
 0x79f   : > { %5534 = vmatprep.subr.bf16.mxu0 %v4911_v10  ;;  %5903 = vmatprep.subr.bf16.mxu1 %v4913_v32  ;;  %v4969_v10 = vld [vmem:[#allocation4 + $0x18d8] sm:$0xff]  ;;  %v4966_v32 = vld [vmem:[#allocation4 + $0x18c0] sm:$0xff] }
 0x7a2   : > { %5535 = vmatpush1.bf16.msra.mxu0 %v4910_v39  ;;  %5904 = vmatpush1.bf16.msra.mxu1 %v4912_v42  ;;  %v4977_v39 = vld [vmem:[#allocation4 + $0x1918] sm:$0xff]  ;;  %v4974_v42 = vld [vmem:[#allocation4 + $0x1900] sm:$0xff] }
 0x7a3   : > { %5536 = vmatprep.subr.bf16.mxu0 %v4919_v43  ;;  %5905 = vmatprep.subr.bf16.mxu1 %v4921_v46  ;;  %v4976_v43 = vld [vmem:[#allocation4 + $0x1910] sm:$0xff]  ;;  %v4983_v46 = vld [vmem:[#allocation4 + $0x1948] sm:$0xff] }
 0x7a6   : > { %5537 = vmatpush1.bf16.msra.mxu0 %v4918_v59  ;;  %5906 = vmatpush1.bf16.msra.mxu1 %v4920_v52  ;;  %v4993_v59 = vld [vmem:[#allocation4 + $0x1998] sm:$0xff]  ;;  %v4990_v52 = vld [vmem:[#allocation4 + $0x1980] sm:$0xff] }
 0x7a7   : > { %5538 = vmatprep.subr.bf16.mxu0 %v4927_v18  ;;  %5907 = vmatprep.subr.bf16.mxu1 %v4929_v40  ;;  %v4992_v18 = vld [vmem:[#allocation4 + $0x1990] sm:$0xff]  ;;  %v4999_v40 = vld [vmem:[#allocation4 + $0x19c8] sm:$0xff] }
 0x7aa   : > { %5539 = vmatpush1.bf16.msra.mxu0 %v4926_v34  ;;  %5908 = vmatpush1.bf16.msra.mxu1 %v4928_v45  ;;  %v5007_v34 = vld [vmem:[#allocation4 + $0x1a08] sm:$0xff]  ;;  %v5009_v45 = vld [vmem:[#allocation4 + $0x1a18] sm:$0xff] }
 0x7ab   : > { %5540 = vmatprep.subr.bf16.mxu0 %v4935_v49  ;;  %5909 = vmatprep.subr.bf16.mxu1 %v4937_v12  ;;  %v5006_v49 = vld [vmem:[#allocation4 + $0x1a00] sm:$0xff]  ;;  %v5008_v12 = vld [vmem:[#allocation4 + $0x1a10] sm:$0xff] }
 0x7ae   : > { %5541 = vmatpush1.bf16.msra.mxu0 %v4934_v14  ;;  %5910 = vmatpush1.bf16.msra.mxu1 %v4936_v60  ;;  %v5014_v14 = vld [vmem:[#allocation4 + $0x1a40] sm:$0xff]  ;;  %v5016_v60 = vld [vmem:[#allocation4 + $0x1a50] sm:$0xff] }
 0x7af   : > { %5551 = vmatprep.subr.bf16.mxu0 %v4943_v6  ;;  %5920 = vmatprep.subr.bf16.mxu1 %v4945_v20  ;;  %v5023_v6 = vld [vmem:[#allocation4 + $0x1a88] sm:$0xff]  ;;  %v5025_v20 = vld [vmem:[#allocation4 + $0x1a98] sm:$0xff] }
 0x7b1   : > { %5543 = vmatmul.mubr.bf16.vlgmr.msra.gmra.mrb[0].mxu0 %v9281_v3  ;;  %5912 = vmatmul.mubr.bf16.vlgmr.msra.gmra.mrb[0].mxu1 %v9281_v3 }
 0x7b2   : > { %5552 = vmatpush1.bf16.msra.mxu0 %v4942_v0  ;;  %5921 = vmatpush1.bf16.msra.mxu1 %v4944_v2  ;;  %v5024_v0 = vld [vmem:[#allocation4 + $0x1a90] sm:$0xff]  ;;  %v5031_v2 = vld [vmem:[#allocation4 + $0x1ac8] sm:$0xff] }
 0x7b3   : > { %5553 = vmatprep.subr.bf16.mxu0 %v4951_v61  ;;  %5922 = vmatprep.subr.bf16.mxu1 %v4953_v62  ;;  %v5033_v61 = vld [vmem:[#allocation4 + $0x1ad8] sm:$0xff]  ;;  %v5030_v62 = vld [vmem:[#allocation4 + $0x1ac0] sm:$0xff] }
 0x7b4   : > { %5583 = vmatprep.mubr.bf16.mxu0 %v9283_v21  ;;  %5952 = vmatprep.mubr.bf16.mxu1 %v9283_v21 }
 0x7b6   : > { %5554 = vmatpush1.bf16.msra.mxu0 %v4950_v4  ;;  %5923 = vmatpush1.bf16.msra.mxu1 %v4952_v22  ;;  %v5032_v4 = vld [vmem:[#allocation4 + $0x1ad0] sm:$0xff]  ;;  %v5039_v22 = vld [vmem:[#allocation4 + $0x1b08] sm:$0xff] }
 0x7b7   : > { %5555 = vmatprep.subr.bf16.mxu0 %v4959_v23  ;;  %5924 = vmatprep.subr.bf16.mxu1 %v4961_v24  ;;  %v5041_v23 = vld [vmem:[#allocation4 + $0x1b18] sm:$0xff]  ;;  %v3979_v24 = vrot.slane %v9240_v19, %v9214_v25 }
 0x7ba   : > { %5556 = vmatpush1.bf16.msra.mxu0 %v4958_v5  ;;  %5925 = vmatpush1.bf16.msra.mxu1 %v4960_v27  ;;  %v3917_v5 = vld [vmem:[#allocation3 + $0x60] sm:$0xff]  ;;  %v5038_v27 = vld [vmem:[#allocation4 + $0x1b00] sm:$0xff] }
 0x7bb   : > { %5557 = vmatprep.subr.bf16.mxu0 %v4967_v8  ;;  %5926 = vmatprep.subr.bf16.mxu1 %v4969_v10  ;;  %v5040_v8 = vld [vmem:[#allocation4 + $0x1b10] sm:$0xff]  ;;  %v5047_v10 = vld [vmem:[#allocation4 + $0x1b48] sm:$0xff] }
 0x7be   : > { %5558 = vmatpush1.bf16.msra.mxu0 %v4966_v32  ;;  %5927 = vmatpush1.bf16.msra.mxu1 %v4968_v33  ;;  %v5049_v32 = vld [vmem:[#allocation4 + $0x1b58] sm:$0xff]  ;;  %v3991_v33 = vrot.slane %v9240_v19, %v9217_v9  ;;  %v5054_v19 = vld [vmem:[#allocation4 + $0x1b80] sm:$0xff] }
 0x7bf   : > { %5559 = vmatprep.subr.bf16.mxu0 %v4975_v36  ;;  %5928 = vmatprep.subr.bf16.mxu1 %v4977_v39  ;;  %v4025_v36 = vmul.f32 %v3979_v24, %v3917_v5  ;;  %v4089_v39 = vrot.slane %v9245_v57, %v9214_v25  ;;  %v5096_v24 = vld [vmem:[#allocation4 + $0x1cd0] sm:$0xff]  ;;  %v5103_v5 = vld [vmem:[#allocation4 + $0x1d08] sm:$0xff] }
 0x7c2   : > { %5560 = vmatpush1.bf16.msra.mxu0 %v4974_v42  ;;  %5929 = vmatpush1.bf16.msra.mxu1 %v4976_v43  ;;  %v3920_v42 = vld [vmem:[#allocation3 + $0x78] sm:$0xff]  ;;  %v5046_v43 = vld [vmem:[#allocation4 + $0x1b40] sm:$0xff] }
 0x7c3   : > { %5561 = vmatprep.subr.bf16.mxu0 %v4983_v46  ;;  %5930 = vmatprep.subr.bf16.mxu1 %v4985_v47  ;;  %v5048_v46 = vld [vmem:[#allocation4 + $0x1b50] sm:$0xff]  ;;  %v5055_v47 = vld [vmem:[#allocation4 + $0x1b88] sm:$0xff] }
 0x7c6   : > { %5562 = vmatpush1.bf16.msra.mxu0 %v4982_v53  ;;  %5931 = vmatpush1.bf16.msra.mxu1 %v4984_v58  ;;  %v5057_v53 = vld [vmem:[#allocation4 + $0x1b98] sm:$0xff]  ;;  %v4028_v58 = vmul.f32 %v3991_v33, %v3920_v42  ;;  %v5119_v42 = vld [vmem:[#allocation4 + $0x1d88] sm:$0xff] }
 0x7c7   : > { %5563 = vmatprep.subr.bf16.mxu0 %v4991_v37  ;;  %5932 = vmatprep.subr.bf16.mxu1 %v4993_v59  ;;  %v4101_v37 = vrot.slane %v9245_v57, %v9217_v9  ;;  %v4135_v59 = vadd.f32 %v4089_v39, %v4025_v36  ;;  %v5113_v33 = vld [vmem:[#allocation4 + $0x1d58] sm:$0xff]  ;;  %v5110_v36 = vld [vmem:[#allocation4 + $0x1d40] sm:$0xff]  ;;  %v5112_v39 = vld [vmem:[#allocation4 + $0x1d50] sm:$0xff] }
 0x7ca   : > { %5564 = vmatpush1.bf16.msra.mxu0 %v4990_v52  ;;  %5933 = vmatpush1.bf16.msra.mxu1 %v4992_v18  ;;  %v5056_v52 = vld [vmem:[#allocation4 + $0x1b90] sm:$0xff]  ;;  %v5063_v18 = vld [vmem:[#allocation4 + $0x1bc8] sm:$0xff] }
 0x7cb   : > { %5565 = vmatprep.subr.bf16.mxu0 %v4999_v40  ;;  %5934 = vmatprep.subr.bf16.mxu1 %v5001_v31  ;;  %v5065_v40 = vld [vmem:[#allocation4 + $0x1bd8] sm:$0xff]  ;;  %v4138_v31 = vadd.f32 %v4101_v37, %v4028_v58  ;;  %v5126_v37 = vld [vmem:[#allocation4 + $0x1dc0] sm:$0xff] }
 0x7cc   : > { %v5129_v58 = vld [vmem:[#allocation4 + $0x1dd8] sm:$0xff] }
 0x7cd   : > { %v4155_v57 = vmax.f32 %v4138_v31, 0.0  ;;  %v5143_v31 = vld [vmem:[#allocation4 + $0x1e48] sm:$0xff] }
 0x7ce   : > { %5566 = vmatpush1.bf16.msra.mxu0 %v4998_v63  ;;  %5935 = vmatpush1.bf16.msra.mxu1 %v5000_v44  ;;  %v4152_v63 = vmax.f32 %v4135_v59, 0.0  ;;  %v5062_v44 = vld [vmem:[#allocation4 + $0x1bc0] sm:$0xff]  ;;  %v5128_v59 = vld [vmem:[#allocation4 + $0x1dd0] sm:$0xff] }
 0x7cf   : > { %5567 = vmatprep.subr.bf16.mxu0 %v5007_v34  ;;  %5936 = vmatprep.subr.bf16.mxu1 %v5009_v45  ;;  %v5064_v34 = vld [vmem:[#allocation4 + $0x1bd0] sm:$0xff]  ;;  %v5071_v45 = vld [vmem:[#allocation4 + $0x1c08] sm:$0xff] }
 0x7d2   : > { %5568 = vmatpush1.bf16.msra.mxu0 %v5006_v49  ;;  %5937 = vmatpush1.bf16.msra.mxu1 %v5008_v12  ;;  %v5073_v49 = vld [vmem:[#allocation4 + $0x1c18] sm:$0xff]  ;;  %v9297_v12 = vpack.c.bf16 %v4152_v63, %v4152_v63 }
 0x7d3   : > { %5569 = vmatprep.subr.bf16.mxu0 %v5015_v16  ;;  %5938 = vmatprep.subr.bf16.mxu1 %v5017_v54  ;;  %v5070_v16 = vld [vmem:[#allocation4 + $0x1c00] sm:$0xff]  ;;  %v5072_v54 = vld [vmem:[#allocation4 + $0x1c10] sm:$0xff]  ;;  %v5145_v63 = vld [vmem:[#allocation4 + $0x1e58] sm:$0xff] }
 0x7d6   : > { %5570 = vmatpush1.bf16.msra.mxu0 %v5014_v14  ;;  %5939 = vmatpush1.bf16.msra.mxu1 %v5016_v60  ;;  %v5079_v14 = vld [vmem:[#allocation4 + $0x1c48] sm:$0xff]  ;;  %v5081_v60 = vld [vmem:[#allocation4 + $0x1c58] sm:$0xff] }
 0x7d7   : > { %5571 = vmatprep.subr.bf16.mxu0 %v5023_v6  ;;  %5940 = vmatprep.subr.bf16.mxu1 %v5025_v20  ;;  %v9299_v6 = vpack.c.bf16 %v4155_v57, %v4155_v57  ;;  %v5078_v20 = vld [vmem:[#allocation4 + $0x1c40] sm:$0xff] }
 0x7d8   : > { %v5150_v57 = vld [vmem:[#allocation4 + $0x1e80] sm:$0xff] }
 0x7da   : > { %5572 = vmatpush1.bf16.msra.mxu0 %v5022_v56  ;;  %5941 = vmatpush1.bf16.msra.mxu1 %v5024_v0  ;;  %v5080_v56 = vld [vmem:[#allocation4 + $0x1c50] sm:$0xff]  ;;  %v5087_v0 = vld [vmem:[#allocation4 + $0x1c88] sm:$0xff] }
 0x7db   : > { %5573 = vmatprep.subr.bf16.mxu0 %v5031_v2  ;;  %5942 = vmatprep.subr.bf16.mxu1 %v5033_v61  ;;  %v5089_v2 = vld [vmem:[#allocation4 + $0x1c98] sm:$0xff]  ;;  %v5086_v61 = vld [vmem:[#allocation4 + $0x1c80] sm:$0xff] }
 0x7de   : > { %5574 = vmatpush1.bf16.msra.mxu0 %v5030_v62  ;;  %5943 = vmatpush1.bf16.msra.mxu1 %v5032_v4  ;;  %v5088_v62 = vld [vmem:[#allocation4 + $0x1c90] sm:$0xff]  ;;  %v5095_v4 = vld [vmem:[#allocation4 + $0x1cc8] sm:$0xff] }
 0x7df   : > { %5575 = vmatprep.subr.bf16.mxu0 %v5039_v22  ;;  %5944 = vmatprep.subr.bf16.mxu1 %v5041_v23  ;;  %v5097_v22 = vld [vmem:[#allocation4 + $0x1cd8] sm:$0xff]  ;;  %v5094_v23 = vld [vmem:[#allocation4 + $0x1cc0] sm:$0xff] }
 0x7e2   : > { %5576 = vmatpush1.bf16.msra.mxu0 %v5038_v27  ;;  %5945 = vmatpush1.bf16.msra.mxu1 %v5040_v8  ;;  %v5105_v27 = vld [vmem:[#allocation4 + $0x1d18] sm:$0xff]  ;;  %v5102_v8 = vld [vmem:[#allocation4 + $0x1d00] sm:$0xff] }
 0x7e3   : > { %5577 = vmatprep.subr.bf16.mxu0 %v5047_v10  ;;  %5946 = vmatprep.subr.bf16.mxu1 %v5049_v32  ;;  %v5104_v10 = vld [vmem:[#allocation4 + $0x1d10] sm:$0xff]  ;;  %v5111_v32 = vld [vmem:[#allocation4 + $0x1d48] sm:$0xff] }
 0x7e6   : > { %5578 = vmatpush1.bf16.msra.mxu0 %v5046_v43  ;;  %5947 = vmatpush1.bf16.msra.mxu1 %v5048_v46  ;;  %v5121_v43 = vld [vmem:[#allocation4 + $0x1d98] sm:$0xff]  ;;  %v5118_v46 = vld [vmem:[#allocation4 + $0x1d80] sm:$0xff] }
 0x7e7   : > { %5579 = vmatprep.subr.bf16.mxu0 %v5055_v47  ;;  %5948 = vmatprep.subr.bf16.mxu1 %v5057_v53  ;;  %v5120_v47 = vld [vmem:[#allocation4 + $0x1d90] sm:$0xff]  ;;  %v5127_v53 = vld [vmem:[#allocation4 + $0x1dc8] sm:$0xff] }
 0x7ea   : > { %5580 = vmatpush1.bf16.msra.mxu0 %v5054_v19  ;;  %5949 = vmatpush1.bf16.msra.mxu1 %v5056_v52  ;;  %v5135_v19 = vld [vmem:[#allocation4 + $0x1e08] sm:$0xff]  ;;  %v5137_v52 = vld [vmem:[#allocation4 + $0x1e18] sm:$0xff] }
 0x7eb   : > { %5581 = vmatprep.subr.bf16.mxu0 %v5063_v18  ;;  %5950 = vmatprep.subr.bf16.mxu1 %v5065_v40  ;;  %v5134_v18 = vld [vmem:[#allocation4 + $0x1e00] sm:$0xff]  ;;  %v5136_v40 = vld [vmem:[#allocation4 + $0x1e10] sm:$0xff] }
 0x7ee   : > { %5582 = vmatpush1.bf16.msra.mxu0 %v5062_v44  ;;  %5951 = vmatpush1.bf16.msra.mxu1 %v5064_v34  ;;  %v5142_v44 = vld [vmem:[#allocation4 + $0x1e40] sm:$0xff]  ;;  %v5144_v34 = vld [vmem:[#allocation4 + $0x1e50] sm:$0xff] }
 0x7ef   : > { %5592 = vmatprep.subr.bf16.mxu0 %v5071_v45  ;;  %5961 = vmatprep.subr.bf16.mxu1 %v5073_v49  ;;  %v5151_v45 = vld [vmem:[#allocation4 + $0x1e88] sm:$0xff]  ;;  %v5153_v49 = vld [vmem:[#allocation4 + $0x1e98] sm:$0xff] }
 0x7f1   : > { %5584 = vmatmul.mubr.bf16.vlgmr.msra.gmra.mrb[0].mxu0 %v9297_v12  ;;  %5953 = vmatmul.mubr.bf16.vlgmr.msra.gmra.mrb[0].mxu1 %v9297_v12 }
 0x7f2   : > { %5593 = vmatpush1.bf16.msra.mxu0 %v5070_v16  ;;  %5962 = vmatpush1.bf16.msra.mxu1 %v5072_v54  ;;  %v5152_v16 = vld [vmem:[#allocation4 + $0x1e90] sm:$0xff]  ;;  %v5159_v54 = vld [vmem:[#allocation4 + $0x1ec8] sm:$0xff] }
 0x7f3   : > { %5594 = vmatprep.subr.bf16.mxu0 %v5079_v14  ;;  %5963 = vmatprep.subr.bf16.mxu1 %v5081_v60  ;;  %v5161_v14 = vld [vmem:[#allocation4 + $0x1ed8] sm:$0xff]  ;;  %v5158_v60 = vld [vmem:[#allocation4 + $0x1ec0] sm:$0xff] }
 0x7f4   : > { %5624 = vmatprep.mubr.bf16.mxu0 %v9299_v6  ;;  %5993 = vmatprep.mubr.bf16.mxu1 %v9299_v6 }
 0x7f6   : > { %5595 = vmatpush1.bf16.msra.mxu0 %v5078_v20  ;;  %5964 = vmatpush1.bf16.msra.mxu1 %v5080_v56  ;;  %v5160_v20 = vld [vmem:[#allocation4 + $0x1ed0] sm:$0xff]  ;;  %v5167_v56 = vld [vmem:[#allocation4 + $0x1f08] sm:$0xff] }
 0x7f7   : > { %5596 = vmatprep.subr.bf16.mxu0 %v5087_v0  ;;  %5965 = vmatprep.subr.bf16.mxu1 %v5089_v2  ;;  %v5169_v0 = vld [vmem:[#allocation4 + $0x1f18] sm:$0xff]  ;;  %v7684_v2 = vld [vmem:[#allocation16 + $0x8] sm:$0xff] }
 0x7fa   : > { %5597 = vmatpush1.bf16.msra.mxu0 %v5086_v61  ;;  %5966 = vmatpush1.bf16.msra.mxu1 %v5088_v62  ;;  %v3987_v61 = vrot.slane %v7684_v2, %v9236_v48  ;;  %v3919_v62 = vld [vmem:[#allocation3 + $0x70] sm:$0xff]  ;;  %v5233_v2 = vld [vmem:[#allocation4 + $0x2118] sm:$0xff] }
 0x7fb   : > { %5598 = vmatprep.subr.bf16.mxu0 %v5095_v4  ;;  %5967 = vmatprep.subr.bf16.mxu1 %v5097_v22  ;;  %v5166_v4 = vld [vmem:[#allocation4 + $0x1f00] sm:$0xff]  ;;  %v5168_v22 = vld [vmem:[#allocation4 + $0x1f10] sm:$0xff] }
 0x7fe   : > { %5599 = vmatpush1.bf16.msra.mxu0 %v5094_v23  ;;  %5968 = vmatpush1.bf16.msra.mxu1 %v5096_v24  ;;  %v5175_v23 = vld [vmem:[#allocation4 + $0x1f48] sm:$0xff]  ;;  %v5177_v24 = vld [vmem:[#allocation4 + $0x1f58] sm:$0xff] }
 0x7ff   : > { %5600 = vmatprep.subr.bf16.mxu0 %v5103_v5  ;;  %5969 = vmatprep.subr.bf16.mxu1 %v5105_v27  ;;  %v4027_v5 = vmul.f32 %v3987_v61, %v3919_v62  ;;  %v7685_v27 = vld [vmem:[#allocation17 + $0x20] ss:$4 sm:$0xff]  ;;  %v7229_v62 = vld [vmem:[#allocation16 + $0x10] ss:$0 sm:$0xff] }
 0x800   : > { %v3921_v61 = vld [vmem:[#allocation3 + $0x80] sm:$0xff] }
 0x802   : > { %5601 = vmatpush1.bf16.msra.mxu0 %v5102_v8  ;;  %5970 = vmatpush1.bf16.msra.mxu1 %v5104_v10  ;;  %v4097_v8 = vrot.slane %v7685_v27, %v9236_v48  ;;  %v5174_v10 = vld [vmem:[#allocation4 + $0x1f40] sm:$0xff]  ;;  %v4029_v27 = vmul.f32 %v7229_v62, %v3921_v61  ;;  %v4213_v61 = vld [vmem:[#allocation4 + $0x138] sm:$0xff]  ;;  %v4212_v62 = vld [vmem:[#allocation4 + $0x130] sm:$0xff] }
 0x803   : > { %5602 = vmatprep.subr.bf16.mxu0 %v5111_v32  ;;  %5971 = vmatprep.subr.bf16.mxu1 %v5113_v33  ;;  %v5176_v32 = vld [vmem:[#allocation4 + $0x1f50] sm:$0xff]  ;;  %v5183_v33 = vld [vmem:[#allocation4 + $0x1f88] sm:$0xff] }
 0x806   : > { %5603 = vmatpush1.bf16.msra.mxu0 %v5110_v36  ;;  %5972 = vmatpush1.bf16.msra.mxu1 %v5112_v39  ;;  %v5185_v36 = vld [vmem:[#allocation4 + $0x1f98] sm:$0xff]  ;;  %v4137_v39 = vadd.f32 %v4097_v8, %v4027_v5 }
 0x807   : > { %5604 = vmatprep.subr.bf16.mxu0 %v5119_v42  ;;  %5973 = vmatprep.subr.bf16.mxu1 %v5121_v43  ;;  %v5182_v42 = vld [vmem:[#allocation4 + $0x1f80] sm:$0xff]  ;;  %v5184_v43 = vld [vmem:[#allocation4 + $0x1f90] sm:$0xff]  ;;  %v5241_v5 = vld [vmem:[#allocation4 + $0x2158] sm:$0xff] }
 0x80a   : > { %5605 = vmatpush1.bf16.msra.mxu0 %v5118_v46  ;;  %5974 = vmatpush1.bf16.msra.mxu1 %v5120_v47  ;;  %v5191_v46 = vld [vmem:[#allocation4 + $0x1fc8] sm:$0xff]  ;;  %v5193_v47 = vld [vmem:[#allocation4 + $0x1fd8] sm:$0xff] }
 0x80b   : > { %5606 = vmatprep.subr.bf16.mxu0 %v5127_v53  ;;  %5975 = vmatprep.subr.bf16.mxu1 %v5129_v58  ;;  %v4154_v53 = vmax.f32 %v4137_v39, 0.0  ;;  %v5190_v58 = vld [vmem:[#allocation4 + $0x1fc0] sm:$0xff] }
 0x80e   : > { %5607 = vmatpush1.bf16.msra.mxu0 %v5126_v37  ;;  %5976 = vmatpush1.bf16.msra.mxu1 %v5128_v59  ;;  %v5192_v37 = vld [vmem:[#allocation4 + $0x1fd0] sm:$0xff]  ;;  %v5199_v59 = vld [vmem:[#allocation4 + $0x2008] sm:$0xff] }
 0x80f   : > { %5608 = vmatprep.subr.bf16.mxu0 %v5135_v19  ;;  %5977 = vmatprep.subr.bf16.mxu1 %v5137_v52  ;;  %v5201_v19 = vld [vmem:[#allocation4 + $0x2018] sm:$0xff]  ;;  %v9307_v52 = vpack.c.bf16 %v4154_v53, %v4154_v53 }
 0x812   : > { %5609 = vmatpush1.bf16.msra.mxu0 %v5134_v18  ;;  %5978 = vmatpush1.bf16.msra.mxu1 %v5136_v40  ;;  %v5198_v18 = vld [vmem:[#allocation4 + $0x2000] sm:$0xff]  ;;  %v5200_v40 = vld [vmem:[#allocation4 + $0x2010] sm:$0xff] }
 0x813   : > { %5610 = vmatprep.subr.bf16.mxu0 %v5143_v31  ;;  %5979 = vmatprep.subr.bf16.mxu1 %v5145_v63  ;;  %v5207_v31 = vld [vmem:[#allocation4 + $0x2048] sm:$0xff]  ;;  %v5209_v63 = vld [vmem:[#allocation4 + $0x2058] sm:$0xff] }
 0x816   : > { %5611 = vmatpush1.bf16.msra.mxu0 %v5142_v44  ;;  %5980 = vmatpush1.bf16.msra.mxu1 %v5144_v34  ;;  %v5206_v44 = vld [vmem:[#allocation4 + $0x2040] sm:$0xff]  ;;  %v5208_v34 = vld [vmem:[#allocation4 + $0x2050] sm:$0xff] }
 0x817   : > { %5612 = vmatprep.subr.bf16.mxu0 %v5151_v45  ;;  %5981 = vmatprep.subr.bf16.mxu1 %v5153_v49  ;;  %v5215_v45 = vld [vmem:[#allocation4 + $0x2088] sm:$0xff]  ;;  %v5217_v49 = vld [vmem:[#allocation4 + $0x2098] sm:$0xff] }
 0x81a   : > { %5613 = vmatpush1.bf16.msra.mxu0 %v5150_v57  ;;  %5982 = vmatpush1.bf16.msra.mxu1 %v5152_v16  ;;  %v7960_v57 = vmov 0   ;;  %v5214_v16 = vld [vmem:[#allocation4 + $0x2080] sm:$0xff] }
 0x81b   : > { %5614 = vmatprep.subr.bf16.mxu0 %v5159_v54  ;;  %5983 = vmatprep.subr.bf16.mxu1 %v5161_v14  ;;  %v5216_v54 = vld [vmem:[#allocation4 + $0x2090] sm:$0xff]  ;;  %v5223_v14 = vld [vmem:[#allocation4 + $0x20c8] sm:$0xff] }
 0x81e   : > { %5615 = vmatpush1.bf16.msra.mxu0 %v5158_v60  ;;  %5984 = vmatpush1.bf16.msra.mxu1 %v5160_v20  ;;  %v5225_v60 = vld [vmem:[#allocation4 + $0x20d8] sm:$0xff]  ;;  %v5222_v20 = vld [vmem:[#allocation4 + $0x20c0] sm:$0xff] }
 0x81f   : > { %5616 = vmatprep.subr.bf16.mxu0 %v5167_v56  ;;  %5985 = vmatprep.subr.bf16.mxu1 %v5169_v0  ;;  %v5224_v56 = vld [vmem:[#allocation4 + $0x20d0] sm:$0xff]  ;;  %v5231_v0 = vld [vmem:[#allocation4 + $0x2108] sm:$0xff] }
 0x822   : > { %5617 = vmatpush1.bf16.msra.mxu0 %v5166_v4  ;;  %5986 = vmatpush1.bf16.msra.mxu1 %v5168_v22  ;;  %v4034_v4 = vld [vmem:[#allocation17 + $0x40] ss:$4 sm:$0x1]  ;;  %v5230_v22 = vld [vmem:[#allocation4 + $0x2100] sm:$0xff] }
 0x823   : > { %5618 = vmatprep.subr.bf16.mxu0 %v5175_v23  ;;  %5987 = vmatprep.subr.bf16.mxu1 %v5177_v24  ;;  %v5232_v23 = vld [vmem:[#allocation4 + $0x2110] sm:$0xff]  ;;  %v5239_v24 = vld [vmem:[#allocation4 + $0x2148] sm:$0xff]  ;;  %v4105_v8 = vrot.slane %v4034_v4, %v9170_v28 }
 0x824   : > { %v4219_v4 = vld [vmem:[#allocation4 + $0x168] sm:$0xff] }
 0x825   : > { %v4139_v39 = vadd.f32 %v4105_v8, %v4029_v27  ;;  %v4229_v27 = vld [vmem:[#allocation4 + $0x1b8] sm:$0xff]  ;;  %v4226_v8 = vld [vmem:[#allocation4 + $0x1a0] sm:$0xff] }
 0x826   : > { %5619 = vmatpush1.bf16.msra.mxu0 %v5174_v10  ;;  %5988 = vmatpush1.bf16.msra.mxu1 %v5176_v32  ;;  %v5238_v10 = vld [vmem:[#allocation4 + $0x2140] sm:$0xff]  ;;  %v5240_v32 = vld [vmem:[#allocation4 + $0x2150] sm:$0xff] }
 0x827   : > { %5620 = vmatprep.subr.bf16.mxu0 %v5183_v33  ;;  %5989 = vmatprep.subr.bf16.mxu1 %v5185_v36  ;;  %v5247_v33 = vld [vmem:[#allocation4 + $0x2188] sm:$0xff]  ;;  %v5249_v36 = vld [vmem:[#allocation4 + $0x2198] sm:$0xff]  ;;  %v4156_v53 = vmax.f32 %v4139_v39, 0.0  ;;  %v4236_v39 = vld [vmem:[#allocation4 + $0x1f0] sm:$0xff] }
 0x82a   : > { %5621 = vmatpush1.bf16.msra.mxu0 %v5182_v42  ;;  %5990 = vmatpush1.bf16.msra.mxu1 %v5184_v43  ;;  %v5246_v42 = vld [vmem:[#allocation4 + $0x2180] sm:$0xff]  ;;  %v5248_v43 = vld [vmem:[#allocation4 + $0x2190] sm:$0xff] }
 0x82b   : > { %5622 = vmatprep.subr.bf16.mxu0 %v5191_v46  ;;  %5991 = vmatprep.subr.bf16.mxu1 %v5193_v47  ;;  %v5255_v46 = vld [vmem:[#allocation4 + $0x21c8] sm:$0xff]  ;;  %v5257_v47 = vld [vmem:[#allocation4 + $0x21d8] sm:$0xff] }
 0x82e   : > { %5623 = vmatpush1.bf16.msra.mxu0 %v5190_v58  ;;  %5992 = vmatpush1.bf16.msra.mxu1 %v5192_v37  ;;  %v5254_v58 = vld [vmem:[#allocation4 + $0x21c0] sm:$0xff]  ;;  %v5256_v37 = vld [vmem:[#allocation4 + $0x21d0] sm:$0xff] }
 0x82f   : > { %5633 = vmatprep.subr.bf16.mxu0 %v5199_v59  ;;  %6002 = vmatprep.subr.bf16.mxu1 %v5201_v19  ;;  %v4179_v59 = vld [vmem:[#allocation4 + $0x28] sm:$0xff]  ;;  %v4181_v19 = vld [vmem:[#allocation4 + $0x38] sm:$0xff] }
 0x831   : > { %5625 = vmatmul.mubr.bf16.vlgmr.msra.gmra.mrb[0].mxu0 %v9307_v52  ;;  %5994 = vmatmul.mubr.bf16.vlgmr.msra.gmra.mrb[0].mxu1 %v9307_v52 }
 0x832   : > { %5634 = vmatpush1.bf16.msra.mxu0 %v5198_v18  ;;  %6003 = vmatpush1.bf16.msra.mxu1 %v5200_v40  ;;  %v9314_v18 = vpack.c.bf16 %v4156_v53, %v4156_v53  ;;  %v4178_v40 = vld [vmem:[#allocation4 + $0x20] sm:$0xff]  ;;  %v4251_v53 = vld [vmem:[#allocation4 + $0x268] sm:$0xff] }
 0x833   : > { %5635 = vmatprep.subr.bf16.mxu0 %v5207_v31  ;;  %6004 = vmatprep.subr.bf16.mxu1 %v5209_v63  ;;  %v4180_v31 = vld [vmem:[#allocation4 + $0x30] sm:$0xff]  ;;  %v4187_v63 = vld [vmem:[#allocation4 + $0x68] sm:$0xff] }
 0x834   : > { %5665 = vmatprep.mubr.bf16.mxu0 %v7960_v57  ;;  %6034 = vmatprep.mubr.bf16.mxu1 %v7960_v57 }
 0x836   : > { %5636 = vmatpush1.bf16.msra.mxu0 %v5206_v44  ;;  %6005 = vmatpush1.bf16.msra.mxu1 %v5208_v34  ;;  %v4189_v44 = vld [vmem:[#allocation4 + $0x78] sm:$0xff]  ;;  %v4186_v34 = vld [vmem:[#allocation4 + $0x60] sm:$0xff] }
 0x837   : > { %5637 = vmatprep.subr.bf16.mxu0 %v5215_v45  ;;  %6006 = vmatprep.subr.bf16.mxu1 %v5217_v49  ;;  %v4188_v45 = vld [vmem:[#allocation4 + $0x70] sm:$0xff]  ;;  %v4195_v49 = vld [vmem:[#allocation4 + $0xa8] sm:$0xff] }
 0x83a   : > { %5638 = vmatpush1.bf16.msra.mxu0 %v5214_v16  ;;  %6007 = vmatpush1.bf16.msra.mxu1 %v5216_v54  ;;  %v4197_v16 = vld [vmem:[#allocation4 + $0xb8] sm:$0xff]  ;;  %v4194_v54 = vld [vmem:[#allocation4 + $0xa0] sm:$0xff] }
 0x83b   : > { %5639 = vmatprep.subr.bf16.mxu0 %v5223_v14  ;;  %6008 = vmatprep.subr.bf16.mxu1 %v5225_v60  ;;  %v4196_v14 = vld [vmem:[#allocation4 + $0xb0] sm:$0xff]  ;;  %v4203_v60 = vld [vmem:[#allocation4 + $0xe8] sm:$0xff] }
 0x83e   : > { %5640 = vmatpush1.bf16.msra.mxu0 %v5222_v20  ;;  %6009 = vmatpush1.bf16.msra.mxu1 %v5224_v56  ;;  %v4205_v20 = vld [vmem:[#allocation4 + $0xf8] sm:$0xff]  ;;  %v4202_v56 = vld [vmem:[#allocation4 + $0xe0] sm:$0xff] }
 0x83f   : > { %5641 = vmatprep.subr.bf16.mxu0 %v5231_v0  ;;  %6010 = vmatprep.subr.bf16.mxu1 %v5233_v2  ;;  %v4204_v0 = vld [vmem:[#allocation4 + $0xf0] sm:$0xff]  ;;  %v4211_v2 = vld [vmem:[#allocation4 + $0x128] sm:$0xff] }
 0x842   : > { %5642 = vmatpush1.bf16.msra.mxu0 %v5230_v22  ;;  %6011 = vmatpush1.bf16.msra.mxu1 %v5232_v23  ;;  %v4221_v22 = vld [vmem:[#allocation4 + $0x178] sm:$0xff]  ;;  %v4218_v23 = vld [vmem:[#allocation4 + $0x160] sm:$0xff] }
 0x843   : > { %5643 = vmatprep.subr.bf16.mxu0 %v5239_v24  ;;  %6012 = vmatprep.subr.bf16.mxu1 %v5241_v5  ;;  %v4220_v24 = vld [vmem:[#allocation4 + $0x170] sm:$0xff]  ;;  %v4227_v5 = vld [vmem:[#allocation4 + $0x1a8] sm:$0xff] }
 0x846   : > { %5644 = vmatpush1.bf16.msra.mxu0 %v5238_v10  ;;  %6013 = vmatpush1.bf16.msra.mxu1 %v5240_v32  ;;  %v4228_v10 = vld [vmem:[#allocation4 + $0x1b0] sm:$0xff]  ;;  %v4235_v32 = vld [vmem:[#allocation4 + $0x1e8] sm:$0xff] }
 0x847   : > { %5645 = vmatprep.subr.bf16.mxu0 %v5247_v33  ;;  %6014 = vmatprep.subr.bf16.mxu1 %v5249_v36  ;;  %v4237_v33 = vld [vmem:[#allocation4 + $0x1f8] sm:$0xff]  ;;  %v4234_v36 = vld [vmem:[#allocation4 + $0x1e0] sm:$0xff] }
 0x84a   : > { %5646 = vmatpush1.bf16.msra.mxu0 %v5246_v42  ;;  %6015 = vmatpush1.bf16.msra.mxu1 %v5248_v43  ;;  %v4243_v42 = vld [vmem:[#allocation4 + $0x228] sm:$0xff]  ;;  %v4245_v43 = vld [vmem:[#allocation4 + $0x238] sm:$0xff] }
 0x84b   : > { %5647 = vmatprep.subr.bf16.mxu0 %v5255_v46  ;;  %6016 = vmatprep.subr.bf16.mxu1 %v5257_v47  ;;  %v4242_v46 = vld [vmem:[#allocation4 + $0x220] sm:$0xff]  ;;  %v4244_v47 = vld [vmem:[#allocation4 + $0x230] sm:$0xff] }
 0x84e   : > { %5648 = vmatpush1.bf16.msra.mxu0 %v5254_v58  ;;  %6017 = vmatpush1.bf16.msra.mxu1 %v5256_v37  ;;  %v4253_v58 = vld [vmem:[#allocation4 + $0x278] sm:$0xff]  ;;  %v4250_v37 = vld [vmem:[#allocation4 + $0x260] sm:$0xff] }
 0x84f   : > { %6043 = vmatprep.subr.bf16.mxu0 %v4179_v59  ;;  %6412 = vmatprep.subr.bf16.mxu1 %v4181_v19  ;;  %v4252_v59 = vld [vmem:[#allocation4 + $0x270] sm:$0xff]  ;;  %v4259_v19 = vld [vmem:[#allocation4 + $0x2a8] sm:$0xff] }
 0x851   : > { %5666 = vmatmul.mubr.bf16.vlgmr.msra.gmra.mrb[0].mxu0 %v9314_v18  ;;  %6035 = vmatmul.mubr.bf16.vlgmr.msra.gmra.mrb[0].mxu1 %v9314_v18 }
 0x852   : > { %6044 = vmatpush1.bf16.msra.mxu0 %v4178_v40  ;;  %6413 = vmatpush1.bf16.msra.mxu1 %v4180_v31  ;;  %v4261_v40 = vld [vmem:[#allocation4 + $0x2b8] sm:$0xff]  ;;  %v4258_v31 = vld [vmem:[#allocation4 + $0x2a0] sm:$0xff] }
 0x853   : > { %6045 = vmatprep.subr.bf16.mxu0 %v4187_v63  ;;  %6414 = vmatprep.subr.bf16.mxu1 %v4189_v44  ;;  %v4260_v63 = vld [vmem:[#allocation4 + $0x2b0] sm:$0xff]  ;;  %v4267_v44 = vld [vmem:[#allocation4 + $0x2e8] sm:$0xff] }
 0x854   : > { %6075 = vmatprep.mubr.bf16.mxu0 %v9165_v55  ;;  %6444 = vmatprep.mubr.bf16.mxu1 %v9165_v55  ;;  %v4210_v55 = vld [vmem:[#allocation4 + $0x120] sm:$0xff] }
 0x856   : > { %6046 = vmatpush1.bf16.msra.mxu0 %v4186_v34  ;;  %6415 = vmatpush1.bf16.msra.mxu1 %v4188_v45  ;;  %v4269_v34 = vld [vmem:[#allocation4 + $0x2f8] sm:$0xff]  ;;  %v4266_v45 = vld [vmem:[#allocation4 + $0x2e0] sm:$0xff] }
 0x857   : > { %6047 = vmatprep.subr.bf16.mxu0 %v4195_v49  ;;  %6416 = vmatprep.subr.bf16.mxu1 %v4197_v16  ;;  %v4268_v49 = vld [vmem:[#allocation4 + $0x2f0] sm:$0xff]  ;;  %v4275_v16 = vld [vmem:[#allocation4 + $0x328] sm:$0xff] }
 0x85a   : > { %6048 = vmatpush1.bf16.msra.mxu0 %v4194_v54  ;;  %6417 = vmatpush1.bf16.msra.mxu1 %v4196_v14  ;;  %v4277_v54 = vld [vmem:[#allocation4 + $0x338] sm:$0xff]  ;;  %v4274_v14 = vld [vmem:[#allocation4 + $0x320] sm:$0xff] }
 0x85b   : > { %6049 = vmatprep.subr.bf16.mxu0 %v4203_v60  ;;  %6418 = vmatprep.subr.bf16.mxu1 %v4205_v20  ;;  %v4276_v60 = vld [vmem:[#allocation4 + $0x330] sm:$0xff]  ;;  %v4283_v20 = vld [vmem:[#allocation4 + $0x368] sm:$0xff] }
 0x85e   : > { %6050 = vmatpush1.bf16.msra.mxu0 %v4202_v56  ;;  %6419 = vmatpush1.bf16.msra.mxu1 %v4204_v0  ;;  %v4285_v56 = vld [vmem:[#allocation4 + $0x378] sm:$0xff]  ;;  %v4282_v0 = vld [vmem:[#allocation4 + $0x360] sm:$0xff] }
 0x85f   : > { %6051 = vmatprep.subr.bf16.mxu0 %v4211_v2  ;;  %6420 = vmatprep.subr.bf16.mxu1 %v4213_v61  ;;  %v4284_v2 = vld [vmem:[#allocation4 + $0x370] sm:$0xff]  ;;  %v4291_v61 = vld [vmem:[#allocation4 + $0x3a8] sm:$0xff] }
 0x862   : > { %6052 = vmatpush1.bf16.msra.mxu0 %v4210_v55  ;;  %6421 = vmatpush1.bf16.msra.mxu1 %v4212_v62  ;;  %v4293_v55 = vld [vmem:[#allocation4 + $0x3b8] sm:$0xff]  ;;  %v4290_v62 = vld [vmem:[#allocation4 + $0x3a0] sm:$0xff] }
 0x863   : > { %6053 = vmatprep.subr.bf16.mxu0 %v4219_v4  ;;  %6422 = vmatprep.subr.bf16.mxu1 %v4221_v22  ;;  %v4292_v4 = vld [vmem:[#allocation4 + $0x3b0] sm:$0xff]  ;;  %v4299_v22 = vld [vmem:[#allocation4 + $0x3e8] sm:$0xff] }
 0x866   : > { %6054 = vmatpush1.bf16.msra.mxu0 %v4218_v23  ;;  %6423 = vmatpush1.bf16.msra.mxu1 %v4220_v24  ;;  %v4301_v23 = vld [vmem:[#allocation4 + $0x3f8] sm:$0xff]  ;;  %v4298_v24 = vld [vmem:[#allocation4 + $0x3e0] sm:$0xff] }
 0x867   : > { %6055 = vmatprep.subr.bf16.mxu0 %v4227_v5  ;;  %6424 = vmatprep.subr.bf16.mxu1 %v4229_v27  ;;  %v4300_v5 = vld [vmem:[#allocation4 + $0x3f0] sm:$0xff]  ;;  %v4307_v27 = vld [vmem:[#allocation4 + $0x428] sm:$0xff] }
 0x86a   : > { %6056 = vmatpush1.bf16.msra.mxu0 %v4226_v8  ;;  %6425 = vmatpush1.bf16.msra.mxu1 %v4228_v10  ;;  %v4309_v8 = vld [vmem:[#allocation4 + $0x438] sm:$0xff]  ;;  %v4306_v10 = vld [vmem:[#allocation4 + $0x420] sm:$0xff] }
 0x86b   : > { %6057 = vmatprep.subr.bf16.mxu0 %v4235_v32  ;;  %6426 = vmatprep.subr.bf16.mxu1 %v4237_v33  ;;  %v4308_v32 = vld [vmem:[#allocation4 + $0x430] sm:$0xff]  ;;  %v4315_v33 = vld [vmem:[#allocation4 + $0x468] sm:$0xff] }
 0x86e   : > { %6058 = vmatpush1.bf16.msra.mxu0 %v4234_v36  ;;  %6427 = vmatpush1.bf16.msra.mxu1 %v4236_v39  ;;  %v4317_v36 = vld [vmem:[#allocation4 + $0x478] sm:$0xff]  ;;  %v4314_v39 = vld [vmem:[#allocation4 + $0x460] sm:$0xff] }
 0x86f   : > { %6059 = vmatprep.subr.bf16.mxu0 %v4243_v42  ;;  %6428 = vmatprep.subr.bf16.mxu1 %v4245_v43  ;;  %v4316_v42 = vld [vmem:[#allocation4 + $0x470] sm:$0xff]  ;;  %v4323_v43 = vld [vmem:[#allocation4 + $0x4a8] sm:$0xff] }
 0x872   : > { %6060 = vmatpush1.bf16.msra.mxu0 %v4242_v46  ;;  %6429 = vmatpush1.bf16.msra.mxu1 %v4244_v47  ;;  %v4325_v46 = vld [vmem:[#allocation4 + $0x4b8] sm:$0xff]  ;;  %v4322_v47 = vld [vmem:[#allocation4 + $0x4a0] sm:$0xff] }
 0x873   : > { %6061 = vmatprep.subr.bf16.mxu0 %v4251_v53  ;;  %6430 = vmatprep.subr.bf16.mxu1 %v4253_v58  ;;  %v4324_v53 = vld [vmem:[#allocation4 + $0x4b0] sm:$0xff]  ;;  %v4331_v58 = vld [vmem:[#allocation4 + $0x4e8] sm:$0xff] }
 0x876   : > { %6062 = vmatpush1.bf16.msra.mxu0 %v4250_v37  ;;  %6431 = vmatpush1.bf16.msra.mxu1 %v4252_v59  ;;  %v4330_v37 = vld [vmem:[#allocation4 + $0x4e0] sm:$0xff]  ;;  %v4332_v59 = vld [vmem:[#allocation4 + $0x4f0] sm:$0xff] }
 0x877   : > { %6063 = vmatprep.subr.bf16.mxu0 %v4259_v19  ;;  %6432 = vmatprep.subr.bf16.mxu1 %v4261_v40  ;;  %v4339_v19 = vld [vmem:[#allocation4 + $0x528] sm:$0xff]  ;;  %v4341_v40 = vld [vmem:[#allocation4 + $0x538] sm:$0xff] }
 0x87a   : > { %6064 = vmatpush1.bf16.msra.mxu0 %v4258_v31  ;;  %6433 = vmatpush1.bf16.msra.mxu1 %v4260_v63  ;;  %v4340_v31 = vld [vmem:[#allocation4 + $0x530] sm:$0xff]  ;;  %v4347_v63 = vld [vmem:[#allocation4 + $0x568] sm:$0xff] }
 0x87b   : > { %6065 = vmatprep.subr.bf16.mxu0 %v4267_v44  ;;  %6434 = vmatprep.subr.bf16.mxu1 %v4269_v34  ;;  %v4349_v44 = vld [vmem:[#allocation4 + $0x578] sm:$0xff]  ;;  %v4346_v34 = vld [vmem:[#allocation4 + $0x560] sm:$0xff] }
 0x87e   : > { %6066 = vmatpush1.bf16.msra.mxu0 %v4266_v45  ;;  %6435 = vmatpush1.bf16.msra.mxu1 %v4268_v49  ;;  %v4348_v45 = vld [vmem:[#allocation4 + $0x570] sm:$0xff]  ;;  %v4355_v49 = vld [vmem:[#allocation4 + $0x5a8] sm:$0xff] }
 0x87f   : > { %6067 = vmatprep.subr.bf16.mxu0 %v4275_v16  ;;  %6436 = vmatprep.subr.bf16.mxu1 %v4277_v54  ;;  %v4357_v16 = vld [vmem:[#allocation4 + $0x5b8] sm:$0xff]  ;;  %v4354_v54 = vld [vmem:[#allocation4 + $0x5a0] sm:$0xff] }
 0x882   : > { %6068 = vmatpush1.bf16.msra.mxu0 %v4274_v14  ;;  %6437 = vmatpush1.bf16.msra.mxu1 %v4276_v60  ;;  %v4356_v14 = vld [vmem:[#allocation4 + $0x5b0] sm:$0xff]  ;;  %v4363_v60 = vld [vmem:[#allocation4 + $0x5e8] sm:$0xff] }
 0x883   : > { %6069 = vmatprep.subr.bf16.mxu0 %v4283_v20  ;;  %6438 = vmatprep.subr.bf16.mxu1 %v4285_v56  ;;  %v4365_v20 = vld [vmem:[#allocation4 + $0x5f8] sm:$0xff]  ;;  %v4362_v56 = vld [vmem:[#allocation4 + $0x5e0] sm:$0xff] }
 0x886   : > { %6070 = vmatpush1.bf16.msra.mxu0 %v4282_v0  ;;  %6439 = vmatpush1.bf16.msra.mxu1 %v4284_v2  ;;  %v4364_v0 = vld [vmem:[#allocation4 + $0x5f0] sm:$0xff]  ;;  %v4371_v2 = vld [vmem:[#allocation4 + $0x628] sm:$0xff] }
 0x887   : > { %6071 = vmatprep.subr.bf16.mxu0 %v4291_v61  ;;  %6440 = vmatprep.subr.bf16.mxu1 %v4293_v55  ;;  %v4373_v61 = vld [vmem:[#allocation4 + $0x638] sm:$0xff]  ;;  %v4370_v55 = vld [vmem:[#allocation4 + $0x620] sm:$0xff] }
 0x88a   : > { %6072 = vmatpush1.bf16.msra.mxu0 %v4290_v62  ;;  %6441 = vmatpush1.bf16.msra.mxu1 %v4292_v4  ;;  %v4372_v62 = vld [vmem:[#allocation4 + $0x630] sm:$0xff]  ;;  %v4379_v4 = vld [vmem:[#allocation4 + $0x668] sm:$0xff] }
 0x88b   : > { %6073 = vmatprep.subr.bf16.mxu0 %v4299_v22  ;;  %6442 = vmatprep.subr.bf16.mxu1 %v4301_v23  ;;  %v4381_v22 = vld [vmem:[#allocation4 + $0x678] sm:$0xff]  ;;  %v4378_v23 = vld [vmem:[#allocation4 + $0x660] sm:$0xff] }
 0x88e   : > { %6074 = vmatpush1.bf16.msra.mxu0 %v4298_v24  ;;  %6443 = vmatpush1.bf16.msra.mxu1 %v4300_v5  ;;  %v4380_v24 = vld [vmem:[#allocation4 + $0x670] sm:$0xff]  ;;  %v4387_v5 = vld [vmem:[#allocation4 + $0x6a8] sm:$0xff] }
 0x88f   : > { %6084 = vmatprep.subr.bf16.mxu0 %v4307_v27  ;;  %6453 = vmatprep.subr.bf16.mxu1 %v4309_v8  ;;  %v4389_v27 = vld [vmem:[#allocation4 + $0x6b8] sm:$0xff]  ;;  %v4386_v8 = vld [vmem:[#allocation4 + $0x6a0] sm:$0xff] }
 0x891   : > { %6076 = vmatmul.mubr.bf16.vlgmr.msra.gmra.mrb[4].mxu0 %v9183_v15  ;;  %6445 = vmatmul.mubr.bf16.vlgmr.msra.gmra.mrb[4].mxu1 %v9183_v15  ;;  %v4333_v15 = vld [vmem:[#allocation4 + $0x4f8] sm:$0xff] }
 0x892   : > { %6085 = vmatpush1.bf16.msra.mxu0 %v4306_v10  ;;  %6454 = vmatpush1.bf16.msra.mxu1 %v4308_v32  ;;  %v4388_v10 = vld [vmem:[#allocation4 + $0x6b0] sm:$0xff]  ;;  %v4395_v32 = vld [vmem:[#allocation4 + $0x6e8] sm:$0xff] }
 0x893   : > { %6086 = vmatprep.subr.bf16.mxu0 %v4315_v33  ;;  %6455 = vmatprep.subr.bf16.mxu1 %v4317_v36  ;;  %v4397_v33 = vld [vmem:[#allocation4 + $0x6f8] sm:$0xff]  ;;  %v4394_v36 = vld [vmem:[#allocation4 + $0x6e0] sm:$0xff] }
 0x894   : > { %6116 = vmatprep.mubr.bf16.mxu0 %v9185_v1  ;;  %6485 = vmatprep.mubr.bf16.mxu1 %v9185_v1  ;;  %v4338_v1 = vld [vmem:[#allocation4 + $0x520] sm:$0xff] }
 0x896   : > { %6087 = vmatpush1.bf16.msra.mxu0 %v4314_v39  ;;  %6456 = vmatpush1.bf16.msra.mxu1 %v4316_v42  ;;  %v4396_v39 = vld [vmem:[#allocation4 + $0x6f0] sm:$0xff]  ;;  %v4403_v42 = vld [vmem:[#allocation4 + $0x728] sm:$0xff] }
 0x897   : > { %6088 = vmatprep.subr.bf16.mxu0 %v4323_v43  ;;  %6457 = vmatprep.subr.bf16.mxu1 %v4325_v46  ;;  %v4405_v43 = vld [vmem:[#allocation4 + $0x738] sm:$0xff]  ;;  %v4402_v46 = vld [vmem:[#allocation4 + $0x720] sm:$0xff] }
 0x89a   : > { %6089 = vmatpush1.bf16.msra.mxu0 %v4322_v47  ;;  %6458 = vmatpush1.bf16.msra.mxu1 %v4324_v53  ;;  %v4404_v47 = vld [vmem:[#allocation4 + $0x730] sm:$0xff]  ;;  %v4411_v53 = vld [vmem:[#allocation4 + $0x768] sm:$0xff] }
 0x89b   : > { %6090 = vmatprep.subr.bf16.mxu0 %v4331_v58  ;;  %6459 = vmatprep.subr.bf16.mxu1 %v4333_v15  ;;  %v4413_v58 = vld [vmem:[#allocation4 + $0x778] sm:$0xff]  ;;  %v4410_v15 = vld [vmem:[#allocation4 + $0x760] sm:$0xff] }
 0x89e   : > { %6091 = vmatpush1.bf16.msra.mxu0 %v4330_v37  ;;  %6460 = vmatpush1.bf16.msra.mxu1 %v4332_v59  ;;  %v4412_v37 = vld [vmem:[#allocation4 + $0x770] sm:$0xff]  ;;  %v4419_v59 = vld [vmem:[#allocation4 + $0x7a8] sm:$0xff] }
 0x89f   : > { %6092 = vmatprep.subr.bf16.mxu0 %v4339_v19  ;;  %6461 = vmatprep.subr.bf16.mxu1 %v4341_v40  ;;  %v4421_v19 = vld [vmem:[#allocation4 + $0x7b8] sm:$0xff]  ;;  %v4418_v40 = vld [vmem:[#allocation4 + $0x7a0] sm:$0xff] }
 0x8a2   : > { %6093 = vmatpush1.bf16.msra.mxu0 %v4338_v1  ;;  %6462 = vmatpush1.bf16.msra.mxu1 %v4340_v31  ;;  %v4420_v1 = vld [vmem:[#allocation4 + $0x7b0] sm:$0xff]  ;;  %v4427_v31 = vld [vmem:[#allocation4 + $0x7e8] sm:$0xff] }
 0x8a3   : > { %6094 = vmatprep.subr.bf16.mxu0 %v4347_v63  ;;  %6463 = vmatprep.subr.bf16.mxu1 %v4349_v44  ;;  %v4429_v63 = vld [vmem:[#allocation4 + $0x7f8] sm:$0xff]  ;;  %v4426_v44 = vld [vmem:[#allocation4 + $0x7e0] sm:$0xff] }
 0x8a6   : > { %6095 = vmatpush1.bf16.msra.mxu0 %v4346_v34  ;;  %6464 = vmatpush1.bf16.msra.mxu1 %v4348_v45  ;;  %v4428_v34 = vld [vmem:[#allocation4 + $0x7f0] sm:$0xff]  ;;  %v4435_v45 = vld [vmem:[#allocation4 + $0x828] sm:$0xff] }
 0x8a7   : > { %6096 = vmatprep.subr.bf16.mxu0 %v4355_v49  ;;  %6465 = vmatprep.subr.bf16.mxu1 %v4357_v16  ;;  %v4437_v49 = vld [vmem:[#allocation4 + $0x838] sm:$0xff]  ;;  %v4434_v16 = vld [vmem:[#allocation4 + $0x820] sm:$0xff] }
 0x8aa   : > { %6097 = vmatpush1.bf16.msra.mxu0 %v4354_v54  ;;  %6466 = vmatpush1.bf16.msra.mxu1 %v4356_v14  ;;  %v4436_v54 = vld [vmem:[#allocation4 + $0x830] sm:$0xff]  ;;  %v4443_v14 = vld [vmem:[#allocation4 + $0x868] sm:$0xff] }
 0x8ab   : > { %6098 = vmatprep.subr.bf16.mxu0 %v4363_v60  ;;  %6467 = vmatprep.subr.bf16.mxu1 %v4365_v20  ;;  %v4445_v60 = vld [vmem:[#allocation4 + $0x878] sm:$0xff]  ;;  %v4442_v20 = vld [vmem:[#allocation4 + $0x860] sm:$0xff] }
 0x8ae   : > { %6099 = vmatpush1.bf16.msra.mxu0 %v4362_v56  ;;  %6468 = vmatpush1.bf16.msra.mxu1 %v4364_v0  ;;  %v4444_v56 = vld [vmem:[#allocation4 + $0x870] sm:$0xff]  ;;  %v4451_v0 = vld [vmem:[#allocation4 + $0x8a8] sm:$0xff] }
 0x8af   : > { %6100 = vmatprep.subr.bf16.mxu0 %v4371_v2  ;;  %6469 = vmatprep.subr.bf16.mxu1 %v4373_v61  ;;  %v4453_v2 = vld [vmem:[#allocation4 + $0x8b8] sm:$0xff]  ;;  %v4450_v61 = vld [vmem:[#allocation4 + $0x8a0] sm:$0xff] }
 0x8b2   : > { %6101 = vmatpush1.bf16.msra.mxu0 %v4370_v55  ;;  %6470 = vmatpush1.bf16.msra.mxu1 %v4372_v62  ;;  %v4452_v55 = vld [vmem:[#allocation4 + $0x8b0] sm:$0xff]  ;;  %v4459_v62 = vld [vmem:[#allocation4 + $0x8e8] sm:$0xff] }
 0x8b3   : > { %6102 = vmatprep.subr.bf16.mxu0 %v4379_v4  ;;  %6471 = vmatprep.subr.bf16.mxu1 %v4381_v22  ;;  %v4458_v4 = vld [vmem:[#allocation4 + $0x8e0] sm:$0xff]  ;;  %v4460_v22 = vld [vmem:[#allocation4 + $0x8f0] sm:$0xff] }
 0x8b6   : > { %6103 = vmatpush1.bf16.msra.mxu0 %v4378_v23  ;;  %6472 = vmatpush1.bf16.msra.mxu1 %v4380_v24  ;;  %v4467_v23 = vld [vmem:[#allocation4 + $0x928] sm:$0xff]  ;;  %v4469_v24 = vld [vmem:[#allocation4 + $0x938] sm:$0xff] }
 0x8b7   : > { %6104 = vmatprep.subr.bf16.mxu0 %v4387_v5  ;;  %6473 = vmatprep.subr.bf16.mxu1 %v4389_v27  ;;  %v4468_v5 = vld [vmem:[#allocation4 + $0x930] sm:$0xff]  ;;  %v4475_v27 = vld [vmem:[#allocation4 + $0x968] sm:$0xff] }
 0x8ba   : > { %6105 = vmatpush1.bf16.msra.mxu0 %v4386_v8  ;;  %6474 = vmatpush1.bf16.msra.mxu1 %v4388_v10  ;;  %v4477_v8 = vld [vmem:[#allocation4 + $0x978] sm:$0xff]  ;;  %v4474_v10 = vld [vmem:[#allocation4 + $0x960] sm:$0xff] }
 0x8bb   : > { %6106 = vmatprep.subr.bf16.mxu0 %v4395_v32  ;;  %6475 = vmatprep.subr.bf16.mxu1 %v4397_v33  ;;  %v4476_v32 = vld [vmem:[#allocation4 + $0x970] sm:$0xff]  ;;  %v4483_v33 = vld [vmem:[#allocation4 + $0x9a8] sm:$0xff] }
 0x8be   : > { %6107 = vmatpush1.bf16.msra.mxu0 %v4394_v36  ;;  %6476 = vmatpush1.bf16.msra.mxu1 %v4396_v39  ;;  %v4485_v36 = vld [vmem:[#allocation4 + $0x9b8] sm:$0xff]  ;;  %v4482_v39 = vld [vmem:[#allocation4 + $0x9a0] sm:$0xff] }
 0x8bf   : > { %6108 = vmatprep.subr.bf16.mxu0 %v4403_v42  ;;  %6477 = vmatprep.subr.bf16.mxu1 %v4405_v43  ;;  %v4484_v42 = vld [vmem:[#allocation4 + $0x9b0] sm:$0xff]  ;;  %v4491_v43 = vld [vmem:[#allocation4 + $0x9e8] sm:$0xff] }
 0x8c2   : > { %6109 = vmatpush1.bf16.msra.mxu0 %v4402_v46  ;;  %6478 = vmatpush1.bf16.msra.mxu1 %v4404_v47  ;;  %v4493_v46 = vld [vmem:[#allocation4 + $0x9f8] sm:$0xff]  ;;  %v4490_v47 = vld [vmem:[#allocation4 + $0x9e0] sm:$0xff] }
 0x8c3   : > { %6110 = vmatprep.subr.bf16.mxu0 %v4411_v53  ;;  %6479 = vmatprep.subr.bf16.mxu1 %v4413_v58  ;;  %v4492_v53 = vld [vmem:[#allocation4 + $0x9f0] sm:$0xff]  ;;  %v4499_v58 = vld [vmem:[#allocation4 + $0xa28] sm:$0xff] }
 0x8c6   : > { %6111 = vmatpush1.bf16.msra.mxu0 %v4410_v15  ;;  %6480 = vmatpush1.bf16.msra.mxu1 %v4412_v37  ;;  %v4501_v15 = vld [vmem:[#allocation4 + $0xa38] sm:$0xff]  ;;  %v4498_v37 = vld [vmem:[#allocation4 + $0xa20] sm:$0xff] }
 0x8c7   : > { %6112 = vmatprep.subr.bf16.mxu0 %v4419_v59  ;;  %6481 = vmatprep.subr.bf16.mxu1 %v4421_v19  ;;  %v4500_v59 = vld [vmem:[#allocation4 + $0xa30] sm:$0xff]  ;;  %v4507_v19 = vld [vmem:[#allocation4 + $0xa68] sm:$0xff] }
 0x8ca   : > { %6113 = vmatpush1.bf16.msra.mxu0 %v4418_v40  ;;  %6482 = vmatpush1.bf16.msra.mxu1 %v4420_v1  ;;  %v4509_v40 = vld [vmem:[#allocation4 + $0xa78] sm:$0xff]  ;;  %v4506_v1 = vld [vmem:[#allocation4 + $0xa60] sm:$0xff] }
 0x8cb   : > { %6114 = vmatprep.subr.bf16.mxu0 %v4427_v31  ;;  %6483 = vmatprep.subr.bf16.mxu1 %v4429_v63  ;;  %v4508_v31 = vld [vmem:[#allocation4 + $0xa70] sm:$0xff]  ;;  %v4515_v63 = vld [vmem:[#allocation4 + $0xaa8] sm:$0xff] }
 0x8ce   : > { %6115 = vmatpush1.bf16.msra.mxu0 %v4426_v44  ;;  %6484 = vmatpush1.bf16.msra.mxu1 %v4428_v34  ;;  %v4517_v44 = vld [vmem:[#allocation4 + $0xab8] sm:$0xff]  ;;  %v4514_v34 = vld [vmem:[#allocation4 + $0xaa0] sm:$0xff] }
 0x8cf   : > { %6125 = vmatprep.subr.bf16.mxu0 %v4435_v45  ;;  %6494 = vmatprep.subr.bf16.mxu1 %v4437_v49  ;;  %v4516_v45 = vld [vmem:[#allocation4 + $0xab0] sm:$0xff]  ;;  %v4523_v49 = vld [vmem:[#allocation4 + $0xae8] sm:$0xff] }
 0x8d1   : > { %6117 = vmatmul.mubr.bf16.vlgmr.msra.gmra.mrb[4].mxu0 %v9205_v29  ;;  %6486 = vmatmul.mubr.bf16.vlgmr.msra.gmra.mrb[4].mxu1 %v9205_v29  ;;  %v4461_v29 = vld [vmem:[#allocation4 + $0x8f8] sm:$0xff] }
 0x8d2   : > { %6126 = vmatpush1.bf16.msra.mxu0 %v4434_v16  ;;  %6495 = vmatpush1.bf16.msra.mxu1 %v4436_v54  ;;  %v4525_v16 = vld [vmem:[#allocation4 + $0xaf8] sm:$0xff]  ;;  %v4522_v54 = vld [vmem:[#allocation4 + $0xae0] sm:$0xff] }
 0x8d3   : > { %6127 = vmatprep.subr.bf16.mxu0 %v4443_v14  ;;  %6496 = vmatprep.subr.bf16.mxu1 %v4445_v60  ;;  %v4524_v14 = vld [vmem:[#allocation4 + $0xaf0] sm:$0xff]  ;;  %v4531_v60 = vld [vmem:[#allocation4 + $0xb28] sm:$0xff] }
 0x8d4   : > { %6157 = vmatprep.mubr.bf16.mxu0 %v9207_v38  ;;  %6526 = vmatprep.mubr.bf16.mxu1 %v9207_v38  ;;  %v4466_v38 = vld [vmem:[#allocation4 + $0x920] sm:$0xff] }
 0x8d6   : > { %6128 = vmatpush1.bf16.msra.mxu0 %v4442_v20  ;;  %6497 = vmatpush1.bf16.msra.mxu1 %v4444_v56  ;;  %v4533_v20 = vld [vmem:[#allocation4 + $0xb38] sm:$0xff]  ;;  %v4530_v56 = vld [vmem:[#allocation4 + $0xb20] sm:$0xff] }
 0x8d7   : > { %6129 = vmatprep.subr.bf16.mxu0 %v4451_v0  ;;  %6498 = vmatprep.subr.bf16.mxu1 %v4453_v2  ;;  %v4532_v0 = vld [vmem:[#allocation4 + $0xb30] sm:$0xff]  ;;  %v4539_v2 = vld [vmem:[#allocation4 + $0xb68] sm:$0xff] }
 0x8da   : > { %6130 = vmatpush1.bf16.msra.mxu0 %v4450_v61  ;;  %6499 = vmatpush1.bf16.msra.mxu1 %v4452_v55  ;;  %v4541_v61 = vld [vmem:[#allocation4 + $0xb78] sm:$0xff]  ;;  %v4538_v55 = vld [vmem:[#allocation4 + $0xb60] sm:$0xff] }
 0x8db   : > { %6131 = vmatprep.subr.bf16.mxu0 %v4459_v62  ;;  %6500 = vmatprep.subr.bf16.mxu1 %v4461_v29  ;;  %v4540_v62 = vld [vmem:[#allocation4 + $0xb70] sm:$0xff]  ;;  %v4547_v29 = vld [vmem:[#allocation4 + $0xba8] sm:$0xff] }
 0x8de   : > { %6132 = vmatpush1.bf16.msra.mxu0 %v4458_v4  ;;  %6501 = vmatpush1.bf16.msra.mxu1 %v4460_v22  ;;  %v4549_v4 = vld [vmem:[#allocation4 + $0xbb8] sm:$0xff]  ;;  %v4546_v22 = vld [vmem:[#allocation4 + $0xba0] sm:$0xff] }
 0x8df   : > { %6133 = vmatprep.subr.bf16.mxu0 %v4467_v23  ;;  %6502 = vmatprep.subr.bf16.mxu1 %v4469_v24  ;;  %v4548_v23 = vld [vmem:[#allocation4 + $0xbb0] sm:$0xff]  ;;  %v4555_v24 = vld [vmem:[#allocation4 + $0xbe8] sm:$0xff] }
 0x8e2   : > { %6134 = vmatpush1.bf16.msra.mxu0 %v4466_v38  ;;  %6503 = vmatpush1.bf16.msra.mxu1 %v4468_v5  ;;  %v4557_v38 = vld [vmem:[#allocation4 + $0xbf8] sm:$0xff]  ;;  %v4554_v5 = vld [vmem:[#allocation4 + $0xbe0] sm:$0xff] }
 0x8e3   : > { %6135 = vmatprep.subr.bf16.mxu0 %v4475_v27  ;;  %6504 = vmatprep.subr.bf16.mxu1 %v4477_v8  ;;  %v4556_v27 = vld [vmem:[#allocation4 + $0xbf0] sm:$0xff]  ;;  %v4563_v8 = vld [vmem:[#allocation4 + $0xc28] sm:$0xff] }
 0x8e6   : > { %6136 = vmatpush1.bf16.msra.mxu0 %v4474_v10  ;;  %6505 = vmatpush1.bf16.msra.mxu1 %v4476_v32  ;;  %v4565_v10 = vld [vmem:[#allocation4 + $0xc38] sm:$0xff]  ;;  %v4562_v32 = vld [vmem:[#allocation4 + $0xc20] sm:$0xff] }
 0x8e7   : > { %6137 = vmatprep.subr.bf16.mxu0 %v4483_v33  ;;  %6506 = vmatprep.subr.bf16.mxu1 %v4485_v36  ;;  %v4564_v33 = vld [vmem:[#allocation4 + $0xc30] sm:$0xff]  ;;  %v4571_v36 = vld [vmem:[#allocation4 + $0xc68] sm:$0xff] }
 0x8ea   : > { %6138 = vmatpush1.bf16.msra.mxu0 %v4482_v39  ;;  %6507 = vmatpush1.bf16.msra.mxu1 %v4484_v42  ;;  %v4573_v39 = vld [vmem:[#allocation4 + $0xc78] sm:$0xff]  ;;  %v4570_v42 = vld [vmem:[#allocation4 + $0xc60] sm:$0xff] }
 0x8eb   : > { %6139 = vmatprep.subr.bf16.mxu0 %v4491_v43  ;;  %6508 = vmatprep.subr.bf16.mxu1 %v4493_v46  ;;  %v4572_v43 = vld [vmem:[#allocation4 + $0xc70] sm:$0xff]  ;;  %v4579_v46 = vld [vmem:[#allocation4 + $0xca8] sm:$0xff] }
 0x8ee   : > { %6140 = vmatpush1.bf16.msra.mxu0 %v4490_v47  ;;  %6509 = vmatpush1.bf16.msra.mxu1 %v4492_v53  ;;  %v4581_v47 = vld [vmem:[#allocation4 + $0xcb8] sm:$0xff]  ;;  %v4578_v53 = vld [vmem:[#allocation4 + $0xca0] sm:$0xff] }
 0x8ef   : > { %6141 = vmatprep.subr.bf16.mxu0 %v4499_v58  ;;  %6510 = vmatprep.subr.bf16.mxu1 %v4501_v15  ;;  %v4580_v58 = vld [vmem:[#allocation4 + $0xcb0] sm:$0xff]  ;;  %v4587_v15 = vld [vmem:[#allocation4 + $0xce8] sm:$0xff] }
 0x8f2   : > { %6142 = vmatpush1.bf16.msra.mxu0 %v4498_v37  ;;  %6511 = vmatpush1.bf16.msra.mxu1 %v4500_v59  ;;  %v4586_v37 = vld [vmem:[#allocation4 + $0xce0] sm:$0xff]  ;;  %v4588_v59 = vld [vmem:[#allocation4 + $0xcf0] sm:$0xff] }
 0x8f3   : > { %6143 = vmatprep.subr.bf16.mxu0 %v4507_v19  ;;  %6512 = vmatprep.subr.bf16.mxu1 %v4509_v40  ;;  %v4595_v19 = vld [vmem:[#allocation4 + $0xd28] sm:$0xff]  ;;  %v4597_v40 = vld [vmem:[#allocation4 + $0xd38] sm:$0xff] }
 0x8f6   : > { %6144 = vmatpush1.bf16.msra.mxu0 %v4506_v1  ;;  %6513 = vmatpush1.bf16.msra.mxu1 %v4508_v31  ;;  %v4596_v1 = vld [vmem:[#allocation4 + $0xd30] sm:$0xff]  ;;  %v4603_v31 = vld [vmem:[#allocation4 + $0xd68] sm:$0xff] }
 0x8f7   : > { %6145 = vmatprep.subr.bf16.mxu0 %v4515_v63  ;;  %6514 = vmatprep.subr.bf16.mxu1 %v4517_v44  ;;  %v4605_v63 = vld [vmem:[#allocation4 + $0xd78] sm:$0xff]  ;;  %v4602_v44 = vld [vmem:[#allocation4 + $0xd60] sm:$0xff] }
 0x8fa   : > { %6146 = vmatpush1.bf16.msra.mxu0 %v4514_v34  ;;  %6515 = vmatpush1.bf16.msra.mxu1 %v4516_v45  ;;  %v4604_v34 = vld [vmem:[#allocation4 + $0xd70] sm:$0xff] }
 0x8fb   : > { %6147 = vmatprep.subr.bf16.mxu0 %v4523_v49  ;;  %6516 = vmatprep.subr.bf16.mxu1 %v4525_v16  ;;  %v4611_v16 = vld [vmem:[#allocation4 + $0xda8] sm:$0xff] }
 0x8fe   : > { %6148 = vmatpush1.bf16.msra.mxu0 %v4522_v54  ;;  %6517 = vmatpush1.bf16.msra.mxu1 %v4524_v14  ;;  %v4613_v54 = vld [vmem:[#allocation4 + $0xdb8] sm:$0xff] }
 0x8ff   : > { %6149 = vmatprep.subr.bf16.mxu0 %v4531_v60  ;;  %6518 = vmatprep.subr.bf16.mxu1 %v4533_v20 }
 0x902   : > { %6150 = vmatpush1.bf16.msra.mxu0 %v4530_v56  ;;  %6519 = vmatpush1.bf16.msra.mxu1 %v4532_v0 }
 0x903   : > { %6151 = vmatprep.subr.bf16.mxu0 %v4539_v2  ;;  %6520 = vmatprep.subr.bf16.mxu1 %v4541_v61  ;;  %v4610_v61 = vld [vmem:[#allocation4 + $0xda0] sm:$0xff] }
 0x906   : > { %6152 = vmatpush1.bf16.msra.mxu0 %v4538_v55  ;;  %6521 = vmatpush1.bf16.msra.mxu1 %v4540_v62  ;;  %v4612_v55 = vld [vmem:[#allocation4 + $0xdb0] sm:$0xff]  ;;  %v4619_v62 = vld [vmem:[#allocation4 + $0xde8] sm:$0xff] }
 0x907   : > { %6153 = vmatprep.subr.bf16.mxu0 %v4547_v29  ;;  %6522 = vmatprep.subr.bf16.mxu1 %v4549_v4  ;;  %v4621_v29 = vld [vmem:[#allocation4 + $0xdf8] sm:$0xff]  ;;  %v4618_v4 = vld [vmem:[#allocation4 + $0xde0] sm:$0xff] }
 0x90a   : > { %6154 = vmatpush1.bf16.msra.mxu0 %v4546_v22  ;;  %6523 = vmatpush1.bf16.msra.mxu1 %v4548_v23  ;;  %v4620_v22 = vld [vmem:[#allocation4 + $0xdf0] sm:$0xff]  ;;  %v4627_v23 = vld [vmem:[#allocation4 + $0xe28] sm:$0xff] }
 0x90b   : > { %6155 = vmatprep.subr.bf16.mxu0 %v4555_v24  ;;  %6524 = vmatprep.subr.bf16.mxu1 %v4557_v38  ;;  %v4629_v24 = vld [vmem:[#allocation4 + $0xe38] sm:$0xff]  ;;  %v4626_v38 = vld [vmem:[#allocation4 + $0xe20] sm:$0xff] }
 0x90e   : > { %6156 = vmatpush1.bf16.msra.mxu0 %v4554_v5  ;;  %6525 = vmatpush1.bf16.msra.mxu1 %v4556_v27  ;;  %v4628_v5 = vld [vmem:[#allocation4 + $0xe30] sm:$0xff]  ;;  %v4635_v27 = vld [vmem:[#allocation4 + $0xe68] sm:$0xff] }
 0x90f   : > { %6166 = vmatprep.subr.bf16.mxu0 %v4563_v8  ;;  %6535 = vmatprep.subr.bf16.mxu1 %v4565_v10  ;;  %v4637_v8 = vld [vmem:[#allocation4 + $0xe78] sm:$0xff]  ;;  %v4634_v10 = vld [vmem:[#allocation4 + $0xe60] sm:$0xff] }
 0x911   : > { %6158 = vmatmul.mubr.bf16.vlgmr.msra.gmra.mrb[4].mxu0 %v9227_v13  ;;  %6527 = vmatmul.mubr.bf16.vlgmr.msra.gmra.mrb[4].mxu1 %v9227_v13  ;;  %v4589_v13 = vld [vmem:[#allocation4 + $0xcf8] sm:$0xff] }
 0x912   : > { %6167 = vmatpush1.bf16.msra.mxu0 %v4562_v32  ;;  %6536 = vmatpush1.bf16.msra.mxu1 %v4564_v33  ;;  %v4636_v32 = vld [vmem:[#allocation4 + $0xe70] sm:$0xff]  ;;  %v4643_v33 = vld [vmem:[#allocation4 + $0xea8] sm:$0xff] }
 0x913   : > { %6168 = vmatprep.subr.bf16.mxu0 %v4571_v36  ;;  %6537 = vmatprep.subr.bf16.mxu1 %v4573_v39  ;;  %v4645_v36 = vld [vmem:[#allocation4 + $0xeb8] sm:$0xff]  ;;  %v4642_v39 = vld [vmem:[#allocation4 + $0xea0] sm:$0xff] }
 0x914   : > { %6198 = vmatprep.mubr.bf16.mxu0 %v9229_v17  ;;  %6567 = vmatprep.mubr.bf16.mxu1 %v9229_v17  ;;  %v4594_v17 = vld [vmem:[#allocation4 + $0xd20] sm:$0xff] }
 0x916   : > { %6169 = vmatpush1.bf16.msra.mxu0 %v4570_v42  ;;  %6538 = vmatpush1.bf16.msra.mxu1 %v4572_v43  ;;  %v4644_v42 = vld [vmem:[#allocation4 + $0xeb0] sm:$0xff]  ;;  %v4651_v43 = vld [vmem:[#allocation4 + $0xee8] sm:$0xff] }
 0x917   : > { %6170 = vmatprep.subr.bf16.mxu0 %v4579_v46  ;;  %6539 = vmatprep.subr.bf16.mxu1 %v4581_v47  ;;  %v4653_v46 = vld [vmem:[#allocation4 + $0xef8] sm:$0xff]  ;;  %v4650_v47 = vld [vmem:[#allocation4 + $0xee0] sm:$0xff] }
 0x91a   : > { %6171 = vmatpush1.bf16.msra.mxu0 %v4578_v53  ;;  %6540 = vmatpush1.bf16.msra.mxu1 %v4580_v58  ;;  %v4652_v53 = vld [vmem:[#allocation4 + $0xef0] sm:$0xff]  ;;  %v4659_v58 = vld [vmem:[#allocation4 + $0xf28] sm:$0xff] }
 0x91b   : > { %6172 = vmatprep.subr.bf16.mxu0 %v4587_v15  ;;  %6541 = vmatprep.subr.bf16.mxu1 %v4589_v13  ;;  %v4661_v15 = vld [vmem:[#allocation4 + $0xf38] sm:$0xff]  ;;  %v4658_v13 = vld [vmem:[#allocation4 + $0xf20] sm:$0xff] }
 0x91e   : > { %6173 = vmatpush1.bf16.msra.mxu0 %v4586_v37  ;;  %6542 = vmatpush1.bf16.msra.mxu1 %v4588_v59  ;;  %v4660_v37 = vld [vmem:[#allocation4 + $0xf30] sm:$0xff]  ;;  %v4667_v59 = vld [vmem:[#allocation4 + $0xf68] sm:$0xff] }
 0x91f   : > { %6174 = vmatprep.subr.bf16.mxu0 %v4595_v19  ;;  %6543 = vmatprep.subr.bf16.mxu1 %v4597_v40  ;;  %v4669_v19 = vld [vmem:[#allocation4 + $0xf78] sm:$0xff]  ;;  %v4666_v40 = vld [vmem:[#allocation4 + $0xf60] sm:$0xff] }
 0x922   : > { %6175 = vmatpush1.bf16.msra.mxu0 %v4594_v17  ;;  %6544 = vmatpush1.bf16.msra.mxu1 %v4596_v1  ;;  %v4668_v17 = vld [vmem:[#allocation4 + $0xf70] sm:$0xff]  ;;  %v4675_v1 = vld [vmem:[#allocation4 + $0xfa8] sm:$0xff] }
 0x923   : > { %6176 = vmatprep.subr.bf16.mxu0 %v4603_v31  ;;  %6545 = vmatprep.subr.bf16.mxu1 %v4605_v63  ;;  %v4677_v31 = vld [vmem:[#allocation4 + $0xfb8] sm:$0xff]  ;;  %v4674_v63 = vld [vmem:[#allocation4 + $0xfa0] sm:$0xff] }
 0x924   : > { %v9332_v45 = vpop.f32.mrb[0].mxu0  ;;  %v9334_v49 = vpop.f32.mrb[0].mxu1 }
 0x925   : > { %v9336_v14 = vpop.f32.mrb[1].mxu0  ;;  %v9338_v60 = vpop.f32.mrb[1].mxu1 }
 0x926   : > { %v5671_v20 = vpop.f32.mrb[2].mxu0  ;;  %v6040_v56 = vpop.f32.mrb[2].mxu1  ;;  %6177 = vmatpush1.bf16.msra.mxu0 %v4602_v44  ;;  %6546 = vmatpush1.bf16.msra.mxu1 %v4604_v34  ;;  %v4676_v44 = vld [vmem:[#allocation4 + $0xfb0] sm:$0xff]  ;;  %v4683_v34 = vld [vmem:[#allocation4 + $0xfe8] sm:$0xff] }
 0x927   : > { %v5672_v0 = vpop.f32.mrb[3].mxu0  ;;  %v6041_v2 = vpop.f32.mrb[3].mxu1  ;;  %6178 = vmatprep.subr.bf16.mxu0 %v4611_v16  ;;  %6547 = vmatprep.subr.bf16.mxu1 %v4613_v54  ;;  %v4685_v16 = vld [vmem:[#allocation4 + $0xff8] sm:$0xff]  ;;  %v4682_v54 = vld [vmem:[#allocation4 + $0xfe0] sm:$0xff]  ;;  %v4684_v20 = vld [vmem:[#allocation4 + $0xff0] sm:$0xff] }
 0x928   : > { %v4691_v56 = vld [vmem:[#allocation4 + $0x1028] sm:$0xff]  ;;  %v4693_v0 = vld [vmem:[#allocation4 + $0x1038] sm:$0xff]  ;;  %v4690_v2 = vld [vmem:[#allocation4 + $0x1020] sm:$0xff] }
 0x92a   : > { %6179 = vmatpush1.bf16.msra.mxu0 %v4610_v61  ;;  %6548 = vmatpush1.bf16.msra.mxu1 %v4612_v55  ;;  %v4692_v61 = vld [vmem:[#allocation4 + $0x1030] sm:$0xff]  ;;  %v4699_v55 = vld [vmem:[#allocation4 + $0x1068] sm:$0xff] }
 0x92b   : > { %6180 = vmatprep.subr.bf16.mxu0 %v4619_v62  ;;  %6549 = vmatprep.subr.bf16.mxu1 %v4621_v29  ;;  %v4701_v62 = vld [vmem:[#allocation4 + $0x1078] sm:$0xff]  ;;  %v4698_v29 = vld [vmem:[#allocation4 + $0x1060] sm:$0xff] }
 0x92e   : > { %6181 = vmatpush1.bf16.msra.mxu0 %v4618_v4  ;;  %6550 = vmatpush1.bf16.msra.mxu1 %v4620_v22  ;;  %v4700_v4 = vld [vmem:[#allocation4 + $0x1070] sm:$0xff]  ;;  %v4707_v22 = vld [vmem:[#allocation4 + $0x10a8] sm:$0xff] }
 0x92f   : > { %6182 = vmatprep.subr.bf16.mxu0 %v4627_v23  ;;  %6551 = vmatprep.subr.bf16.mxu1 %v4629_v24  ;;  %v4709_v23 = vld [vmem:[#allocation4 + $0x10b8] sm:$0xff]  ;;  %v4706_v24 = vld [vmem:[#allocation4 + $0x10a0] sm:$0xff] }
 0x932   : > { %6183 = vmatpush1.bf16.msra.mxu0 %v4626_v38  ;;  %6552 = vmatpush1.bf16.msra.mxu1 %v4628_v5  ;;  %v4708_v38 = vld [vmem:[#allocation4 + $0x10b0] sm:$0xff]  ;;  %v4715_v5 = vld [vmem:[#allocation4 + $0x10e8] sm:$0xff] }
 0x933   : > { %6184 = vmatprep.subr.bf16.mxu0 %v4635_v27  ;;  %6553 = vmatprep.subr.bf16.mxu1 %v4637_v8  ;;  %v4714_v27 = vld [vmem:[#allocation4 + $0x10e0] sm:$0xff]  ;;  %v4716_v8 = vld [vmem:[#allocation4 + $0x10f0] sm:$0xff] }
 0x936   : > { %6185 = vmatpush1.bf16.msra.mxu0 %v4634_v10  ;;  %6554 = vmatpush1.bf16.msra.mxu1 %v4636_v32  ;;  %v4723_v10 = vld [vmem:[#allocation4 + $0x1128] sm:$0xff]  ;;  %v4725_v32 = vld [vmem:[#allocation4 + $0x1138] sm:$0xff] }
 0x937   : > { %6186 = vmatprep.subr.bf16.mxu0 %v4643_v33  ;;  %6555 = vmatprep.subr.bf16.mxu1 %v4645_v36  ;;  %v4724_v33 = vld [vmem:[#allocation4 + $0x1130] sm:$0xff]  ;;  %v4731_v36 = vld [vmem:[#allocation4 + $0x1168] sm:$0xff] }
 0x93a   : > { %6187 = vmatpush1.bf16.msra.mxu0 %v4642_v39  ;;  %6556 = vmatpush1.bf16.msra.mxu1 %v4644_v42  ;;  %v4733_v39 = vld [vmem:[#allocation4 + $0x1178] sm:$0xff]  ;;  %v4730_v42 = vld [vmem:[#allocation4 + $0x1160] sm:$0xff] }
 0x93b   : > { %6188 = vmatprep.subr.bf16.mxu0 %v4651_v43  ;;  %6557 = vmatprep.subr.bf16.mxu1 %v4653_v46  ;;  %v4732_v43 = vld [vmem:[#allocation4 + $0x1170] sm:$0xff]  ;;  %v4739_v46 = vld [vmem:[#allocation4 + $0x11a8] sm:$0xff] }
 0x93e   : > { %6189 = vmatpush1.bf16.msra.mxu0 %v4650_v47  ;;  %6558 = vmatpush1.bf16.msra.mxu1 %v4652_v53  ;;  %v4741_v47 = vld [vmem:[#allocation4 + $0x11b8] sm:$0xff]  ;;  %v4738_v53 = vld [vmem:[#allocation4 + $0x11a0] sm:$0xff] }
 0x93f   : > { %6190 = vmatprep.subr.bf16.mxu0 %v4659_v58  ;;  %6559 = vmatprep.subr.bf16.mxu1 %v4661_v15  ;;  %v4740_v58 = vld [vmem:[#allocation4 + $0x11b0] sm:$0xff]  ;;  %v4747_v15 = vld [vmem:[#allocation4 + $0x11e8] sm:$0xff] }
 0x942   : > { %6191 = vmatpush1.bf16.msra.mxu0 %v4658_v13  ;;  %6560 = vmatpush1.bf16.msra.mxu1 %v4660_v37  ;;  %v4749_v13 = vld [vmem:[#allocation4 + $0x11f8] sm:$0xff]  ;;  %v4746_v37 = vld [vmem:[#allocation4 + $0x11e0] sm:$0xff] }
 0x943   : > { %6192 = vmatprep.subr.bf16.mxu0 %v4667_v59  ;;  %6561 = vmatprep.subr.bf16.mxu1 %v4669_v19  ;;  %v4748_v59 = vld [vmem:[#allocation4 + $0x11f0] sm:$0xff]  ;;  %v4755_v19 = vld [vmem:[#allocation4 + $0x1228] sm:$0xff] }
 0x946   : > { %6193 = vmatpush1.bf16.msra.mxu0 %v4666_v40  ;;  %6562 = vmatpush1.bf16.msra.mxu1 %v4668_v17  ;;  %v4757_v40 = vld [vmem:[#allocation4 + $0x1238] sm:$0xff]  ;;  %v4754_v17 = vld [vmem:[#allocation4 + $0x1220] sm:$0xff] }
 0x947   : > { %6194 = vmatprep.subr.bf16.mxu0 %v4675_v1  ;;  %6563 = vmatprep.subr.bf16.mxu1 %v4677_v31  ;;  %v4756_v1 = vld [vmem:[#allocation4 + $0x1230] sm:$0xff]  ;;  %v4763_v31 = vld [vmem:[#allocation4 + $0x1268] sm:$0xff] }
 0x94a   : > { %6195 = vmatpush1.bf16.msra.mxu0 %v4674_v63  ;;  %6564 = vmatpush1.bf16.msra.mxu1 %v4676_v44  ;;  %v4765_v63 = vld [vmem:[#allocation4 + $0x1278] sm:$0xff]  ;;  %v4762_v44 = vld [vmem:[#allocation4 + $0x1260] sm:$0xff] }
 0x94b   : > { %6196 = vmatprep.subr.bf16.mxu0 %v4683_v34  ;;  %6565 = vmatprep.subr.bf16.mxu1 %v4685_v16  ;;  %v4764_v34 = vld [vmem:[#allocation4 + $0x1270] sm:$0xff]  ;;  %v4771_v16 = vld [vmem:[#allocation4 + $0x12a8] sm:$0xff] }
 0x94e   : > { %6197 = vmatpush1.bf16.msra.mxu0 %v4682_v54  ;;  %6566 = vmatpush1.bf16.msra.mxu1 %v4684_v20  ;;  %v4773_v54 = vld [vmem:[#allocation4 + $0x12b8] sm:$0xff]  ;;  %v4770_v20 = vld [vmem:[#allocation4 + $0x12a0] sm:$0xff] }
 0x94f   : > { %6207 = vmatprep.subr.bf16.mxu0 %v4691_v56  ;;  %6576 = vmatprep.subr.bf16.mxu1 %v4693_v0  ;;  %v4772_v56 = vld [vmem:[#allocation4 + $0x12b0] sm:$0xff]  ;;  %v4779_v0 = vld [vmem:[#allocation4 + $0x12e8] sm:$0xff] }
 0x951   : > { %6199 = vmatmul.mubr.bf16.vlgmr.msra.gmra.mrb[4].mxu0 %v9249_v50  ;;  %6568 = vmatmul.mubr.bf16.vlgmr.msra.gmra.mrb[4].mxu1 %v9249_v50  ;;  %v4717_v50 = vld [vmem:[#allocation4 + $0x10f8] sm:$0xff] }
 0x952   : > { %6208 = vmatpush1.bf16.msra.mxu0 %v4690_v2  ;;  %6577 = vmatpush1.bf16.msra.mxu1 %v4692_v61  ;;  %v4781_v2 = vld [vmem:[#allocation4 + $0x12f8] sm:$0xff]  ;;  %v4778_v61 = vld [vmem:[#allocation4 + $0x12e0] sm:$0xff] }
 0x953   : > { %6209 = vmatprep.subr.bf16.mxu0 %v4699_v55  ;;  %6578 = vmatprep.subr.bf16.mxu1 %v4701_v62  ;;  %v4780_v55 = vld [vmem:[#allocation4 + $0x12f0] sm:$0xff]  ;;  %v4787_v62 = vld [vmem:[#allocation4 + $0x1328] sm:$0xff] }
 0x954   : > { %6239 = vmatprep.mubr.bf16.mxu0 %v9251_v51  ;;  %6608 = vmatprep.mubr.bf16.mxu1 %v9251_v51  ;;  %v4722_v51 = vld [vmem:[#allocation4 + $0x1120] sm:$0xff] }
 0x956   : > { %6210 = vmatpush1.bf16.msra.mxu0 %v4698_v29  ;;  %6579 = vmatpush1.bf16.msra.mxu1 %v4700_v4  ;;  %v4789_v29 = vld [vmem:[#allocation4 + $0x1338] sm:$0xff]  ;;  %v4786_v4 = vld [vmem:[#allocation4 + $0x1320] sm:$0xff] }
 0x957   : > { %6211 = vmatprep.subr.bf16.mxu0 %v4707_v22  ;;  %6580 = vmatprep.subr.bf16.mxu1 %v4709_v23  ;;  %v4788_v22 = vld [vmem:[#allocation4 + $0x1330] sm:$0xff]  ;;  %v4795_v23 = vld [vmem:[#allocation4 + $0x1368] sm:$0xff] }
 0x95a   : > { %6212 = vmatpush1.bf16.msra.mxu0 %v4706_v24  ;;  %6581 = vmatpush1.bf16.msra.mxu1 %v4708_v38  ;;  %v4797_v24 = vld [vmem:[#allocation4 + $0x1378] sm:$0xff]  ;;  %v4794_v38 = vld [vmem:[#allocation4 + $0x1360] sm:$0xff] }
 0x95b   : > { %6213 = vmatprep.subr.bf16.mxu0 %v4715_v5  ;;  %6582 = vmatprep.subr.bf16.mxu1 %v4717_v50  ;;  %v4796_v5 = vld [vmem:[#allocation4 + $0x1370] sm:$0xff]  ;;  %v4803_v50 = vld [vmem:[#allocation4 + $0x13a8] sm:$0xff] }
 0x95e   : > { %6214 = vmatpush1.bf16.msra.mxu0 %v4714_v27  ;;  %6583 = vmatpush1.bf16.msra.mxu1 %v4716_v8  ;;  %v4805_v27 = vld [vmem:[#allocation4 + $0x13b8] sm:$0xff]  ;;  %v4802_v8 = vld [vmem:[#allocation4 + $0x13a0] sm:$0xff] }
 0x95f   : > { %6215 = vmatprep.subr.bf16.mxu0 %v4723_v10  ;;  %6584 = vmatprep.subr.bf16.mxu1 %v4725_v32  ;;  %v4804_v10 = vld [vmem:[#allocation4 + $0x13b0] sm:$0xff]  ;;  %v4811_v32 = vld [vmem:[#allocation4 + $0x13e8] sm:$0xff] }
 0x962   : > { %6216 = vmatpush1.bf16.msra.mxu0 %v4722_v51  ;;  %6585 = vmatpush1.bf16.msra.mxu1 %v4724_v33  ;;  %v4813_v51 = vld [vmem:[#allocation4 + $0x13f8] sm:$0xff]  ;;  %v4810_v33 = vld [vmem:[#allocation4 + $0x13e0] sm:$0xff] }
 0x963   : > { %6217 = vmatprep.subr.bf16.mxu0 %v4731_v36  ;;  %6586 = vmatprep.subr.bf16.mxu1 %v4733_v39  ;;  %v4812_v36 = vld [vmem:[#allocation4 + $0x13f0] sm:$0xff]  ;;  %v4819_v39 = vld [vmem:[#allocation4 + $0x1428] sm:$0xff] }
 0x966   : > { %6218 = vmatpush1.bf16.msra.mxu0 %v4730_v42  ;;  %6587 = vmatpush1.bf16.msra.mxu1 %v4732_v43  ;;  %v4821_v42 = vld [vmem:[#allocation4 + $0x1438] sm:$0xff]  ;;  %v4818_v43 = vld [vmem:[#allocation4 + $0x1420] sm:$0xff] }
 0x967   : > { %6219 = vmatprep.subr.bf16.mxu0 %v4739_v46  ;;  %6588 = vmatprep.subr.bf16.mxu1 %v4741_v47  ;;  %v4820_v46 = vld [vmem:[#allocation4 + $0x1430] sm:$0xff]  ;;  %v4827_v47 = vld [vmem:[#allocation4 + $0x1468] sm:$0xff] }
 0x96a   : > { %6220 = vmatpush1.bf16.msra.mxu0 %v4738_v53  ;;  %6589 = vmatpush1.bf16.msra.mxu1 %v4740_v58  ;;  %v4829_v53 = vld [vmem:[#allocation4 + $0x1478] sm:$0xff]  ;;  %v4826_v58 = vld [vmem:[#allocation4 + $0x1460] sm:$0xff] }
 0x96b   : > { %6221 = vmatprep.subr.bf16.mxu0 %v4747_v15  ;;  %6590 = vmatprep.subr.bf16.mxu1 %v4749_v13  ;;  %v4828_v15 = vld [vmem:[#allocation4 + $0x1470] sm:$0xff]  ;;  %v4835_v13 = vld [vmem:[#allocation4 + $0x14a8] sm:$0xff] }
 0x96e   : > { %6222 = vmatpush1.bf16.msra.mxu0 %v4746_v37  ;;  %6591 = vmatpush1.bf16.msra.mxu1 %v4748_v59  ;;  %v4837_v37 = vld [vmem:[#allocation4 + $0x14b8] sm:$0xff]  ;;  %v4834_v59 = vld [vmem:[#allocation4 + $0x14a0] sm:$0xff] }
 0x96f   : > { %6223 = vmatprep.subr.bf16.mxu0 %v4755_v19  ;;  %6592 = vmatprep.subr.bf16.mxu1 %v4757_v40  ;;  %v4836_v19 = vld [vmem:[#allocation4 + $0x14b0] sm:$0xff]  ;;  %v4843_v40 = vld [vmem:[#allocation4 + $0x14e8] sm:$0xff] }
 0x972   : > { %6224 = vmatpush1.bf16.msra.mxu0 %v4754_v17  ;;  %6593 = vmatpush1.bf16.msra.mxu1 %v4756_v1  ;;  %v4842_v17 = vld [vmem:[#allocation4 + $0x14e0] sm:$0xff]  ;;  %v4844_v1 = vld [vmem:[#allocation4 + $0x14f0] sm:$0xff] }
 0x973   : > { %6225 = vmatprep.subr.bf16.mxu0 %v4763_v31  ;;  %6594 = vmatprep.subr.bf16.mxu1 %v4765_v63  ;;  %v4851_v31 = vld [vmem:[#allocation4 + $0x1528] sm:$0xff]  ;;  %v4853_v63 = vld [vmem:[#allocation4 + $0x1538] sm:$0xff] }
 0x976   : > { %6226 = vmatpush1.bf16.msra.mxu0 %v4762_v44  ;;  %6595 = vmatpush1.bf16.msra.mxu1 %v4764_v34  ;;  %v4852_v44 = vld [vmem:[#allocation4 + $0x1530] sm:$0xff]  ;;  %v4859_v34 = vld [vmem:[#allocation4 + $0x1568] sm:$0xff] }
 0x977   : > { %6227 = vmatprep.subr.bf16.mxu0 %v4771_v16  ;;  %6596 = vmatprep.subr.bf16.mxu1 %v4773_v54  ;;  %v4861_v16 = vld [vmem:[#allocation4 + $0x1578] sm:$0xff]  ;;  %v4858_v54 = vld [vmem:[#allocation4 + $0x1560] sm:$0xff] }
 0x97a   : > { %6228 = vmatpush1.bf16.msra.mxu0 %v4770_v20  ;;  %6597 = vmatpush1.bf16.msra.mxu1 %v4772_v56  ;;  %v4860_v20 = vld [vmem:[#allocation4 + $0x1570] sm:$0xff]  ;;  %v4867_v56 = vld [vmem:[#allocation4 + $0x15a8] sm:$0xff] }
 0x97b   : > { %6229 = vmatprep.subr.bf16.mxu0 %v4779_v0  ;;  %6598 = vmatprep.subr.bf16.mxu1 %v4781_v2  ;;  %v4869_v0 = vld [vmem:[#allocation4 + $0x15b8] sm:$0xff]  ;;  %v4866_v2 = vld [vmem:[#allocation4 + $0x15a0] sm:$0xff] }
 0x97e   : > { %6230 = vmatpush1.bf16.msra.mxu0 %v4778_v61  ;;  %6599 = vmatpush1.bf16.msra.mxu1 %v4780_v55  ;;  %v4868_v61 = vld [vmem:[#allocation4 + $0x15b0] sm:$0xff]  ;;  %v4875_v55 = vld [vmem:[#allocation4 + $0x15e8] sm:$0xff] }
 0x97f   : > { %6231 = vmatprep.subr.bf16.mxu0 %v4787_v62  ;;  %6600 = vmatprep.subr.bf16.mxu1 %v4789_v29  ;;  %v4877_v62 = vld [vmem:[#allocation4 + $0x15f8] sm:$0xff]  ;;  %v4874_v29 = vld [vmem:[#allocation4 + $0x15e0] sm:$0xff] }
 0x982   : > { %6232 = vmatpush1.bf16.msra.mxu0 %v4786_v4  ;;  %6601 = vmatpush1.bf16.msra.mxu1 %v4788_v22  ;;  %v4876_v4 = vld [vmem:[#allocation4 + $0x15f0] sm:$0xff]  ;;  %v4883_v22 = vld [vmem:[#allocation4 + $0x1628] sm:$0xff] }
 0x983   : > { %6233 = vmatprep.subr.bf16.mxu0 %v4795_v23  ;;  %6602 = vmatprep.subr.bf16.mxu1 %v4797_v24  ;;  %v4885_v23 = vld [vmem:[#allocation4 + $0x1638] sm:$0xff]  ;;  %v4882_v24 = vld [vmem:[#allocation4 + $0x1620] sm:$0xff] }
 0x986   : > { %6234 = vmatpush1.bf16.msra.mxu0 %v4794_v38  ;;  %6603 = vmatpush1.bf16.msra.mxu1 %v4796_v5  ;;  %v4884_v38 = vld [vmem:[#allocation4 + $0x1630] sm:$0xff]  ;;  %v4891_v5 = vld [vmem:[#allocation4 + $0x1668] sm:$0xff] }
 0x987   : > { %6235 = vmatprep.subr.bf16.mxu0 %v4803_v50  ;;  %6604 = vmatprep.subr.bf16.mxu1 %v4805_v27  ;;  %v4893_v50 = vld [vmem:[#allocation4 + $0x1678] sm:$0xff]  ;;  %v4890_v27 = vld [vmem:[#allocation4 + $0x1660] sm:$0xff] }
 0x98a   : > { %6236 = vmatpush1.bf16.msra.mxu0 %v4802_v8  ;;  %6605 = vmatpush1.bf16.msra.mxu1 %v4804_v10  ;;  %v4892_v8 = vld [vmem:[#allocation4 + $0x1670] sm:$0xff]  ;;  %v4899_v10 = vld [vmem:[#allocation4 + $0x16a8] sm:$0xff] }
 0x98b   : > { %6237 = vmatprep.subr.bf16.mxu0 %v4811_v32  ;;  %6606 = vmatprep.subr.bf16.mxu1 %v4813_v51  ;;  %v4901_v32 = vld [vmem:[#allocation4 + $0x16b8] sm:$0xff]  ;;  %v4898_v51 = vld [vmem:[#allocation4 + $0x16a0] sm:$0xff] }
 0x98e   : > { %6238 = vmatpush1.bf16.msra.mxu0 %v4810_v33  ;;  %6607 = vmatpush1.bf16.msra.mxu1 %v4812_v36  ;;  %v4900_v33 = vld [vmem:[#allocation4 + $0x16b0] sm:$0xff]  ;;  %v4907_v36 = vld [vmem:[#allocation4 + $0x16e8] sm:$0xff] }
 0x98f   : > { %6248 = vmatprep.subr.bf16.mxu0 %v4819_v39  ;;  %6617 = vmatprep.subr.bf16.mxu1 %v4821_v42  ;;  %v4909_v39 = vld [vmem:[#allocation4 + $0x16f8] sm:$0xff]  ;;  %v4906_v42 = vld [vmem:[#allocation4 + $0x16e0] sm:$0xff] }
 0x991   : > { %6240 = vmatmul.mubr.bf16.vlgmr.msra.gmra.mrb[4].mxu0 %v9265_v26  ;;  %6609 = vmatmul.mubr.bf16.vlgmr.msra.gmra.mrb[4].mxu1 %v9265_v26  ;;  %v4845_v26 = vld [vmem:[#allocation4 + $0x14f8] sm:$0xff] }
 0x992   : > { %6249 = vmatpush1.bf16.msra.mxu0 %v4818_v43  ;;  %6618 = vmatpush1.bf16.msra.mxu1 %v4820_v46  ;;  %v4908_v43 = vld [vmem:[#allocation4 + $0x16f0] sm:$0xff]  ;;  %v4915_v46 = vld [vmem:[#allocation4 + $0x1728] sm:$0xff] }
 0x993   : > { %6250 = vmatprep.subr.bf16.mxu0 %v4827_v47  ;;  %6619 = vmatprep.subr.bf16.mxu1 %v4829_v53  ;;  %v4917_v47 = vld [vmem:[#allocation4 + $0x1738] sm:$0xff]  ;;  %v4914_v53 = vld [vmem:[#allocation4 + $0x1720] sm:$0xff] }
 0x994   : > { %6280 = vmatprep.mubr.bf16.mxu0 %v9267_v30  ;;  %6649 = vmatprep.mubr.bf16.mxu1 %v9267_v30  ;;  %v4850_v30 = vld [vmem:[#allocation4 + $0x1520] sm:$0xff] }
 0x996   : > { %6251 = vmatpush1.bf16.msra.mxu0 %v4826_v58  ;;  %6620 = vmatpush1.bf16.msra.mxu1 %v4828_v15  ;;  %v4916_v58 = vld [vmem:[#allocation4 + $0x1730] sm:$0xff]  ;;  %v4923_v15 = vld [vmem:[#allocation4 + $0x1768] sm:$0xff] }
 0x997   : > { %6252 = vmatprep.subr.bf16.mxu0 %v4835_v13  ;;  %6621 = vmatprep.subr.bf16.mxu1 %v4837_v37  ;;  %v4925_v13 = vld [vmem:[#allocation4 + $0x1778] sm:$0xff]  ;;  %v4922_v37 = vld [vmem:[#allocation4 + $0x1760] sm:$0xff] }
 0x99a   : > { %6253 = vmatpush1.bf16.msra.mxu0 %v4834_v59  ;;  %6622 = vmatpush1.bf16.msra.mxu1 %v4836_v19  ;;  %v4924_v59 = vld [vmem:[#allocation4 + $0x1770] sm:$0xff]  ;;  %v4931_v19 = vld [vmem:[#allocation4 + $0x17a8] sm:$0xff] }
 0x99b   : > { %6254 = vmatprep.subr.bf16.mxu0 %v4843_v40  ;;  %6623 = vmatprep.subr.bf16.mxu1 %v4845_v26  ;;  %v4933_v40 = vld [vmem:[#allocation4 + $0x17b8] sm:$0xff]  ;;  %v4930_v26 = vld [vmem:[#allocation4 + $0x17a0] sm:$0xff] }
 0x99e   : > { %6255 = vmatpush1.bf16.msra.mxu0 %v4842_v17  ;;  %6624 = vmatpush1.bf16.msra.mxu1 %v4844_v1  ;;  %v4932_v17 = vld [vmem:[#allocation4 + $0x17b0] sm:$0xff]  ;;  %v4939_v1 = vld [vmem:[#allocation4 + $0x17e8] sm:$0xff] }
 0x99f   : > { %6256 = vmatprep.subr.bf16.mxu0 %v4851_v31  ;;  %6625 = vmatprep.subr.bf16.mxu1 %v4853_v63  ;;  %v4941_v31 = vld [vmem:[#allocation4 + $0x17f8] sm:$0xff]  ;;  %v4938_v63 = vld [vmem:[#allocation4 + $0x17e0] sm:$0xff] }
 0x9a2   : > { %6257 = vmatpush1.bf16.msra.mxu0 %v4850_v30  ;;  %6626 = vmatpush1.bf16.msra.mxu1 %v4852_v44  ;;  %v4940_v30 = vld [vmem:[#allocation4 + $0x17f0] sm:$0xff]  ;;  %v4947_v44 = vld [vmem:[#allocation4 + $0x1828] sm:$0xff] }
 0x9a3   : > { %6258 = vmatprep.subr.bf16.mxu0 %v4859_v34  ;;  %6627 = vmatprep.subr.bf16.mxu1 %v4861_v16  ;;  %v4949_v34 = vld [vmem:[#allocation4 + $0x1838] sm:$0xff]  ;;  %v4946_v16 = vld [vmem:[#allocation4 + $0x1820] sm:$0xff] }
 0x9a6   : > { %6259 = vmatpush1.bf16.msra.mxu0 %v4858_v54  ;;  %6628 = vmatpush1.bf16.msra.mxu1 %v4860_v20  ;;  %v4948_v54 = vld [vmem:[#allocation4 + $0x1830] sm:$0xff]  ;;  %v4955_v20 = vld [vmem:[#allocation4 + $0x1868] sm:$0xff] }
 0x9a7   : > { %6260 = vmatprep.subr.bf16.mxu0 %v4867_v56  ;;  %6629 = vmatprep.subr.bf16.mxu1 %v4869_v0  ;;  %v4957_v56 = vld [vmem:[#allocation4 + $0x1878] sm:$0xff]  ;;  %v4954_v0 = vld [vmem:[#allocation4 + $0x1860] sm:$0xff] }
 0x9aa   : > { %6261 = vmatpush1.bf16.msra.mxu0 %v4866_v2  ;;  %6630 = vmatpush1.bf16.msra.mxu1 %v4868_v61  ;;  %v4956_v2 = vld [vmem:[#allocation4 + $0x1870] sm:$0xff]  ;;  %v4963_v61 = vld [vmem:[#allocation4 + $0x18a8] sm:$0xff] }
 0x9ab   : > { %6262 = vmatprep.subr.bf16.mxu0 %v4875_v55  ;;  %6631 = vmatprep.subr.bf16.mxu1 %v4877_v62  ;;  %v4965_v55 = vld [vmem:[#allocation4 + $0x18b8] sm:$0xff]  ;;  %v4962_v62 = vld [vmem:[#allocation4 + $0x18a0] sm:$0xff] }
 0x9ae   : > { %6263 = vmatpush1.bf16.msra.mxu0 %v4874_v29  ;;  %6632 = vmatpush1.bf16.msra.mxu1 %v4876_v4  ;;  %v4964_v29 = vld [vmem:[#allocation4 + $0x18b0] sm:$0xff]  ;;  %v4971_v4 = vld [vmem:[#allocation4 + $0x18e8] sm:$0xff] }
 0x9af   : > { %6264 = vmatprep.subr.bf16.mxu0 %v4883_v22  ;;  %6633 = vmatprep.subr.bf16.mxu1 %v4885_v23  ;;  %v4970_v22 = vld [vmem:[#allocation4 + $0x18e0] sm:$0xff]  ;;  %v4972_v23 = vld [vmem:[#allocation4 + $0x18f0] sm:$0xff] }
 0x9b2   : > { %6265 = vmatpush1.bf16.msra.mxu0 %v4882_v24  ;;  %6634 = vmatpush1.bf16.msra.mxu1 %v4884_v38  ;;  %v4979_v24 = vld [vmem:[#allocation4 + $0x1928] sm:$0xff]  ;;  %v4981_v38 = vld [vmem:[#allocation4 + $0x1938] sm:$0xff] }
 0x9b3   : > { %6266 = vmatprep.subr.bf16.mxu0 %v4891_v5  ;;  %6635 = vmatprep.subr.bf16.mxu1 %v4893_v50  ;;  %v4980_v5 = vld [vmem:[#allocation4 + $0x1930] sm:$0xff]  ;;  %v4987_v50 = vld [vmem:[#allocation4 + $0x1968] sm:$0xff] }
 0x9b6   : > { %6267 = vmatpush1.bf16.msra.mxu0 %v4890_v27  ;;  %6636 = vmatpush1.bf16.msra.mxu1 %v4892_v8  ;;  %v4989_v27 = vld [vmem:[#allocation4 + $0x1978] sm:$0xff]  ;;  %v4986_v8 = vld [vmem:[#allocation4 + $0x1960] sm:$0xff] }
 0x9b7   : > { %6268 = vmatprep.subr.bf16.mxu0 %v4899_v10  ;;  %6637 = vmatprep.subr.bf16.mxu1 %v4901_v32  ;;  %v4988_v10 = vld [vmem:[#allocation4 + $0x1970] sm:$0xff]  ;;  %v4995_v32 = vld [vmem:[#allocation4 + $0x19a8] sm:$0xff] }
 0x9ba   : > { %6269 = vmatpush1.bf16.msra.mxu0 %v4898_v51  ;;  %6638 = vmatpush1.bf16.msra.mxu1 %v4900_v33  ;;  %v4997_v51 = vld [vmem:[#allocation4 + $0x19b8] sm:$0xff]  ;;  %v4994_v33 = vld [vmem:[#allocation4 + $0x19a0] sm:$0xff] }
 0x9bb   : > { %6270 = vmatprep.subr.bf16.mxu0 %v4907_v36  ;;  %6639 = vmatprep.subr.bf16.mxu1 %v4909_v39  ;;  %v4996_v36 = vld [vmem:[#allocation4 + $0x19b0] sm:$0xff]  ;;  %v5003_v39 = vld [vmem:[#allocation4 + $0x19e8] sm:$0xff] }
 0x9be   : > { %6271 = vmatpush1.bf16.msra.mxu0 %v4906_v42  ;;  %6640 = vmatpush1.bf16.msra.mxu1 %v4908_v43  ;;  %v5005_v42 = vld [vmem:[#allocation4 + $0x19f8] sm:$0xff]  ;;  %v5002_v43 = vld [vmem:[#allocation4 + $0x19e0] sm:$0xff] }
 0x9bf   : > { %6272 = vmatprep.subr.bf16.mxu0 %v4915_v46  ;;  %6641 = vmatprep.subr.bf16.mxu1 %v4917_v47  ;;  %v5004_v46 = vld [vmem:[#allocation4 + $0x19f0] sm:$0xff]  ;;  %v5011_v47 = vld [vmem:[#allocation4 + $0x1a28] sm:$0xff] }
 0x9c2   : > { %6273 = vmatpush1.bf16.msra.mxu0 %v4914_v53  ;;  %6642 = vmatpush1.bf16.msra.mxu1 %v4916_v58  ;;  %v5013_v53 = vld [vmem:[#allocation4 + $0x1a38] sm:$0xff]  ;;  %v5010_v58 = vld [vmem:[#allocation4 + $0x1a20] sm:$0xff] }
 0x9c3   : > { %6274 = vmatprep.subr.bf16.mxu0 %v4923_v15  ;;  %6643 = vmatprep.subr.bf16.mxu1 %v4925_v13  ;;  %v5012_v15 = vld [vmem:[#allocation4 + $0x1a30] sm:$0xff]  ;;  %v5019_v13 = vld [vmem:[#allocation4 + $0x1a68] sm:$0xff] }
 0x9c6   : > { %6275 = vmatpush1.bf16.msra.mxu0 %v4922_v37  ;;  %6644 = vmatpush1.bf16.msra.mxu1 %v4924_v59  ;;  %v5021_v37 = vld [vmem:[#allocation4 + $0x1a78] sm:$0xff]  ;;  %v5018_v59 = vld [vmem:[#allocation4 + $0x1a60] sm:$0xff] }
 0x9c7   : > { %6276 = vmatprep.subr.bf16.mxu0 %v4931_v19  ;;  %6645 = vmatprep.subr.bf16.mxu1 %v4933_v40  ;;  %v5020_v19 = vld [vmem:[#allocation4 + $0x1a70] sm:$0xff]  ;;  %v5027_v40 = vld [vmem:[#allocation4 + $0x1aa8] sm:$0xff] }
 0x9ca   : > { %6277 = vmatpush1.bf16.msra.mxu0 %v4930_v26  ;;  %6646 = vmatpush1.bf16.msra.mxu1 %v4932_v17  ;;  %v5029_v26 = vld [vmem:[#allocation4 + $0x1ab8] sm:$0xff]  ;;  %v5026_v17 = vld [vmem:[#allocation4 + $0x1aa0] sm:$0xff] }
 0x9cb   : > { %6278 = vmatprep.subr.bf16.mxu0 %v4939_v1  ;;  %6647 = vmatprep.subr.bf16.mxu1 %v4941_v31  ;;  %v5028_v1 = vld [vmem:[#allocation4 + $0x1ab0] sm:$0xff]  ;;  %v5035_v31 = vld [vmem:[#allocation4 + $0x1ae8] sm:$0xff] }
 0x9ce   : > { %6279 = vmatpush1.bf16.msra.mxu0 %v4938_v63  ;;  %6648 = vmatpush1.bf16.msra.mxu1 %v4940_v30  ;;  %v5037_v63 = vld [vmem:[#allocation4 + $0x1af8] sm:$0xff]  ;;  %v5034_v30 = vld [vmem:[#allocation4 + $0x1ae0] sm:$0xff] }
 0x9cf   : > { %6289 = vmatprep.subr.bf16.mxu0 %v4947_v44  ;;  %6658 = vmatprep.subr.bf16.mxu1 %v4949_v34  ;;  %v5036_v44 = vld [vmem:[#allocation4 + $0x1af0] sm:$0xff]  ;;  %v5043_v34 = vld [vmem:[#allocation4 + $0x1b28] sm:$0xff] }
 0x9d1   : > { %6281 = vmatmul.mubr.bf16.vlgmr.msra.gmra.mrb[4].mxu0 %v9281_v3  ;;  %6650 = vmatmul.mubr.bf16.vlgmr.msra.gmra.mrb[4].mxu1 %v9281_v3  ;;  %v4973_v3 = vld [vmem:[#allocation4 + $0x18f8] sm:$0xff] }
 0x9d2   : > { %6290 = vmatpush1.bf16.msra.mxu0 %v4946_v16  ;;  %6659 = vmatpush1.bf16.msra.mxu1 %v4948_v54  ;;  %v5045_v16 = vld [vmem:[#allocation4 + $0x1b38] sm:$0xff]  ;;  %v5042_v54 = vld [vmem:[#allocation4 + $0x1b20] sm:$0xff] }
 0x9d3   : > { %6291 = vmatprep.subr.bf16.mxu0 %v4955_v20  ;;  %6660 = vmatprep.subr.bf16.mxu1 %v4957_v56  ;;  %v5044_v20 = vld [vmem:[#allocation4 + $0x1b30] sm:$0xff]  ;;  %v5051_v56 = vld [vmem:[#allocation4 + $0x1b68] sm:$0xff] }
 0x9d4   : > { %6321 = vmatprep.mubr.bf16.mxu0 %v9283_v21  ;;  %6690 = vmatprep.mubr.bf16.mxu1 %v9283_v21  ;;  %v4978_v21 = vld [vmem:[#allocation4 + $0x1920] sm:$0xff] }
 0x9d6   : > { %6292 = vmatpush1.bf16.msra.mxu0 %v4954_v0  ;;  %6661 = vmatpush1.bf16.msra.mxu1 %v4956_v2  ;;  %v5053_v0 = vld [vmem:[#allocation4 + $0x1b78] sm:$0xff]  ;;  %v5050_v2 = vld [vmem:[#allocation4 + $0x1b60] sm:$0xff] }
 0x9d7   : > { %6293 = vmatprep.subr.bf16.mxu0 %v4963_v61  ;;  %6662 = vmatprep.subr.bf16.mxu1 %v4965_v55  ;;  %v5052_v61 = vld [vmem:[#allocation4 + $0x1b70] sm:$0xff]  ;;  %v5059_v55 = vld [vmem:[#allocation4 + $0x1ba8] sm:$0xff] }
 0x9da   : > { %6294 = vmatpush1.bf16.msra.mxu0 %v4962_v62  ;;  %6663 = vmatpush1.bf16.msra.mxu1 %v4964_v29  ;;  %v5061_v62 = vld [vmem:[#allocation4 + $0x1bb8] sm:$0xff]  ;;  %v5058_v29 = vld [vmem:[#allocation4 + $0x1ba0] sm:$0xff] }
 0x9db   : > { %6295 = vmatprep.subr.bf16.mxu0 %v4971_v4  ;;  %6664 = vmatprep.subr.bf16.mxu1 %v4973_v3  ;;  %v5060_v4 = vld [vmem:[#allocation4 + $0x1bb0] sm:$0xff]  ;;  %v5067_v3 = vld [vmem:[#allocation4 + $0x1be8] sm:$0xff] }
 0x9de   : > { %6296 = vmatpush1.bf16.msra.mxu0 %v4970_v22  ;;  %6665 = vmatpush1.bf16.msra.mxu1 %v4972_v23  ;;  %v5069_v22 = vld [vmem:[#allocation4 + $0x1bf8] sm:$0xff]  ;;  %v5066_v23 = vld [vmem:[#allocation4 + $0x1be0] sm:$0xff] }
 0x9df   : > { %6297 = vmatprep.subr.bf16.mxu0 %v4979_v24  ;;  %6666 = vmatprep.subr.bf16.mxu1 %v4981_v38  ;;  %v5068_v24 = vld [vmem:[#allocation4 + $0x1bf0] sm:$0xff]  ;;  %v5075_v38 = vld [vmem:[#allocation4 + $0x1c28] sm:$0xff] }
 0x9e2   : > { %6298 = vmatpush1.bf16.msra.mxu0 %v4978_v21  ;;  %6667 = vmatpush1.bf16.msra.mxu1 %v4980_v5  ;;  %v5077_v21 = vld [vmem:[#allocation4 + $0x1c38] sm:$0xff]  ;;  %v5074_v5 = vld [vmem:[#allocation4 + $0x1c20] sm:$0xff] }
 0x9e3   : > { %6299 = vmatprep.subr.bf16.mxu0 %v4987_v50  ;;  %6668 = vmatprep.subr.bf16.mxu1 %v4989_v27  ;;  %v5076_v50 = vld [vmem:[#allocation4 + $0x1c30] sm:$0xff]  ;;  %v5083_v27 = vld [vmem:[#allocation4 + $0x1c68] sm:$0xff] }
 0x9e6   : > { %6300 = vmatpush1.bf16.msra.mxu0 %v4986_v8  ;;  %6669 = vmatpush1.bf16.msra.mxu1 %v4988_v10  ;;  %v5085_v8 = vld [vmem:[#allocation4 + $0x1c78] sm:$0xff]  ;;  %v5082_v10 = vld [vmem:[#allocation4 + $0x1c60] sm:$0xff] }
 0x9e7   : > { %6301 = vmatprep.subr.bf16.mxu0 %v4995_v32  ;;  %6670 = vmatprep.subr.bf16.mxu1 %v4997_v51  ;;  %v5084_v32 = vld [vmem:[#allocation4 + $0x1c70] sm:$0xff]  ;;  %v5091_v51 = vld [vmem:[#allocation4 + $0x1ca8] sm:$0xff] }
 0x9ea   : > { %6302 = vmatpush1.bf16.msra.mxu0 %v4994_v33  ;;  %6671 = vmatpush1.bf16.msra.mxu1 %v4996_v36  ;;  %v5093_v33 = vld [vmem:[#allocation4 + $0x1cb8] sm:$0xff]  ;;  %v5090_v36 = vld [vmem:[#allocation4 + $0x1ca0] sm:$0xff] }
 0x9eb   : > { %6303 = vmatprep.subr.bf16.mxu0 %v5003_v39  ;;  %6672 = vmatprep.subr.bf16.mxu1 %v5005_v42  ;;  %v5092_v39 = vld [vmem:[#allocation4 + $0x1cb0] sm:$0xff]  ;;  %v5099_v42 = vld [vmem:[#allocation4 + $0x1ce8] sm:$0xff] }
 0x9ee   : > { %6304 = vmatpush1.bf16.msra.mxu0 %v5002_v43  ;;  %6673 = vmatpush1.bf16.msra.mxu1 %v5004_v46  ;;  %v5098_v43 = vld [vmem:[#allocation4 + $0x1ce0] sm:$0xff]  ;;  %v5100_v46 = vld [vmem:[#allocation4 + $0x1cf0] sm:$0xff] }
 0x9ef   : > { %6305 = vmatprep.subr.bf16.mxu0 %v5011_v47  ;;  %6674 = vmatprep.subr.bf16.mxu1 %v5013_v53  ;;  %v5107_v47 = vld [vmem:[#allocation4 + $0x1d28] sm:$0xff]  ;;  %v5109_v53 = vld [vmem:[#allocation4 + $0x1d38] sm:$0xff] }
 0x9f2   : > { %6306 = vmatpush1.bf16.msra.mxu0 %v5010_v58  ;;  %6675 = vmatpush1.bf16.msra.mxu1 %v5012_v15  ;;  %v5108_v58 = vld [vmem:[#allocation4 + $0x1d30] sm:$0xff]  ;;  %v5115_v15 = vld [vmem:[#allocation4 + $0x1d68] sm:$0xff] }
 0x9f3   : > { %6307 = vmatprep.subr.bf16.mxu0 %v5019_v13  ;;  %6676 = vmatprep.subr.bf16.mxu1 %v5021_v37  ;;  %v5117_v13 = vld [vmem:[#allocation4 + $0x1d78] sm:$0xff]  ;;  %v5114_v37 = vld [vmem:[#allocation4 + $0x1d60] sm:$0xff] }
 0x9f6   : > { %6308 = vmatpush1.bf16.msra.mxu0 %v5018_v59  ;;  %6677 = vmatpush1.bf16.msra.mxu1 %v5020_v19  ;;  %v5116_v59 = vld [vmem:[#allocation4 + $0x1d70] sm:$0xff]  ;;  %v5123_v19 = vld [vmem:[#allocation4 + $0x1da8] sm:$0xff] }
 0x9f7   : > { %6309 = vmatprep.subr.bf16.mxu0 %v5027_v40  ;;  %6678 = vmatprep.subr.bf16.mxu1 %v5029_v26  ;;  %v5125_v40 = vld [vmem:[#allocation4 + $0x1db8] sm:$0xff]  ;;  %v5122_v26 = vld [vmem:[#allocation4 + $0x1da0] sm:$0xff] }
 0x9fa   : > { %6310 = vmatpush1.bf16.msra.mxu0 %v5026_v17  ;;  %6679 = vmatpush1.bf16.msra.mxu1 %v5028_v1  ;;  %v5124_v17 = vld [vmem:[#allocation4 + $0x1db0] sm:$0xff]  ;;  %v5131_v1 = vld [vmem:[#allocation4 + $0x1de8] sm:$0xff] }
 0x9fb   : > { %6311 = vmatprep.subr.bf16.mxu0 %v5035_v31  ;;  %6680 = vmatprep.subr.bf16.mxu1 %v5037_v63  ;;  %v5133_v31 = vld [vmem:[#allocation4 + $0x1df8] sm:$0xff]  ;;  %v5130_v63 = vld [vmem:[#allocation4 + $0x1de0] sm:$0xff] }
 0x9fe   : > { %6312 = vmatpush1.bf16.msra.mxu0 %v5034_v30  ;;  %6681 = vmatpush1.bf16.msra.mxu1 %v5036_v44  ;;  %v5132_v30 = vld [vmem:[#allocation4 + $0x1df0] sm:$0xff]  ;;  %v5139_v44 = vld [vmem:[#allocation4 + $0x1e28] sm:$0xff] }
 0x9ff   : > { %6313 = vmatprep.subr.bf16.mxu0 %v5043_v34  ;;  %6682 = vmatprep.subr.bf16.mxu1 %v5045_v16  ;;  %v5141_v34 = vld [vmem:[#allocation4 + $0x1e38] sm:$0xff]  ;;  %v5138_v16 = vld [vmem:[#allocation4 + $0x1e20] sm:$0xff] }
 0xa02   : > { %6314 = vmatpush1.bf16.msra.mxu0 %v5042_v54  ;;  %6683 = vmatpush1.bf16.msra.mxu1 %v5044_v20  ;;  %v5140_v54 = vld [vmem:[#allocation4 + $0x1e30] sm:$0xff]  ;;  %v5147_v20 = vld [vmem:[#allocation4 + $0x1e68] sm:$0xff] }
 0xa03   : > { %6315 = vmatprep.subr.bf16.mxu0 %v5051_v56  ;;  %6684 = vmatprep.subr.bf16.mxu1 %v5053_v0  ;;  %v5149_v56 = vld [vmem:[#allocation4 + $0x1e78] sm:$0xff]  ;;  %v5146_v0 = vld [vmem:[#allocation4 + $0x1e60] sm:$0xff] }
 0xa06   : > { %6316 = vmatpush1.bf16.msra.mxu0 %v5050_v2  ;;  %6685 = vmatpush1.bf16.msra.mxu1 %v5052_v61  ;;  %v5148_v2 = vld [vmem:[#allocation4 + $0x1e70] sm:$0xff]  ;;  %v5155_v61 = vld [vmem:[#allocation4 + $0x1ea8] sm:$0xff] }
 0xa07   : > { %6317 = vmatprep.subr.bf16.mxu0 %v5059_v55  ;;  %6686 = vmatprep.subr.bf16.mxu1 %v5061_v62  ;;  %v5157_v55 = vld [vmem:[#allocation4 + $0x1eb8] sm:$0xff]  ;;  %v5154_v62 = vld [vmem:[#allocation4 + $0x1ea0] sm:$0xff] }
 0xa0a   : > { %6318 = vmatpush1.bf16.msra.mxu0 %v5058_v29  ;;  %6687 = vmatpush1.bf16.msra.mxu1 %v5060_v4  ;;  %v5156_v29 = vld [vmem:[#allocation4 + $0x1eb0] sm:$0xff]  ;;  %v5163_v4 = vld [vmem:[#allocation4 + $0x1ee8] sm:$0xff] }
 0xa0b   : > { %6319 = vmatprep.subr.bf16.mxu0 %v5067_v3  ;;  %6688 = vmatprep.subr.bf16.mxu1 %v5069_v22  ;;  %v5165_v3 = vld [vmem:[#allocation4 + $0x1ef8] sm:$0xff]  ;;  %v5162_v22 = vld [vmem:[#allocation4 + $0x1ee0] sm:$0xff] }
 0xa0e   : > { %6320 = vmatpush1.bf16.msra.mxu0 %v5066_v23  ;;  %6689 = vmatpush1.bf16.msra.mxu1 %v5068_v24  ;;  %v5164_v23 = vld [vmem:[#allocation4 + $0x1ef0] sm:$0xff]  ;;  %v5171_v24 = vld [vmem:[#allocation4 + $0x1f28] sm:$0xff] }
 0xa0f   : > { %6330 = vmatprep.subr.bf16.mxu0 %v5075_v38  ;;  %6699 = vmatprep.subr.bf16.mxu1 %v5077_v21  ;;  %v5173_v38 = vld [vmem:[#allocation4 + $0x1f38] sm:$0xff]  ;;  %v5170_v21 = vld [vmem:[#allocation4 + $0x1f20] sm:$0xff] }
 0xa11   : > { %6322 = vmatmul.mubr.bf16.vlgmr.msra.gmra.mrb[4].mxu0 %v9297_v12  ;;  %6691 = vmatmul.mubr.bf16.vlgmr.msra.gmra.mrb[4].mxu1 %v9297_v12  ;;  %v5101_v12 = vld [vmem:[#allocation4 + $0x1cf8] sm:$0xff] }
 0xa12   : > { %6331 = vmatpush1.bf16.msra.mxu0 %v5074_v5  ;;  %6700 = vmatpush1.bf16.msra.mxu1 %v5076_v50  ;;  %v5172_v5 = vld [vmem:[#allocation4 + $0x1f30] sm:$0xff]  ;;  %v5179_v50 = vld [vmem:[#allocation4 + $0x1f68] sm:$0xff] }
 0xa13   : > { %6332 = vmatprep.subr.bf16.mxu0 %v5083_v27  ;;  %6701 = vmatprep.subr.bf16.mxu1 %v5085_v8  ;;  %v5181_v27 = vld [vmem:[#allocation4 + $0x1f78] sm:$0xff]  ;;  %v5178_v8 = vld [vmem:[#allocation4 + $0x1f60] sm:$0xff] }
 0xa14   : > { %6362 = vmatprep.mubr.bf16.mxu0 %v9299_v6  ;;  %6731 = vmatprep.mubr.bf16.mxu1 %v9299_v6  ;;  %v5106_v6 = vld [vmem:[#allocation4 + $0x1d20] sm:$0xff] }
 0xa16   : > { %6333 = vmatpush1.bf16.msra.mxu0 %v5082_v10  ;;  %6702 = vmatpush1.bf16.msra.mxu1 %v5084_v32  ;;  %v5180_v10 = vld [vmem:[#allocation4 + $0x1f70] sm:$0xff]  ;;  %v5187_v32 = vld [vmem:[#allocation4 + $0x1fa8] sm:$0xff] }
 0xa17   : > { %6334 = vmatprep.subr.bf16.mxu0 %v5091_v51  ;;  %6703 = vmatprep.subr.bf16.mxu1 %v5093_v33  ;;  %v5189_v51 = vld [vmem:[#allocation4 + $0x1fb8] sm:$0xff]  ;;  %v5186_v33 = vld [vmem:[#allocation4 + $0x1fa0] sm:$0xff] }
 0xa1a   : > { %6335 = vmatpush1.bf16.msra.mxu0 %v5090_v36  ;;  %6704 = vmatpush1.bf16.msra.mxu1 %v5092_v39  ;;  %v5188_v36 = vld [vmem:[#allocation4 + $0x1fb0] sm:$0xff]  ;;  %v5195_v39 = vld [vmem:[#allocation4 + $0x1fe8] sm:$0xff] }
 0xa1b   : > { %6336 = vmatprep.subr.bf16.mxu0 %v5099_v42  ;;  %6705 = vmatprep.subr.bf16.mxu1 %v5101_v12  ;;  %v5197_v42 = vld [vmem:[#allocation4 + $0x1ff8] sm:$0xff]  ;;  %v5194_v12 = vld [vmem:[#allocation4 + $0x1fe0] sm:$0xff] }
 0xa1e   : > { %6337 = vmatpush1.bf16.msra.mxu0 %v5098_v43  ;;  %6706 = vmatpush1.bf16.msra.mxu1 %v5100_v46  ;;  %v5196_v43 = vld [vmem:[#allocation4 + $0x1ff0] sm:$0xff]  ;;  %v5203_v46 = vld [vmem:[#allocation4 + $0x2028] sm:$0xff] }
 0xa1f   : > { %6338 = vmatprep.subr.bf16.mxu0 %v5107_v47  ;;  %6707 = vmatprep.subr.bf16.mxu1 %v5109_v53  ;;  %v5205_v47 = vld [vmem:[#allocation4 + $0x2038] sm:$0xff]  ;;  %v5202_v53 = vld [vmem:[#allocation4 + $0x2020] sm:$0xff] }
 0xa22   : > { %6339 = vmatpush1.bf16.msra.mxu0 %v5106_v6  ;;  %6708 = vmatpush1.bf16.msra.mxu1 %v5108_v58  ;;  %v5204_v6 = vld [vmem:[#allocation4 + $0x2030] sm:$0xff]  ;;  %v5211_v58 = vld [vmem:[#allocation4 + $0x2068] sm:$0xff] }
 0xa23   : > { %6340 = vmatprep.subr.bf16.mxu0 %v5115_v15  ;;  %6709 = vmatprep.subr.bf16.mxu1 %v5117_v13  ;;  %v5213_v15 = vld [vmem:[#allocation4 + $0x2078] sm:$0xff]  ;;  %v5210_v13 = vld [vmem:[#allocation4 + $0x2060] sm:$0xff] }
 0xa26   : > { %6341 = vmatpush1.bf16.msra.mxu0 %v5114_v37  ;;  %6710 = vmatpush1.bf16.msra.mxu1 %v5116_v59  ;;  %v5212_v37 = vld [vmem:[#allocation4 + $0x2070] sm:$0xff]  ;;  %v5219_v59 = vld [vmem:[#allocation4 + $0x20a8] sm:$0xff] }
 0xa27   : > { %6342 = vmatprep.subr.bf16.mxu0 %v5123_v19  ;;  %6711 = vmatprep.subr.bf16.mxu1 %v5125_v40  ;;  %v5221_v19 = vld [vmem:[#allocation4 + $0x20b8] sm:$0xff]  ;;  %v5218_v40 = vld [vmem:[#allocation4 + $0x20a0] sm:$0xff] }
 0xa2a   : > { %6343 = vmatpush1.bf16.msra.mxu0 %v5122_v26  ;;  %6712 = vmatpush1.bf16.msra.mxu1 %v5124_v17  ;;  %v5220_v26 = vld [vmem:[#allocation4 + $0x20b0] sm:$0xff]  ;;  %v5227_v17 = vld [vmem:[#allocation4 + $0x20e8] sm:$0xff] }
 0xa2b   : > { %6344 = vmatprep.subr.bf16.mxu0 %v5131_v1  ;;  %6713 = vmatprep.subr.bf16.mxu1 %v5133_v31  ;;  %v5226_v1 = vld [vmem:[#allocation4 + $0x20e0] sm:$0xff]  ;;  %v5228_v31 = vld [vmem:[#allocation4 + $0x20f0] sm:$0xff] }
 0xa2e   : > { %6345 = vmatpush1.bf16.msra.mxu0 %v5130_v63  ;;  %6714 = vmatpush1.bf16.msra.mxu1 %v5132_v30  ;;  %v5235_v63 = vld [vmem:[#allocation4 + $0x2128] sm:$0xff]  ;;  %v5237_v30 = vld [vmem:[#allocation4 + $0x2138] sm:$0xff] }
 0xa2f   : > { %6346 = vmatprep.subr.bf16.mxu0 %v5139_v44  ;;  %6715 = vmatprep.subr.bf16.mxu1 %v5141_v34  ;;  %v5236_v44 = vld [vmem:[#allocation4 + $0x2130] sm:$0xff]  ;;  %v5243_v34 = vld [vmem:[#allocation4 + $0x2168] sm:$0xff] }
 0xa32   : > { %6347 = vmatpush1.bf16.msra.mxu0 %v5138_v16  ;;  %6716 = vmatpush1.bf16.msra.mxu1 %v5140_v54  ;;  %v5245_v16 = vld [vmem:[#allocation4 + $0x2178] sm:$0xff] }
 0xa33   : > { %6348 = vmatprep.subr.bf16.mxu0 %v5147_v20  ;;  %6717 = vmatprep.subr.bf16.mxu1 %v5149_v56  ;;  %v9360_v54 = vld [vmem:[#allocation17 + $0x1] ss:$4 sm:$0xff] }
 0xa34   : > { %v5242_v20 = vld [vmem:[#allocation4 + $0x2160] sm:$0xff]  ;;  %v5244_v56 = vld [vmem:[#allocation4 + $0x2170] sm:$0xff] }
 0xa36   : > { %6349 = vmatpush1.bf16.msra.mxu0 %v5146_v0  ;;  %6718 = vmatpush1.bf16.msra.mxu1 %v5148_v2  ;;  %v5272_v0 = vrot.slane %v9360_v54, %v9155_v11  ;;  %v5251_v2 = vld [vmem:[#allocation4 + $0x21a8] sm:$0xff]  ;;  %v5258_v11 = vld [vmem:[#allocation4 + $0x21e0] sm:$0xff] }
 0xa37   : > { %6350 = vmatprep.subr.bf16.mxu0 %v5155_v61  ;;  %6719 = vmatprep.subr.bf16.mxu1 %v5157_v55  ;;  %v5253_v61 = vld [vmem:[#allocation4 + $0x21b8] sm:$0xff]  ;;  %v5280_v55 = vrot.slane %v9360_v54, %v9173_v35  ;;  %v6805_v35 = vld [vmem:[#allocation5 + $0x40] sm:$0xff] }
 0xa3a   : > { %6351 = vmatpush1.bf16.msra.mxu0 %v5154_v62  ;;  %6720 = vmatpush1.bf16.msra.mxu1 %v5156_v29  ;;  %v5250_v62 = vld [vmem:[#allocation4 + $0x21a0] sm:$0xff]  ;;  %v5252_v29 = vld [vmem:[#allocation4 + $0x21b0] sm:$0xff] }
 0xa3b   : > { %6352 = vmatprep.subr.bf16.mxu0 %v5163_v4  ;;  %6721 = vmatprep.subr.bf16.mxu1 %v5165_v3  ;;  %v7423_v4 = vadd.f32 %v9336_v14, %v5272_v0  ;;  %v5259_v3 = vld [vmem:[#allocation4 + $0x21e8] sm:$0xff]  ;;  %v6845_v0 = vld [vmem:[#allocation5 + $0x180] sm:$0xff] }
 0xa3e   : > { %6353 = vmatpush1.bf16.msra.mxu0 %v5162_v22  ;;  %6722 = vmatpush1.bf16.msra.mxu1 %v5164_v23  ;;  %v5261_v22 = vld [vmem:[#allocation4 + $0x21f8] sm:$0xff]  ;;  %v7425_v23 = vadd.f32 %v9338_v60, %v5280_v55  ;;  %v6806_v60 = vld [vmem:[#allocation5 + $0x48] sm:$0xff] }
 0xa3f   : > { %6354 = vmatprep.subr.bf16.mxu0 %v5171_v24  ;;  %6723 = vmatprep.subr.bf16.mxu1 %v5173_v38  ;;  %v5260_v24 = vld [vmem:[#allocation4 + $0x21f0] sm:$0xff]  ;;  %v6782_v38 = vmax.f32 %v7423_v4, 0.0  ;;  %v6830_v55 = vld [vmem:[#allocation5 + $0x108] sm:$0xff] }
 0xa40   : > { %v6855_v4 = vld [vmem:[#allocation5 + $0x1d0] sm:$0xff] }
 0xa41   : > { %v6790_v14 = vpack.c.bf16 %v6782_v38, %v6782_v38  ;;  %v6848_v38 = vld [vmem:[#allocation5 + $0x198] sm:$0xff] }
 0xa42   : > { %6355 = vmatpush1.bf16.msra.mxu0 %v5170_v21  ;;  %6724 = vmatpush1.bf16.msra.mxu1 %v5172_v5  ;;  %v6821_v21 = vld [vmem:[#allocation5 + $0xc0] sm:$0xff]  ;;  %v6784_v5 = vmax.f32 %v7425_v23, 0.0  ;;  %v6840_v23 = vld [vmem:[#allocation5 + $0x158] sm:$0xff] }
 0xa43   : > { %6356 = vmatprep.subr.bf16.mxu0 %v5179_v50  ;;  %6725 = vmatprep.subr.bf16.mxu1 %v5181_v27  ;;  %v6797_v50 = vld [vmem:[#allocation5] sm:$0xff] }
 0xa44   : > { %v6813_v27 = vld [vmem:[#allocation5 + $0x80] sm:$0xff] }
 0xa46   : > { %6357 = vmatpush1.bf16.msra.mxu0 %v5178_v8  ;;  %6726 = vmatpush1.bf16.msra.mxu1 %v5180_v10  ;;  %v6792_v8 = vpack.c.bf16 %v6784_v5, %v6784_v5  ;;  %v6822_v10 = vld [vmem:[#allocation5 + $0xc8] sm:$0xff]  ;;  %v6833_v5 = vld [vmem:[#allocation5 + $0x120] sm:$0xff] }
 0xa47   : > { %6358 = vmatprep.subr.bf16.mxu0 %v5187_v32  ;;  %6727 = vmatprep.subr.bf16.mxu1 %v5189_v51  ;;  %v6798_v32 = vld [vmem:[#allocation5 + $0x8] sm:$0xff] }
 0xa48   : > { %v6814_v51 = vld [vmem:[#allocation5 + $0x88] sm:$0xff] }
 0xa4a   : > { %6359 = vmatpush1.bf16.msra.mxu0 %v5186_v33  ;;  %6728 = vmatpush1.bf16.msra.mxu1 %v5188_v36  ;;  %v6807_v33 = vld [vmem:[#allocation5 + $0x50] sm:$0xff] }
 0xa4b   : > { %6360 = vmatprep.subr.bf16.mxu0 %v5195_v39  ;;  %6729 = vmatprep.subr.bf16.mxu1 %v5197_v42  ;;  %v6823_v36 = vld [vmem:[#allocation5 + $0xd0] sm:$0xff] }
 0xa4c   : > { %v6799_v39 = vld [vmem:[#allocation5 + $0x10] sm:$0xff] }
 0xa4d   : > { %v6815_v42 = vld [vmem:[#allocation5 + $0x90] sm:$0xff] }
 0xa4e   : > { %6361 = vmatpush1.bf16.msra.mxu0 %v5194_v12  ;;  %6730 = vmatpush1.bf16.msra.mxu1 %v5196_v43  ;;  %v6808_v12 = vld [vmem:[#allocation5 + $0x58] sm:$0xff] }
 0xa4f   : > { %6371 = vmatprep.subr.bf16.mxu0 %v5203_v46  ;;  %6740 = vmatprep.subr.bf16.mxu1 %v5205_v47  ;;  %v6800_v43 = vld [vmem:[#allocation5 + $0x18] sm:$0xff]  ;;  %v6809_v47 = vld [vmem:[#allocation5 + $0x60] sm:$0xff] }
 0xa50   : > { %v6816_v46 = vld [vmem:[#allocation5 + $0x98] sm:$0xff] }
 0xa51   : > { %6363 = vmatmul.mubr.bf16.vlgmr.msra.gmra.mrb[4].mxu0 %v9307_v52  ;;  %6732 = vmatmul.mubr.bf16.vlgmr.msra.gmra.mrb[4].mxu1 %v9307_v52  ;;  %v5229_v52 = vld [vmem:[#allocation4 + $0x20f8] sm:$0xff] }
 0xa52   : > { %6372 = vmatpush1.bf16.msra.mxu0 %v5202_v53  ;;  %6741 = vmatpush1.bf16.msra.mxu1 %v5204_v6  ;;  %v6825_v53 = vld [vmem:[#allocation5 + $0xe0] sm:$0xff] }
 0xa53   : > { %6373 = vmatprep.subr.bf16.mxu0 %v5211_v58  ;;  %6742 = vmatprep.subr.bf16.mxu1 %v5213_v15  ;;  %v6801_v6 = vld [vmem:[#allocation5 + $0x20] sm:$0xff]  ;;  %v6810_v15 = vld [vmem:[#allocation5 + $0x68] sm:$0xff] }
 0xa54   : > { %6403 = vmatprep.mubr.bf16.mxu0 %v7960_v57  ;;  %6772 = vmatprep.mubr.bf16.mxu1 %v7960_v57  ;;  %v5234_v57 = vld [vmem:[#allocation4 + $0x2120] sm:$0xff] }
 0xa55   : > { %v6817_v58 = vld [vmem:[#allocation5 + $0xa0] sm:$0xff] }
 0xa56   : > { %6374 = vmatpush1.bf16.msra.mxu0 %v5210_v13  ;;  %6743 = vmatpush1.bf16.msra.mxu1 %v5212_v37  ;;  %v6826_v13 = vld [vmem:[#allocation5 + $0xe8] sm:$0xff]  ;;  %v5268_v37 = vrot.slane %v9360_v54, %v9170_v28  ;;  %v6819_v28 = vld [vmem:[#allocation5 + $0xb0] sm:$0xff] }
 0xa57   : > { %6375 = vmatprep.subr.bf16.mxu0 %v5219_v59  ;;  %6744 = vmatprep.subr.bf16.mxu1 %v5221_v19  ;;  %v6802_v59 = vld [vmem:[#allocation5 + $0x28] sm:$0xff]  ;;  %v5276_v19 = vrot.slane %v9360_v54, %v9192_v41  ;;  %v6804_v41 = vld [vmem:[#allocation5 + $0x38] sm:$0xff] }
 0xa5a   : > { %6376 = vmatpush1.bf16.msra.mxu0 %v5218_v40  ;;  %6745 = vmatpush1.bf16.msra.mxu1 %v5220_v26  ;;  %v6818_v40 = vld [vmem:[#allocation5 + $0xa8] sm:$0xff]  ;;  %v6811_v26 = vld [vmem:[#allocation5 + $0x70] sm:$0xff] }
 0xa5b   : > { %6377 = vmatprep.subr.bf16.mxu0 %v5227_v17  ;;  %6746 = vmatprep.subr.bf16.mxu1 %v5229_v52  ;;  %v6827_v17 = vld [vmem:[#allocation5 + $0xf0] sm:$0xff]  ;;  %v7422_v52 = vadd.f32 %v9332_v45, %v5268_v37 }
 0xa5e   : > { %6378 = vmatpush1.bf16.msra.mxu0 %v5226_v1  ;;  %6747 = vmatpush1.bf16.msra.mxu1 %v5228_v31  ;;  %v6803_v1 = vld [vmem:[#allocation5 + $0x30] sm:$0xff]  ;;  %v7424_v31 = vadd.f32 %v9334_v49, %v5276_v19 }
 0xa5f   : > { %6379 = vmatprep.subr.bf16.mxu0 %v5235_v63  ;;  %6748 = vmatprep.subr.bf16.mxu1 %v5237_v30  ;;  %v6812_v63 = vld [vmem:[#allocation5 + $0x78] sm:$0xff] }
 0xa60   : > { %v6828_v30 = vld [vmem:[#allocation5 + $0xf8] sm:$0xff] }
 0xa62   : > { %6380 = vmatpush1.bf16.msra.mxu0 %v5234_v57  ;;  %6749 = vmatpush1.bf16.msra.mxu1 %v5236_v44  ;;  %v6781_v57 = vmax.f32 %v7422_v52, 0.0  ;;  %v6783_v44 = vmax.f32 %v7424_v31, 0.0 }
 0xa63   : > { %6381 = vmatprep.subr.bf16.mxu0 %v5243_v34  ;;  %6750 = vmatprep.subr.bf16.mxu1 %v5245_v16  ;;  %v6820_v34 = vld [vmem:[#allocation5 + $0xb8] sm:$0xff]  ;;  %v6837_v16 = vld [vmem:[#allocation5 + $0x140] sm:$0xff] }
 0xa64   : > { %v6789_v45 = vpack.c.bf16 %v6781_v57, %v6781_v57  ;;  %v6791_v49 = vpack.c.bf16 %v6783_v44, %v6783_v44  ;;  %v7230_v57 = vld [vmem:[#allocation17 + $0x2] ss:$0 sm:$0xff] }
 0xa66   : > { %6382 = vmatpush1.bf16.msra.mxu0 %v5242_v20  ;;  %6751 = vmatpush1.bf16.msra.mxu1 %v5244_v56  ;;  %v6853_v20 = vld [vmem:[#allocation5 + $0x1c0] sm:$0xff] }
 0xa67   : > { %6383 = vmatprep.subr.bf16.mxu0 %v5251_v2  ;;  %6752 = vmatprep.subr.bf16.mxu1 %v5253_v61  ;;  %v6829_v56 = vld [vmem:[#allocation5 + $0x100] sm:$0xff]  ;;  %v6838_v2 = vld [vmem:[#allocation5 + $0x148] sm:$0xff] }
 0xa68   : > { %v6854_v61 = vld [vmem:[#allocation5 + $0x1c8] sm:$0xff] }
 0xa6a   : > { %6384 = vmatpush1.bf16.msra.mxu0 %v5250_v62  ;;  %6753 = vmatpush1.bf16.msra.mxu1 %v5252_v29  ;;  %v6846_v62 = vld [vmem:[#allocation5 + $0x188] sm:$0xff]  ;;  %v6839_v29 = vld [vmem:[#allocation5 + $0x150] sm:$0xff] }
 0xa6b   : > { %6385 = vmatprep.subr.bf16.mxu0 %v5259_v3  ;;  %6754 = vmatprep.subr.bf16.mxu1 %v5261_v22  ;;  %v6831_v3 = vld [vmem:[#allocation5 + $0x110] sm:$0xff] }
 0xa6c   : > { %v6847_v22 = vld [vmem:[#allocation5 + $0x190] sm:$0xff] }
 0xa6e   : > { %6386 = vmatpush1.bf16.msra.mxu0 %v5258_v11  ;;  %6755 = vmatpush1.bf16.msra.mxu1 %v5260_v24  ;;  %v6856_v11 = vld [vmem:[#allocation5 + $0x1d8] sm:$0xff] }
 0xa6f   : > { %7334 = vmatprep.subr.bf16.mxu0 %v6805_v35  ;;  %7356 = vmatprep.subr.bf16.mxu1 %v6821_v21  ;;  %v6832_v24 = vld [vmem:[#allocation5 + $0x118] sm:$0xff]  ;;  %v6841_v35 = vld [vmem:[#allocation5 + $0x160] sm:$0xff] }
 0xa70   : > { %v6857_v21 = vld [vmem:[#allocation5 + $0x1e0] sm:$0xff] }
 0xa71   : > { %6404 = vmatmul.mubr.bf16.vlgmr.msra.gmra.mrb[4].mxu0 %v9314_v18  ;;  %6773 = vmatmul.mubr.bf16.vlgmr.msra.gmra.mrb[4].mxu1 %v9314_v18  ;;  %v6824_v18 = vld [vmem:[#allocation5 + $0xd8] sm:$0xff] }
 0xa72   : > { %7335 = vmatpush3.bf16.msra.mxu0 %v6797_v50  ;;  %6898 = vmatprep.mubr.bf16.mxu0 %v6790_v14  ;;  %v6849_v50 = vld [vmem:[#allocation5 + $0x1a0] sm:$0xff]  ;;  %v6842_v14 = vld [vmem:[#allocation5 + $0x168] sm:$0xff] }
 0xa73   : > { %7357 = vmatpush3.bf16.msra.mxu1 %v6813_v27  ;;  %6938 = vmatprep.mubr.bf16.mxu1 %v6792_v8  ;;  %v6858_v27 = vld [vmem:[#allocation5 + $0x1e8] sm:$0xff] }
 0xa74   : > { %7336 = vmatprep.subr.bf16.mxu0 %v6806_v60  ;;  %7358 = vmatprep.subr.bf16.mxu1 %v6822_v10  ;;  %v6834_v8 = vld [vmem:[#allocation5 + $0x128] sm:$0xff]  ;;  %v6843_v10 = vld [vmem:[#allocation5 + $0x170] sm:$0xff] }
 0xa75   : > { %v6850_v60 = vld [vmem:[#allocation5 + $0x1a8] sm:$0xff] }
 0xa76   : > { %7337 = vmatpush3.bf16.msra.mxu0 %v6798_v32  ;;  %v6859_v32 = vld [vmem:[#allocation5 + $0x1f0] sm:$0xff] }
 0xa77   : > { %7359 = vmatpush3.bf16.msra.mxu1 %v6814_v51  ;;  %7338 = vmatprep.subr.bf16.mxu0 %v6807_v33  ;;  %v6835_v51 = vld [vmem:[#allocation5 + $0x130] sm:$0xff] }
 0xa78   : > { %7360 = vmatprep.subr.bf16.mxu1 %v6823_v36  ;;  %v6851_v33 = vld [vmem:[#allocation5 + $0x1b0] sm:$0xff]  ;;  %v6844_v36 = vld [vmem:[#allocation5 + $0x178] sm:$0xff] }
 0xa7a   : > { %7339 = vmatpush3.bf16.msra.mxu0 %v6799_v39  ;;  %v6860_v39 = vld [vmem:[#allocation5 + $0x1f8] sm:$0xff] }
 0xa7b   : > { %7361 = vmatpush3.bf16.msra.mxu1 %v6815_v42  ;;  %7340 = vmatprep.subr.bf16.mxu0 %v6808_v12  ;;  %v6836_v42 = vld [vmem:[#allocation5 + $0x138] sm:$0xff] }
 0xa7c   : > { %7362 = vmatprep.subr.bf16.mxu1 %v6824_v18  ;;  %v6852_v12 = vld [vmem:[#allocation5 + $0x1b8] sm:$0xff]  ;;  %v5284_v18 = vrot.slane %v9360_v54, %v9214_v25 }
 0xa7e   : > { %7341 = vmatpush3.bf16.msra.mxu0 %v6800_v43  ;;  %v5292_v43 = vrot.slane %v9360_v54, %v9236_v48 }
 0xa7f   : > { %7363 = vmatpush3.bf16.msra.mxu1 %v6816_v46  ;;  %7342 = vmatprep.subr.bf16.mxu0 %v6809_v47  ;;  %v5288_v46 = vrot.slane %v9360_v54, %v9195_v7  ;;  %v5296_v47 = vrot.slane %v9360_v54, %v9217_v9 }
 0xa80   : > { %7364 = vmatprep.subr.bf16.mxu1 %v6825_v53 }
 0xa82   : > { %7343 = vmatpush3.bf16.msra.mxu0 %v6801_v6 }
 0xa83   : > { %7365 = vmatpush3.bf16.msra.mxu1 %v6817_v58  ;;  %7344 = vmatprep.subr.bf16.mxu0 %v6810_v15 }
 0xa84   : > { %7366 = vmatprep.subr.bf16.mxu1 %v6826_v13 }
 0xa86   : > { %7345 = vmatpush3.bf16.msra.mxu0 %v6802_v59 }
 0xa87   : > { %7367 = vmatpush3.bf16.msra.mxu1 %v6818_v40  ;;  %7346 = vmatprep.subr.bf16.mxu0 %v6811_v26 }
 0xa88   : > { %7368 = vmatprep.subr.bf16.mxu1 %v6827_v17 }
 0xa8a   : > { %7347 = vmatpush3.bf16.msra.mxu0 %v6803_v1 }
 0xa8b   : > { %7369 = vmatpush3.bf16.msra.mxu1 %v6819_v28  ;;  %7348 = vmatprep.subr.bf16.mxu0 %v6812_v63 }
 0xa8c   : > { %7370 = vmatprep.subr.bf16.mxu1 %v6828_v30 }
 0xa8e   : > { %7349 = vmatpush3.bf16.msra.mxu0 %v6804_v41 }
 0xa8f   : > { %7371 = vmatpush3.bf16.msra.mxu1 %v6820_v34  ;;  %7378 = vmatprep.subr.bf16.mxu0 %v6837_v16 }
 0xa90   : > { %7400 = vmatprep.subr.bf16.mxu1 %v6853_v20 }
 0xa91   : > { %6899 = vmatmul.mubr.bf16.vlgmr.msra.gmra.mrb[8].mxu0 %v6789_v45 }
 0xa92   : > { %6939 = vmatmul.mubr.bf16.vlgmr.msra.gmra.mrb[8].mxu1 %v6791_v49  ;;  %7379 = vmatpush3.bf16.msra.mxu0 %v6829_v56 }
 0xa93   : > { %7401 = vmatpush3.bf16.msra.mxu1 %v6845_v0  ;;  %7380 = vmatprep.subr.bf16.mxu0 %v6838_v2 }
 0xa94   : > { %7402 = vmatprep.subr.bf16.mxu1 %v6854_v61 }
 0xa96   : > { %7381 = vmatpush3.bf16.msra.mxu0 %v6830_v55 }
 0xa97   : > { %7403 = vmatpush3.bf16.msra.mxu1 %v6846_v62  ;;  %7382 = vmatprep.subr.bf16.mxu0 %v6839_v29 }
 0xa98   : > { %7404 = vmatprep.subr.bf16.mxu1 %v6855_v4 }
 0xa9a   : > { %7383 = vmatpush3.bf16.msra.mxu0 %v6831_v3 }
 0xa9b   : > { %7405 = vmatpush3.bf16.msra.mxu1 %v6847_v22  ;;  %7384 = vmatprep.subr.bf16.mxu0 %v6840_v23 }
 0xa9c   : > { %7406 = vmatprep.subr.bf16.mxu1 %v6856_v11 }
 0xa9e   : > { %7385 = vmatpush3.bf16.msra.mxu0 %v6832_v24 }
 0xa9f   : > { %7407 = vmatpush3.bf16.msra.mxu1 %v6848_v38  ;;  %7386 = vmatprep.subr.bf16.mxu0 %v6841_v35 }
 0xaa0   : > { %7408 = vmatprep.subr.bf16.mxu1 %v6857_v21 }
 0xaa2   : > { %7387 = vmatpush3.bf16.msra.mxu0 %v6833_v5 }
 0xaa3   : > { %7409 = vmatpush3.bf16.msra.mxu1 %v6849_v50  ;;  %7388 = vmatprep.subr.bf16.mxu0 %v6842_v14 }
 0xaa4   : > { %7410 = vmatprep.subr.bf16.mxu1 %v6858_v27 }
 0xaa6   : > { %7389 = vmatpush3.bf16.msra.mxu0 %v6834_v8 }
 0xaa7   : > { %7411 = vmatpush3.bf16.msra.mxu1 %v6850_v60  ;;  %7390 = vmatprep.subr.bf16.mxu0 %v6843_v10 }
 0xaa8   : > { %7412 = vmatprep.subr.bf16.mxu1 %v6859_v32 }
 0xaaa   : > { %7391 = vmatpush3.bf16.msra.mxu0 %v6835_v51 }
 0xaab   : > { %7413 = vmatpush3.bf16.msra.mxu1 %v6851_v33  ;;  %7392 = vmatprep.subr.bf16.mxu0 %v6844_v36 }
 0xaac   : > { %7414 = vmatprep.subr.bf16.mxu1 %v6860_v39 }
 0xaae   : > { %7393 = vmatpush3.bf16.msra.mxu0 %v6836_v42 }
 0xaaf   : > { %7415 = vmatpush3.bf16.msra.mxu1 %v6852_v12 }
 0xb44   : > { %v6405_v53 = vpop.f32.mrb[4].mxu0  ;;  %v6774_v6 = vpop.f32.mrb[4].mxu1 }
 0xb45   : > { %v7426_v58 = vadd.f32 %v6405_v53, %v5284_v18  ;;  %v7428_v15 = vadd.f32 %v6774_v6, %v5292_v43  ;;  %v6407_v13 = vpop.f32.mrb[5].mxu0  ;;  %v6776_v37 = vpop.f32.mrb[5].mxu1 }
 0xb46   : > { %v7427_v59 = vadd.f32 %v6407_v13, %v5288_v46  ;;  %v7429_v19 = vadd.f32 %v6776_v37, %v5296_v47  ;;  %v6409_v40 = vpop.f32.mrb[6].mxu0  ;;  %v6778_v26 = vpop.f32.mrb[6].mxu1 }
 0xb47   : > { %v6785_v25 = vmax.f32 %v7426_v58, 0.0  ;;  %v6787_v17 = vmax.f32 %v7428_v15, 0.0  ;;  %v6410_v52 = vpop.f32.mrb[7].mxu0  ;;  %v6779_v48 = vpop.f32.mrb[7].mxu1 }
 0xb48   : > { %v6786_v1 = vmax.f32 %v7427_v59, 0.0  ;;  %v6788_v31 = vmax.f32 %v7429_v19, 0.0 }
 0xb49   : > { %v6793_v63 = vpack.c.bf16 %v6785_v25, %v6785_v25  ;;  %v6795_v9 = vpack.c.bf16 %v6787_v17, %v6787_v17 }
 0xb4a   : > { %v6794_v7 = vpack.c.bf16 %v6786_v1, %v6786_v1  ;;  %v6796_v28 = vpack.c.bf16 %v6788_v31, %v6788_v31 }
 0xb4c   : > { %6978 = vmatprep.mubr.bf16.mxu0 %v6794_v7  ;;  %7018 = vmatprep.mubr.bf16.mxu1 %v6796_v28 }
 0xb4d   : > { %6979 = vmatmul.mubr.bf16.vlgmr.msra.gmra.mrb[12].mxu0 %v6793_v63  ;;  %7019 = vmatmul.mubr.bf16.vlgmr.msra.gmra.mrb[12].mxu1 %v6795_v9 }
 0xb64   : > { %v7350_v54 = vpop.f32.mrb[8].mxu0 }
 0xb65   : > { %v7372_v30 = vpop.f32.mrb[8].mxu1  ;;  %v7351_v41 = vpop.f32.mrb[9].mxu0 }
 0xb66   : > { %v7352_v44 = vadd.f32 %v7351_v41, %v7350_v54  ;;  %v7373_v34 = vpop.f32.mrb[9].mxu1  ;;  %v7353_v16 = vpop.f32.mrb[10].mxu0 }
 0xb67   : > { %v7374_v20 = vadd.f32 %v7373_v34, %v7372_v30  ;;  %v7375_v45 = vpop.f32.mrb[10].mxu1  ;;  %v7354_v56 = vpop.f32.mrb[11].mxu0 }
 0xb68   : > { %v6901_v49 = vadd.f32 %v7352_v44, %v7230_v57  ;;  %v7376_v0 = vpop.f32.mrb[11].mxu1 }
 0xb6a   : > { %v6941_v2 = vadd.f32 %v7374_v20, %v6901_v49 }
 0xc20   : > { %v7394_v61 = vpop.f32.mrb[12].mxu0  ;;  %v7416_v55 = vpop.f32.mrb[12].mxu1 }
 0xc21   : > { %v7395_v62 = vpop.f32.mrb[13].mxu0  ;;  %v7417_v29 = vpop.f32.mrb[13].mxu1 }
 0xc22   : > { %v7396_v4 = vadd.f32 %v7395_v62, %v7394_v61  ;;  %v7418_v3 = vadd.f32 %v7417_v29, %v7416_v55  ;;  %v7397_v22 = vpop.f32.mrb[14].mxu0  ;;  %v7419_v23 = vpop.f32.mrb[14].mxu1 }
 0xc23   : > { %v7398_v11 = vpop.f32.mrb[15].mxu0  ;;  %v7420_v24 = vpop.f32.mrb[15].mxu1 }
 0xc24   : > { %v6981_v38 = vadd.f32 %v7396_v4, %v6941_v2 }
 0xc26   : > { %v7021_v35 = vadd.f32 %v7418_v3, %v6981_v38 }
 0xc28   : > { %7026 = vst [vmem:[#allocation19] sm:$0xff] %v7021_v35 }
 0xc29 PF: > { %p7618_p9 = scmp.eq.s32.totalorder %s8026_s9, 1  ;;  %s7961_s18 = smov [#allocation19]  }
 0xc2a   : > { %s7034_s22 = sshll.u32 %s7961_s18, 4  ;;  %s7035_s22 = int_to_ptr.vmem [resolvable:$true] %s7034_s22 }
 0xc2b   : > { %s7848_s20 = scalar_lea.vmem %s7035_s22, 128  ;;  %p7855_p12 = scmp.lt.s32.totalorder %s7035_s22, %s7035_s22 }
 0xc2c   : > { %p7849_p11 = scmp.ne.s32.totalorder %s7035_s22, %s7848_s20  ;;  %p7856_p13 = scmp.lt.s32.totalorder %s7848_s20, %s7848_s20 }
 0xc2e   : > { %p7850_p8 = pnand %p7849_p11, %p7618_p9  ;;  %p7857_p4 = por %p7856_p13, %p7855_p12 }
 0xc30   : > { %p7851_p5 = pneg %p7850_p8 }
 0xc32   : > { %p7858_p6 = pnand %p7857_p4, %p7851_p5 }
 0xc34   : > { %7861 = shalt.err (!%p7858_p6)
}
 0xc35   : > { %s7862_s14 = scalar_lea.hbm %s9428_s8, 128 }
 0xc36   : > { %p7863_p0 = scmp.ne.s32.totalorder %s9428_s8, %s7862_s14  ;;  %p7868_p3 = scmp.lt.u32.totalorder %s7862_s14, %s9428_s8 }
 0xc38   : > { %p7864_p2 = pnand %p7863_p0, %p7618_p9 }
 0xc3a   : > { %p7865_p10 = pneg %p7864_p2 }
 0xc3c   : > { %p7870_p1 = pnand %p7868_p3, %p7865_p10 }
 0xc3e   : > { %7873 = shalt.err (!%p7870_p1)
}
 0xc3f   : > { %7584 = dma.vmem_to_hbm [thread:$0]  (%p7618_p9), %s7035_s22, 128, %s9428_s8, [#allocation9]  }
 0xc40   : > { %7919 = dma.done.wait (%p7618_p9), [#allocation9], 128  }
 0xc41   : > { %7921 = vsyncadd (%p7618_p9), [#allocation9], 4294967168 }
 0xc42 PF: > { %p23_p7 = scmp.ge.s32.totalorder %s8133_s15, 4   ;;  %s9450_s27 = smov %s7928_s28 }
 0xc43   : > { %s9451_s28 = smov %s7932_s29  ;;  %s9452_s29 = smov %s8161_s16 }
 0xc44   : > { %s9453_s30 = smov %s8133_s15  ;;  %25 = sbr.rel (!%p23_p7) target bundleno = 8 (0x8), region = 134 }
 0xc4b   :  { %7047 = vsyncpa [#allocation8], 1 }
 0xc4c   :  { %7049 = vsyncpa [#allocation8 + $0x1], 1 }
 0xc4d   :  { %7050 = vsyncpa [#allocation15], 1 }
 0xc4e   :  { %7052 = vsyncpa [#allocation15 + $0x1], 1 }
 0xc4f   :  { %7053 = vsyncpa [#allocation18], 1 }
 0xc50   :  { %7054 = vsyncpa [#allocation9], 1 }
 0xc51   :  { %7056 = vsyncpa [#allocation9 + $0x1], 1 }
 0xc52   :  { %7057 = vsyncpa [#allocation10], 1 }
 0xc53   :  { %7059 = vsyncpa [#allocation10 + $0x1], 1 }
 0xc54   :  { %7060 = vsyncpa [#allocation13], 1 }
 0xc55   :  { %7061 = vsyncmov [#allocation6] }
 0xc58   :  { %s7062_s9 = vpop.sfrf %7061 }
 0xc59   :  { %p7235_p9 = scmp.ne.s32.totalorder %s7062_s9, 0 }
 0xc5b   :  { %7066 = shalt.err (%p7235_p9)  }
 0xc5c   :  { %7068 = vsyncmov [#allocation6 + $0x1] }
 0xc5f   :  { %s7069_s26 = vpop.sfrf %7068 }
 0xc60   :  { %p7236_p11 = scmp.ne.s32.totalorder %s7069_s26, 0 }
 0xc62   :  { %7073 = shalt.err (%p7236_p11)  }

</bundles_post_ra>
